<compile_context>
chip_gen: v7x
topology: tpu7x:2x2x1
jax: 0.10.0
libtpu: 0.0.40
codegen_flags: <defaults>
</compile_context>

<pallas_src>
import functools

import jax
import jax.numpy as jnp
from jax.experimental import pallas as pl
from jax.experimental.pallas import tpu as pltpu


# ----------------------------------------------------------------------------
# Pallas kernel 1: tiled matmul + bias (+ optional ReLU).
# Operands cast to bf16 per-tile inside the kernel, f32 VMEM accumulator,
# P3 init/finalize over the K axis.
# ----------------------------------------------------------------------------
def _mm_bias_kernel(x_ref, w_ref, b_ref, o_ref, acc_ref, *, act):
    @pl.when(pl.program_id(2) == 0)
    def _():
        acc_ref[...] = jnp.zeros_like(acc_ref)

    acc_ref[...] += jnp.dot(x_ref[...].astype(jnp.bfloat16),
                            w_ref[...].astype(jnp.bfloat16),
                            preferred_element_type=jnp.float32)

    @pl.when(pl.program_id(2) == pl.num_programs(2) - 1)
    def _():
        y = acc_ref[...] + b_ref[...]
        if act == "relu":
            y = jnp.maximum(y, 0.0)
        o_ref[...] = y.astype(o_ref.dtype)


def _pick_tile(dim, target):
    """Largest divisor of `dim` that is <= target (falls back to dim)."""
    if dim <= target:
        return dim
    t = target
    while t > 8 and dim % t:
        t //= 2
    return t if dim % t == 0 else dim


def matmul_bias(x, w, b, act="none", out_dtype=jnp.float32):
    M, K = x.shape
    K2, N = w.shape
    assert K == K2
    tm = _pick_tile(M, 256)
    tn = _pick_tile(N, 512)
    tk = _pick_tile(K, 512)
    grid = (M // tm, N // tn, K // tk)
    b2 = b.reshape(1, N).astype(jnp.float32)
    return pl.pallas_call(
        functools.partial(_mm_bias_kernel, act=act),
        out_shape=jax.ShapeDtypeStruct((M, N), out_dtype),
        grid_spec=pltpu.PrefetchScalarGridSpec(
            num_scalar_prefetch=0,
            grid=grid,
            in_specs=[
                pl.BlockSpec((tm, tk), lambda i, j, k: (i, k)),
                pl.BlockSpec((tk, tn), lambda i, j, k: (k, j)),
                pl.BlockSpec((1, tn), lambda i, j, k: (0, j)),
            ],
            out_specs=pl.BlockSpec((tm, tn), lambda i, j, k: (i, j)),
            scratch_shapes=[pltpu.VMEM((tm, tn), jnp.float32)],
        ),
        compiler_params=pltpu.CompilerParams(
            dimension_semantics=("parallel", "parallel", "arbitrary"),
            vmem_limit_bytes=48 * 1024 * 1024,
        ),
    )(x, w, b2)


# ----------------------------------------------------------------------------
# Pallas kernel 2: fused 3x3 conv + ReLU + global-avg-pool + image projection.
# Row-strip tiled: per strip an in-VMEM im2col (strip_L, 9C) is assembled from
# 9 static shifted slices of the flattened zero-padded NHWC slab and fed to a
# single MXU dot (K = 9*C).  Valid-column mask via in-kernel iota; pooled sum
# accumulates into a (1, CH) f32 scratch; the (1, CH) x (CH, IMG_DIM)
# projection is done in the finalize so feat never touches HBM.
# ----------------------------------------------------------------------------
def _conv_gap_proj_kernel(x_ref, w_ref, b_ref, pw_ref, pb_ref, o_ref,
                          im_sc, pool_sc, *, H, W, C, rows_per_strip):
    # x_ref:   (Lpad, C)  f32   flattened zero-padded image (+ slack rows)
    # w_ref:   (9*C, CH)  bf16  stacked 3x3 taps (tap-major rows)
    # b_ref:   (1, CH)    f32
    # pw_ref:  (CH, D)    bf16  image projection weight
    # pb_ref:  (1, D)     f32
    # o_ref:   (1, D)     f32   projected image embedding for this image
    # im_sc:   (strip_L, 9*C) f32 scratch (in-VMEM im2col)
    # pool_sc: (1, CH)    f32 scratch (pooled-sum accumulator)
    Wp = W + 2
    strip_L = rows_per_strip * Wp
    n_strips = H // rows_per_strip

    # valid-output-column mask; identical for every strip since strip_L % Wp == 0
    col = jax.lax.broadcasted_iota(jnp.int32, (strip_L, 1), 0) % Wp
    valid = (col < W).astype(jnp.float32)

    pool_sc[...] = jnp.zeros_like(pool_sc)

    def strip_body(r, carry):
        base = r * strip_L
        # assemble (strip_L, 9C) im2col from the 9 shifted views of the slab
        for k in range(9):
            di, dj = k // 3, k % 3
            off = di * Wp + dj
            im_sc[:, k * C:(k + 1) * C] = x_ref[pl.ds(base + off, strip_L), :]
        y = jnp.dot(im_sc[...].astype(jnp.bfloat16), w_ref[...],
                    preferred_element_type=jnp.float32)
        y = jnp.maximum(y + b_ref[...], 0.0) * valid     # mask BEFORE pooling
        pool_sc[...] += jnp.sum(y, axis=0, keepdims=True)
        return carry

    jax.lax.fori_loop(0, n_strips, strip_body, 0, unroll=n_strips <= 4)

    feat = (pool_sc[...] * (1.0 / (H * W))).astype(jnp.bfloat16)
    o_ref[...] = (jnp.dot(feat, pw_ref[...], preferred_element_type=jnp.float32)
                  + pb_ref[...]).astype(o_ref.dtype)


def conv_relu_gap_proj(xflat, conv_w, conv_b, proj_w, proj_b, *, H, W):
    """xflat: [B, Lpad, C] flattened zero-padded NHWC.  Returns [B, D]."""
    B, Lpad, C = xflat.shape
    CH = conv_w.shape[-1]
    D = proj_w.shape[-1]
    rows = _pick_tile(H, 8)                       # VMEM use independent of H
    strip_L = rows * (W + 2)
    w_stacked = conv_w.reshape(9 * C, CH)         # tap-major, matches im2col
    out = pl.pallas_call(
        functools.partial(_conv_gap_proj_kernel, H=H, W=W, C=C,
                          rows_per_strip=rows),
        out_shape=jax.ShapeDtypeStruct((B, 1, D), jnp.float32),
        grid_spec=pltpu.PrefetchScalarGridSpec(
            num_scalar_prefetch=0,
            grid=(B,),
            in_specs=[
                pl.BlockSpec((None, Lpad, C), lambda b: (b, 0, 0)),
                pl.BlockSpec((9 * C, CH), lambda b: (0, 0)),
                pl.BlockSpec((1, CH), lambda b: (0, 0)),
                pl.BlockSpec((CH, D), lambda b: (0, 0)),
                pl.BlockSpec((1, D), lambda b: (0, 0)),
            ],
            out_specs=pl.BlockSpec((None, 1, D), lambda b: (b, 0, 0)),
            scratch_shapes=[
                pltpu.VMEM((strip_L, 9 * C), jnp.float32),   # im2col strip
                pltpu.VMEM((1, CH), jnp.float32),            # pooled sum
            ],
        ),
        compiler_params=pltpu.CompilerParams(
            dimension_semantics=("parallel",),
            vmem_limit_bytes=32 * 1024 * 1024,
        ),
    )(xflat, w_stacked, conv_b.reshape(1, CH).astype(jnp.float32),
      proj_w, proj_b.reshape(1, D).astype(jnp.float32))
    return out.reshape(B, D)


# ----------------------------------------------------------------------------
# Pallas kernel 3: both BiLSTM directions + masked mean-pool numerator in one
# call.  grid = (direction=2 "parallel", time-block "arbitrary"); each grid
# step loads TB timesteps of gate pre-activations + mask and runs an unrolled
# recurrence over them.  Backward direction = reversed block index_map +
# reversed in-block order.  h/c/pool live in VMEM scratch; the recurrence is
# gated on the attention mask so padding never enters the cell state.  Gate
# math stays f32 (xp is f32; only the h @ W_hh operands are bf16 on the MXU).
# ----------------------------------------------------------------------------
def _bilstm_pool_kernel(xp_ref, whh_ref, m_ref, pooled_ref, h_sc, c_sc, p_sc,
                        *, hidden, tb):
    d = pl.program_id(0)
    blk = pl.program_id(1)

    @pl.when(blk == 0)
    def _():
        h_sc[...] = jnp.zeros_like(h_sc)
        c_sc[...] = jnp.zeros_like(c_sc)
        p_sc[...] = jnp.zeros_like(p_sc)

    whh = whh_ref[...]                               # (hidden, 4H) bf16

    def step(s, carry):
        idx = s + d * (tb - 1 - 2 * s)               # fwd: s, bwd: tb-1-s
        gates = xp_ref[idx] + jnp.dot(h_sc[...].astype(jnp.bfloat16), whh,
                                      preferred_element_type=jnp.float32)
        i = jax.nn.sigmoid(gates[:, 0 * hidden:1 * hidden])
        f = jax.nn.sigmoid(gates[:, 1 * hidden:2 * hidden])
        g = jnp.tanh(gates[:, 2 * hidden:3 * hidden])
        o = jax.nn.sigmoid(gates[:, 3 * hidden:4 * hidden])

        c_new = f * c_sc[...] + i * g
        h_new = o * jnp.tanh(c_new)

        m = m_ref[idx]                               # (Bp, 1) in {0,1}
        c_sc[...] = m * c_new + (1.0 - m) * c_sc[...]
        h_sc[...] = m * h_new + (1.0 - m) * h_sc[...]
        p_sc[...] += m * h_new                       # masked-pool numerator
        return carry

    jax.lax.fori_loop(0, tb, step, 0, unroll=True)

    @pl.when(blk == pl.num_programs(1) - 1)
    def _():
        pooled_ref[...] = p_sc[...]


def bilstm_pool(xp, w_hh, mask_t, *, hidden):
    """xp: [T, Bp, 8H] f32 (fwd gates || bwd gates along last dim);
    w_hh: [2, H, 4H] bf16; mask_t: [T, Bp, 1] f32.
    Returns per-direction masked pooled sums [2, Bp, H] f32."""
    T, Bp, eight_h = xp.shape
    assert eight_h == 8 * hidden
    tb = _pick_tile(T, 32)                           # timesteps per grid step
    nblk = T // tb
    # TODO(synk): on single-TensorCore parts (v5e/v6e) folding both directions
    # into one grid step would halve grid steps; kept direction-parallel here
    # so v7x's two TensorCores both stay busy.
    return pl.pallas_call(
        functools.partial(_bilstm_pool_kernel, hidden=hidden, tb=tb),
        out_shape=jax.ShapeDtypeStruct((2, Bp, hidden), jnp.float32),
        grid_spec=pltpu.PrefetchScalarGridSpec(
            num_scalar_prefetch=0,
            grid=(2, nblk),
            in_specs=[
                # direction selected on the gate axis (block index d) -> no
                # [T,Bp,2,4H] transpose materialization in HBM.
                pl.BlockSpec((tb, Bp, 4 * hidden),
                             lambda d, t: (t + d * (nblk - 1 - 2 * t), 0, d)),
                pl.BlockSpec((None, hidden, 4 * hidden), lambda d, t: (d, 0, 0)),
                pl.BlockSpec((tb, Bp, 1),
                             lambda d, t: (t + d * (nblk - 1 - 2 * t), 0, 0)),
            ],
            out_specs=pl.BlockSpec((None, Bp, hidden), lambda d, t: (d, 0, 0)),
            scratch_shapes=[pltpu.VMEM((Bp, hidden), jnp.float32)] * 3,
        ),
        compiler_params=pltpu.CompilerParams(
            dimension_semantics=("parallel", "arbitrary"),
            vmem_limit_bytes=32 * 1024 * 1024,
        ),
    )(xp, w_hh, mask_t)


# ----------------------------------------------------------------------------
# Parameter construction (deterministic, synthetic stand-ins).
# Weight matrices are stored bf16 once (MXU operands); biases stay f32.
# ----------------------------------------------------------------------------
def make_params(key, *, in_ch, conv_ch, img_dim, vocab, emb, hidden, txt_dim):
    ks = jax.random.split(key, 8)
    w = lambda k, shape, scale=0.1: (
        scale * jax.random.normal(k, shape)).astype(jnp.bfloat16)
    return {
        # image branch
        "conv_w": w(ks[0], (9, in_ch, conv_ch)),          # 3x3 taps
        "conv_b": jnp.zeros((conv_ch,), jnp.float32),
        "img_proj_w": w(ks[1], (conv_ch, img_dim)),
        "img_proj_b": jnp.zeros((img_dim,), jnp.float32),
        # text branch (fwd gates || bwd gates concatenated along N)
        "emb_table": w(ks[2], (vocab, emb)),
        "w_ih": w(ks[3], (emb, 8 * hidden)),
        # TODO(synk): real nn.LSTM has separate b_ih + b_hh; sum them when
        # porting weights (single combined bias used here).
        "b_ih": jnp.zeros((8 * hidden,), jnp.float32),
        "w_hh": w(ks[4], (2, hidden, 4 * hidden)),
        "txt_proj_w": w(ks[5], (2 * hidden, txt_dim)),
        "txt_proj_b": jnp.zeros((txt_dim,), jnp.float32),
    }


# ----------------------------------------------------------------------------
# Forward pass (thin wrapper glue + Pallas hot paths).
# ----------------------------------------------------------------------------
def model_bert_forward(params, images_nchw, text, text_length, attention_mask,
                       *, hidden):
    # ---------------- image branch (stand-in for ResNet/MobileNet) ----------
    # TODO(synk): the real image backbones (MobileNetV2/ResNet50/101) are not
    # in the snippet; a single fused conv->ReLU->GAP->proj block stands in.
    x = jnp.transpose(images_nchw, (0, 2, 3, 1))             # NCHW -> NHWC
    B, H, W, C = x.shape
    xpad = jnp.pad(x, ((0, 0), (1, 1), (1, 1), (0, 0)))      # zero pad
    Wp = W + 2
    flat_len = (H + 2) * Wp
    need = flat_len + 2                                      # shifted-view slack
    Lpad = ((need + 7) // 8) * 8
    xflat = xpad.reshape(B, flat_len, C)                     # free reshape
    xflat = jnp.pad(xflat, ((0, 0), (0, Lpad - flat_len), (0, 0)))
    image_embeddings = conv_relu_gap_proj(
        xflat, params["conv_w"], params["conv_b"],
        params["img_proj_w"], params["img_proj_b"], H=H, W=W)  # [B, img_dim]

    # ---------------- text branch (stand-in for BiLSTM_Bert) ----------------
    # TODO(synk): the real BiLSTM_Bert wraps a BERT encoder + packed sequences;
    # token embedding + mask-gated BiLSTM + masked mean pooling is used here.
    Bt, T = text.shape
    Bp = max(8, ((Bt + 7) // 8) * 8)                         # fill sublanes
    emb = params["emb_table"][text]                          # gather (bf16)
    emb = jnp.transpose(emb, (1, 0, 2))                      # [T, B, E] (tiny)
    emb = jnp.pad(emb, ((0, 0), (0, Bp - Bt), (0, 0)))       # [T, Bp, E]
    E = emb.shape[-1]

    # one wide input projection for both directions: [T*Bp, 8H] f32
    xp = matmul_bias(emb.reshape(T * Bp, E), params["w_ih"], params["b_ih"])
    xp = xp.reshape(T, Bp, 8 * hidden)                       # free reshape only

    mask = attention_mask.astype(jnp.float32)                # [B, T]
    mask_p = jnp.pad(mask, ((0, Bp - Bt), (0, 0)))           # [Bp, T]
    mask_t = mask_p.T.reshape(T, Bp, 1)                      # [T, Bp, 1]

    pooled_sums = bilstm_pool(xp, params["w_hh"], mask_t,
                              hidden=hidden)                 # [2, Bp, H]
    denom = jnp.maximum(mask_p.sum(axis=1, keepdims=True), 1.0)       # [Bp, 1]
    pooled = jnp.concatenate(
        [pooled_sums[0], pooled_sums[1]], axis=-1) / denom   # [Bp, 2H]

    # text projection on the sublane-padded slab (avoids a tiny-M matmul)
    text_embeddings = matmul_bias(pooled, params["txt_proj_w"],
                                  params["txt_proj_b"])[:Bt]  # [B, txt_dim]

    return image_embeddings, text_embeddings


# ----------------------------------------------------------------------------
if __name__ == "__main__":
    B, C, HH, WW = 2, 4, 16, 16
    T, VOCAB, EMB, HIDDEN = 8, 100, 128, 128          # lane-dense dims
    CONV_CH, IMG_DIM, TXT_DIM = 128, 256, 256         # small stand-ins

    key = jax.random.PRNGKey(0)
    k_img, k_txt, k_par = jax.random.split(key, 3)

    images = jax.random.normal(k_img, (B, C, HH, WW), dtype=jnp.float32)  # NCHW
    text = jax.random.randint(k_txt, (B, T), 0, VOCAB, dtype=jnp.int32)
    text_length = jnp.array([T, 5], dtype=jnp.int32)
    attention_mask = (jnp.arange(T)[None, :] < text_length[:, None]).astype(
        jnp.float32
    )

    params = make_params(
        k_par, in_ch=C, conv_ch=CONV_CH, img_dim=IMG_DIM,
        vocab=VOCAB, emb=EMB, hidden=HIDDEN, txt_dim=TXT_DIM,
    )

    fwd = jax.jit(functools.partial(model_bert_forward, hidden=HIDDEN))
    img_emb, txt_emb = fwd(params, images, text, text_length, attention_mask)
    jax.block_until_ready((img_emb, txt_emb))

    assert img_emb.shape == (B, IMG_DIM) and txt_emb.shape == (B, TXT_DIM)
    assert jnp.all(jnp.isfinite(img_emb)) and jnp.all(jnp.isfinite(txt_emb))
    print("KERNEL_OK")
</pallas_src>

<mosaic_0001>
module attributes {stable_mosaic.version = 11 : i64} {
  func.func @_conv_gap_proj_kernel(%arg0: i32, %arg1: memref<1x328x4xf32, #tpu.memory_space<vmem>>, %arg2: memref<36x128xbf16, #tpu.memory_space<vmem>>, %arg3: memref<1x128xf32, #tpu.memory_space<vmem>>, %arg4: memref<128x256xbf16, #tpu.memory_space<vmem>>, %arg5: memref<1x256xf32, #tpu.memory_space<vmem>>, %arg6: memref<1x1x256xf32, #tpu.memory_space<vmem>>, %arg7: memref<144x36xf32, #tpu.memory_space<vmem>>, %arg8: memref<1x128xf32, #tpu.memory_space<vmem>>) attributes {dimension_semantics = [#tpu.dimension_semantics<parallel>], iteration_bounds = array<i64: 2>, scalar_prefetch = 0 : i64, scratch_operands = 2 : i64, tpu.core_type = #tpu.core_type<tc>, window_params = [{transform_indices = @transform_0, window_bounds = array<i64: 1, 328, 4>}, {pipeline_mode = #tpu.pipeline_mode<synchronous>, transform_indices = @transform_1, window_bounds = array<i64: 36, 128>}, {pipeline_mode = #tpu.pipeline_mode<synchronous>, transform_indices = @transform_2, window_bounds = array<i64: 1, 128>}, {pipeline_mode = #tpu.pipeline_mode<synchronous>, transform_indices = @transform_3, window_bounds = array<i64: 128, 256>}, {pipeline_mode = #tpu.pipeline_mode<synchronous>, transform_indices = @transform_4, window_bounds = array<i64: 1, 256>}, {transform_indices = @transform_5, window_bounds = array<i64: 1, 1, 256>}]} {
    %0 = tpu.iota {dimensions = array<i32: 0>} : vector<144x1xi32>
    %c18_i32 = arith.constant 18 : i32
    %c0_i32 = arith.constant 0 : i32
    %1 = arith.cmpi eq, %c18_i32, %c0_i32 : i32
    %c1_i32 = arith.constant 1 : i32
    %2 = arith.select %1, %c1_i32, %c18_i32 : i32
    %3 = vector.broadcast %2 : i32 to vector<144x1xi32>
    %4 = arith.remsi %0, %3 : vector<144x1xi32>
    %c0_i32_0 = arith.constant 0 : i32
    %5 = vector.broadcast %c0_i32_0 : i32 to vector<144x1xi32>
    %6 = arith.cmpi ne, %4, %5 : vector<144x1xi32>
    %c0_i32_1 = arith.constant 0 : i32
    %7 = vector.broadcast %c0_i32_1 : i32 to vector<144x1xi32>
    %8 = arith.cmpi slt, %4, %7 : vector<144x1xi32>
    %c0_i32_2 = arith.constant 0 : i32
    %9 = arith.cmpi slt, %2, %c0_i32_2 : i32
    %10 = vector.broadcast %9 : i1 to vector<144x1xi1>
    %11 = vector.broadcast %10 : vector<144x1xi1> to vector<144x1xi1>
    %12 = arith.xori %8, %11 : vector<144x1xi1>
    %13 = arith.andi %12, %6 : vector<144x1xi1>
    %14 = vector.broadcast %2 : i32 to vector<144x1xi32>
    %15 = arith.addi %4, %14 : vector<144x1xi32>
    %16 = arith.select %13, %15, %4 : vector<144x1xi1>, vector<144x1xi32>
    %c16_i32 = arith.constant 16 : i32
    %17 = vector.broadcast %c16_i32 : i32 to vector<144x1xi32>
    %18 = arith.cmpi slt, %16, %17 : vector<144x1xi32>
    %19 = arith.extui %18 : vector<144x1xi1> to vector<144x1xi32>
    %20 = arith.sitofp %19 : vector<144x1xi32> to vector<144x1xf32>
    %cst = arith.constant 0.000000e+00 : f32
    %21 = vector.broadcast %cst : f32 to vector<1x128xf32>
    %c0 = arith.constant 0 : index
    %c0_3 = arith.constant 0 : index
    %22 = vector.load %arg8[%c0, %c0_3] : memref<1x128xf32, #tpu.memory_space<vmem>>, vector<1x128xf32>
    tpu.vector_store %arg8[%c0, %c0_3], %21 {strides = array<i32>} : memref<1x128xf32, #tpu.memory_space<vmem>>, vector<1x128xf32>,
    %c0_i32_4 = arith.constant 0 : i32
    %c144_i32 = arith.constant 144 : i32
    %23 = arith.muli %c0_i32_4, %c144_i32 : i32
    %c0_i32_5 = arith.constant 0 : i32
    %24 = arith.addi %23, %c0_i32_5 : i32
    %c0_6 = arith.constant 0 : index
    %25 = arith.index_cast %24 : i32 to index
    %c0_7 = arith.constant 0 : index
    %26 = vector.load %arg1[%c0_6, %25, %c0_7] : memref<1x328x4xf32, #tpu.memory_space<vmem>>, vector<1x144x4xf32>
    %27 = vector.shape_cast %26 : vector<1x144x4xf32> to vector<144x4xf32>
    %c0_8 = arith.constant 0 : index
    %c0_9 = arith.constant 0 : index
    %28 = vector.load %arg7[%c0_8, %c0_9] : memref<144x36xf32, #tpu.memory_space<vmem>>, vector<144x4xf32>
    tpu.vector_store %arg7[%c0_8, %c0_9], %27 {strides = array<i32>} : memref<144x36xf32, #tpu.memory_space<vmem>>, vector<144x4xf32>,
    %c1_i32_10 = arith.constant 1 : i32
    %29 = arith.addi %23, %c1_i32_10 : i32
    %c0_11 = arith.constant 0 : index
    %30 = arith.index_cast %29 : i32 to index
    %c0_12 = arith.constant 0 : index
    %31 = vector.load %arg1[%c0_11, %30, %c0_12] : memref<1x328x4xf32, #tpu.memory_space<vmem>>, vector<1x144x4xf32>
    %32 = vector.shape_cast %31 : vector<1x144x4xf32> to vector<144x4xf32>
    %c0_13 = arith.constant 0 : index
    %c4 = arith.constant 4 : index
    %33 = vector.load %arg7[%c0_13, %c4] : memref<144x36xf32, #tpu.memory_space<vmem>>, vector<144x4xf32>
    tpu.vector_store %arg7[%c0_13, %c4], %32 {strides = array<i32>} : memref<144x36xf32, #tpu.memory_space<vmem>>, vector<144x4xf32>,
    %c2_i32 = arith.constant 2 : i32
    %34 = arith.addi %23, %c2_i32 : i32
    %c0_14 = arith.constant 0 : index
    %35 = arith.index_cast %34 : i32 to index
    %c0_15 = arith.constant 0 : index
    %36 = vector.load %arg1[%c0_14, %35, %c0_15] : memref<1x328x4xf32, #tpu.memory_space<vmem>>, vector<1x144x4xf32>
    %37 = vector.shape_cast %36 : vector<1x144x4xf32> to vector<144x4xf32>
    %c0_16 = arith.constant 0 : index
    %c8 = arith.constant 8 : index
    %38 = vector.load %arg7[%c0_16, %c8] : memref<144x36xf32, #tpu.memory_space<vmem>>, vector<144x4xf32>
    tpu.vector_store %arg7[%c0_16, %c8], %37 {strides = array<i32>} : memref<144x36xf32, #tpu.memory_space<vmem>>, vector<144x4xf32>,
    %c18_i32_17 = arith.constant 18 : i32
    %39 = arith.addi %23, %c18_i32_17 : i32
    %c0_18 = arith.constant 0 : index
    %40 = arith.index_cast %39 : i32 to index
    %c0_19 = arith.constant 0 : index
    %41 = vector.load %arg1[%c0_18, %40, %c0_19] : memref<1x328x4xf32, #tpu.memory_space<vmem>>, vector<1x144x4xf32>
    %42 = vector.shape_cast %41 : vector<1x144x4xf32> to vector<144x4xf32>
    %c0_20 = arith.constant 0 : index
    %c12 = arith.constant 12 : index
    %43 = vector.load %arg7[%c0_20, %c12] : memref<144x36xf32, #tpu.memory_space<vmem>>, vector<144x4xf32>
    tpu.vector_store %arg7[%c0_20, %c12], %42 {strides = array<i32>} : memref<144x36xf32, #tpu.memory_space<vmem>>, vector<144x4xf32>,
    %c19_i32 = arith.constant 19 : i32
    %44 = arith.addi %23, %c19_i32 : i32
    %c0_21 = arith.constant 0 : index
    %45 = arith.index_cast %44 : i32 to index
    %c0_22 = arith.constant 0 : index
    %46 = vector.load %arg1[%c0_21, %45, %c0_22] : memref<1x328x4xf32, #tpu.memory_space<vmem>>, vector<1x144x4xf32>
    %47 = vector.shape_cast %46 : vector<1x144x4xf32> to vector<144x4xf32>
    %c0_23 = arith.constant 0 : index
    %c16 = arith.constant 16 : index
    %48 = vector.load %arg7[%c0_23, %c16] : memref<144x36xf32, #tpu.memory_space<vmem>>, vector<144x4xf32>
    tpu.vector_store %arg7[%c0_23, %c16], %47 {strides = array<i32>} : memref<144x36xf32, #tpu.memory_space<vmem>>, vector<144x4xf32>,
    %c20_i32 = arith.constant 20 : i32
    %49 = arith.addi %23, %c20_i32 : i32
    %c0_24 = arith.constant 0 : index
    %50 = arith.index_cast %49 : i32 to index
    %c0_25 = arith.constant 0 : index
    %51 = vector.load %arg1[%c0_24, %50, %c0_25] : memref<1x328x4xf32, #tpu.memory_space<vmem>>, vector<1x144x4xf32>
    %52 = vector.shape_cast %51 : vector<1x144x4xf32> to vector<144x4xf32>
    %c0_26 = arith.constant 0 : index
    %c20 = arith.constant 20 : index
    %53 = vector.load %arg7[%c0_26, %c20] : memref<144x36xf32, #tpu.memory_space<vmem>>, vector<144x4xf32>
    tpu.vector_store %arg7[%c0_26, %c20], %52 {strides = array<i32>} : memref<144x36xf32, #tpu.memory_space<vmem>>, vector<144x4xf32>,
    %c36_i32 = arith.constant 36 : i32
    %54 = arith.addi %23, %c36_i32 : i32
    %c0_27 = arith.constant 0 : index
    %55 = arith.index_cast %54 : i32 to index
    %c0_28 = arith.constant 0 : index
    %56 = vector.load %arg1[%c0_27, %55, %c0_28] : memref<1x328x4xf32, #tpu.memory_space<vmem>>, vector<1x144x4xf32>
    %57 = vector.shape_cast %56 : vector<1x144x4xf32> to vector<144x4xf32>
    %c0_29 = arith.constant 0 : index
    %c24 = arith.constant 24 : index
    %58 = vector.load %arg7[%c0_29, %c24] : memref<144x36xf32, #tpu.memory_space<vmem>>, vector<144x4xf32>
    tpu.vector_store %arg7[%c0_29, %c24], %57 {strides = array<i32>} : memref<144x36xf32, #tpu.memory_space<vmem>>, vector<144x4xf32>,
    %c37_i32 = arith.constant 37 : i32
    %59 = arith.addi %23, %c37_i32 : i32
    %c0_30 = arith.constant 0 : index
    %60 = arith.index_cast %59 : i32 to index
    %c0_31 = arith.constant 0 : index
    %61 = vector.load %arg1[%c0_30, %60, %c0_31] : memref<1x328x4xf32, #tpu.memory_space<vmem>>, vector<1x144x4xf32>
    %62 = vector.shape_cast %61 : vector<1x144x4xf32> to vector<144x4xf32>
    %c0_32 = arith.constant 0 : index
    %c28 = arith.constant 28 : index
    %63 = vector.load %arg7[%c0_32, %c28] : memref<144x36xf32, #tpu.memory_space<vmem>>, vector<144x4xf32>
    tpu.vector_store %arg7[%c0_32, %c28], %62 {strides = array<i32>} : memref<144x36xf32, #tpu.memory_space<vmem>>, vector<144x4xf32>,
    %c38_i32 = arith.constant 38 : i32
    %64 = arith.addi %23, %c38_i32 : i32
    %c0_33 = arith.constant 0 : index
    %65 = arith.index_cast %64 : i32 to index
    %c0_34 = arith.constant 0 : index
    %66 = vector.load %arg1[%c0_33, %65, %c0_34] : memref<1x328x4xf32, #tpu.memory_space<vmem>>, vector<1x144x4xf32>
    %67 = vector.shape_cast %66 : vector<1x144x4xf32> to vector<144x4xf32>
    %c0_35 = arith.constant 0 : index
    %c32 = arith.constant 32 : index
    %68 = vector.load %arg7[%c0_35, %c32] : memref<144x36xf32, #tpu.memory_space<vmem>>, vector<144x4xf32>
    tpu.vector_store %arg7[%c0_35, %c32], %67 {strides = array<i32>} : memref<144x36xf32, #tpu.memory_space<vmem>>, vector<144x4xf32>,
    %c0_36 = arith.constant 0 : index
    %c0_37 = arith.constant 0 : index
    %69 = vector.load %arg7[%c0_36, %c0_37] : memref<144x36xf32, #tpu.memory_space<vmem>>, vector<144x36xf32>
    %70 = arith.truncf %69 : vector<144x36xf32> to vector<144x36xbf16>
    %c0_38 = arith.constant 0 : index
    %c0_39 = arith.constant 0 : index
    %71 = vector.load %arg2[%c0_38, %c0_39] : memref<36x128xbf16, #tpu.memory_space<vmem>>, vector<36x128xbf16>
    %cst_40 = arith.constant dense<0.000000e+00> : vector<144x128xf32>
    %72 = tpu.matmul %70, %71, %cst_40 {dimension_numbers = #tpu.dot_dimension_numbers<[1], [0], [0], [1], [0, 0, 1, 1], [], []>} : vector<144x36xbf16>, vector<36x128xbf16>, vector<144x128xf32> -> vector<144x128xf32>
    %c0_41 = arith.constant 0 : index
    %c0_42 = arith.constant 0 : index
    %73 = vector.load %arg3[%c0_41, %c0_42] : memref<1x128xf32, #tpu.memory_space<vmem>>, vector<1x128xf32>
    %74 = vector.broadcast %73 : vector<1x128xf32> to vector<144x128xf32>
    %75 = arith.addf %72, %74 : vector<144x128xf32>
    %cst_43 = arith.constant 0.000000e+00 : f32
    %76 = vector.broadcast %cst_43 : f32 to vector<144x128xf32>
    %77 = arith.maximumf %75, %76 : vector<144x128xf32>
    %78 = vector.broadcast %20 : vector<144x1xf32> to vector<144x128xf32>
    %79 = arith.mulf %77, %78 : vector<144x128xf32>
    %c0_44 = arith.constant 0 : index
    %c0_45 = arith.constant 0 : index
    %80 = vector.load %arg8[%c0_44, %c0_45] : memref<1x128xf32, #tpu.memory_space<vmem>>, vector<1x128xf32>
    %cst_46 = arith.constant dense<0.000000e+00> : vector<128xf32>
    %81 = vector.multi_reduction <add>, %79, %cst_46 [0] : vector<144x128xf32> to vector<128xf32>
    %82 = vector.shape_cast %81 : vector<128xf32> to vector<1x128xf32>
    %83 = arith.addf %80, %82 : vector<1x128xf32>
    %c0_47 = arith.constant 0 : index
    %c0_48 = arith.constant 0 : index
    %84 = vector.load %arg8[%c0_47, %c0_48] : memref<1x128xf32, #tpu.memory_space<vmem>>, vector<1x128xf32>
    tpu.vector_store %arg8[%c0_47, %c0_48], %83 {strides = array<i32>} : memref<1x128xf32, #tpu.memory_space<vmem>>, vector<1x128xf32>,
    %c1_i32_49 = arith.constant 1 : i32
    %c144_i32_50 = arith.constant 144 : i32
    %85 = arith.muli %c1_i32_49, %c144_i32_50 : i32
    %c0_i32_51 = arith.constant 0 : i32
    %86 = arith.addi %85, %c0_i32_51 : i32
    %c0_52 = arith.constant 0 : index
    %87 = arith.index_cast %86 : i32 to index
    %c0_53 = arith.constant 0 : index
    %88 = vector.load %arg1[%c0_52, %87, %c0_53] : memref<1x328x4xf32, #tpu.memory_space<vmem>>, vector<1x144x4xf32>
    %89 = vector.shape_cast %88 : vector<1x144x4xf32> to vector<144x4xf32>
    %c0_54 = arith.constant 0 : index
    %c0_55 = arith.constant 0 : index
    %90 = vector.load %arg7[%c0_54, %c0_55] : memref<144x36xf32, #tpu.memory_space<vmem>>, vector<144x4xf32>
    tpu.vector_store %arg7[%c0_54, %c0_55], %89 {strides = array<i32>} : memref<144x36xf32, #tpu.memory_space<vmem>>, vector<144x4xf32>,
    %c1_i32_56 = arith.constant 1 : i32
    %91 = arith.addi %85, %c1_i32_56 : i32
    %c0_57 = arith.constant 0 : index
    %92 = arith.index_cast %91 : i32 to index
    %c0_58 = arith.constant 0 : index
    %93 = vector.load %arg1[%c0_57, %92, %c0_58] : memref<1x328x4xf32, #tpu.memory_space<vmem>>, vector<1x144x4xf32>
    %94 = vector.shape_cast %93 : vector<1x144x4xf32> to vector<144x4xf32>
    %c0_59 = arith.constant 0 : index
    %c4_60 = arith.constant 4 : index
    %95 = vector.load %arg7[%c0_59, %c4_60] : memref<144x36xf32, #tpu.memory_space<vmem>>, vector<144x4xf32>
    tpu.vector_store %arg7[%c0_59, %c4_60], %94 {strides = array<i32>} : memref<144x36xf32, #tpu.memory_space<vmem>>, vector<144x4xf32>,
    %c2_i32_61 = arith.constant 2 : i32
    %96 = arith.addi %85, %c2_i32_61 : i32
    %c0_62 = arith.constant 0 : index
    %97 = arith.index_cast %96 : i32 to index
    %c0_63 = arith.constant 0 : index
    %98 = vector.load %arg1[%c0_62, %97, %c0_63] : memref<1x328x4xf32, #tpu.memory_space<vmem>>, vector<1x144x4xf32>
    %99 = vector.shape_cast %98 : vector<1x144x4xf32> to vector<144x4xf32>
    %c0_64 = arith.constant 0 : index
    %c8_65 = arith.constant 8 : index
    %100 = vector.load %arg7[%c0_64, %c8_65] : memref<144x36xf32, #tpu.memory_space<vmem>>, vector<144x4xf32>
    tpu.vector_store %arg7[%c0_64, %c8_65], %99 {strides = array<i32>} : memref<144x36xf32, #tpu.memory_space<vmem>>, vector<144x4xf32>,
    %c18_i32_66 = arith.constant 18 : i32
    %101 = arith.addi %85, %c18_i32_66 : i32
    %c0_67 = arith.constant 0 : index
    %102 = arith.index_cast %101 : i32 to index
    %c0_68 = arith.constant 0 : index
    %103 = vector.load %arg1[%c0_67, %102, %c0_68] : memref<1x328x4xf32, #tpu.memory_space<vmem>>, vector<1x144x4xf32>
    %104 = vector.shape_cast %103 : vector<1x144x4xf32> to vector<144x4xf32>
    %c0_69 = arith.constant 0 : index
    %c12_70 = arith.constant 12 : index
    %105 = vector.load %arg7[%c0_69, %c12_70] : memref<144x36xf32, #tpu.memory_space<vmem>>, vector<144x4xf32>
    tpu.vector_store %arg7[%c0_69, %c12_70], %104 {strides = array<i32>} : memref<144x36xf32, #tpu.memory_space<vmem>>, vector<144x4xf32>,
    %c19_i32_71 = arith.constant 19 : i32
    %106 = arith.addi %85, %c19_i32_71 : i32
    %c0_72 = arith.constant 0 : index
    %107 = arith.index_cast %106 : i32 to index
    %c0_73 = arith.constant 0 : index
    %108 = vector.load %arg1[%c0_72, %107, %c0_73] : memref<1x328x4xf32, #tpu.memory_space<vmem>>, vector<1x144x4xf32>
    %109 = vector.shape_cast %108 : vector<1x144x4xf32> to vector<144x4xf32>
    %c0_74 = arith.constant 0 : index
    %c16_75 = arith.constant 16 : index
    %110 = vector.load %arg7[%c0_74, %c16_75] : memref<144x36xf32, #tpu.memory_space<vmem>>, vector<144x4xf32>
    tpu.vector_store %arg7[%c0_74, %c16_75], %109 {strides = array<i32>} : memref<144x36xf32, #tpu.memory_space<vmem>>, vector<144x4xf32>,
    %c20_i32_76 = arith.constant 20 : i32
    %111 = arith.addi %85, %c20_i32_76 : i32
    %c0_77 = arith.constant 0 : index
    %112 = arith.index_cast %111 : i32 to index
    %c0_78 = arith.constant 0 : index
    %113 = vector.load %arg1[%c0_77, %112, %c0_78] : memref<1x328x4xf32, #tpu.memory_space<vmem>>, vector<1x144x4xf32>
    %114 = vector.shape_cast %113 : vector<1x144x4xf32> to vector<144x4xf32>
    %c0_79 = arith.constant 0 : index
    %c20_80 = arith.constant 20 : index
    %115 = vector.load %arg7[%c0_79, %c20_80] : memref<144x36xf32, #tpu.memory_space<vmem>>, vector<144x4xf32>
    tpu.vector_store %arg7[%c0_79, %c20_80], %114 {strides = array<i32>} : memref<144x36xf32, #tpu.memory_space<vmem>>, vector<144x4xf32>,
    %c36_i32_81 = arith.constant 36 : i32
    %116 = arith.addi %85, %c36_i32_81 : i32
    %c0_82 = arith.constant 0 : index
    %117 = arith.index_cast %116 : i32 to index
    %c0_83 = arith.constant 0 : index
    %118 = vector.load %arg1[%c0_82, %117, %c0_83] : memref<1x328x4xf32, #tpu.memory_space<vmem>>, vector<1x144x4xf32>
    %119 = vector.shape_cast %118 : vector<1x144x4xf32> to vector<144x4xf32>
    %c0_84 = arith.constant 0 : index
    %c24_85 = arith.constant 24 : index
    %120 = vector.load %arg7[%c0_84, %c24_85] : memref<144x36xf32, #tpu.memory_space<vmem>>, vector<144x4xf32>
    tpu.vector_store %arg7[%c0_84, %c24_85], %119 {strides = array<i32>} : memref<144x36xf32, #tpu.memory_space<vmem>>, vector<144x4xf32>,
    %c37_i32_86 = arith.constant 37 : i32
    %121 = arith.addi %85, %c37_i32_86 : i32
    %c0_87 = arith.constant 0 : index
    %122 = arith.index_cast %121 : i32 to index
    %c0_88 = arith.constant 0 : index
    %123 = vector.load %arg1[%c0_87, %122, %c0_88] : memref<1x328x4xf32, #tpu.memory_space<vmem>>, vector<1x144x4xf32>
    %124 = vector.shape_cast %123 : vector<1x144x4xf32> to vector<144x4xf32>
    %c0_89 = arith.constant 0 : index
    %c28_90 = arith.constant 28 : index
    %125 = vector.load %arg7[%c0_89, %c28_90] : memref<144x36xf32, #tpu.memory_space<vmem>>, vector<144x4xf32>
    tpu.vector_store %arg7[%c0_89, %c28_90], %124 {strides = array<i32>} : memref<144x36xf32, #tpu.memory_space<vmem>>, vector<144x4xf32>,
    %c38_i32_91 = arith.constant 38 : i32
    %126 = arith.addi %85, %c38_i32_91 : i32
    %c0_92 = arith.constant 0 : index
    %127 = arith.index_cast %126 : i32 to index
    %c0_93 = arith.constant 0 : index
    %128 = vector.load %arg1[%c0_92, %127, %c0_93] : memref<1x328x4xf32, #tpu.memory_space<vmem>>, vector<1x144x4xf32>
    %129 = vector.shape_cast %128 : vector<1x144x4xf32> to vector<144x4xf32>
    %c0_94 = arith.constant 0 : index
    %c32_95 = arith.constant 32 : index
    %130 = vector.load %arg7[%c0_94, %c32_95] : memref<144x36xf32, #tpu.memory_space<vmem>>, vector<144x4xf32>
    tpu.vector_store %arg7[%c0_94, %c32_95], %129 {strides = array<i32>} : memref<144x36xf32, #tpu.memory_space<vmem>>, vector<144x4xf32>,
    %c0_96 = arith.constant 0 : index
    %c0_97 = arith.constant 0 : index
    %131 = vector.load %arg7[%c0_96, %c0_97] : memref<144x36xf32, #tpu.memory_space<vmem>>, vector<144x36xf32>
    %132 = arith.truncf %131 : vector<144x36xf32> to vector<144x36xbf16>
    %c0_98 = arith.constant 0 : index
    %c0_99 = arith.constant 0 : index
    %133 = vector.load %arg2[%c0_98, %c0_99] : memref<36x128xbf16, #tpu.memory_space<vmem>>, vector<36x128xbf16>
    %cst_100 = arith.constant dense<0.000000e+00> : vector<144x128xf32>
    %134 = tpu.matmul %132, %133, %cst_100 {dimension_numbers = #tpu.dot_dimension_numbers<[1], [0], [0], [1], [0, 0, 1, 1], [], []>} : vector<144x36xbf16>, vector<36x128xbf16>, vector<144x128xf32> -> vector<144x128xf32>
    %c0_101 = arith.constant 0 : index
    %c0_102 = arith.constant 0 : index
    %135 = vector.load %arg3[%c0_101, %c0_102] : memref<1x128xf32, #tpu.memory_space<vmem>>, vector<1x128xf32>
    %136 = vector.broadcast %135 : vector<1x128xf32> to vector<144x128xf32>
    %137 = arith.addf %134, %136 : vector<144x128xf32>
    %cst_103 = arith.constant 0.000000e+00 : f32
    %138 = vector.broadcast %cst_103 : f32 to vector<144x128xf32>
    %139 = arith.maximumf %137, %138 : vector<144x128xf32>
    %140 = vector.broadcast %20 : vector<144x1xf32> to vector<144x128xf32>
    %141 = arith.mulf %139, %140 : vector<144x128xf32>
    %c0_104 = arith.constant 0 : index
    %c0_105 = arith.constant 0 : index
    %142 = vector.load %arg8[%c0_104, %c0_105] : memref<1x128xf32, #tpu.memory_space<vmem>>, vector<1x128xf32>
    %cst_106 = arith.constant dense<0.000000e+00> : vector<128xf32>
    %143 = vector.multi_reduction <add>, %141, %cst_106 [0] : vector<144x128xf32> to vector<128xf32>
    %144 = vector.shape_cast %143 : vector<128xf32> to vector<1x128xf32>
    %145 = arith.addf %142, %144 : vector<1x128xf32>
    %c0_107 = arith.constant 0 : index
    %c0_108 = arith.constant 0 : index
    %146 = vector.load %arg8[%c0_107, %c0_108] : memref<1x128xf32, #tpu.memory_space<vmem>>, vector<1x128xf32>
    tpu.vector_store %arg8[%c0_107, %c0_108], %145 {strides = array<i32>} : memref<1x128xf32, #tpu.memory_space<vmem>>, vector<1x128xf32>,
    %c2_i32_109 = arith.constant 2 : i32
    %c0_110 = arith.constant 0 : index
    %c0_111 = arith.constant 0 : index
    %147 = vector.load %arg8[%c0_110, %c0_111] : memref<1x128xf32, #tpu.memory_space<vmem>>, vector<1x128xf32>
    %cst_112 = arith.constant 3.906250e-03 : f32
    %148 = vector.broadcast %cst_112 : f32 to vector<1x128xf32>
    %149 = arith.mulf %147, %148 : vector<1x128xf32>
    %150 = arith.truncf %149 : vector<1x128xf32> to vector<1x128xbf16>
    %c0_113 = arith.constant 0 : index
    %c0_114 = arith.constant 0 : index
    %151 = vector.load %arg4[%c0_113, %c0_114] : memref<128x256xbf16, #tpu.memory_space<vmem>>, vector<128x256xbf16>
    %cst_115 = arith.constant dense<0.000000e+00> : vector<1x256xf32>
    %152 = tpu.matmul %150, %151, %cst_115 {dimension_numbers = #tpu.dot_dimension_numbers<[1], [0], [0], [1], [0, 0, 1, 1], [], []>} : vector<1x128xbf16>, vector<128x256xbf16>, vector<1x256xf32> -> vector<1x256xf32>
    %c0_116 = arith.constant 0 : index
    %c0_117 = arith.constant 0 : index
    %153 = vector.load %arg5[%c0_116, %c0_117] : memref<1x256xf32, #tpu.memory_space<vmem>>, vector<1x256xf32>
    %154 = arith.addf %152, %153 : vector<1x256xf32>
    %c0_118 = arith.constant 0 : index
    %c0_119 = arith.constant 0 : index
    %c0_120 = arith.constant 0 : index
    %155 = vector.load %arg6[%c0_118, %c0_119, %c0_120] : memref<1x1x256xf32, #tpu.memory_space<vmem>>, vector<1x1x256xf32>
    %156 = vector.shape_cast %155 : vector<1x1x256xf32> to vector<1x256xf32>
    %157 = vector.shape_cast %154 : vector<1x256xf32> to vector<1x1x256xf32>
    tpu.vector_store %arg6[%c0_118, %c0_119, %c0_120], %157 {strides = array<i32>} : memref<1x1x256xf32, #tpu.memory_space<vmem>>, vector<1x1x256xf32>,
    return
  }
  func.func @transform_0(%arg0: i32) -> (i32, i32, i32) {
    %c0_i32 = arith.constant 0 : i32
    %c0_i32_0 = arith.constant 0 : i32
    %c0_i32_1 = arith.constant 0 : i32
    return %arg0, %c0_i32, %c0_i32_0 : i32, i32, i32
  }
  func.func @transform_1(%arg0: i32) -> (i32, i32) {
    %c0_i32 = arith.constant 0 : i32
    %c0_i32_0 = arith.constant 0 : i32
    %c0_i32_1 = arith.constant 0 : i32
    return %c0_i32, %c0_i32_0 : i32, i32
  }
  func.func @transform_2(%arg0: i32) -> (i32, i32) {
    %c0_i32 = arith.constant 0 : i32
    %c0_i32_0 = arith.constant 0 : i32
    %c0_i32_1 = arith.constant 0 : i32
    return %c0_i32, %c0_i32_0 : i32, i32
  }
  func.func @transform_3(%arg0: i32) -> (i32, i32) {
    %c0_i32 = arith.constant 0 : i32
    %c0_i32_0 = arith.constant 0 : i32
    %c0_i32_1 = arith.constant 0 : i32
    return %c0_i32, %c0_i32_0 : i32, i32
  }
  func.func @transform_4(%arg0: i32) -> (i32, i32) {
    %c0_i32 = arith.constant 0 : i32
    %c0_i32_0 = arith.constant 0 : i32
    %c0_i32_1 = arith.constant 0 : i32
    return %c0_i32, %c0_i32_0 : i32, i32
  }
  func.func @transform_5(%arg0: i32) -> (i32, i32, i32) {
    %c0_i32 = arith.constant 0 : i32
    %c0_i32_0 = arith.constant 0 : i32
    %c0_i32_1 = arith.constant 0 : i32
    return %arg0, %c0_i32, %c0_i32_0 : i32, i32, i32
  }
}

module attributes {stable_mosaic.version = 11 : i64} {
  func.func @_mm_bias_kernel(%arg0: i32, %arg1: i32, %arg2: i32, %arg3: memref<64x128xbf16, #tpu.memory_space<vmem>>, %arg4: memref<128x512xbf16, #tpu.memory_space<vmem>>, %arg5: memref<1x512xf32, #tpu.memory_space<vmem>>, %arg6: memref<64x512xf32, #tpu.memory_space<vmem>>, %arg7: memref<64x512xf32, #tpu.memory_space<vmem>>) attributes {dimension_semantics = [#tpu.dimension_semantics<parallel>, #tpu.dimension_semantics<parallel>, #tpu.dimension_semantics<arbitrary>], iteration_bounds = array<i64: 1, 2, 1>, scalar_prefetch = 0 : i64, scratch_operands = 1 : i64, tpu.core_type = #tpu.core_type<tc>, window_params = [{transform_indices = @transform_0, window_bounds = array<i64: 64, 128>}, {transform_indices = @transform_1, window_bounds = array<i64: 128, 512>}, {transform_indices = @transform_2, window_bounds = array<i64: 1, 512>}, {transform_indices = @transform_3, window_bounds = array<i64: 64, 512>}]} {
    %c0_i32 = arith.constant 0 : i32
    %0 = arith.cmpi eq, %arg2, %c0_i32 : i32
    %1 = arith.extui %0 : i1 to i32
    %c0_i32_0 = arith.constant 0 : i32
    %2 = arith.cmpi ne, %1, %c0_i32_0 : i32
    scf.if %2 {
      %cst_10 = arith.constant 0.000000e+00 : f32
      %12 = vector.broadcast %cst_10 : f32 to vector<64x512xf32>
      %c0_11 = arith.constant 0 : index
      %c0_12 = arith.constant 0 : index
      %13 = vector.load %arg7[%c0_11, %c0_12] : memref<64x512xf32, #tpu.memory_space<vmem>>, vector<64x512xf32>
      tpu.vector_store %arg7[%c0_11, %c0_12], %12 {strides = array<i32>} : memref<64x512xf32, #tpu.memory_space<vmem>>, vector<64x512xf32>,
    } else {
    }
    %c0 = arith.constant 0 : index
    %c0_1 = arith.constant 0 : index
    %3 = vector.load %arg7[%c0, %c0_1] : memref<64x512xf32, #tpu.memory_space<vmem>>, vector<64x512xf32>
    %c0_2 = arith.constant 0 : index
    %c0_3 = arith.constant 0 : index
    %4 = vector.load %arg3[%c0_2, %c0_3] : memref<64x128xbf16, #tpu.memory_space<vmem>>, vector<64x128xbf16>
    %c0_4 = arith.constant 0 : index
    %c0_5 = arith.constant 0 : index
    %5 = vector.load %arg4[%c0_4, %c0_5] : memref<128x512xbf16, #tpu.memory_space<vmem>>, vector<128x512xbf16>
    %cst = arith.constant dense<0.000000e+00> : vector<64x512xf32>
    %6 = tpu.matmul %4, %5, %cst {dimension_numbers = #tpu.dot_dimension_numbers<[1], [0], [0], [1], [0, 0, 1, 1], [], []>} : vector<64x128xbf16>, vector<128x512xbf16>, vector<64x512xf32> -> vector<64x512xf32>
    %7 = arith.addf %3, %6 : vector<64x512xf32>
    %c0_6 = arith.constant 0 : index
    %c0_7 = arith.constant 0 : index
    %8 = vector.load %arg7[%c0_6, %c0_7] : memref<64x512xf32, #tpu.memory_space<vmem>>, vector<64x512xf32>
    tpu.vector_store %arg7[%c0_6, %c0_7], %7 {strides = array<i32>} : memref<64x512xf32, #tpu.memory_space<vmem>>, vector<64x512xf32>,
    %c0_i32_8 = arith.constant 0 : i32
    %9 = arith.cmpi eq, %arg2, %c0_i32_8 : i32
    %10 = arith.extui %9 : i1 to i32
    %c0_i32_9 = arith.constant 0 : i32
    %11 = arith.cmpi ne, %10, %c0_i32_9 : i32
    scf.if %11 {
      %c0_10 = arith.constant 0 : index
      %c0_11 = arith.constant 0 : index
      %12 = vector.load %arg7[%c0_10, %c0_11] : memref<64x512xf32, #tpu.memory_space<vmem>>, vector<64x512xf32>
      %c0_12 = arith.constant 0 : index
      %c0_13 = arith.constant 0 : index
      %13 = vector.load %arg5[%c0_12, %c0_13] : memref<1x512xf32, #tpu.memory_space<vmem>>, vector<1x512xf32>
      %14 = vector.broadcast %13 : vector<1x512xf32> to vector<64x512xf32>
      %15 = arith.addf %12, %14 : vector<64x512xf32>
      %c0_14 = arith.constant 0 : index
      %c0_15 = arith.constant 0 : index
      %16 = vector.load %arg6[%c0_14, %c0_15] : memref<64x512xf32, #tpu.memory_space<vmem>>, vector<64x512xf32>
      tpu.vector_store %arg6[%c0_14, %c0_15], %15 {strides = array<i32>} : memref<64x512xf32, #tpu.memory_space<vmem>>, vector<64x512xf32>,
    } else {
    }
    return
  }
  func.func @transform_0(%arg0: i32, %arg1: i32, %arg2: i32) -> (i32, i32) {
    %c0_i32 = arith.constant 0 : i32
    return %arg0, %arg2 : i32, i32
  }
  func.func @transform_1(%arg0: i32, %arg1: i32, %arg2: i32) -> (i32, i32) {
    %c0_i32 = arith.constant 0 : i32
    return %arg2, %arg1 : i32, i32
  }
  func.func @transform_2(%arg0: i32, %arg1: i32, %arg2: i32) -> (i32, i32) {
    %c0_i32 = arith.constant 0 : i32
    %c0_i32_0 = arith.constant 0 : i32
    return %c0_i32, %arg1 : i32, i32
  }
  func.func @transform_3(%arg0: i32, %arg1: i32, %arg2: i32) -> (i32, i32) {
    %c0_i32 = arith.constant 0 : i32
    return %arg0, %arg1 : i32, i32
  }
}

module attributes {stable_mosaic.version = 11 : i64} {
  func.func @_bilstm_pool_kernel(%arg0: i32, %arg1: i32, %arg2: memref<8x8x512xf32, #tpu.memory_space<vmem>>, %arg3: memref<1x128x512xbf16, #tpu.memory_space<vmem>>, %arg4: memref<8x8x1xf32, #tpu.memory_space<vmem>>, %arg5: memref<1x8x128xf32, #tpu.memory_space<vmem>>, %arg6: memref<8x128xf32, #tpu.memory_space<vmem>>, %arg7: memref<8x128xf32, #tpu.memory_space<vmem>>, %arg8: memref<8x128xf32, #tpu.memory_space<vmem>>) attributes {dimension_semantics = [#tpu.dimension_semantics<parallel>, #tpu.dimension_semantics<arbitrary>], iteration_bounds = array<i64: 2, 1>, scalar_prefetch = 0 : i64, scratch_operands = 3 : i64, tpu.core_type = #tpu.core_type<tc>, window_params = [{transform_indices = @transform_0, window_bounds = array<i64: 8, 8, 512>}, {transform_indices = @transform_1, window_bounds = array<i64: 1, 128, 512>}, {transform_indices = @transform_2, window_bounds = array<i64: 8, 8, 1>}, {transform_indices = @transform_3, window_bounds = array<i64: 1, 8, 128>}]} {
    %c0_i32 = arith.constant 0 : i32
    %0 = arith.cmpi eq, %arg1, %c0_i32 : i32
    %1 = arith.extui %0 : i1 to i32
    %c0_i32_0 = arith.constant 0 : i32
    %2 = arith.cmpi ne, %1, %c0_i32_0 : i32
    scf.if %2 {
      %cst_229 = arith.constant 0.000000e+00 : f32
      %512 = vector.broadcast %cst_229 : f32 to vector<8x128xf32>
      %c0_230 = arith.constant 0 : index
      %c0_231 = arith.constant 0 : index
      %513 = vector.load %arg6[%c0_230, %c0_231] : memref<8x128xf32, #tpu.memory_space<vmem>>, vector<8x128xf32>
      tpu.vector_store %arg6[%c0_230, %c0_231], %512 {strides = array<i32>} : memref<8x128xf32, #tpu.memory_space<vmem>>, vector<8x128xf32>,
      %cst_232 = arith.constant 0.000000e+00 : f32
      %514 = vector.broadcast %cst_232 : f32 to vector<8x128xf32>
      %c0_233 = arith.constant 0 : index
      %c0_234 = arith.constant 0 : index
      %515 = vector.load %arg7[%c0_233, %c0_234] : memref<8x128xf32, #tpu.memory_space<vmem>>, vector<8x128xf32>
      tpu.vector_store %arg7[%c0_233, %c0_234], %514 {strides = array<i32>} : memref<8x128xf32, #tpu.memory_space<vmem>>, vector<8x128xf32>,
      %cst_235 = arith.constant 0.000000e+00 : f32
      %516 = vector.broadcast %cst_235 : f32 to vector<8x128xf32>
      %c0_236 = arith.constant 0 : index
      %c0_237 = arith.constant 0 : index
      %517 = vector.load %arg8[%c0_236, %c0_237] : memref<8x128xf32, #tpu.memory_space<vmem>>, vector<8x128xf32>
      tpu.vector_store %arg8[%c0_236, %c0_237], %516 {strides = array<i32>} : memref<8x128xf32, #tpu.memory_space<vmem>>, vector<8x128xf32>,
    } else {
    }
    %c0 = arith.constant 0 : index
    %c0_1 = arith.constant 0 : index
    %c0_2 = arith.constant 0 : index
    %3 = vector.load %arg3[%c0, %c0_1, %c0_2] : memref<1x128x512xbf16, #tpu.memory_space<vmem>>, vector<1x128x512xbf16>
    %4 = vector.shape_cast %3 : vector<1x128x512xbf16> to vector<128x512xbf16>
    %c0_i32_3 = arith.constant 0 : i32
    %c2_i32 = arith.constant 2 : i32
    %5 = arith.muli %c2_i32, %c0_i32_3 : i32
    %c7_i32 = arith.constant 7 : i32
    %6 = arith.subi %c7_i32, %5 : i32
    %7 = arith.muli %arg0, %6 : i32
    %8 = arith.addi %c0_i32_3, %7 : i32
    %9 = arith.index_cast %8 : i32 to index
    %c0_4 = arith.constant 0 : index
    %c0_5 = arith.constant 0 : index
    %10 = vector.load %arg2[%9, %c0_4, %c0_5] : memref<8x8x512xf32, #tpu.memory_space<vmem>>, vector<1x8x512xf32>
    %11 = vector.shape_cast %10 : vector<1x8x512xf32> to vector<8x512xf32>
    %c0_6 = arith.constant 0 : index
    %c0_7 = arith.constant 0 : index
    %12 = vector.load %arg6[%c0_6, %c0_7] : memref<8x128xf32, #tpu.memory_space<vmem>>, vector<8x128xf32>
    %13 = arith.truncf %12 : vector<8x128xf32> to vector<8x128xbf16>
    %cst = arith.constant dense<0.000000e+00> : vector<8x512xf32>
    %14 = tpu.matmul %13, %4, %cst {dimension_numbers = #tpu.dot_dimension_numbers<[1], [0], [0], [1], [0, 0, 1, 1], [], []>} : vector<8x128xbf16>, vector<128x512xbf16>, vector<8x512xf32> -> vector<8x512xf32>
    %15 = arith.addf %11, %14 : vector<8x512xf32>
    %16 = vector.extract_strided_slice %15 {offsets = [0, 0], sizes = [8, 128], strides = [1, 1]} : vector<8x512xf32> to vector<8x128xf32>
    %17 = arith.negf %16 : vector<8x128xf32>
    %18 = math.exp %17 : vector<8x128xf32>
    %cst_8 = arith.constant 1.000000e+00 : f32
    %19 = vector.broadcast %cst_8 : f32 to vector<8x128xf32>
    %20 = arith.addf %19, %18 : vector<8x128xf32>
    %21 = arith.divf %19, %20 : vector<8x128xf32>
    %22 = vector.extract_strided_slice %15 {offsets = [0, 128], sizes = [8, 128], strides = [1, 1]} : vector<8x512xf32> to vector<8x128xf32>
    %23 = arith.negf %22 : vector<8x128xf32>
    %24 = math.exp %23 : vector<8x128xf32>
    %cst_9 = arith.constant 1.000000e+00 : f32
    %25 = vector.broadcast %cst_9 : f32 to vector<8x128xf32>
    %26 = arith.addf %25, %24 : vector<8x128xf32>
    %27 = arith.divf %25, %26 : vector<8x128xf32>
    %28 = vector.extract_strided_slice %15 {offsets = [0, 256], sizes = [8, 128], strides = [1, 1]} : vector<8x512xf32> to vector<8x128xf32>
    %29 = math.tanh %28 : vector<8x128xf32>
    %30 = vector.extract_strided_slice %15 {offsets = [0, 384], sizes = [8, 128], strides = [1, 1]} : vector<8x512xf32> to vector<8x128xf32>
    %31 = arith.negf %30 : vector<8x128xf32>
    %32 = math.exp %31 : vector<8x128xf32>
    %cst_10 = arith.constant 1.000000e+00 : f32
    %33 = vector.broadcast %cst_10 : f32 to vector<8x128xf32>
    %34 = arith.addf %33, %32 : vector<8x128xf32>
    %35 = arith.divf %33, %34 : vector<8x128xf32>
    %c0_11 = arith.constant 0 : index
    %c0_12 = arith.constant 0 : index
    %36 = vector.load %arg7[%c0_11, %c0_12] : memref<8x128xf32, #tpu.memory_space<vmem>>, vector<8x128xf32>
    %37 = arith.mulf %27, %36 : vector<8x128xf32>
    %38 = arith.mulf %21, %29 : vector<8x128xf32>
    %39 = arith.addf %37, %38 : vector<8x128xf32>
    %40 = math.tanh %39 : vector<8x128xf32>
    %41 = arith.mulf %35, %40 : vector<8x128xf32>
    %42 = arith.index_cast %8 : i32 to index
    %c0_13 = arith.constant 0 : index
    %c0_14 = arith.constant 0 : index
    %43 = vector.load %arg4[%42, %c0_13, %c0_14] : memref<8x8x1xf32, #tpu.memory_space<vmem>>, vector<1x8x1xf32>
    %44 = vector.shape_cast %43 : vector<1x8x1xf32> to vector<8x1xf32>
    %45 = vector.broadcast %44 : vector<8x1xf32> to vector<8x128xf32>
    %46 = arith.mulf %45, %39 : vector<8x128xf32>
    %cst_15 = arith.constant 1.000000e+00 : f32
    %47 = vector.broadcast %cst_15 : f32 to vector<8x1xf32>
    %48 = arith.subf %47, %44 : vector<8x1xf32>
    %c0_16 = arith.constant 0 : index
    %c0_17 = arith.constant 0 : index
    %49 = vector.load %arg7[%c0_16, %c0_17] : memref<8x128xf32, #tpu.memory_space<vmem>>, vector<8x128xf32>
    %50 = vector.broadcast %48 : vector<8x1xf32> to vector<8x128xf32>
    %51 = arith.mulf %50, %49 : vector<8x128xf32>
    %52 = arith.addf %46, %51 : vector<8x128xf32>
    %c0_18 = arith.constant 0 : index
    %c0_19 = arith.constant 0 : index
    %53 = vector.load %arg7[%c0_18, %c0_19] : memref<8x128xf32, #tpu.memory_space<vmem>>, vector<8x128xf32>
    tpu.vector_store %arg7[%c0_18, %c0_19], %52 {strides = array<i32>} : memref<8x128xf32, #tpu.memory_space<vmem>>, vector<8x128xf32>,
    %54 = vector.broadcast %44 : vector<8x1xf32> to vector<8x128xf32>
    %55 = arith.mulf %54, %41 : vector<8x128xf32>
    %cst_20 = arith.constant 1.000000e+00 : f32
    %56 = vector.broadcast %cst_20 : f32 to vector<8x1xf32>
    %57 = arith.subf %56, %44 : vector<8x1xf32>
    %c0_21 = arith.constant 0 : index
    %c0_22 = arith.constant 0 : index
    %58 = vector.load %arg6[%c0_21, %c0_22] : memref<8x128xf32, #tpu.memory_space<vmem>>, vector<8x128xf32>
    %59 = vector.broadcast %57 : vector<8x1xf32> to vector<8x128xf32>
    %60 = arith.mulf %59, %58 : vector<8x128xf32>
    %61 = arith.addf %55, %60 : vector<8x128xf32>
    %c0_23 = arith.constant 0 : index
    %c0_24 = arith.constant 0 : index
    %62 = vector.load %arg6[%c0_23, %c0_24] : memref<8x128xf32, #tpu.memory_space<vmem>>, vector<8x128xf32>
    tpu.vector_store %arg6[%c0_23, %c0_24], %61 {strides = array<i32>} : memref<8x128xf32, #tpu.memory_space<vmem>>, vector<8x128xf32>,
    %c0_25 = arith.constant 0 : index
    %c0_26 = arith.constant 0 : index
    %63 = vector.load %arg8[%c0_25, %c0_26] : memref<8x128xf32, #tpu.memory_space<vmem>>, vector<8x128xf32>
    %64 = vector.broadcast %44 : vector<8x1xf32> to vector<8x128xf32>
    %65 = arith.mulf %64, %41 : vector<8x128xf32>
    %66 = arith.addf %63, %65 : vector<8x128xf32>
    %c0_27 = arith.constant 0 : index
    %c0_28 = arith.constant 0 : index
    %67 = vector.load %arg8[%c0_27, %c0_28] : memref<8x128xf32, #tpu.memory_space<vmem>>, vector<8x128xf32>
    tpu.vector_store %arg8[%c0_27, %c0_28], %66 {strides = array<i32>} : memref<8x128xf32, #tpu.memory_space<vmem>>, vector<8x128xf32>,
    %c1_i32 = arith.constant 1 : i32
    %c2_i32_29 = arith.constant 2 : i32
    %68 = arith.muli %c2_i32_29, %c1_i32 : i32
    %c7_i32_30 = arith.constant 7 : i32
    %69 = arith.subi %c7_i32_30, %68 : i32
    %70 = arith.muli %arg0, %69 : i32
    %71 = arith.addi %c1_i32, %70 : i32
    %72 = arith.index_cast %71 : i32 to index
    %c0_31 = arith.constant 0 : index
    %c0_32 = arith.constant 0 : index
    %73 = vector.load %arg2[%72, %c0_31, %c0_32] : memref<8x8x512xf32, #tpu.memory_space<vmem>>, vector<1x8x512xf32>
    %74 = vector.shape_cast %73 : vector<1x8x512xf32> to vector<8x512xf32>
    %c0_33 = arith.constant 0 : index
    %c0_34 = arith.constant 0 : index
    %75 = vector.load %arg6[%c0_33, %c0_34] : memref<8x128xf32, #tpu.memory_space<vmem>>, vector<8x128xf32>
    %76 = arith.truncf %75 : vector<8x128xf32> to vector<8x128xbf16>
    %cst_35 = arith.constant dense<0.000000e+00> : vector<8x512xf32>
    %77 = tpu.matmul %76, %4, %cst_35 {dimension_numbers = #tpu.dot_dimension_numbers<[1], [0], [0], [1], [0, 0, 1, 1], [], []>} : vector<8x128xbf16>, vector<128x512xbf16>, vector<8x512xf32> -> vector<8x512xf32>
    %78 = arith.addf %74, %77 : vector<8x512xf32>
    %79 = vector.extract_strided_slice %78 {offsets = [0, 0], sizes = [8, 128], strides = [1, 1]} : vector<8x512xf32> to vector<8x128xf32>
    %80 = arith.negf %79 : vector<8x128xf32>
    %81 = math.exp %80 : vector<8x128xf32>
    %cst_36 = arith.constant 1.000000e+00 : f32
    %82 = vector.broadcast %cst_36 : f32 to vector<8x128xf32>
    %83 = arith.addf %82, %81 : vector<8x128xf32>
    %84 = arith.divf %82, %83 : vector<8x128xf32>
    %85 = vector.extract_strided_slice %78 {offsets = [0, 128], sizes = [8, 128], strides = [1, 1]} : vector<8x512xf32> to vector<8x128xf32>
    %86 = arith.negf %85 : vector<8x128xf32>
    %87 = math.exp %86 : vector<8x128xf32>
    %cst_37 = arith.constant 1.000000e+00 : f32
    %88 = vector.broadcast %cst_37 : f32 to vector<8x128xf32>
    %89 = arith.addf %88, %87 : vector<8x128xf32>
    %90 = arith.divf %88, %89 : vector<8x128xf32>
    %91 = vector.extract_strided_slice %78 {offsets = [0, 256], sizes = [8, 128], strides = [1, 1]} : vector<8x512xf32> to vector<8x128xf32>
    %92 = math.tanh %91 : vector<8x128xf32>
    %93 = vector.extract_strided_slice %78 {offsets = [0, 384], sizes = [8, 128], strides = [1, 1]} : vector<8x512xf32> to vector<8x128xf32>
    %94 = arith.negf %93 : vector<8x128xf32>
    %95 = math.exp %94 : vector<8x128xf32>
    %cst_38 = arith.constant 1.000000e+00 : f32
    %96 = vector.broadcast %cst_38 : f32 to vector<8x128xf32>
    %97 = arith.addf %96, %95 : vector<8x128xf32>
    %98 = arith.divf %96, %97 : vector<8x128xf32>
    %c0_39 = arith.constant 0 : index
    %c0_40 = arith.constant 0 : index
    %99 = vector.load %arg7[%c0_39, %c0_40] : memref<8x128xf32, #tpu.memory_space<vmem>>, vector<8x128xf32>
    %100 = arith.mulf %90, %99 : vector<8x128xf32>
    %101 = arith.mulf %84, %92 : vector<8x128xf32>
    %102 = arith.addf %100, %101 : vector<8x128xf32>
    %103 = math.tanh %102 : vector<8x128xf32>
    %104 = arith.mulf %98, %103 : vector<8x128xf32>
    %105 = arith.index_cast %71 : i32 to index
    %c0_41 = arith.constant 0 : index
    %c0_42 = arith.constant 0 : index
    %106 = vector.load %arg4[%105, %c0_41, %c0_42] : memref<8x8x1xf32, #tpu.memory_space<vmem>>, vector<1x8x1xf32>
    %107 = vector.shape_cast %106 : vector<1x8x1xf32> to vector<8x1xf32>
    %108 = vector.broadcast %107 : vector<8x1xf32> to vector<8x128xf32>
    %109 = arith.mulf %108, %102 : vector<8x128xf32>
    %cst_43 = arith.constant 1.000000e+00 : f32
    %110 = vector.broadcast %cst_43 : f32 to vector<8x1xf32>
    %111 = arith.subf %110, %107 : vector<8x1xf32>
    %c0_44 = arith.constant 0 : index
    %c0_45 = arith.constant 0 : index
    %112 = vector.load %arg7[%c0_44, %c0_45] : memref<8x128xf32, #tpu.memory_space<vmem>>, vector<8x128xf32>
    %113 = vector.broadcast %111 : vector<8x1xf32> to vector<8x128xf32>
    %114 = arith.mulf %113, %112 : vector<8x128xf32>
    %115 = arith.addf %109, %114 : vector<8x128xf32>
    %c0_46 = arith.constant 0 : index
    %c0_47 = arith.constant 0 : index
    %116 = vector.load %arg7[%c0_46, %c0_47] : memref<8x128xf32, #tpu.memory_space<vmem>>, vector<8x128xf32>
    tpu.vector_store %arg7[%c0_46, %c0_47], %115 {strides = array<i32>} : memref<8x128xf32, #tpu.memory_space<vmem>>, vector<8x128xf32>,
    %117 = vector.broadcast %107 : vector<8x1xf32> to vector<8x128xf32>
    %118 = arith.mulf %117, %104 : vector<8x128xf32>
    %cst_48 = arith.constant 1.000000e+00 : f32
    %119 = vector.broadcast %cst_48 : f32 to vector<8x1xf32>
    %120 = arith.subf %119, %107 : vector<8x1xf32>
    %c0_49 = arith.constant 0 : index
    %c0_50 = arith.constant 0 : index
    %121 = vector.load %arg6[%c0_49, %c0_50] : memref<8x128xf32, #tpu.memory_space<vmem>>, vector<8x128xf32>
    %122 = vector.broadcast %120 : vector<8x1xf32> to vector<8x128xf32>
    %123 = arith.mulf %122, %121 : vector<8x128xf32>
    %124 = arith.addf %118, %123 : vector<8x128xf32>
    %c0_51 = arith.constant 0 : index
    %c0_52 = arith.constant 0 : index
    %125 = vector.load %arg6[%c0_51, %c0_52] : memref<8x128xf32, #tpu.memory_space<vmem>>, vector<8x128xf32>
    tpu.vector_store %arg6[%c0_51, %c0_52], %124 {strides = array<i32>} : memref<8x128xf32, #tpu.memory_space<vmem>>, vector<8x128xf32>,
    %c0_53 = arith.constant 0 : index
    %c0_54 = arith.constant 0 : index
    %126 = vector.load %arg8[%c0_53, %c0_54] : memref<8x128xf32, #tpu.memory_space<vmem>>, vector<8x128xf32>
    %127 = vector.broadcast %107 : vector<8x1xf32> to vector<8x128xf32>
    %128 = arith.mulf %127, %104 : vector<8x128xf32>
    %129 = arith.addf %126, %128 : vector<8x128xf32>
    %c0_55 = arith.constant 0 : index
    %c0_56 = arith.constant 0 : index
    %130 = vector.load %arg8[%c0_55, %c0_56] : memref<8x128xf32, #tpu.memory_space<vmem>>, vector<8x128xf32>
    tpu.vector_store %arg8[%c0_55, %c0_56], %129 {strides = array<i32>} : memref<8x128xf32, #tpu.memory_space<vmem>>, vector<8x128xf32>,
    %c2_i32_57 = arith.constant 2 : i32
    %c2_i32_58 = arith.constant 2 : i32
    %131 = arith.muli %c2_i32_58, %c2_i32_57 : i32
    %c7_i32_59 = arith.constant 7 : i32
    %132 = arith.subi %c7_i32_59, %131 : i32
    %133 = arith.muli %arg0, %132 : i32
    %134 = arith.addi %c2_i32_57, %133 : i32
    %135 = arith.index_cast %134 : i32 to index
    %c0_60 = arith.constant 0 : index
    %c0_61 = arith.constant 0 : index
    %136 = vector.load %arg2[%135, %c0_60, %c0_61] : memref<8x8x512xf32, #tpu.memory_space<vmem>>, vector<1x8x512xf32>
    %137 = vector.shape_cast %136 : vector<1x8x512xf32> to vector<8x512xf32>
    %c0_62 = arith.constant 0 : index
    %c0_63 = arith.constant 0 : index
    %138 = vector.load %arg6[%c0_62, %c0_63] : memref<8x128xf32, #tpu.memory_space<vmem>>, vector<8x128xf32>
    %139 = arith.truncf %138 : vector<8x128xf32> to vector<8x128xbf16>
    %cst_64 = arith.constant dense<0.000000e+00> : vector<8x512xf32>
    %140 = tpu.matmul %139, %4, %cst_64 {dimension_numbers = #tpu.dot_dimension_numbers<[1], [0], [0], [1], [0, 0, 1, 1], [], []>} : vector<8x128xbf16>, vector<128x512xbf16>, vector<8x512xf32> -> vector<8x512xf32>
    %141 = arith.addf %137, %140 : vector<8x512xf32>
    %142 = vector.extract_strided_slice %141 {offsets = [0, 0], sizes = [8, 128], strides = [1, 1]} : vector<8x512xf32> to vector<8x128xf32>
    %143 = arith.negf %142 : vector<8x128xf32>
    %144 = math.exp %143 : vector<8x128xf32>
    %cst_65 = arith.constant 1.000000e+00 : f32
    %145 = vector.broadcast %cst_65 : f32 to vector<8x128xf32>
    %146 = arith.addf %145, %144 : vector<8x128xf32>
    %147 = arith.divf %145, %146 : vector<8x128xf32>
    %148 = vector.extract_strided_slice %141 {offsets = [0, 128], sizes = [8, 128], strides = [1, 1]} : vector<8x512xf32> to vector<8x128xf32>
    %149 = arith.negf %148 : vector<8x128xf32>
    %150 = math.exp %149 : vector<8x128xf32>
    %cst_66 = arith.constant 1.000000e+00 : f32
    %151 = vector.broadcast %cst_66 : f32 to vector<8x128xf32>
    %152 = arith.addf %151, %150 : vector<8x128xf32>
    %153 = arith.divf %151, %152 : vector<8x128xf32>
    %154 = vector.extract_strided_slice %141 {offsets = [0, 256], sizes = [8, 128], strides = [1, 1]} : vector<8x512xf32> to vector<8x128xf32>
    %155 = math.tanh %154 : vector<8x128xf32>
    %156 = vector.extract_strided_slice %141 {offsets = [0, 384], sizes = [8, 128], strides = [1, 1]} : vector<8x512xf32> to vector<8x128xf32>
    %157 = arith.negf %156 : vector<8x128xf32>
    %158 = math.exp %157 : vector<8x128xf32>
    %cst_67 = arith.constant 1.000000e+00 : f32
    %159 = vector.broadcast %cst_67 : f32 to vector<8x128xf32>
    %160 = arith.addf %159, %158 : vector<8x128xf32>
    %161 = arith.divf %159, %160 : vector<8x128xf32>
    %c0_68 = arith.constant 0 : index
    %c0_69 = arith.constant 0 : index
    %162 = vector.load %arg7[%c0_68, %c0_69] : memref<8x128xf32, #tpu.memory_space<vmem>>, vector<8x128xf32>
    %163 = arith.mulf %153, %162 : vector<8x128xf32>
    %164 = arith.mulf %147, %155 : vector<8x128xf32>
    %165 = arith.addf %163, %164 : vector<8x128xf32>
    %166 = math.tanh %165 : vector<8x128xf32>
    %167 = arith.mulf %161, %166 : vector<8x128xf32>
    %168 = arith.index_cast %134 : i32 to index
    %c0_70 = arith.constant 0 : index
    %c0_71 = arith.constant 0 : index
    %169 = vector.load %arg4[%168, %c0_70, %c0_71] : memref<8x8x1xf32, #tpu.memory_space<vmem>>, vector<1x8x1xf32>
    %170 = vector.shape_cast %169 : vector<1x8x1xf32> to vector<8x1xf32>
    %171 = vector.broadcast %170 : vector<8x1xf32> to vector<8x128xf32>
    %172 = arith.mulf %171, %165 : vector<8x128xf32>
    %cst_72 = arith.constant 1.000000e+00 : f32
    %173 = vector.broadcast %cst_72 : f32 to vector<8x1xf32>
    %174 = arith.subf %173, %170 : vector<8x1xf32>
    %c0_73 = arith.constant 0 : index
    %c0_74 = arith.constant 0 : index
    %175 = vector.load %arg7[%c0_73, %c0_74] : memref<8x128xf32, #tpu.memory_space<vmem>>, vector<8x128xf32>
    %176 = vector.broadcast %174 : vector<8x1xf32> to vector<8x128xf32>
    %177 = arith.mulf %176, %175 : vector<8x128xf32>
    %178 = arith.addf %172, %177 : vector<8x128xf32>
    %c0_75 = arith.constant 0 : index
    %c0_76 = arith.constant 0 : index
    %179 = vector.load %arg7[%c0_75, %c0_76] : memref<8x128xf32, #tpu.memory_space<vmem>>, vector<8x128xf32>
    tpu.vector_store %arg7[%c0_75, %c0_76], %178 {strides = array<i32>} : memref<8x128xf32, #tpu.memory_space<vmem>>, vector<8x128xf32>,
    %180 = vector.broadcast %170 : vector<8x1xf32> to vector<8x128xf32>
    %181 = arith.mulf %180, %167 : vector<8x128xf32>
    %cst_77 = arith.constant 1.000000e+00 : f32
    %182 = vector.broadcast %cst_77 : f32 to vector<8x1xf32>
    %183 = arith.subf %182, %170 : vector<8x1xf32>
    %c0_78 = arith.constant 0 : index
    %c0_79 = arith.constant 0 : index
    %184 = vector.load %arg6[%c0_78, %c0_79] : memref<8x128xf32, #tpu.memory_space<vmem>>, vector<8x128xf32>
    %185 = vector.broadcast %183 : vector<8x1xf32> to vector<8x128xf32>
    %186 = arith.mulf %185, %184 : vector<8x128xf32>
    %187 = arith.addf %181, %186 : vector<8x128xf32>
    %c0_80 = arith.constant 0 : index
    %c0_81 = arith.constant 0 : index
    %188 = vector.load %arg6[%c0_80, %c0_81] : memref<8x128xf32, #tpu.memory_space<vmem>>, vector<8x128xf32>
    tpu.vector_store %arg6[%c0_80, %c0_81], %187 {strides = array<i32>} : memref<8x128xf32, #tpu.memory_space<vmem>>, vector<8x128xf32>,
    %c0_82 = arith.constant 0 : index
    %c0_83 = arith.constant 0 : index
    %189 = vector.load %arg8[%c0_82, %c0_83] : memref<8x128xf32, #tpu.memory_space<vmem>>, vector<8x128xf32>
    %190 = vector.broadcast %170 : vector<8x1xf32> to vector<8x128xf32>
    %191 = arith.mulf %190, %167 : vector<8x128xf32>
    %192 = arith.addf %189, %191 : vector<8x128xf32>
    %c0_84 = arith.constant 0 : index
    %c0_85 = arith.constant 0 : index
    %193 = vector.load %arg8[%c0_84, %c0_85] : memref<8x128xf32, #tpu.memory_space<vmem>>, vector<8x128xf32>
    tpu.vector_store %arg8[%c0_84, %c0_85], %192 {strides = array<i32>} : memref<8x128xf32, #tpu.memory_space<vmem>>, vector<8x128xf32>,
    %c3_i32 = arith.constant 3 : i32
    %c2_i32_86 = arith.constant 2 : i32
    %194 = arith.muli %c2_i32_86, %c3_i32 : i32
    %c7_i32_87 = arith.constant 7 : i32
    %195 = arith.subi %c7_i32_87, %194 : i32
    %196 = arith.muli %arg0, %195 : i32
    %197 = arith.addi %c3_i32, %196 : i32
    %198 = arith.index_cast %197 : i32 to index
    %c0_88 = arith.constant 0 : index
    %c0_89 = arith.constant 0 : index
    %199 = vector.load %arg2[%198, %c0_88, %c0_89] : memref<8x8x512xf32, #tpu.memory_space<vmem>>, vector<1x8x512xf32>
    %200 = vector.shape_cast %199 : vector<1x8x512xf32> to vector<8x512xf32>
    %c0_90 = arith.constant 0 : index
    %c0_91 = arith.constant 0 : index
    %201 = vector.load %arg6[%c0_90, %c0_91] : memref<8x128xf32, #tpu.memory_space<vmem>>, vector<8x128xf32>
    %202 = arith.truncf %201 : vector<8x128xf32> to vector<8x128xbf16>
    %cst_92 = arith.constant dense<0.000000e+00> : vector<8x512xf32>
    %203 = tpu.matmul %202, %4, %cst_92 {dimension_numbers = #tpu.dot_dimension_numbers<[1], [0], [0], [1], [0, 0, 1, 1], [], []>} : vector<8x128xbf16>, vector<128x512xbf16>, vector<8x512xf32> -> vector<8x512xf32>
    %204 = arith.addf %200, %203 : vector<8x512xf32>
    %205 = vector.extract_strided_slice %204 {offsets = [0, 0], sizes = [8, 128], strides = [1, 1]} : vector<8x512xf32> to vector<8x128xf32>
    %206 = arith.negf %205 : vector<8x128xf32>
    %207 = math.exp %206 : vector<8x128xf32>
    %cst_93 = arith.constant 1.000000e+00 : f32
    %208 = vector.broadcast %cst_93 : f32 to vector<8x128xf32>
    %209 = arith.addf %208, %207 : vector<8x128xf32>
    %210 = arith.divf %208, %209 : vector<8x128xf32>
    %211 = vector.extract_strided_slice %204 {offsets = [0, 128], sizes = [8, 128], strides = [1, 1]} : vector<8x512xf32> to vector<8x128xf32>
    %212 = arith.negf %211 : vector<8x128xf32>
    %213 = math.exp %212 : vector<8x128xf32>
    %cst_94 = arith.constant 1.000000e+00 : f32
    %214 = vector.broadcast %cst_94 : f32 to vector<8x128xf32>
    %215 = arith.addf %214, %213 : vector<8x128xf32>
    %216 = arith.divf %214, %215 : vector<8x128xf32>
    %217 = vector.extract_strided_slice %204 {offsets = [0, 256], sizes = [8, 128], strides = [1, 1]} : vector<8x512xf32> to vector<8x128xf32>
    %218 = math.tanh %217 : vector<8x128xf32>
    %219 = vector.extract_strided_slice %204 {offsets = [0, 384], sizes = [8, 128], strides = [1, 1]} : vector<8x512xf32> to vector<8x128xf32>
    %220 = arith.negf %219 : vector<8x128xf32>
    %221 = math.exp %220 : vector<8x128xf32>
    %cst_95 = arith.constant 1.000000e+00 : f32
    %222 = vector.broadcast %cst_95 : f32 to vector<8x128xf32>
    %223 = arith.addf %222, %221 : vector<8x128xf32>
    %224 = arith.divf %222, %223 : vector<8x128xf32>
    %c0_96 = arith.constant 0 : index
    %c0_97 = arith.constant 0 : index
    %225 = vector.load %arg7[%c0_96, %c0_97] : memref<8x128xf32, #tpu.memory_space<vmem>>, vector<8x128xf32>
    %226 = arith.mulf %216, %225 : vector<8x128xf32>
    %227 = arith.mulf %210, %218 : vector<8x128xf32>
    %228 = arith.addf %226, %227 : vector<8x128xf32>
    %229 = math.tanh %228 : vector<8x128xf32>
    %230 = arith.mulf %224, %229 : vector<8x128xf32>
    %231 = arith.index_cast %197 : i32 to index
    %c0_98 = arith.constant 0 : index
    %c0_99 = arith.constant 0 : index
    %232 = vector.load %arg4[%231, %c0_98, %c0_99] : memref<8x8x1xf32, #tpu.memory_space<vmem>>, vector<1x8x1xf32>
    %233 = vector.shape_cast %232 : vector<1x8x1xf32> to vector<8x1xf32>
    %234 = vector.broadcast %233 : vector<8x1xf32> to vector<8x128xf32>
    %235 = arith.mulf %234, %228 : vector<8x128xf32>
    %cst_100 = arith.constant 1.000000e+00 : f32
    %236 = vector.broadcast %cst_100 : f32 to vector<8x1xf32>
    %237 = arith.subf %236, %233 : vector<8x1xf32>
    %c0_101 = arith.constant 0 : index
    %c0_102 = arith.constant 0 : index
    %238 = vector.load %arg7[%c0_101, %c0_102] : memref<8x128xf32, #tpu.memory_space<vmem>>, vector<8x128xf32>
    %239 = vector.broadcast %237 : vector<8x1xf32> to vector<8x128xf32>
    %240 = arith.mulf %239, %238 : vector<8x128xf32>
    %241 = arith.addf %235, %240 : vector<8x128xf32>
    %c0_103 = arith.constant 0 : index
    %c0_104 = arith.constant 0 : index
    %242 = vector.load %arg7[%c0_103, %c0_104] : memref<8x128xf32, #tpu.memory_space<vmem>>, vector<8x128xf32>
    tpu.vector_store %arg7[%c0_103, %c0_104], %241 {strides = array<i32>} : memref<8x128xf32, #tpu.memory_space<vmem>>, vector<8x128xf32>,
    %243 = vector.broadcast %233 : vector<8x1xf32> to vector<8x128xf32>
    %244 = arith.mulf %243, %230 : vector<8x128xf32>
    %cst_105 = arith.constant 1.000000e+00 : f32
    %245 = vector.broadcast %cst_105 : f32 to vector<8x1xf32>
    %246 = arith.subf %245, %233 : vector<8x1xf32>
    %c0_106 = arith.constant 0 : index
    %c0_107 = arith.constant 0 : index
    %247 = vector.load %arg6[%c0_106, %c0_107] : memref<8x128xf32, #tpu.memory_space<vmem>>, vector<8x128xf32>
    %248 = vector.broadcast %246 : vector<8x1xf32> to vector<8x128xf32>
    %249 = arith.mulf %248, %247 : vector<8x128xf32>
    %250 = arith.addf %244, %249 : vector<8x128xf32>
    %c0_108 = arith.constant 0 : index
    %c0_109 = arith.constant 0 : index
    %251 = vector.load %arg6[%c0_108, %c0_109] : memref<8x128xf32, #tpu.memory_space<vmem>>, vector<8x128xf32>
    tpu.vector_store %arg6[%c0_108, %c0_109], %250 {strides = array<i32>} : memref<8x128xf32, #tpu.memory_space<vmem>>, vector<8x128xf32>,
    %c0_110 = arith.constant 0 : index
    %c0_111 = arith.constant 0 : index
    %252 = vector.load %arg8[%c0_110, %c0_111] : memref<8x128xf32, #tpu.memory_space<vmem>>, vector<8x128xf32>
    %253 = vector.broadcast %233 : vector<8x1xf32> to vector<8x128xf32>
    %254 = arith.mulf %253, %230 : vector<8x128xf32>
    %255 = arith.addf %252, %254 : vector<8x128xf32>
    %c0_112 = arith.constant 0 : index
    %c0_113 = arith.constant 0 : index
    %256 = vector.load %arg8[%c0_112, %c0_113] : memref<8x128xf32, #tpu.memory_space<vmem>>, vector<8x128xf32>
    tpu.vector_store %arg8[%c0_112, %c0_113], %255 {strides = array<i32>} : memref<8x128xf32, #tpu.memory_space<vmem>>, vector<8x128xf32>,
    %c4_i32 = arith.constant 4 : i32
    %c2_i32_114 = arith.constant 2 : i32
    %257 = arith.muli %c2_i32_114, %c4_i32 : i32
    %c7_i32_115 = arith.constant 7 : i32
    %258 = arith.subi %c7_i32_115, %257 : i32
    %259 = arith.muli %arg0, %258 : i32
    %260 = arith.addi %c4_i32, %259 : i32
    %261 = arith.index_cast %260 : i32 to index
    %c0_116 = arith.constant 0 : index
    %c0_117 = arith.constant 0 : index
    %262 = vector.load %arg2[%261, %c0_116, %c0_117] : memref<8x8x512xf32, #tpu.memory_space<vmem>>, vector<1x8x512xf32>
    %263 = vector.shape_cast %262 : vector<1x8x512xf32> to vector<8x512xf32>
    %c0_118 = arith.constant 0 : index
    %c0_119 = arith.constant 0 : index
    %264 = vector.load %arg6[%c0_118, %c0_119] : memref<8x128xf32, #tpu.memory_space<vmem>>, vector<8x128xf32>
    %265 = arith.truncf %264 : vector<8x128xf32> to vector<8x128xbf16>
    %cst_120 = arith.constant dense<0.000000e+00> : vector<8x512xf32>
    %266 = tpu.matmul %265, %4, %cst_120 {dimension_numbers = #tpu.dot_dimension_numbers<[1], [0], [0], [1], [0, 0, 1, 1], [], []>} : vector<8x128xbf16>, vector<128x512xbf16>, vector<8x512xf32> -> vector<8x512xf32>
    %267 = arith.addf %263, %266 : vector<8x512xf32>
    %268 = vector.extract_strided_slice %267 {offsets = [0, 0], sizes = [8, 128], strides = [1, 1]} : vector<8x512xf32> to vector<8x128xf32>
    %269 = arith.negf %268 : vector<8x128xf32>
    %270 = math.exp %269 : vector<8x128xf32>
    %cst_121 = arith.constant 1.000000e+00 : f32
    %271 = vector.broadcast %cst_121 : f32 to vector<8x128xf32>
    %272 = arith.addf %271, %270 : vector<8x128xf32>
    %273 = arith.divf %271, %272 : vector<8x128xf32>
    %274 = vector.extract_strided_slice %267 {offsets = [0, 128], sizes = [8, 128], strides = [1, 1]} : vector<8x512xf32> to vector<8x128xf32>
    %275 = arith.negf %274 : vector<8x128xf32>
    %276 = math.exp %275 : vector<8x128xf32>
    %cst_122 = arith.constant 1.000000e+00 : f32
    %277 = vector.broadcast %cst_122 : f32 to vector<8x128xf32>
    %278 = arith.addf %277, %276 : vector<8x128xf32>
    %279 = arith.divf %277, %278 : vector<8x128xf32>
    %280 = vector.extract_strided_slice %267 {offsets = [0, 256], sizes = [8, 128], strides = [1, 1]} : vector<8x512xf32> to vector<8x128xf32>
    %281 = math.tanh %280 : vector<8x128xf32>
    %282 = vector.extract_strided_slice %267 {offsets = [0, 384], sizes = [8, 128], strides = [1, 1]} : vector<8x512xf32> to vector<8x128xf32>
    %283 = arith.negf %282 : vector<8x128xf32>
    %284 = math.exp %283 : vector<8x128xf32>
    %cst_123 = arith.constant 1.000000e+00 : f32
    %285 = vector.broadcast %cst_123 : f32 to vector<8x128xf32>
    %286 = arith.addf %285, %284 : vector<8x128xf32>
    %287 = arith.divf %285, %286 : vector<8x128xf32>
    %c0_124 = arith.constant 0 : index
    %c0_125 = arith.constant 0 : index
    %288 = vector.load %arg7[%c0_124, %c0_125] : memref<8x128xf32, #tpu.memory_space<vmem>>, vector<8x128xf32>
    %289 = arith.mulf %279, %288 : vector<8x128xf32>
    %290 = arith.mulf %273, %281 : vector<8x128xf32>
    %291 = arith.addf %289, %290 : vector<8x128xf32>
    %292 = math.tanh %291 : vector<8x128xf32>
    %293 = arith.mulf %287, %292 : vector<8x128xf32>
    %294 = arith.index_cast %260 : i32 to index
    %c0_126 = arith.constant 0 : index
    %c0_127 = arith.constant 0 : index
    %295 = vector.load %arg4[%294, %c0_126, %c0_127] : memref<8x8x1xf32, #tpu.memory_space<vmem>>, vector<1x8x1xf32>
    %296 = vector.shape_cast %295 : vector<1x8x1xf32> to vector<8x1xf32>
    %297 = vector.broadcast %296 : vector<8x1xf32> to vector<8x128xf32>
    %298 = arith.mulf %297, %291 : vector<8x128xf32>
    %cst_128 = arith.constant 1.000000e+00 : f32
    %299 = vector.broadcast %cst_128 : f32 to vector<8x1xf32>
    %300 = arith.subf %299, %296 : vector<8x1xf32>
    %c0_129 = arith.constant 0 : index
    %c0_130 = arith.constant 0 : index
    %301 = vector.load %arg7[%c0_129, %c0_130] : memref<8x128xf32, #tpu.memory_space<vmem>>, vector<8x128xf32>
    %302 = vector.broadcast %300 : vector<8x1xf32> to vector<8x128xf32>
    %303 = arith.mulf %302, %301 : vector<8x128xf32>
    %304 = arith.addf %298, %303 : vector<8x128xf32>
    %c0_131 = arith.constant 0 : index
    %c0_132 = arith.constant 0 : index
    %305 = vector.load %arg7[%c0_131, %c0_132] : memref<8x128xf32, #tpu.memory_space<vmem>>, vector<8x128xf32>
    tpu.vector_store %arg7[%c0_131, %c0_132], %304 {strides = array<i32>} : memref<8x128xf32, #tpu.memory_space<vmem>>, vector<8x128xf32>,
    %306 = vector.broadcast %296 : vector<8x1xf32> to vector<8x128xf32>
    %307 = arith.mulf %306, %293 : vector<8x128xf32>
    %cst_133 = arith.constant 1.000000e+00 : f32
    %308 = vector.broadcast %cst_133 : f32 to vector<8x1xf32>
    %309 = arith.subf %308, %296 : vector<8x1xf32>
    %c0_134 = arith.constant 0 : index
    %c0_135 = arith.constant 0 : index
    %310 = vector.load %arg6[%c0_134, %c0_135] : memref<8x128xf32, #tpu.memory_space<vmem>>, vector<8x128xf32>
    %311 = vector.broadcast %309 : vector<8x1xf32> to vector<8x128xf32>
    %312 = arith.mulf %311, %310 : vector<8x128xf32>
    %313 = arith.addf %307, %312 : vector<8x128xf32>
    %c0_136 = arith.constant 0 : index
    %c0_137 = arith.constant 0 : index
    %314 = vector.load %arg6[%c0_136, %c0_137] : memref<8x128xf32, #tpu.memory_space<vmem>>, vector<8x128xf32>
    tpu.vector_store %arg6[%c0_136, %c0_137], %313 {strides = array<i32>} : memref<8x128xf32, #tpu.memory_space<vmem>>, vector<8x128xf32>,
    %c0_138 = arith.constant 0 : index
    %c0_139 = arith.constant 0 : index
    %315 = vector.load %arg8[%c0_138, %c0_139] : memref<8x128xf32, #tpu.memory_space<vmem>>, vector<8x128xf32>
    %316 = vector.broadcast %296 : vector<8x1xf32> to vector<8x128xf32>
    %317 = arith.mulf %316, %293 : vector<8x128xf32>
    %318 = arith.addf %315, %317 : vector<8x128xf32>
    %c0_140 = arith.constant 0 : index
    %c0_141 = arith.constant 0 : index
    %319 = vector.load %arg8[%c0_140, %c0_141] : memref<8x128xf32, #tpu.memory_space<vmem>>, vector<8x128xf32>
    tpu.vector_store %arg8[%c0_140, %c0_141], %318 {strides = array<i32>} : memref<8x128xf32, #tpu.memory_space<vmem>>, vector<8x128xf32>,
    %c5_i32 = arith.constant 5 : i32
    %c2_i32_142 = arith.constant 2 : i32
    %320 = arith.muli %c2_i32_142, %c5_i32 : i32
    %c7_i32_143 = arith.constant 7 : i32
    %321 = arith.subi %c7_i32_143, %320 : i32
    %322 = arith.muli %arg0, %321 : i32
    %323 = arith.addi %c5_i32, %322 : i32
    %324 = arith.index_cast %323 : i32 to index
    %c0_144 = arith.constant 0 : index
    %c0_145 = arith.constant 0 : index
    %325 = vector.load %arg2[%324, %c0_144, %c0_145] : memref<8x8x512xf32, #tpu.memory_space<vmem>>, vector<1x8x512xf32>
    %326 = vector.shape_cast %325 : vector<1x8x512xf32> to vector<8x512xf32>
    %c0_146 = arith.constant 0 : index
    %c0_147 = arith.constant 0 : index
    %327 = vector.load %arg6[%c0_146, %c0_147] : memref<8x128xf32, #tpu.memory_space<vmem>>, vector<8x128xf32>
    %328 = arith.truncf %327 : vector<8x128xf32> to vector<8x128xbf16>
    %cst_148 = arith.constant dense<0.000000e+00> : vector<8x512xf32>
    %329 = tpu.matmul %328, %4, %cst_148 {dimension_numbers = #tpu.dot_dimension_numbers<[1], [0], [0], [1], [0, 0, 1, 1], [], []>} : vector<8x128xbf16>, vector<128x512xbf16>, vector<8x512xf32> -> vector<8x512xf32>
    %330 = arith.addf %326, %329 : vector<8x512xf32>
    %331 = vector.extract_strided_slice %330 {offsets = [0, 0], sizes = [8, 128], strides = [1, 1]} : vector<8x512xf32> to vector<8x128xf32>
    %332 = arith.negf %331 : vector<8x128xf32>
    %333 = math.exp %332 : vector<8x128xf32>
    %cst_149 = arith.constant 1.000000e+00 : f32
    %334 = vector.broadcast %cst_149 : f32 to vector<8x128xf32>
    %335 = arith.addf %334, %333 : vector<8x128xf32>
    %336 = arith.divf %334, %335 : vector<8x128xf32>
    %337 = vector.extract_strided_slice %330 {offsets = [0, 128], sizes = [8, 128], strides = [1, 1]} : vector<8x512xf32> to vector<8x128xf32>
    %338 = arith.negf %337 : vector<8x128xf32>
    %339 = math.exp %338 : vector<8x128xf32>
    %cst_150 = arith.constant 1.000000e+00 : f32
    %340 = vector.broadcast %cst_150 : f32 to vector<8x128xf32>
    %341 = arith.addf %340, %339 : vector<8x128xf32>
    %342 = arith.divf %340, %341 : vector<8x128xf32>
    %343 = vector.extract_strided_slice %330 {offsets = [0, 256], sizes = [8, 128], strides = [1, 1]} : vector<8x512xf32> to vector<8x128xf32>
    %344 = math.tanh %343 : vector<8x128xf32>
    %345 = vector.extract_strided_slice %330 {offsets = [0, 384], sizes = [8, 128], strides = [1, 1]} : vector<8x512xf32> to vector<8x128xf32>
    %346 = arith.negf %345 : vector<8x128xf32>
    %347 = math.exp %346 : vector<8x128xf32>
    %cst_151 = arith.constant 1.000000e+00 : f32
    %348 = vector.broadcast %cst_151 : f32 to vector<8x128xf32>
    %349 = arith.addf %348, %347 : vector<8x128xf32>
    %350 = arith.divf %348, %349 : vector<8x128xf32>
    %c0_152 = arith.constant 0 : index
    %c0_153 = arith.constant 0 : index
    %351 = vector.load %arg7[%c0_152, %c0_153] : memref<8x128xf32, #tpu.memory_space<vmem>>, vector<8x128xf32>
    %352 = arith.mulf %342, %351 : vector<8x128xf32>
    %353 = arith.mulf %336, %344 : vector<8x128xf32>
    %354 = arith.addf %352, %353 : vector<8x128xf32>
    %355 = math.tanh %354 : vector<8x128xf32>
    %356 = arith.mulf %350, %355 : vector<8x128xf32>
    %357 = arith.index_cast %323 : i32 to index
    %c0_154 = arith.constant 0 : index
    %c0_155 = arith.constant 0 : index
    %358 = vector.load %arg4[%357, %c0_154, %c0_155] : memref<8x8x1xf32, #tpu.memory_space<vmem>>, vector<1x8x1xf32>
    %359 = vector.shape_cast %358 : vector<1x8x1xf32> to vector<8x1xf32>
    %360 = vector.broadcast %359 : vector<8x1xf32> to vector<8x128xf32>
    %361 = arith.mulf %360, %354 : vector<8x128xf32>
    %cst_156 = arith.constant 1.000000e+00 : f32
    %362 = vector.broadcast %cst_156 : f32 to vector<8x1xf32>
    %363 = arith.subf %362, %359 : vector<8x1xf32>
    %c0_157 = arith.constant 0 : index
    %c0_158 = arith.constant 0 : index
    %364 = vector.load %arg7[%c0_157, %c0_158] : memref<8x128xf32, #tpu.memory_space<vmem>>, vector<8x128xf32>
    %365 = vector.broadcast %363 : vector<8x1xf32> to vector<8x128xf32>
    %366 = arith.mulf %365, %364 : vector<8x128xf32>
    %367 = arith.addf %361, %366 : vector<8x128xf32>
    %c0_159 = arith.constant 0 : index
    %c0_160 = arith.constant 0 : index
    %368 = vector.load %arg7[%c0_159, %c0_160] : memref<8x128xf32, #tpu.memory_space<vmem>>, vector<8x128xf32>
    tpu.vector_store %arg7[%c0_159, %c0_160], %367 {strides = array<i32>} : memref<8x128xf32, #tpu.memory_space<vmem>>, vector<8x128xf32>,
    %369 = vector.broadcast %359 : vector<8x1xf32> to vector<8x128xf32>
    %370 = arith.mulf %369, %356 : vector<8x128xf32>
    %cst_161 = arith.constant 1.000000e+00 : f32
    %371 = vector.broadcast %cst_161 : f32 to vector<8x1xf32>
    %372 = arith.subf %371, %359 : vector<8x1xf32>
    %c0_162 = arith.constant 0 : index
    %c0_163 = arith.constant 0 : index
    %373 = vector.load %arg6[%c0_162, %c0_163] : memref<8x128xf32, #tpu.memory_space<vmem>>, vector<8x128xf32>
    %374 = vector.broadcast %372 : vector<8x1xf32> to vector<8x128xf32>
    %375 = arith.mulf %374, %373 : vector<8x128xf32>
    %376 = arith.addf %370, %375 : vector<8x128xf32>
    %c0_164 = arith.constant 0 : index
    %c0_165 = arith.constant 0 : index
    %377 = vector.load %arg6[%c0_164, %c0_165] : memref<8x128xf32, #tpu.memory_space<vmem>>, vector<8x128xf32>
    tpu.vector_store %arg6[%c0_164, %c0_165], %376 {strides = array<i32>} : memref<8x128xf32, #tpu.memory_space<vmem>>, vector<8x128xf32>,
    %c0_166 = arith.constant 0 : index
    %c0_167 = arith.constant 0 : index
    %378 = vector.load %arg8[%c0_166, %c0_167] : memref<8x128xf32, #tpu.memory_space<vmem>>, vector<8x128xf32>
    %379 = vector.broadcast %359 : vector<8x1xf32> to vector<8x128xf32>
    %380 = arith.mulf %379, %356 : vector<8x128xf32>
    %381 = arith.addf %378, %380 : vector<8x128xf32>
    %c0_168 = arith.constant 0 : index
    %c0_169 = arith.constant 0 : index
    %382 = vector.load %arg8[%c0_168, %c0_169] : memref<8x128xf32, #tpu.memory_space<vmem>>, vector<8x128xf32>
    tpu.vector_store %arg8[%c0_168, %c0_169], %381 {strides = array<i32>} : memref<8x128xf32, #tpu.memory_space<vmem>>, vector<8x128xf32>,
    %c6_i32 = arith.constant 6 : i32
    %c2_i32_170 = arith.constant 2 : i32
    %383 = arith.muli %c2_i32_170, %c6_i32 : i32
    %c7_i32_171 = arith.constant 7 : i32
    %384 = arith.subi %c7_i32_171, %383 : i32
    %385 = arith.muli %arg0, %384 : i32
    %386 = arith.addi %c6_i32, %385 : i32
    %387 = arith.index_cast %386 : i32 to index
    %c0_172 = arith.constant 0 : index
    %c0_173 = arith.constant 0 : index
    %388 = vector.load %arg2[%387, %c0_172, %c0_173] : memref<8x8x512xf32, #tpu.memory_space<vmem>>, vector<1x8x512xf32>
    %389 = vector.shape_cast %388 : vector<1x8x512xf32> to vector<8x512xf32>
    %c0_174 = arith.constant 0 : index
    %c0_175 = arith.constant 0 : index
    %390 = vector.load %arg6[%c0_174, %c0_175] : memref<8x128xf32, #tpu.memory_space<vmem>>, vector<8x128xf32>
    %391 = arith.truncf %390 : vector<8x128xf32> to vector<8x128xbf16>
    %cst_176 = arith.constant dense<0.000000e+00> : vector<8x512xf32>
    %392 = tpu.matmul %391, %4, %cst_176 {dimension_numbers = #tpu.dot_dimension_numbers<[1], [0], [0], [1], [0, 0, 1, 1], [], []>} : vector<8x128xbf16>, vector<128x512xbf16>, vector<8x512xf32> -> vector<8x512xf32>
    %393 = arith.addf %389, %392 : vector<8x512xf32>
    %394 = vector.extract_strided_slice %393 {offsets = [0, 0], sizes = [8, 128], strides = [1, 1]} : vector<8x512xf32> to vector<8x128xf32>
    %395 = arith.negf %394 : vector<8x128xf32>
    %396 = math.exp %395 : vector<8x128xf32>
    %cst_177 = arith.constant 1.000000e+00 : f32
    %397 = vector.broadcast %cst_177 : f32 to vector<8x128xf32>
    %398 = arith.addf %397, %396 : vector<8x128xf32>
    %399 = arith.divf %397, %398 : vector<8x128xf32>
    %400 = vector.extract_strided_slice %393 {offsets = [0, 128], sizes = [8, 128], strides = [1, 1]} : vector<8x512xf32> to vector<8x128xf32>
    %401 = arith.negf %400 : vector<8x128xf32>
    %402 = math.exp %401 : vector<8x128xf32>
    %cst_178 = arith.constant 1.000000e+00 : f32
    %403 = vector.broadcast %cst_178 : f32 to vector<8x128xf32>
    %404 = arith.addf %403, %402 : vector<8x128xf32>
    %405 = arith.divf %403, %404 : vector<8x128xf32>
    %406 = vector.extract_strided_slice %393 {offsets = [0, 256], sizes = [8, 128], strides = [1, 1]} : vector<8x512xf32> to vector<8x128xf32>
    %407 = math.tanh %406 : vector<8x128xf32>
    %408 = vector.extract_strided_slice %393 {offsets = [0, 384], sizes = [8, 128], strides = [1, 1]} : vector<8x512xf32> to vector<8x128xf32>
    %409 = arith.negf %408 : vector<8x128xf32>
    %410 = math.exp %409 : vector<8x128xf32>
    %cst_179 = arith.constant 1.000000e+00 : f32
    %411 = vector.broadcast %cst_179 : f32 to vector<8x128xf32>
    %412 = arith.addf %411, %410 : vector<8x128xf32>
    %413 = arith.divf %411, %412 : vector<8x128xf32>
    %c0_180 = arith.constant 0 : index
    %c0_181 = arith.constant 0 : index
    %414 = vector.load %arg7[%c0_180, %c0_181] : memref<8x128xf32, #tpu.memory_space<vmem>>, vector<8x128xf32>
    %415 = arith.mulf %405, %414 : vector<8x128xf32>
    %416 = arith.mulf %399, %407 : vector<8x128xf32>
    %417 = arith.addf %415, %416 : vector<8x128xf32>
    %418 = math.tanh %417 : vector<8x128xf32>
    %419 = arith.mulf %413, %418 : vector<8x128xf32>
    %420 = arith.index_cast %386 : i32 to index
    %c0_182 = arith.constant 0 : index
    %c0_183 = arith.constant 0 : index
    %421 = vector.load %arg4[%420, %c0_182, %c0_183] : memref<8x8x1xf32, #tpu.memory_space<vmem>>, vector<1x8x1xf32>
    %422 = vector.shape_cast %421 : vector<1x8x1xf32> to vector<8x1xf32>
    %423 = vector.broadcast %422 : vector<8x1xf32> to vector<8x128xf32>
    %424 = arith.mulf %423, %417 : vector<8x128xf32>
    %cst_184 = arith.constant 1.000000e+00 : f32
    %425 = vector.broadcast %cst_184 : f32 to vector<8x1xf32>
    %426 = arith.subf %425, %422 : vector<8x1xf32>
    %c0_185 = arith.constant 0 : index
    %c0_186 = arith.constant 0 : index
    %427 = vector.load %arg7[%c0_185, %c0_186] : memref<8x128xf32, #tpu.memory_space<vmem>>, vector<8x128xf32>
    %428 = vector.broadcast %426 : vector<8x1xf32> to vector<8x128xf32>
    %429 = arith.mulf %428, %427 : vector<8x128xf32>
    %430 = arith.addf %424, %429 : vector<8x128xf32>
    %c0_187 = arith.constant 0 : index
    %c0_188 = arith.constant 0 : index
    %431 = vector.load %arg7[%c0_187, %c0_188] : memref<8x128xf32, #tpu.memory_space<vmem>>, vector<8x128xf32>
    tpu.vector_store %arg7[%c0_187, %c0_188], %430 {strides = array<i32>} : memref<8x128xf32, #tpu.memory_space<vmem>>, vector<8x128xf32>,
    %432 = vector.broadcast %422 : vector<8x1xf32> to vector<8x128xf32>
    %433 = arith.mulf %432, %419 : vector<8x128xf32>
    %cst_189 = arith.constant 1.000000e+00 : f32
    %434 = vector.broadcast %cst_189 : f32 to vector<8x1xf32>
    %435 = arith.subf %434, %422 : vector<8x1xf32>
    %c0_190 = arith.constant 0 : index
    %c0_191 = arith.constant 0 : index
    %436 = vector.load %arg6[%c0_190, %c0_191] : memref<8x128xf32, #tpu.memory_space<vmem>>, vector<8x128xf32>
    %437 = vector.broadcast %435 : vector<8x1xf32> to vector<8x128xf32>
    %438 = arith.mulf %437, %436 : vector<8x128xf32>
    %439 = arith.addf %433, %438 : vector<8x128xf32>
    %c0_192 = arith.constant 0 : index
    %c0_193 = arith.constant 0 : index
    %440 = vector.load %arg6[%c0_192, %c0_193] : memref<8x128xf32, #tpu.memory_space<vmem>>, vector<8x128xf32>
    tpu.vector_store %arg6[%c0_192, %c0_193], %439 {strides = array<i32>} : memref<8x128xf32, #tpu.memory_space<vmem>>, vector<8x128xf32>,
    %c0_194 = arith.constant 0 : index
    %c0_195 = arith.constant 0 : index
    %441 = vector.load %arg8[%c0_194, %c0_195] : memref<8x128xf32, #tpu.memory_space<vmem>>, vector<8x128xf32>
    %442 = vector.broadcast %422 : vector<8x1xf32> to vector<8x128xf32>
    %443 = arith.mulf %442, %419 : vector<8x128xf32>
    %444 = arith.addf %441, %443 : vector<8x128xf32>
    %c0_196 = arith.constant 0 : index
    %c0_197 = arith.constant 0 : index
    %445 = vector.load %arg8[%c0_196, %c0_197] : memref<8x128xf32, #tpu.memory_space<vmem>>, vector<8x128xf32>
    tpu.vector_store %arg8[%c0_196, %c0_197], %444 {strides = array<i32>} : memref<8x128xf32, #tpu.memory_space<vmem>>, vector<8x128xf32>,
    %c7_i32_198 = arith.constant 7 : i32
    %c2_i32_199 = arith.constant 2 : i32
    %446 = arith.muli %c2_i32_199, %c7_i32_198 : i32
    %c7_i32_200 = arith.constant 7 : i32
    %447 = arith.subi %c7_i32_200, %446 : i32
    %448 = arith.muli %arg0, %447 : i32
    %449 = arith.addi %c7_i32_198, %448 : i32
    %450 = arith.index_cast %449 : i32 to index
    %c0_201 = arith.constant 0 : index
    %c0_202 = arith.constant 0 : index
    %451 = vector.load %arg2[%450, %c0_201, %c0_202] : memref<8x8x512xf32, #tpu.memory_space<vmem>>, vector<1x8x512xf32>
    %452 = vector.shape_cast %451 : vector<1x8x512xf32> to vector<8x512xf32>
    %c0_203 = arith.constant 0 : index
    %c0_204 = arith.constant 0 : index
    %453 = vector.load %arg6[%c0_203, %c0_204] : memref<8x128xf32, #tpu.memory_space<vmem>>, vector<8x128xf32>
    %454 = arith.truncf %453 : vector<8x128xf32> to vector<8x128xbf16>
    %cst_205 = arith.constant dense<0.000000e+00> : vector<8x512xf32>
    %455 = tpu.matmul %454, %4, %cst_205 {dimension_numbers = #tpu.dot_dimension_numbers<[1], [0], [0], [1], [0, 0, 1, 1], [], []>} : vector<8x128xbf16>, vector<128x512xbf16>, vector<8x512xf32> -> vector<8x512xf32>
    %456 = arith.addf %452, %455 : vector<8x512xf32>
    %457 = vector.extract_strided_slice %456 {offsets = [0, 0], sizes = [8, 128], strides = [1, 1]} : vector<8x512xf32> to vector<8x128xf32>
    %458 = arith.negf %457 : vector<8x128xf32>
    %459 = math.exp %458 : vector<8x128xf32>
    %cst_206 = arith.constant 1.000000e+00 : f32
    %460 = vector.broadcast %cst_206 : f32 to vector<8x128xf32>
    %461 = arith.addf %460, %459 : vector<8x128xf32>
    %462 = arith.divf %460, %461 : vector<8x128xf32>
    %463 = vector.extract_strided_slice %456 {offsets = [0, 128], sizes = [8, 128], strides = [1, 1]} : vector<8x512xf32> to vector<8x128xf32>
    %464 = arith.negf %463 : vector<8x128xf32>
    %465 = math.exp %464 : vector<8x128xf32>
    %cst_207 = arith.constant 1.000000e+00 : f32
    %466 = vector.broadcast %cst_207 : f32 to vector<8x128xf32>
    %467 = arith.addf %466, %465 : vector<8x128xf32>
    %468 = arith.divf %466, %467 : vector<8x128xf32>
    %469 = vector.extract_strided_slice %456 {offsets = [0, 256], sizes = [8, 128], strides = [1, 1]} : vector<8x512xf32> to vector<8x128xf32>
    %470 = math.tanh %469 : vector<8x128xf32>
    %471 = vector.extract_strided_slice %456 {offsets = [0, 384], sizes = [8, 128], strides = [1, 1]} : vector<8x512xf32> to vector<8x128xf32>
    %472 = arith.negf %471 : vector<8x128xf32>
    %473 = math.exp %472 : vector<8x128xf32>
    %cst_208 = arith.constant 1.000000e+00 : f32
    %474 = vector.broadcast %cst_208 : f32 to vector<8x128xf32>
    %475 = arith.addf %474, %473 : vector<8x128xf32>
    %476 = arith.divf %474, %475 : vector<8x128xf32>
    %c0_209 = arith.constant 0 : index
    %c0_210 = arith.constant 0 : index
    %477 = vector.load %arg7[%c0_209, %c0_210] : memref<8x128xf32, #tpu.memory_space<vmem>>, vector<8x128xf32>
    %478 = arith.mulf %468, %477 : vector<8x128xf32>
    %479 = arith.mulf %462, %470 : vector<8x128xf32>
    %480 = arith.addf %478, %479 : vector<8x128xf32>
    %481 = math.tanh %480 : vector<8x128xf32>
    %482 = arith.mulf %476, %481 : vector<8x128xf32>
    %483 = arith.index_cast %449 : i32 to index
    %c0_211 = arith.constant 0 : index
    %c0_212 = arith.constant 0 : index
    %484 = vector.load %arg4[%483, %c0_211, %c0_212] : memref<8x8x1xf32, #tpu.memory_space<vmem>>, vector<1x8x1xf32>
    %485 = vector.shape_cast %484 : vector<1x8x1xf32> to vector<8x1xf32>
    %486 = vector.broadcast %485 : vector<8x1xf32> to vector<8x128xf32>
    %487 = arith.mulf %486, %480 : vector<8x128xf32>
    %cst_213 = arith.constant 1.000000e+00 : f32
    %488 = vector.broadcast %cst_213 : f32 to vector<8x1xf32>
    %489 = arith.subf %488, %485 : vector<8x1xf32>
    %c0_214 = arith.constant 0 : index
    %c0_215 = arith.constant 0 : index
    %490 = vector.load %arg7[%c0_214, %c0_215] : memref<8x128xf32, #tpu.memory_space<vmem>>, vector<8x128xf32>
    %491 = vector.broadcast %489 : vector<8x1xf32> to vector<8x128xf32>
    %492 = arith.mulf %491, %490 : vector<8x128xf32>
    %493 = arith.addf %487, %492 : vector<8x128xf32>
    %c0_216 = arith.constant 0 : index
    %c0_217 = arith.constant 0 : index
    %494 = vector.load %arg7[%c0_216, %c0_217] : memref<8x128xf32, #tpu.memory_space<vmem>>, vector<8x128xf32>
    tpu.vector_store %arg7[%c0_216, %c0_217], %493 {strides = array<i32>} : memref<8x128xf32, #tpu.memory_space<vmem>>, vector<8x128xf32>,
    %495 = vector.broadcast %485 : vector<8x1xf32> to vector<8x128xf32>
    %496 = arith.mulf %495, %482 : vector<8x128xf32>
    %cst_218 = arith.constant 1.000000e+00 : f32
    %497 = vector.broadcast %cst_218 : f32 to vector<8x1xf32>
    %498 = arith.subf %497, %485 : vector<8x1xf32>
    %c0_219 = arith.constant 0 : index
    %c0_220 = arith.constant 0 : index
    %499 = vector.load %arg6[%c0_219, %c0_220] : memref<8x128xf32, #tpu.memory_space<vmem>>, vector<8x128xf32>
    %500 = vector.broadcast %498 : vector<8x1xf32> to vector<8x128xf32>
    %501 = arith.mulf %500, %499 : vector<8x128xf32>
    %502 = arith.addf %496, %501 : vector<8x128xf32>
    %c0_221 = arith.constant 0 : index
    %c0_222 = arith.constant 0 : index
    %503 = vector.load %arg6[%c0_221, %c0_222] : memref<8x128xf32, #tpu.memory_space<vmem>>, vector<8x128xf32>
    tpu.vector_store %arg6[%c0_221, %c0_222], %502 {strides = array<i32>} : memref<8x128xf32, #tpu.memory_space<vmem>>, vector<8x128xf32>,
    %c0_223 = arith.constant 0 : index
    %c0_224 = arith.constant 0 : index
    %504 = vector.load %arg8[%c0_223, %c0_224] : memref<8x128xf32, #tpu.memory_space<vmem>>, vector<8x128xf32>
    %505 = vector.broadcast %485 : vector<8x1xf32> to vector<8x128xf32>
    %506 = arith.mulf %505, %482 : vector<8x128xf32>
    %507 = arith.addf %504, %506 : vector<8x128xf32>
    %c0_225 = arith.constant 0 : index
    %c0_226 = arith.constant 0 : index
    %508 = vector.load %arg8[%c0_225, %c0_226] : memref<8x128xf32, #tpu.memory_space<vmem>>, vector<8x128xf32>
    tpu.vector_store %arg8[%c0_225, %c0_226], %507 {strides = array<i32>} : memref<8x128xf32, #tpu.memory_space<vmem>>, vector<8x128xf32>,
    %c8_i32 = arith.constant 8 : i32
    %c0_i32_227 = arith.constant 0 : i32
    %509 = arith.cmpi eq, %arg1, %c0_i32_227 : i32
    %510 = arith.extui %509 : i1 to i32
    %c0_i32_228 = arith.constant 0 : i32
    %511 = arith.cmpi ne, %510, %c0_i32_228 : i32
    scf.if %511 {
      %c0_229 = arith.constant 0 : index
      %c0_230 = arith.constant 0 : index
      %512 = vector.load %arg8[%c0_229, %c0_230] : memref<8x128xf32, #tpu.memory_space<vmem>>, vector<8x128xf32>
      %c0_231 = arith.constant 0 : index
      %c0_232 = arith.constant 0 : index
      %c0_233 = arith.constant 0 : index
      %513 = vector.load %arg5[%c0_231, %c0_232, %c0_233] : memref<1x8x128xf32, #tpu.memory_space<vmem>>, vector<1x8x128xf32>
      %514 = vector.shape_cast %513 : vector<1x8x128xf32> to vector<8x128xf32>
      %515 = vector.shape_cast %512 : vector<8x128xf32> to vector<1x8x128xf32>
      tpu.vector_store %arg5[%c0_231, %c0_232, %c0_233], %515 {strides = array<i32>} : memref<1x8x128xf32, #tpu.memory_space<vmem>>, vector<1x8x128xf32>,
    } else {
    }
    return
  }
  func.func @transform_0(%arg0: i32, %arg1: i32) -> (i32, i32, i32) {
    %c2_i32 = arith.constant 2 : i32
    %0 = arith.muli %c2_i32, %arg1 : i32
    %c0_i32 = arith.constant 0 : i32
    %1 = arith.subi %c0_i32, %0 : i32
    %2 = arith.muli %arg0, %1 : i32
    %3 = arith.addi %arg1, %2 : i32
    %c0_i32_0 = arith.constant 0 : i32
    %c0_i32_1 = arith.constant 0 : i32
    return %3, %c0_i32_0, %arg0 : i32, i32, i32
  }
  func.func @transform_1(%arg0: i32, %arg1: i32) -> (i32, i32, i32) {
    %c0_i32 = arith.constant 0 : i32
    %c0_i32_0 = arith.constant 0 : i32
    %c0_i32_1 = arith.constant 0 : i32
    return %arg0, %c0_i32, %c0_i32_0 : i32, i32, i32
  }
  func.func @transform_2(%arg0: i32, %arg1: i32) -> (i32, i32, i32) {
    %c2_i32 = arith.constant 2 : i32
    %0 = arith.muli %c2_i32, %arg1 : i32
    %c0_i32 = arith.constant 0 : i32
    %1 = arith.subi %c0_i32, %0 : i32
    %2 = arith.muli %arg0, %1 : i32
    %3 = arith.addi %arg1, %2 : i32
    %c0_i32_0 = arith.constant 0 : i32
    %c0_i32_1 = arith.constant 0 : i32
    %c0_i32_2 = arith.constant 0 : i32
    return %3, %c0_i32_0, %c0_i32_1 : i32, i32, i32
  }
  func.func @transform_3(%arg0: i32, %arg1: i32) -> (i32, i32, i32) {
    %c0_i32 = arith.constant 0 : i32
    %c0_i32_0 = arith.constant 0 : i32
    %c0_i32_1 = arith.constant 0 : i32
    return %arg0, %c0_i32, %c0_i32_0 : i32, i32, i32
  }
}

module attributes {stable_mosaic.version = 11 : i64} {
  func.func @_mm_bias_kernel(%arg0: i32, %arg1: i32, %arg2: i32, %arg3: memref<8x256xf32, #tpu.memory_space<vmem>>, %arg4: memref<256x256xbf16, #tpu.memory_space<vmem>>, %arg5: memref<1x256xf32, #tpu.memory_space<vmem>>, %arg6: memref<8x256xf32, #tpu.memory_space<vmem>>, %arg7: memref<8x256xf32, #tpu.memory_space<vmem>>) attributes {dimension_semantics = [#tpu.dimension_semantics<parallel>, #tpu.dimension_semantics<parallel>, #tpu.dimension_semantics<arbitrary>], iteration_bounds = array<i64: 1, 1, 1>, scalar_prefetch = 0 : i64, scratch_operands = 1 : i64, tpu.core_type = #tpu.core_type<tc>, window_params = [{transform_indices = @transform_0, window_bounds = array<i64: 8, 256>}, {transform_indices = @transform_1, window_bounds = array<i64: 256, 256>}, {transform_indices = @transform_2, window_bounds = array<i64: 1, 256>}, {transform_indices = @transform_3, window_bounds = array<i64: 8, 256>}]} {
    %c0_i32 = arith.constant 0 : i32
    %0 = arith.cmpi eq, %arg2, %c0_i32 : i32
    %1 = arith.extui %0 : i1 to i32
    %c0_i32_0 = arith.constant 0 : i32
    %2 = arith.cmpi ne, %1, %c0_i32_0 : i32
    scf.if %2 {
      %cst_10 = arith.constant 0.000000e+00 : f32
      %13 = vector.broadcast %cst_10 : f32 to vector<8x256xf32>
      %c0_11 = arith.constant 0 : index
      %c0_12 = arith.constant 0 : index
      %14 = vector.load %arg7[%c0_11, %c0_12] : memref<8x256xf32, #tpu.memory_space<vmem>>, vector<8x256xf32>
      tpu.vector_store %arg7[%c0_11, %c0_12], %13 {strides = array<i32>} : memref<8x256xf32, #tpu.memory_space<vmem>>, vector<8x256xf32>,
    } else {
    }
    %c0 = arith.constant 0 : index
    %c0_1 = arith.constant 0 : index
    %3 = vector.load %arg7[%c0, %c0_1] : memref<8x256xf32, #tpu.memory_space<vmem>>, vector<8x256xf32>
    %c0_2 = arith.constant 0 : index
    %c0_3 = arith.constant 0 : index
    %4 = vector.load %arg3[%c0_2, %c0_3] : memref<8x256xf32, #tpu.memory_space<vmem>>, vector<8x256xf32>
    %5 = arith.truncf %4 : vector<8x256xf32> to vector<8x256xbf16>
    %c0_4 = arith.constant 0 : index
    %c0_5 = arith.constant 0 : index
    %6 = vector.load %arg4[%c0_4, %c0_5] : memref<256x256xbf16, #tpu.memory_space<vmem>>, vector<256x256xbf16>
    %cst = arith.constant dense<0.000000e+00> : vector<8x256xf32>
    %7 = tpu.matmul %5, %6, %cst {dimension_numbers = #tpu.dot_dimension_numbers<[1], [0], [0], [1], [0, 0, 1, 1], [], []>} : vector<8x256xbf16>, vector<256x256xbf16>, vector<8x256xf32> -> vector<8x256xf32>
    %8 = arith.addf %3, %7 : vector<8x256xf32>
    %c0_6 = arith.constant 0 : index
    %c0_7 = arith.constant 0 : index
    %9 = vector.load %arg7[%c0_6, %c0_7] : memref<8x256xf32, #tpu.memory_space<vmem>>, vector<8x256xf32>
    tpu.vector_store %arg7[%c0_6, %c0_7], %8 {strides = array<i32>} : memref<8x256xf32, #tpu.memory_space<vmem>>, vector<8x256xf32>,
    %c0_i32_8 = arith.constant 0 : i32
    %10 = arith.cmpi eq, %arg2, %c0_i32_8 : i32
    %11 = arith.extui %10 : i1 to i32
    %c0_i32_9 = arith.constant 0 : i32
    %12 = arith.cmpi ne, %11, %c0_i32_9 : i32
    scf.if %12 {
      %c0_10 = arith.constant 0 : index
      %c0_11 = arith.constant 0 : index
      %13 = vector.load %arg7[%c0_10, %c0_11] : memref<8x256xf32, #tpu.memory_space<vmem>>, vector<8x256xf32>
      %c0_12 = arith.constant 0 : index
      %c0_13 = arith.constant 0 : index
      %14 = vector.load %arg5[%c0_12, %c0_13] : memref<1x256xf32, #tpu.memory_space<vmem>>, vector<1x256xf32>
      %15 = vector.broadcast %14 : vector<1x256xf32> to vector<8x256xf32>
      %16 = arith.addf %13, %15 : vector<8x256xf32>
      %c0_14 = arith.constant 0 : index
      %c0_15 = arith.constant 0 : index
      %17 = vector.load %arg6[%c0_14, %c0_15] : memref<8x256xf32, #tpu.memory_space<vmem>>, vector<8x256xf32>
      tpu.vector_store %arg6[%c0_14, %c0_15], %16 {strides = array<i32>} : memref<8x256xf32, #tpu.memory_space<vmem>>, vector<8x256xf32>,
    } else {
    }
    return
  }
  func.func @transform_0(%arg0: i32, %arg1: i32, %arg2: i32) -> (i32, i32) {
    %c0_i32 = arith.constant 0 : i32
    return %arg0, %arg2 : i32, i32
  }
  func.func @transform_1(%arg0: i32, %arg1: i32, %arg2: i32) -> (i32, i32) {
    %c0_i32 = arith.constant 0 : i32
    return %arg2, %arg1 : i32, i32
  }
  func.func @transform_2(%arg0: i32, %arg1: i32, %arg2: i32) -> (i32, i32) {
    %c0_i32 = arith.constant 0 : i32
    %c0_i32_0 = arith.constant 0 : i32
    return %c0_i32, %arg1 : i32, i32
  }
  func.func @transform_3(%arg0: i32, %arg1: i32, %arg2: i32) -> (i32, i32) {
    %c0_i32 = arith.constant 0 : i32
    return %arg0, %arg1 : i32, i32
  }
}

</mosaic_0001>

<bundles_post_ra>
// kernel: model_bert_forward.7
= control target key start
LH: loop header
LB: loop body
LE: loop exit
PB: predicated region body
PF: predicated region fallthrough
CT: control target
= control target key end

     0   :  { %v270_v36 = vlaneseq  ;;  %s499_s1 = inlined_call_operand.vmem [shape: bf16[256,256], index: 1, kind: input, shape index: {}]   ;;  %s500_s0 = inlined_call_operand.vmem [shape: f32[8,256], index: 0, kind: input, shape index: {}]   ;;  %s501_s2 = inlined_call_operand.vmem [shape: f32[1,256], index: 2, kind: input, shape index: {}]   ;;  %s502_s3 = inlined_call_operand.vmem [shape: f32[8,256], index: 3, kind: output, shape index: {}]  }
   0x1   :  { %v320_v0 = vld [vmem:[%s499_s1 + $0x4] ss:$8 sps:$4 sm:$0xff]   ;;  %v322_v1 = vld [vmem:[%s499_s1] ss:$8 sps:$4 sm:$0xff]   ;;  %v323_v2 = vld [vmem:[%s499_s1 + $0x14] ss:$8 sps:$4 sm:$0xff]  }
   0x2   :  { %218 = vmatprep.subr.bf16.mxu0 %v320_v0  ;;  %v325_v3 = vld [vmem:[%s499_s1 + $0x10] ss:$8 sps:$4 sm:$0xff]   ;;  %v326_v4 = vld [vmem:[%s499_s1 + $0x24] ss:$8 sps:$4 sm:$0xff]   ;;  %v328_v5 = vld [vmem:[%s499_s1 + $0x20] ss:$8 sps:$4 sm:$0xff]  }
   0x3   :  { %219 = vmatpush1.bf16.msra.mxu0 %v322_v1  ;;  %v329_v6 = vld [vmem:[%s499_s1 + $0x34] ss:$8 sps:$4 sm:$0xff]   ;;  %v331_v7 = vld [vmem:[%s499_s1 + $0x30] ss:$8 sps:$4 sm:$0xff]   ;;  %v332_v8 = vld [vmem:[%s499_s1 + $0x44] ss:$8 sps:$4 sm:$0xff]  }
   0x4   :  { %220 = vmatprep.subr.bf16.mxu0 %v323_v2  ;;  %v334_v9 = vld [vmem:[%s499_s1 + $0x40] ss:$8 sps:$4 sm:$0xff]   ;;  %v335_v10 = vld [vmem:[%s499_s1 + $0x54] ss:$8 sps:$4 sm:$0xff]   ;;  %v337_v11 = vld [vmem:[%s499_s1 + $0x50] ss:$8 sps:$4 sm:$0xff]  }
   0x5   :  { %v338_v12 = vld [vmem:[%s499_s1 + $0x64] ss:$8 sps:$4 sm:$0xff]   ;;  %v340_v15 = vld [vmem:[%s499_s1 + $0x60] ss:$8 sps:$4 sm:$0xff]   ;;  %v341_v16 = vld [vmem:[%s499_s1 + $0x74] ss:$8 sps:$4 sm:$0xff]  }
   0x6   :  { %v23_v13 = vld [vmem:[%s500_s0 + $0x8] sm:$0xff]  ;;  %v343_v17 = vld [vmem:[%s499_s1 + $0x70] ss:$8 sps:$4 sm:$0xff]   ;;  %v347_v20 = vld [vmem:[%s499_s1 + $0x94] ss:$8 sps:$4 sm:$0xff]   ;;  %v271_v37 = vshrl.u32 %v270_v36, 7 }
   0x7   :  { %221 = vmatpush1.bf16.msra.mxu0 %v325_v3  ;;  %v25_v14 = vpack.c.bf16 %v23_v13, %v23_v13  ;;  %v344_v18 = vld [vmem:[%s499_s1 + $0x84] ss:$8 sps:$4 sm:$0xff]   ;;  %v346_v19 = vld [vmem:[%s499_s1 + $0x80] ss:$8 sps:$4 sm:$0xff]   ;;  %v349_v21 = vld [vmem:[%s499_s1 + $0x90] ss:$8 sps:$4 sm:$0xff]  }
   0x8   :  { %222 = vmatprep.subr.bf16.mxu0 %v326_v4  ;;  %v350_v22 = vld [vmem:[%s499_s1 + $0xa4] ss:$8 sps:$4 sm:$0xff]   ;;  %v352_v23 = vld [vmem:[%s499_s1 + $0xa0] ss:$8 sps:$4 sm:$0xff]   ;;  %v353_v24 = vld [vmem:[%s499_s1 + $0xb4] ss:$8 sps:$4 sm:$0xff]  }
   0x9   :  { %250 = vmatprep.mubr.bf16.mxu0 %v25_v14  ;;  %v355_v25 = vld [vmem:[%s499_s1 + $0xb0] ss:$8 sps:$4 sm:$0xff]   ;;  %v356_v26 = vld [vmem:[%s499_s1 + $0xc4] ss:$8 sps:$4 sm:$0xff]   ;;  %v358_v27 = vld [vmem:[%s499_s1 + $0xc0] ss:$8 sps:$4 sm:$0xff]  }
   0xa   :  { %v359_v28 = vld [vmem:[%s499_s1 + $0xd4] ss:$8 sps:$4 sm:$0xff]   ;;  %v361_v29 = vld [vmem:[%s499_s1 + $0xd0] ss:$8 sps:$4 sm:$0xff]   ;;  %v362_v30 = vld [vmem:[%s499_s1 + $0xe4] ss:$8 sps:$4 sm:$0xff]  }
   0xb   :  { %223 = vmatpush1.bf16.msra.mxu0 %v328_v5  ;;  %v364_v31 = vld [vmem:[%s499_s1 + $0xe0] ss:$8 sps:$4 sm:$0xff]   ;;  %v365_v32 = vld [vmem:[%s499_s1 + $0xf4] ss:$8 sps:$4 sm:$0xff]   ;;  %v367_v33 = vld [vmem:[%s499_s1 + $0xf0] ss:$8 sps:$4 sm:$0xff]  }
   0xc   :  { %224 = vmatprep.subr.bf16.mxu0 %v329_v6  ;;  %v22_v34 = vld [vmem:[%s500_s0] sm:$0xff]  ;;  %v272_v38 = vsub.s32 0, %v271_v37  ;;  %v276_v40 = vsub.s32 1, %v271_v37 }
   0xd   :  { %v24_v35 = vpack.c.bf16 %v22_v34, %v22_v34  ;;  %v268_v39 = vld [vmem:[%s501_s2] sm:$0x3] }
   0xe   :  { %v273_v41 = vrot.slane %v268_v39, %v272_v38  ;;  %v277_v42 = vrot.slane %v268_v39, %v276_v40 }
   0xf   :  { %225 = vmatpush1.bf16.msra.mxu0 %v331_v7 }
  0x10   :  { %226 = vmatprep.subr.bf16.mxu0 %v332_v8 }
  0x13   :  { %227 = vmatpush1.bf16.msra.mxu0 %v334_v9 }
  0x14   :  { %228 = vmatprep.subr.bf16.mxu0 %v335_v10 }
  0x17   :  { %229 = vmatpush1.bf16.msra.mxu0 %v337_v11 }
  0x18   :  { %230 = vmatprep.subr.bf16.mxu0 %v338_v12 }
  0x1b   :  { %231 = vmatpush1.bf16.msra.mxu0 %v340_v15 }
  0x1c   :  { %232 = vmatprep.subr.bf16.mxu0 %v341_v16 }
  0x1f   :  { %233 = vmatpush1.bf16.msra.mxu0 %v343_v17 }
  0x20   :  { %234 = vmatprep.subr.bf16.mxu0 %v344_v18 }
  0x23   :  { %235 = vmatpush1.bf16.msra.mxu0 %v346_v19 }
  0x24   :  { %236 = vmatprep.subr.bf16.mxu0 %v347_v20 }
  0x27   :  { %237 = vmatpush1.bf16.msra.mxu0 %v349_v21 }
  0x28   :  { %238 = vmatprep.subr.bf16.mxu0 %v350_v22 }
  0x2b   :  { %239 = vmatpush1.bf16.msra.mxu0 %v352_v23 }
  0x2c   :  { %240 = vmatprep.subr.bf16.mxu0 %v353_v24 }
  0x2f   :  { %241 = vmatpush1.bf16.msra.mxu0 %v355_v25 }
  0x30   :  { %242 = vmatprep.subr.bf16.mxu0 %v356_v26 }
  0x33   :  { %243 = vmatpush1.bf16.msra.mxu0 %v358_v27 }
  0x34   :  { %244 = vmatprep.subr.bf16.mxu0 %v359_v28 }
  0x37   :  { %245 = vmatpush1.bf16.msra.mxu0 %v361_v29 }
  0x38   :  { %246 = vmatprep.subr.bf16.mxu0 %v362_v30 }
  0x3b   :  { %247 = vmatpush1.bf16.msra.mxu0 %v364_v31 }
  0x3c   :  { %248 = vmatprep.subr.bf16.mxu0 %v365_v32 }
  0x3f   :  { %249 = vmatpush1.bf16.msra.mxu0 %v367_v33 }
  0x42   :  { %251 = vmatmul.mubr.bf16.vlgmr.msra.gmra.mrb[0].mxu0 %v24_v35 }
 0x115   :  { %v252_v43 = vpop.f32.mrb[0].mxu0 }
 0x116   :  { %v280_v44 = vadd.f32 %v273_v41, %v252_v43  ;;  %v254_v45 = vpop.f32.mrb[1].mxu0 }
 0x117   :  { %v281_v46 = vadd.f32 %v277_v42, %v254_v45  ;;  %v256_v47 = vpop.f32.mrb[2].mxu0 }
 0x118   :  { %282 = vst [vmem:[%s502_s3] sm:$0xff] %v280_v44  ;;  %v257_v48 = vpop.f32.mrb[3].mxu0 }
 0x119   :  { %283 = vst [vmem:[%s502_s3 + $0x8] sm:$0xff] %v281_v46 }

// kernel: model_bert_forward.5
= control target key start
LH: loop header
LB: loop body
LE: loop exit
PB: predicated region body
PF: predicated region fallthrough
CT: control target
= control target key end

     0   :  { %s1355_s12 = smov 0   ;;  %s1357_s13 = smov 0   ;;  %s1697_s0 = inlined_call_operand.vmem [shape: bf16[64,128], index: 0, kind: input, shape index: {}]   ;;  %s1698_s1 = inlined_call_operand.vmem [shape: bf16[128,1024], index: 1, kind: input, shape index: {}]   ;;  %s1699_s2 = inlined_call_operand.vmem [shape: f32[1,1024], index: 2, kind: input, shape index: {}]   ;;  %s1700_s3 = inlined_call_operand.vmem [shape: f32[64,1024], index: 3, kind: output, shape index: {}]  }
   0x1   :  { %s1359_s14 = smov 0   ;;  %s1361_s15 = smov 0  }
   0x2   :  { %s1363_s16 = smov 0  }
   0x3 LB: > { %s28_s17 = sadd.s32 1, %s1328_s15  ;;  %s1146_s18 = sadd.s32 4294967295, %s1332_s16   ;;  %s1332_s16 = sphi %s1363_s16, %s13_s16   ;;  %s1328_s15 = sphi %s1361_s15, %s1705_s15   ;;  %s1324_s14 = sphi %s1359_s14, %s1704_s14   ;;  %s1320_s13 = sphi %s1357_s13, %s1703_s13   ;;  %s1316_s12 = sphi %s1355_s12, %s1702_s12  }
   0x4   : > { %p30_p0 = scmp.ge.s32.totalorder %s28_s17, 2  ;;  %p76_p1 = scmp.ne.s32.totalorder %s1320_s13, %s1316_s12 }
   0x5   : > { %p77_p2 = scmp.eq.s32.totalorder %s1332_s16, 0  ;;  %p134_p4 = scmp.eq.s32.totalorder %s1146_s18, 1 }
   0x6   : > { %s1707_s17 = smov (%p30_p0, %s28_s17), 0  ;;  %s69_s20 = sadd.s32 1, %s1320_s13 }
   0x7   : > { %p78_p3 = por %p77_p2, %p76_p1  ;;  %s65_s19 = ssub.s32 %s1328_s15, %s1707_s17 }
   0x8   : > { %p67_p5 = scmp.eq.s32.totalorder %s65_s19, 0  ;;  %p1390_p6 = por %p134_p4, %p76_p1 }
   0x9   : > { %p1150_p7 = scmp.ge.s32.totalorder %s1332_s16, 2 }
   0xa   : > { %s1395_s22 = scalar_select %p67_p5, %s1320_s13, %s69_s20  }
   0xb   : > { %168 = sbr.rel (%p1150_p7) target bundleno = 38 (0x26), region = 20 }
  0x12   : > { %171 = sbr.rel (!%p78_p3) target bundleno = 38 (0x26), region = 24  ;;  %s173_s23 = sand.u32 (%p78_p3), 1, %s1320_s13  }
  0x13   : > { %s1199_s24 = sshll.u32 (%p78_p3), %s1328_s15, 4  ;;  %s1151_s25 = sshll.u32 (%p78_p3), %s173_s23, 8 }
  0x14   : > { %s1403_s28 = scalar_lea.vmem (%p78_p3), %s1698_s1, %s1199_s24  ;;  %s1408_s29 = scalar_lea.vmem (%p78_p3), [#allocation3], %s1151_s25 }
  0x15   : > { %v194_v0 = vld [vmem:[%s1403_s28] sm:$0xff] (%p78_p3)  ;;  %v196_v1 = vld [vmem:[%s1403_s28 + $0x8] sm:$0xff] (%p78_p3) }
  0x16   : > { %v198_v2 = vld [vmem:[%s1403_s28 + $0x20] sm:$0xff] (%p78_p3)  ;;  %195 = vst [vmem:[%s1408_s29] sm:$0xff] (%p78_p3), %v194_v0  ;;  %197 = vst [vmem:[%s1408_s29 + $0x8] sm:$0xff] (%p78_p3), %v196_v1  ;;  %v200_v3 = vld [vmem:[%s1403_s28 + $0x28] sm:$0xff] (%p78_p3) }
  0x17   : > { %199 = vst [vmem:[%s1408_s29 + $0x10] sm:$0xff] (%p78_p3), %v198_v2  ;;  %v202_v4 = vld [vmem:[%s1403_s28 + $0x40] sm:$0xff] (%p78_p3)  ;;  %v204_v5 = vld [vmem:[%s1403_s28 + $0x48] sm:$0xff] (%p78_p3)  ;;  %201 = vst [vmem:[%s1408_s29 + $0x18] sm:$0xff] (%p78_p3), %v200_v3 }
  0x18   : > { %203 = vst [vmem:[%s1408_s29 + $0x20] sm:$0xff] (%p78_p3), %v202_v4  ;;  %205 = vst [vmem:[%s1408_s29 + $0x28] sm:$0xff] (%p78_p3), %v204_v5  ;;  %v206_v6 = vld [vmem:[%s1403_s28 + $0x60] sm:$0xff] (%p78_p3)  ;;  %v208_v7 = vld [vmem:[%s1403_s28 + $0x68] sm:$0xff] (%p78_p3) }
  0x19   : > { %v210_v8 = vld [vmem:[%s1403_s28 + $0x80] sm:$0xff]  ;;  %207 = vst [vmem:[%s1408_s29 + $0x30] sm:$0xff] %v206_v6  ;;  %209 = vst [vmem:[%s1408_s29 + $0x38] sm:$0xff] %v208_v7  ;;  %v212_v9 = vld [vmem:[%s1403_s28 + $0x88] sm:$0xff] }
  0x1a   : > { %211 = vst [vmem:[%s1408_s29 + $0x40] sm:$0xff] %v210_v8  ;;  %v214_v10 = vld [vmem:[%s1403_s28 + $0xa0] sm:$0xff]  ;;  %v216_v11 = vld [vmem:[%s1403_s28 + $0xa8] sm:$0xff]  ;;  %213 = vst [vmem:[%s1408_s29 + $0x48] sm:$0xff] %v212_v9 }
  0x1b   : > { %215 = vst [vmem:[%s1408_s29 + $0x50] sm:$0xff] %v214_v10  ;;  %217 = vst [vmem:[%s1408_s29 + $0x58] sm:$0xff] %v216_v11  ;;  %v218_v12 = vld [vmem:[%s1403_s28 + $0xc0] sm:$0xff]  ;;  %v220_v13 = vld [vmem:[%s1403_s28 + $0xc8] sm:$0xff] }
  0x1c   : > { %v222_v14 = vld [vmem:[%s1403_s28 + $0xe0] sm:$0xff]  ;;  %219 = vst [vmem:[%s1408_s29 + $0x60] sm:$0xff] %v218_v12  ;;  %221 = vst [vmem:[%s1408_s29 + $0x68] sm:$0xff] %v220_v13  ;;  %v224_v15 = vld [vmem:[%s1403_s28 + $0xe8] sm:$0xff] }
  0x1d   : > { %223 = vst [vmem:[%s1408_s29 + $0x70] sm:$0xff] %v222_v14  ;;  %v226_v16 = vld [vmem:[%s1403_s28 + $0x100] sm:$0xff]  ;;  %v228_v17 = vld [vmem:[%s1403_s28 + $0x108] sm:$0xff]  ;;  %225 = vst [vmem:[%s1408_s29 + $0x78] sm:$0xff] %v224_v15 }
  0x1e   : > { %227 = vst [vmem:[%s1408_s29 + $0x80] sm:$0xff] %v226_v16  ;;  %229 = vst [vmem:[%s1408_s29 + $0x88] sm:$0xff] %v228_v17  ;;  %v230_v18 = vld [vmem:[%s1403_s28 + $0x120] sm:$0xff]  ;;  %v232_v19 = vld [vmem:[%s1403_s28 + $0x128] sm:$0xff] }
  0x1f   : > { %v234_v20 = vld [vmem:[%s1403_s28 + $0x140] sm:$0xff]  ;;  %231 = vst [vmem:[%s1408_s29 + $0x90] sm:$0xff] %v230_v18  ;;  %233 = vst [vmem:[%s1408_s29 + $0x98] sm:$0xff] %v232_v19  ;;  %v236_v21 = vld [vmem:[%s1403_s28 + $0x148] sm:$0xff] }
  0x20   : > { %235 = vst [vmem:[%s1408_s29 + $0xa0] sm:$0xff] %v234_v20  ;;  %v238_v22 = vld [vmem:[%s1403_s28 + $0x160] sm:$0xff]  ;;  %v240_v23 = vld [vmem:[%s1403_s28 + $0x168] sm:$0xff]  ;;  %237 = vst [vmem:[%s1408_s29 + $0xa8] sm:$0xff] %v236_v21 }
  0x21   : > { %239 = vst [vmem:[%s1408_s29 + $0xb0] sm:$0xff] %v238_v22  ;;  %241 = vst [vmem:[%s1408_s29 + $0xb8] sm:$0xff] %v240_v23  ;;  %v242_v24 = vld [vmem:[%s1403_s28 + $0x180] sm:$0xff]  ;;  %v244_v25 = vld [vmem:[%s1403_s28 + $0x188] sm:$0xff] }
  0x22   : > { %v246_v26 = vld [vmem:[%s1403_s28 + $0x1a0] sm:$0xff]  ;;  %243 = vst [vmem:[%s1408_s29 + $0xc0] sm:$0xff] %v242_v24  ;;  %245 = vst [vmem:[%s1408_s29 + $0xc8] sm:$0xff] %v244_v25  ;;  %v248_v27 = vld [vmem:[%s1403_s28 + $0x1a8] sm:$0xff] }
  0x23   : > { %247 = vst [vmem:[%s1408_s29 + $0xd0] sm:$0xff] %v246_v26  ;;  %v250_v28 = vld [vmem:[%s1403_s28 + $0x1c0] sm:$0xff]  ;;  %v252_v29 = vld [vmem:[%s1403_s28 + $0x1c8] sm:$0xff]  ;;  %249 = vst [vmem:[%s1408_s29 + $0xd8] sm:$0xff] %v248_v27 }
  0x24   : > { %251 = vst [vmem:[%s1408_s29 + $0xe0] sm:$0xff] %v250_v28  ;;  %253 = vst [vmem:[%s1408_s29 + $0xe8] sm:$0xff] %v252_v29  ;;  %v254_v30 = vld [vmem:[%s1403_s28 + $0x1e0] sm:$0xff]  ;;  %v256_v31 = vld [vmem:[%s1403_s28 + $0x1e8] sm:$0xff] }
  0x25   : > { %255 = vst [vmem:[%s1408_s29 + $0xf0] sm:$0xff] %v254_v30  ;;  %257 = vst [vmem:[%s1408_s29 + $0xf8] sm:$0xff] %v256_v31 }
  0x26 PF: > { %p1154_p8 = scmp.ge.s32.totalorder %s1332_s16, 1  ;;  %p270_p9 = scmp.lt.s32.totalorder %s1332_s16, 3 }
  0x28   : > { %p271_p10 = pnand %p1154_p8, %p270_p9 }
  0x29   : > { %s277_s30 = sand.u32 (!%p271_p10), 1, %s1316_s12   ;;  %v1334_v32 = vmov (!%p271_p10), 0   ;;  %v1290_v1 = vld [vmem:[%s1697_s0] sm:$0xff] (!%p271_p10)   ;;  %v1291_v2 = vld [vmem:[%s1697_s0 + $0x8] sm:$0xff] (!%p271_p10)   ;;  %v1292_v3 = vld [vmem:[%s1697_s0 + $0x10] sm:$0xff] (!%p271_p10)   ;;  %s1157_s19 = sshll.u32 (!%p271_p10), %s1324_s14, 2  ;;  %v869_v5 = vlaneseq (!%p271_p10) }
  0x2a   : > { %274 = sbr.rel (%p271_p10) target bundleno = 329 (0x149), region = 51  ;;  %s1474_s4 = sshll.u32 (!%p271_p10), %s277_s30, 8  ;;  %654 = vmatprep.mubr.bf16.mxu0 (!%p271_p10), %v1334_v32  ;;  %727 = vmatprep.mubr.bf16.mxu1 (!%p271_p10), %v1334_v32  ;;  %v1293_v4 = vld [vmem:[%s1697_s0 + $0x18] sm:$0xff] (!%p271_p10)  }
  0x2b   : > { %s1479_s5 = scalar_lea.vmem (!%p271_p10), [#allocation3], %s1474_s4  ;;  %p323_p11 = scmp.lt.s32.totalorder (!%p271_p10), %s1157_s19, 7  ;;  %v870_v6 = vshrl.u32 (!%p271_p10), %v869_v5, 7 }
  0x2c   : > { %v1242_v33 = vld [vmem:[%s1479_s5 + $0x4] ss:$16 sps:$4 sm:$0xff] (!%p271_p10)   ;;  %v1244_v34 = vld [vmem:[%s1479_s5 + $0xc] ss:$16 sps:$4 sm:$0xff] (!%p271_p10)   ;;  %v1246_v35 = vld [vmem:[%s1479_s5] ss:$16 sps:$4 sm:$0xff] (!%p271_p10)  }
  0x2d   : > { %622 = vmatprep.subr.bf16.mxu0 (!%p271_p10), %v1242_v33  ;;  %v1247_v36 = vld [vmem:[%s1479_s5 + $0x8] ss:$16 sps:$4 sm:$0xff] (!%p271_p10)   ;;  %695 = vmatprep.subr.bf16.mxu1 (!%p271_p10), %v1244_v34  ;;  %v1248_v37 = vld [vmem:[%s1479_s5 + $0x24] ss:$16 sps:$4 sm:$0xff] (!%p271_p10)   ;;  %v1250_v38 = vld [vmem:[%s1479_s5 + $0x2c] ss:$16 sps:$4 sm:$0xff] (!%p271_p10)  }
  0x2e   : > { %623 = vmatpush1.bf16.msra.mxu0 (!%p271_p10), %v1246_v35  ;;  %696 = vmatpush1.bf16.msra.mxu1 (!%p271_p10), %v1247_v36  ;;  %v1252_v39 = vld [vmem:[%s1479_s5 + $0x20] ss:$16 sps:$4 sm:$0xff] (!%p271_p10)   ;;  %v1253_v40 = vld [vmem:[%s1479_s5 + $0x28] ss:$16 sps:$4 sm:$0xff] (!%p271_p10)   ;;  %v1254_v41 = vld [vmem:[%s1479_s5 + $0x44] ss:$16 sps:$4 sm:$0xff] (!%p271_p10)  }
  0x2f   : > { %624 = vmatprep.subr.bf16.mxu0 (!%p271_p10), %v1248_v37  ;;  %697 = vmatprep.subr.bf16.mxu1 (!%p271_p10), %v1250_v38  ;;  %v1256_v42 = vld [vmem:[%s1479_s5 + $0x4c] ss:$16 sps:$4 sm:$0xff] (!%p271_p10)   ;;  %v1258_v43 = vld [vmem:[%s1479_s5 + $0x40] ss:$16 sps:$4 sm:$0xff] (!%p271_p10)   ;;  %v1259_v44 = vld [vmem:[%s1479_s5 + $0x48] ss:$16 sps:$4 sm:$0xff] (!%p271_p10)  }
  0x30   : > { %v1260_v45 = vld [vmem:[%s1479_s5 + $0x64] ss:$16 sps:$4 sm:$0xff] (!%p271_p10)   ;;  %v1262_v46 = vld [vmem:[%s1479_s5 + $0x6c] ss:$16 sps:$4 sm:$0xff] (!%p271_p10)   ;;  %v1264_v47 = vld [vmem:[%s1479_s5 + $0x60] ss:$16 sps:$4 sm:$0xff] (!%p271_p10)  }
  0x31   : > { %v1265_v48 = vld [vmem:[%s1479_s5 + $0x68] ss:$16 sps:$4 sm:$0xff]   ;;  %v1266_v49 = vld [vmem:[%s1479_s5 + $0x84] ss:$16 sps:$4 sm:$0xff]   ;;  %v1268_v50 = vld [vmem:[%s1479_s5 + $0x8c] ss:$16 sps:$4 sm:$0xff]  }
  0x32   : > { %625 = vmatpush1.bf16.msra.mxu0 %v1252_v39  ;;  %698 = vmatpush1.bf16.msra.mxu1 %v1253_v40  ;;  %v1270_v51 = vld [vmem:[%s1479_s5 + $0x80] ss:$16 sps:$4 sm:$0xff]   ;;  %v1271_v52 = vld [vmem:[%s1479_s5 + $0x88] ss:$16 sps:$4 sm:$0xff]   ;;  %v1272_v53 = vld [vmem:[%s1479_s5 + $0xa4] ss:$16 sps:$4 sm:$0xff]  }
  0x33   : > { %626 = vmatprep.subr.bf16.mxu0 %v1254_v41  ;;  %699 = vmatprep.subr.bf16.mxu1 %v1256_v42  ;;  %v1274_v54 = vld [vmem:[%s1479_s5 + $0xac] ss:$16 sps:$4 sm:$0xff]   ;;  %v1276_v55 = vld [vmem:[%s1479_s5 + $0xa0] ss:$16 sps:$4 sm:$0xff]   ;;  %v1277_v56 = vld [vmem:[%s1479_s5 + $0xa8] ss:$16 sps:$4 sm:$0xff]  }
  0x34   : > { %v1278_v57 = vld [vmem:[%s1479_s5 + $0xc4] ss:$16 sps:$4 sm:$0xff]   ;;  %v1280_v58 = vld [vmem:[%s1479_s5 + $0xcc] ss:$16 sps:$4 sm:$0xff]   ;;  %v1282_v59 = vld [vmem:[%s1479_s5 + $0xc0] ss:$16 sps:$4 sm:$0xff]  }
  0x35   : > { %v1283_v60 = vld [vmem:[%s1479_s5 + $0xc8] ss:$16 sps:$4 sm:$0xff]   ;;  %v1284_v61 = vld [vmem:[%s1479_s5 + $0xe4] ss:$16 sps:$4 sm:$0xff]   ;;  %v1286_v62 = vld [vmem:[%s1479_s5 + $0xec] ss:$16 sps:$4 sm:$0xff]  }
  0x36   : > { %627 = vmatpush1.bf16.msra.mxu0 %v1258_v43  ;;  %700 = vmatpush1.bf16.msra.mxu1 %v1259_v44  ;;  %v1288_v63 = vld [vmem:[%s1479_s5 + $0xe0] ss:$16 sps:$4 sm:$0xff]   ;;  %v1289_v0 = vld [vmem:[%s1479_s5 + $0xe8] ss:$16 sps:$4 sm:$0xff]   ;;  %s1709_s19 = smov (!%p323_p11, %s1157_s19), 7  ;;  %v871_v7 = vsub.s32 0, %v870_v6 }
  0x37   : > { %628 = vmatprep.subr.bf16.mxu0 %v1260_v45  ;;  %701 = vmatprep.subr.bf16.mxu1 %v1262_v46  ;;  %s325_s24 = scalar_lea.vmem %s1699_s2, %s1709_s19  ;;  %v879_v8 = vsub.s32 2, %v870_v6  ;;  %v875_v10 = vsub.s32 1, %v870_v6  ;;  %v883_v11 = vsub.s32 3, %v870_v6  ;;  %s1548_s25 = scalar_lea.vmem [#allocation4], %s1474_s4 }
  0x38   : > { %v867_v9 = vld [vmem:[%s325_s24] sm:$0xf]  ;;  %s1200_s26 = sshll.u32 (%p1390_p6), %s1324_s14, 5 }
  0x39   : > { %v1535_v12 = vrot.slane %v867_v9, %v871_v7  ;;  %v1537_v13 = vrot.slane %v867_v9, %v879_v8  ;;  %v1539_v14 = vrot.slane %v867_v9, %v875_v10  ;;  %v1541_v15 = vrot.slane %v867_v9, %v883_v11  ;;  %s1619_s29 = scalar_lea.vmem (%p1390_p6), %s1700_s3, %s1200_s26 }
  0x3a   : > { %629 = vmatpush1.bf16.msra.mxu0 %v1264_v47  ;;  %702 = vmatpush1.bf16.msra.mxu1 %v1265_v48 }
  0x3b   : > { %630 = vmatprep.subr.bf16.mxu0 %v1266_v49  ;;  %703 = vmatprep.subr.bf16.mxu1 %v1268_v50 }
  0x3e   : > { %631 = vmatpush1.bf16.msra.mxu0 %v1270_v51  ;;  %704 = vmatpush1.bf16.msra.mxu1 %v1271_v52 }
  0x3f   : > { %632 = vmatprep.subr.bf16.mxu0 %v1272_v53  ;;  %705 = vmatprep.subr.bf16.mxu1 %v1274_v54 }
  0x42   : > { %633 = vmatpush1.bf16.msra.mxu0 %v1276_v55  ;;  %706 = vmatpush1.bf16.msra.mxu1 %v1277_v56 }
  0x43   : > { %634 = vmatprep.subr.bf16.mxu0 %v1278_v57  ;;  %707 = vmatprep.subr.bf16.mxu1 %v1280_v58 }
  0x46   : > { %635 = vmatpush1.bf16.msra.mxu0 %v1282_v59  ;;  %708 = vmatpush1.bf16.msra.mxu1 %v1283_v60 }
  0x47   : > { %636 = vmatprep.subr.bf16.mxu0 %v1284_v61  ;;  %709 = vmatprep.subr.bf16.mxu1 %v1286_v62 }
  0x4a   : > { %637 = vmatpush1.bf16.msra.mxu0 %v1288_v63  ;;  %710 = vmatpush1.bf16.msra.mxu1 %v1289_v0 }
  0x4d   : > { %655 = vmatmul.mubr.bf16.vlgmr.msra.gmra.mrb[0].mxu0 %v1290_v1  ;;  %728 = vmatmul.mubr.bf16.vlgmr.msra.gmra.mrb[0].mxu1 %v1290_v1 }
  0x4e   : > { %664 = vmatprep.mubr.bf16.mxu0 %v1334_v32  ;;  %737 = vmatprep.mubr.bf16.mxu1 %v1334_v32 }
  0x55   : > { %665 = vmatmul.mubr.bf16.gmra.mrb[4].mxu0 %v1291_v2  ;;  %738 = vmatmul.mubr.bf16.gmra.mrb[4].mxu1 %v1291_v2 }
  0x56   : > { %674 = vmatprep.mubr.bf16.mxu0 %v1334_v32  ;;  %747 = vmatprep.mubr.bf16.mxu1 %v1334_v32 }
  0x5d   : > { %675 = vmatmul.mubr.bf16.gmra.mrb[8].mxu0 %v1292_v3  ;;  %748 = vmatmul.mubr.bf16.gmra.mrb[8].mxu1 %v1292_v3 }
  0x5e   : > { %684 = vmatprep.mubr.bf16.mxu0 %v1334_v32  ;;  %757 = vmatprep.mubr.bf16.mxu1 %v1334_v32 }
  0x65   : > { %685 = vmatmul.mubr.bf16.gmra.mrb[12].mxu0 %v1293_v4  ;;  %758 = vmatmul.mubr.bf16.gmra.mrb[12].mxu1 %v1293_v4 }
 0x120   : > { %v656_v16 = vpop.f32.mrb[0].mxu0  ;;  %v729_v17 = vpop.f32.mrb[0].mxu1 }
 0x121   : > { %v889_v18 = vadd.f32 %v1535_v12, %v656_v16  ;;  %v891_v19 = vadd.f32 %v1537_v13, %v729_v17  ;;  %v658_v20 = vpop.f32.mrb[1].mxu0  ;;  %v731_v21 = vpop.f32.mrb[1].mxu1 }
 0x122   : > { %v890_v22 = vadd.f32 %v1539_v14, %v658_v20  ;;  %v892_v23 = vadd.f32 %v1541_v15, %v731_v21  ;;  %v660_v24 = vpop.f32.mrb[2].mxu0  ;;  %v733_v25 = vpop.f32.mrb[2].mxu1 }
 0x123   : > { %921 = vst [vmem:[%s1548_s25] sm:$0xff] %v889_v18  ;;  %923 = vst [vmem:[%s1548_s25 + $0x10] sm:$0xff] %v891_v19  ;;  %v893_v26 = vadd.f32 %v1535_v12, %v660_v24  ;;  %v895_v27 = vadd.f32 %v1537_v13, %v733_v25  ;;  %v662_v28 = vpop.f32.mrb[3].mxu0  ;;  %v735_v29 = vpop.f32.mrb[3].mxu1 }
 0x124   : > { %922 = vst [vmem:[%s1548_s25 + $0x8] sm:$0xff] %v890_v22  ;;  %924 = vst [vmem:[%s1548_s25 + $0x18] sm:$0xff] %v892_v23  ;;  %v894_v30 = vadd.f32 %v1539_v14, %v662_v28  ;;  %v896_v31 = vadd.f32 %v1541_v15, %v735_v29 }
 0x125   : > { %925 = vst [vmem:[%s1548_s25 + $0x20] sm:$0xff] %v893_v26  ;;  %927 = vst [vmem:[%s1548_s25 + $0x30] sm:$0xff] %v895_v27 }
 0x126   : > { %926 = vst [vmem:[%s1548_s25 + $0x28] sm:$0xff] %v894_v30  ;;  %928 = vst [vmem:[%s1548_s25 + $0x38] sm:$0xff] %v896_v31 }
 0x128   : > { %v666_v32 = vpop.f32.mrb[4].mxu0  ;;  %v739_v33 = vpop.f32.mrb[4].mxu1 }
 0x129   : > { %v897_v34 = vadd.f32 %v1535_v12, %v666_v32  ;;  %v899_v35 = vadd.f32 %v1537_v13, %v739_v33  ;;  %v668_v36 = vpop.f32.mrb[5].mxu0  ;;  %v741_v37 = vpop.f32.mrb[5].mxu1 }
 0x12a   : > { %v898_v38 = vadd.f32 %v1539_v14, %v668_v36  ;;  %v900_v39 = vadd.f32 %v1541_v15, %v741_v37  ;;  %v670_v40 = vpop.f32.mrb[6].mxu0  ;;  %v743_v41 = vpop.f32.mrb[6].mxu1 }
 0x12b   : > { %929 = vst [vmem:[%s1548_s25 + $0x40] sm:$0xff] %v897_v34  ;;  %931 = vst [vmem:[%s1548_s25 + $0x50] sm:$0xff] %v899_v35  ;;  %v901_v42 = vadd.f32 %v1535_v12, %v670_v40  ;;  %v903_v43 = vadd.f32 %v1537_v13, %v743_v41  ;;  %v672_v44 = vpop.f32.mrb[7].mxu0  ;;  %v745_v45 = vpop.f32.mrb[7].mxu1 }
 0x12c   : > { %930 = vst [vmem:[%s1548_s25 + $0x48] sm:$0xff] %v898_v38  ;;  %932 = vst [vmem:[%s1548_s25 + $0x58] sm:$0xff] %v900_v39  ;;  %v902_v46 = vadd.f32 %v1539_v14, %v672_v44  ;;  %v904_v47 = vadd.f32 %v1541_v15, %v745_v45  ;;  %v986_v20 = vld [vmem:[%s1548_s25 + $0x20] sm:$0xff] (%p1390_p6)  ;;  %v990_v22 = vld [vmem:[%s1548_s25 + $0x30] sm:$0xff] (%p1390_p6) }
 0x12d   : > { %933 = vst [vmem:[%s1548_s25 + $0x60] sm:$0xff] %v901_v42  ;;  %935 = vst [vmem:[%s1548_s25 + $0x70] sm:$0xff] %v903_v43  ;;  %v988_v21 = vld [vmem:[%s1548_s25 + $0x28] sm:$0xff] (%p1390_p6)  ;;  %v992_v23 = vld [vmem:[%s1548_s25 + $0x38] sm:$0xff] (%p1390_p6) }
 0x12e   : > { %934 = vst [vmem:[%s1548_s25 + $0x68] sm:$0xff] %v902_v46  ;;  %936 = vst [vmem:[%s1548_s25 + $0x78] sm:$0xff] %v904_v47 }
 0x12f   : > { %987 = vst [vmem:[%s1619_s29 + $0x40] sm:$0xff] (%p1390_p6), %v986_v20  ;;  %989 = vst [vmem:[%s1619_s29 + $0x48] sm:$0xff] (%p1390_p6), %v988_v21 }
 0x130   : > { %v676_v48 = vpop.f32.mrb[8].mxu0  ;;  %v749_v49 = vpop.f32.mrb[8].mxu1  ;;  %991 = vst [vmem:[%s1619_s29 + $0x50] sm:$0xff] (%p1390_p6), %v990_v22  ;;  %993 = vst [vmem:[%s1619_s29 + $0x58] sm:$0xff] (%p1390_p6), %v992_v23 }
 0x131   : > { %v905_v50 = vadd.f32 %v1535_v12, %v676_v48  ;;  %v907_v51 = vadd.f32 %v1537_v13, %v749_v49  ;;  %v678_v52 = vpop.f32.mrb[9].mxu0  ;;  %v751_v53 = vpop.f32.mrb[9].mxu1 }
 0x132   : > { %v906_v54 = vadd.f32 %v1539_v14, %v678_v52  ;;  %v908_v55 = vadd.f32 %v1541_v15, %v751_v53  ;;  %v680_v56 = vpop.f32.mrb[10].mxu0  ;;  %v753_v57 = vpop.f32.mrb[10].mxu1  ;;  %v994_v24 = vld [vmem:[%s1548_s25 + $0x40] sm:$0xff] (%p1390_p6)  ;;  %v998_v26 = vld [vmem:[%s1548_s25 + $0x50] sm:$0xff] (%p1390_p6) }
 0x133   : > { %937 = vst [vmem:[%s1548_s25 + $0x80] sm:$0xff] %v905_v50  ;;  %939 = vst [vmem:[%s1548_s25 + $0x90] sm:$0xff] %v907_v51  ;;  %v909_v58 = vadd.f32 %v1535_v12, %v680_v56  ;;  %v911_v59 = vadd.f32 %v1537_v13, %v753_v57  ;;  %v682_v60 = vpop.f32.mrb[11].mxu0  ;;  %v755_v61 = vpop.f32.mrb[11].mxu1  ;;  %v996_v25 = vld [vmem:[%s1548_s25 + $0x48] sm:$0xff] (%p1390_p6)  ;;  %v1000_v27 = vld [vmem:[%s1548_s25 + $0x58] sm:$0xff] (%p1390_p6) }
 0x134   : > { %938 = vst [vmem:[%s1548_s25 + $0x88] sm:$0xff] %v906_v54  ;;  %940 = vst [vmem:[%s1548_s25 + $0x98] sm:$0xff] %v908_v55  ;;  %v910_v62 = vadd.f32 %v1539_v14, %v682_v60  ;;  %v912_v63 = vadd.f32 %v1541_v15, %v755_v61  ;;  %v1002_v28 = vld [vmem:[%s1548_s25 + $0x60] sm:$0xff] (%p1390_p6)  ;;  %v1006_v30 = vld [vmem:[%s1548_s25 + $0x70] sm:$0xff] (%p1390_p6) }
 0x135   : > { %941 = vst [vmem:[%s1548_s25 + $0xa0] sm:$0xff] %v909_v58  ;;  %943 = vst [vmem:[%s1548_s25 + $0xb0] sm:$0xff] %v911_v59  ;;  %v1004_v29 = vld [vmem:[%s1548_s25 + $0x68] sm:$0xff] (%p1390_p6)  ;;  %v1008_v31 = vld [vmem:[%s1548_s25 + $0x78] sm:$0xff] (%p1390_p6) }
 0x136   : > { %942 = vst [vmem:[%s1548_s25 + $0xa8] sm:$0xff] %v910_v62  ;;  %944 = vst [vmem:[%s1548_s25 + $0xb8] sm:$0xff] %v912_v63 }
 0x137   : > { %995 = vst [vmem:[%s1619_s29 + $0x80] sm:$0xff] (%p1390_p6), %v994_v24  ;;  %997 = vst [vmem:[%s1619_s29 + $0x88] sm:$0xff] (%p1390_p6), %v996_v25 }
 0x138   : > { %v686_v0 = vpop.f32.mrb[12].mxu0  ;;  %v759_v1 = vpop.f32.mrb[12].mxu1  ;;  %959 = sbr.rel (!%p1390_p6) target bundleno = 329 (0x149), region = 67  ;;  %999 = vst [vmem:[%s1619_s29 + $0x90] sm:$0xff] (%p1390_p6), %v998_v26  ;;  %1001 = vst [vmem:[%s1619_s29 + $0x98] sm:$0xff] (%p1390_p6), %v1000_v27 }
 0x139   : > { %v913_v2 = vadd.f32 %v1535_v12, %v686_v0  ;;  %v915_v3 = vadd.f32 %v1537_v13, %v759_v1  ;;  %v688_v4 = vpop.f32.mrb[13].mxu0  ;;  %v761_v5 = vpop.f32.mrb[13].mxu1  ;;  %1003 = vst [vmem:[%s1619_s29 + $0xc0] sm:$0xff] (%p1390_p6), %v1002_v28  ;;  %1005 = vst [vmem:[%s1619_s29 + $0xc8] sm:$0xff] (%p1390_p6), %v1004_v29 }
 0x13a   : > { %v914_v6 = vadd.f32 %v1539_v14, %v688_v4  ;;  %v916_v7 = vadd.f32 %v1541_v15, %v761_v5  ;;  %v690_v8 = vpop.f32.mrb[14].mxu0  ;;  %v763_v9 = vpop.f32.mrb[14].mxu1  ;;  %1007 = vst [vmem:[%s1619_s29 + $0xd0] sm:$0xff] (%p1390_p6), %v1006_v30  ;;  %v1010_v32 = vld [vmem:[%s1548_s25 + $0x80] sm:$0xff] (%p1390_p6)  ;;  %1009 = vst [vmem:[%s1619_s29 + $0xd8] sm:$0xff] (%p1390_p6), %v1008_v31  ;;  %v1014_v34 = vld [vmem:[%s1548_s25 + $0x90] sm:$0xff] (%p1390_p6) }
 0x13b   : > { %945 = vst [vmem:[%s1548_s25 + $0xc0] sm:$0xff] %v913_v2  ;;  %947 = vst [vmem:[%s1548_s25 + $0xd0] sm:$0xff] %v915_v3  ;;  %v917_v10 = vadd.f32 %v1535_v12, %v690_v8  ;;  %v919_v11 = vadd.f32 %v1537_v13, %v763_v9  ;;  %v692_v16 = vpop.f32.mrb[15].mxu0  ;;  %v765_v17 = vpop.f32.mrb[15].mxu1  ;;  %v978_v12 = vld [vmem:[%s1548_s25] sm:$0xff] (%p1390_p6)  ;;  %v980_v13 = vld [vmem:[%s1548_s25 + $0x8] sm:$0xff] (%p1390_p6) }
 0x13c   : > { %946 = vst [vmem:[%s1548_s25 + $0xc8] sm:$0xff] %v914_v6  ;;  %948 = vst [vmem:[%s1548_s25 + $0xd8] sm:$0xff] %v916_v7  ;;  %v918_v18 = vadd.f32 %v1539_v14, %v692_v16  ;;  %v920_v19 = vadd.f32 %v1541_v15, %v765_v17  ;;  %v982_v14 = vld [vmem:[%s1548_s25 + $0x10] sm:$0xff] (%p1390_p6)  ;;  %v984_v15 = vld [vmem:[%s1548_s25 + $0x18] sm:$0xff] (%p1390_p6) }
 0x13d   : > { %949 = vst [vmem:[%s1548_s25 + $0xe0] sm:$0xff] %v917_v10  ;;  %951 = vst [vmem:[%s1548_s25 + $0xf0] sm:$0xff] %v919_v11  ;;  %v1012_v33 = vld [vmem:[%s1548_s25 + $0x88] sm:$0xff] (%p1390_p6)  ;;  %v1016_v35 = vld [vmem:[%s1548_s25 + $0x98] sm:$0xff] (%p1390_p6) }
 0x13e   : > { %950 = vst [vmem:[%s1548_s25 + $0xe8] sm:$0xff] %v918_v18  ;;  %952 = vst [vmem:[%s1548_s25 + $0xf8] sm:$0xff] %v920_v19  ;;  %v1018_v36 = vld [vmem:[%s1548_s25 + $0xa0] sm:$0xff] (%p1390_p6)  ;;  %v1020_v37 = vld [vmem:[%s1548_s25 + $0xa8] sm:$0xff] (%p1390_p6) }
 0x13f   : > { %979 = vst [vmem:[%s1619_s29] sm:$0xff] %v978_v12  ;;  %981 = vst [vmem:[%s1619_s29 + $0x8] sm:$0xff] %v980_v13  ;;  %v1022_v38 = vld [vmem:[%s1548_s25 + $0xb0] sm:$0xff]  ;;  %v1024_v39 = vld [vmem:[%s1548_s25 + $0xb8] sm:$0xff] }
 0x140   : > { %983 = vst [vmem:[%s1619_s29 + $0x10] sm:$0xff] %v982_v14  ;;  %985 = vst [vmem:[%s1619_s29 + $0x18] sm:$0xff] %v984_v15 }
 0x141   : > { %1011 = vst [vmem:[%s1619_s29 + $0x100] sm:$0xff] %v1010_v32  ;;  %1013 = vst [vmem:[%s1619_s29 + $0x108] sm:$0xff] %v1012_v33 }
 0x142   : > { %1015 = vst [vmem:[%s1619_s29 + $0x110] sm:$0xff] %v1014_v34  ;;  %1017 = vst [vmem:[%s1619_s29 + $0x118] sm:$0xff] %v1016_v35  ;;  %v1026_v40 = vld [vmem:[%s1548_s25 + $0xc0] sm:$0xff]  ;;  %v1030_v42 = vld [vmem:[%s1548_s25 + $0xd0] sm:$0xff] }
 0x143   : > { %1019 = vst [vmem:[%s1619_s29 + $0x140] sm:$0xff] %v1018_v36  ;;  %1021 = vst [vmem:[%s1619_s29 + $0x148] sm:$0xff] %v1020_v37  ;;  %v1028_v41 = vld [vmem:[%s1548_s25 + $0xc8] sm:$0xff]  ;;  %v1032_v43 = vld [vmem:[%s1548_s25 + $0xd8] sm:$0xff] }
 0x144   : > { %1023 = vst [vmem:[%s1619_s29 + $0x150] sm:$0xff] %v1022_v38  ;;  %1025 = vst [vmem:[%s1619_s29 + $0x158] sm:$0xff] %v1024_v39  ;;  %v1034_v44 = vld [vmem:[%s1548_s25 + $0xe0] sm:$0xff]  ;;  %v1038_v46 = vld [vmem:[%s1548_s25 + $0xf0] sm:$0xff] }
 0x145   : > { %1027 = vst [vmem:[%s1619_s29 + $0x180] sm:$0xff] %v1026_v40  ;;  %1029 = vst [vmem:[%s1619_s29 + $0x188] sm:$0xff] %v1028_v41  ;;  %v1036_v45 = vld [vmem:[%s1548_s25 + $0xe8] sm:$0xff]  ;;  %v1040_v47 = vld [vmem:[%s1548_s25 + $0xf8] sm:$0xff] }
 0x146   : > { %1031 = vst [vmem:[%s1619_s29 + $0x190] sm:$0xff] %v1030_v42  ;;  %1033 = vst [vmem:[%s1619_s29 + $0x198] sm:$0xff] %v1032_v43 }
 0x147   : > { %1035 = vst [vmem:[%s1619_s29 + $0x1c0] sm:$0xff] %v1034_v44  ;;  %1037 = vst [vmem:[%s1619_s29 + $0x1c8] sm:$0xff] %v1036_v45 }
 0x148   : > { %1039 = vst [vmem:[%s1619_s29 + $0x1d0] sm:$0xff] %v1038_v46  ;;  %1041 = vst [vmem:[%s1619_s29 + $0x1d8] sm:$0xff] %v1040_v47 }
 0x149 PF: > { %s13_s16 = sadd.s32 1, %s1332_s16   ;;  %s1702_s12 = smov %s1320_s13 }
 0x14a   : > { %p10_p12 = scmp.ge.s32.totalorder %s13_s16, 4   ;;  %s1703_s13 = smov %s1395_s22 }
 0x14b   : > { %s1704_s14 = smov %s1328_s15  ;;  %s1705_s15 = smov %s1707_s17 }
 0x14c   :  { %12 = sbr.rel (!%p10_p12) target bundleno = 3 (0x3), region = 127 }

// kernel: model_bert_forward.6
= control target key start
LH: loop header
LB: loop body
LE: loop exit
PB: predicated region body
PF: predicated region fallthrough
CT: control target
= control target key end

     0   :  { %s2328_s12 = smov 0   ;;  %s2330_s13 = smov 0   ;;  %s3110_s0 = inlined_call_operand.vmem [shape: f32[8,8,1024], index: 0, kind: input, shape index: {}]   ;;  %s3111_s1 = inlined_call_operand.vmem [shape: bf16[2,128,512], index: 1, kind: input, shape index: {}]   ;;  %s3112_s2 = inlined_call_operand.vmem [shape: f32[8,8,1], index: 2, kind: input, shape index: {}]   ;;  %s3113_s3 = inlined_call_operand.vmem [shape: f32[2,8,128], index: 3, kind: output, shape index: {}]  }
   0x1   :  { %s2332_s14 = smov 0   ;;  %s2334_s15 = smov 0  }
   0x2   :  { %s2336_s16 = smov 0  }
   0x3 LB: > { %s25_s17 = sadd.s32 1, %s2300_s15  ;;  %p49_p1 = scmp.ne.s32.totalorder %s2292_s13, %s2288_s12  ;;  %s2304_s16 = sphi %s2336_s16, %s13_s16   ;;  %s2300_s15 = sphi %s2334_s15, %s3117_s15   ;;  %s2296_s14 = sphi %s2332_s14, %s3116_s14   ;;  %s2292_s13 = sphi %s2330_s13, %s3115_s13   ;;  %s2288_s12 = sphi %s2328_s12, %s3114_s12  }
   0x4   : > { %p27_p0 = scmp.ge.s32.totalorder %s25_s17, 2  ;;  %p50_p2 = scmp.eq.s32.totalorder %s2304_s16, 0 }
   0x5   : > { %s42_s19 = sadd.s32 1, %s2292_s13  ;;  %p1894_p5 = scmp.ge.s32.totalorder %s2304_s16, 2 }
   0x6   : > { %s3119_s17 = smov (%p27_p0, %s25_s17), 0  ;;  %p51_p3 = por %p50_p2, %p49_p1 }
   0x7   : > { %s38_s18 = ssub.s32 %s2300_s15, %s3119_s17  ;;  %161 = sbr.rel (%p1894_p5) target bundleno = 34 (0x22), region = 16 }
   0x8   : > { %p40_p4 = scmp.eq.s32.totalorder %s38_s18, 0 }
   0xa   : > { %s2363_s20 = scalar_select %p40_p4, %s2292_s13, %s42_s19  }
   0xe   : > { %164 = sbr.rel (!%p51_p3) target bundleno = 34 (0x22), region = 20  ;;  %s166_s21 = sand.u32 (%p51_p3), 1, %s2292_s13  }
   0xf   : > { %s2010_s22 = sshll.u32 (%p51_p3), %s2300_s15, 5  ;;  %s1895_s23 = sshll.u32 (%p51_p3), %s166_s21, 8 }
  0x10   : > { %s2371_s26 = scalar_lea.vmem (%p51_p3), %s3110_s0, %s2010_s22  ;;  %s2376_s27 = scalar_lea.vmem (%p51_p3), [#allocation5], %s1895_s23 }
  0x11   : > { %v191_v0 = vld [vmem:[%s2371_s26] sm:$0xff] (%p51_p3)  ;;  %v193_v1 = vld [vmem:[%s2371_s26 + $0x8] sm:$0xff] (%p51_p3)  ;;  %v195_v2 = vld [vmem:[%s2371_s26 + $0x10] sm:$0xff] (%p51_p3) }
  0x12   : > { %192 = vst [vmem:[%s2376_s27] sm:$0xff] (%p51_p3), %v191_v0  ;;  %194 = vst [vmem:[%s2376_s27 + $0x8] sm:$0xff] (%p51_p3), %v193_v1  ;;  %v197_v3 = vld [vmem:[%s2371_s26 + $0x18] sm:$0xff] (%p51_p3)  ;;  %v199_v4 = vld [vmem:[%s2371_s26 + $0x40] sm:$0xff] (%p51_p3) }
  0x13   : > { %196 = vst [vmem:[%s2376_s27 + $0x10] sm:$0xff] (%p51_p3), %v195_v2  ;;  %v201_v5 = vld [vmem:[%s2371_s26 + $0x48] sm:$0xff] (%p51_p3)  ;;  %198 = vst [vmem:[%s2376_s27 + $0x18] sm:$0xff] (%p51_p3), %v197_v3  ;;  %v203_v6 = vld [vmem:[%s2371_s26 + $0x50] sm:$0xff] (%p51_p3) }
  0x14   : > { %200 = vst [vmem:[%s2376_s27 + $0x20] sm:$0xff] (%p51_p3), %v199_v4  ;;  %202 = vst [vmem:[%s2376_s27 + $0x28] sm:$0xff] (%p51_p3), %v201_v5  ;;  %v205_v7 = vld [vmem:[%s2371_s26 + $0x58] sm:$0xff] (%p51_p3)  ;;  %v207_v8 = vld [vmem:[%s2371_s26 + $0x80] sm:$0xff] (%p51_p3) }
  0x15   : > { %204 = vst [vmem:[%s2376_s27 + $0x30] sm:$0xff] %v203_v6  ;;  %206 = vst [vmem:[%s2376_s27 + $0x38] sm:$0xff] %v205_v7  ;;  %v209_v9 = vld [vmem:[%s2371_s26 + $0x88] sm:$0xff]  ;;  %v211_v10 = vld [vmem:[%s2371_s26 + $0x90] sm:$0xff] }
  0x16   : > { %208 = vst [vmem:[%s2376_s27 + $0x40] sm:$0xff] %v207_v8  ;;  %v213_v11 = vld [vmem:[%s2371_s26 + $0x98] sm:$0xff]  ;;  %210 = vst [vmem:[%s2376_s27 + $0x48] sm:$0xff] %v209_v9  ;;  %v215_v12 = vld [vmem:[%s2371_s26 + $0xc0] sm:$0xff] }
  0x17   : > { %212 = vst [vmem:[%s2376_s27 + $0x50] sm:$0xff] %v211_v10  ;;  %214 = vst [vmem:[%s2376_s27 + $0x58] sm:$0xff] %v213_v11  ;;  %v217_v13 = vld [vmem:[%s2371_s26 + $0xc8] sm:$0xff]  ;;  %v219_v14 = vld [vmem:[%s2371_s26 + $0xd0] sm:$0xff] }
  0x18   : > { %216 = vst [vmem:[%s2376_s27 + $0x60] sm:$0xff] %v215_v12  ;;  %218 = vst [vmem:[%s2376_s27 + $0x68] sm:$0xff] %v217_v13  ;;  %v221_v15 = vld [vmem:[%s2371_s26 + $0xd8] sm:$0xff]  ;;  %v223_v16 = vld [vmem:[%s2371_s26 + $0x100] sm:$0xff] }
  0x19   : > { %220 = vst [vmem:[%s2376_s27 + $0x70] sm:$0xff] %v219_v14  ;;  %v225_v17 = vld [vmem:[%s2371_s26 + $0x108] sm:$0xff]  ;;  %222 = vst [vmem:[%s2376_s27 + $0x78] sm:$0xff] %v221_v15  ;;  %v227_v18 = vld [vmem:[%s2371_s26 + $0x110] sm:$0xff] }
  0x1a   : > { %224 = vst [vmem:[%s2376_s27 + $0x80] sm:$0xff] %v223_v16  ;;  %226 = vst [vmem:[%s2376_s27 + $0x88] sm:$0xff] %v225_v17  ;;  %v229_v19 = vld [vmem:[%s2371_s26 + $0x118] sm:$0xff]  ;;  %v231_v20 = vld [vmem:[%s2371_s26 + $0x140] sm:$0xff] }
  0x1b   : > { %228 = vst [vmem:[%s2376_s27 + $0x90] sm:$0xff] %v227_v18  ;;  %230 = vst [vmem:[%s2376_s27 + $0x98] sm:$0xff] %v229_v19  ;;  %v233_v21 = vld [vmem:[%s2371_s26 + $0x148] sm:$0xff]  ;;  %v235_v22 = vld [vmem:[%s2371_s26 + $0x150] sm:$0xff] }
  0x1c   : > { %232 = vst [vmem:[%s2376_s27 + $0xa0] sm:$0xff] %v231_v20  ;;  %v237_v23 = vld [vmem:[%s2371_s26 + $0x158] sm:$0xff]  ;;  %234 = vst [vmem:[%s2376_s27 + $0xa8] sm:$0xff] %v233_v21  ;;  %v239_v24 = vld [vmem:[%s2371_s26 + $0x180] sm:$0xff] }
  0x1d   : > { %236 = vst [vmem:[%s2376_s27 + $0xb0] sm:$0xff] %v235_v22  ;;  %238 = vst [vmem:[%s2376_s27 + $0xb8] sm:$0xff] %v237_v23  ;;  %v241_v25 = vld [vmem:[%s2371_s26 + $0x188] sm:$0xff]  ;;  %v243_v26 = vld [vmem:[%s2371_s26 + $0x190] sm:$0xff] }
  0x1e   : > { %240 = vst [vmem:[%s2376_s27 + $0xc0] sm:$0xff] %v239_v24  ;;  %242 = vst [vmem:[%s2376_s27 + $0xc8] sm:$0xff] %v241_v25  ;;  %v245_v27 = vld [vmem:[%s2371_s26 + $0x198] sm:$0xff]  ;;  %v247_v28 = vld [vmem:[%s2371_s26 + $0x1c0] sm:$0xff] }
  0x1f   : > { %244 = vst [vmem:[%s2376_s27 + $0xd0] sm:$0xff] %v243_v26  ;;  %v249_v29 = vld [vmem:[%s2371_s26 + $0x1c8] sm:$0xff]  ;;  %246 = vst [vmem:[%s2376_s27 + $0xd8] sm:$0xff] %v245_v27  ;;  %v251_v30 = vld [vmem:[%s2371_s26 + $0x1d0] sm:$0xff] }
  0x20   : > { %248 = vst [vmem:[%s2376_s27 + $0xe0] sm:$0xff] %v247_v28  ;;  %250 = vst [vmem:[%s2376_s27 + $0xe8] sm:$0xff] %v249_v29  ;;  %v253_v31 = vld [vmem:[%s2371_s26 + $0x1d8] sm:$0xff] }
  0x21   : > { %252 = vst [vmem:[%s2376_s27 + $0xf0] sm:$0xff] %v251_v30  ;;  %254 = vst [vmem:[%s2376_s27 + $0xf8] sm:$0xff] %v253_v31 }
  0x22 PF: > { %p1899_p6 = scmp.ge.s32.totalorder %s2304_s16, 1  ;;  %p284_p7 = scmp.lt.s32.totalorder %s2304_s16, 3 }
  0x24   : > { %p285_p8 = pnand %p1899_p6, %p284_p7 }
  0x25   : > { %p333_p9 = scmp.lt.s32.totalorder (!%p285_p8), %s2296_s14, 1  ;;  %s1941_s28 = smul.u32 (!%p285_p8), 56, %s2296_s14  ;;  %v2306_v32 = vmov (!%p285_p8), 0   ;;  %v2307_v13 = vmov (!%p285_p8), 0.0|0.0  }
  0x26   : > { %288 = sbr.rel (%p285_p8) target bundleno = 2193 (0x891), region = 51  ;;  %598 = vmatprep.mubr.bf16.mxu0 (!%p285_p8), %v2306_v32  ;;  %639 = vmatprep.mubr.bf16.mxu1 (!%p285_p8), %v2306_v32  ;;  %s1970_s21 = sshll.u32 (!%p285_p8), %s2296_s14, 3 }
  0x27   : > { %2056 = vset.pattern.permute.xlu0 (!%p285_p8), %v2306_v32  ;;  %2057 = vset.pattern.permute.xlu1 (!%p285_p8), %v2306_v32  ;;  %s678_s5 = scalar_lea.vmem (!%p285_p8), %s3112_s2, %s1941_s28  ;;  %s1960_s10 = smul.u32 (!%p285_p8), 24, %s2296_s14 }
  0x28   : > { %v679_v33 = vld [vmem:[%s678_s5] sm:$0xff] (!%p285_p8)  ;;  %s1813_s24 = scalar_lea.vmem (!%p285_p8), %s3112_s2, %s1970_s21  ;;  %s1146_s25 = ssub.s32 (!%p285_p8), 4, %s2296_s14 }
  0x29   : > { %v686_v34 = vsub.f32 (!%p285_p8), 1.0, %v679_v33  ;;  %682 = vperm.xlu0 (!%p285_p8), %2056, %v679_v33   ;;  %s1807_s19 = scalar_lea.vmem (!%p285_p8), %s3112_s2, %s1960_s10  ;;  %v2511_v47 = vld [vmem:[%s1813_s24 + $0x18] sm:$0xff] (!%p285_p8)  ;;  %s1950_s26 = smul.u32 (!%p285_p8), 40, %s2296_s14 }
  0x2a   : > { %v2488_v42 = vld [vmem:[%s1807_s19 + $0x10] sm:$0xff] (!%p285_p8)  ;;  %s1977_s27 = sshll.u32 (!%p285_p8), %s1146_s25, 3  ;;  %s1986_s28 = smul.u32 (!%p285_p8), 4294967272, %s2296_s14  ;;  %v1129_v12 = vsub.f32 (!%p285_p8), 1.0, %v2511_v47 }
  0x2b   : > { %s1268_s5 = scalar_lea.vmem (!%p285_p8), %s3112_s2, %s1977_s27  ;;  %s1799_s8 = scalar_lea.vmem (!%p285_p8), %s3112_s2, %s1950_s26  ;;  %v982_v5 = vsub.f32 (!%p285_p8), 1.0, %v2488_v42 }
  0x2c   : > { %s1825_s18 = scalar_lea.vmem (!%p285_p8), %s3112_s2, %s1986_s28  ;;  %s1996_s19 = smul.u32 (!%p285_p8), 4294967256, %s2296_s14  ;;  %v1269_v61 = vld [vmem:[%s1268_s5] sm:$0xff] (!%p285_p8)  ;;  %v1951_v62 = vld [vmem:[%s1799_s8 + $0x8] sm:$0xff] (!%p285_p8) }
  0x2d   : > { %s2446_s29 = scalar_select %p333_p9, %s2296_s14, 1  ;;  %689 = vperm.xlu0 %2056, %v686_v34   ;;  %v834_v63 = vsub.f32 1.0, %v1951_v62  ;;  %830 = vperm.xlu1 %2057, %v1951_v62   ;;  %v1987_v1 = vld [vmem:[%s1825_s18 + $0x28] sm:$0xff]  ;;  %v1276_v14 = vsub.f32 1.0, %v1269_v61 }
  0x2e   : > { %s1833_s23 = scalar_lea.vmem %s3112_s2, %s1996_s19  ;;  %s2006_s24 = smul.u32 4294967240, %s2296_s14  ;;  %v1424_v15 = vsub.f32 1.0, %v1987_v1 }
  0x2f   : > { %s2011_s6 = sshll.u32 %s2446_s29, 8  ;;  %v1997_v7 = vld [vmem:[%s1833_s23 + $0x30] sm:$0xff]  ;;  %s291_s30 = sand.u32 1, %s2288_s12  }
  0x30   : > { %s2457_s9 = scalar_lea.vmem %s3111_s1, %s2011_s6  ;;  %s1841_s28 = scalar_lea.vmem %s3112_s2, %s2006_s24  ;;  %v1572_v16 = vsub.f32 1.0, %v1997_v7 }
  0x31   : > { %v2461_v35 = vld [vmem:[%s2457_s9 + $0x4] ss:$16 sps:$4 sm:$0xff]   ;;  %v2464_v36 = vld [vmem:[%s2457_s9] ss:$16 sps:$4 sm:$0xff]   ;;  %v2483_v40 = vld [vmem:[%s2457_s9 + $0xc] ss:$16 sps:$4 sm:$0xff]   ;;  %978 = vperm.xlu0 %2056, %v2488_v42   ;;  %837 = vperm.xlu1 %2057, %v834_v63  }
  0x32   : > { %566 = vmatprep.subr.bf16.mxu0 %v2461_v35  ;;  %v2468_v37 = vld [vmem:[%s2457_s9 + $0x24] ss:$16 sps:$4 sm:$0xff]   ;;  %v2472_v38 = vld [vmem:[%s2457_s9 + $0x20] ss:$16 sps:$4 sm:$0xff]   ;;  %v2486_v41 = vld [vmem:[%s2457_s9 + $0x8] ss:$16 sps:$4 sm:$0xff]   ;;  %607 = vmatprep.subr.bf16.mxu1 %v2483_v40 }
  0x33   : > { %567 = vmatpush1.bf16.msra.mxu0 %v2464_v36  ;;  %v2479_v39 = vld [vmem:[%s2457_s9 + $0x44] ss:$16 sps:$4 sm:$0xff]   ;;  %v2492_v43 = vld [vmem:[%s2457_s9 + $0x40] ss:$16 sps:$4 sm:$0xff]   ;;  %608 = vmatpush1.bf16.msra.mxu1 %v2486_v41  ;;  %v2504_v45 = vld [vmem:[%s2457_s9 + $0x2c] ss:$16 sps:$4 sm:$0xff]  }
  0x34   : > { %568 = vmatprep.subr.bf16.mxu0 %v2468_v37  ;;  %v2500_v44 = vld [vmem:[%s2457_s9 + $0x64] ss:$16 sps:$4 sm:$0xff]   ;;  %v2507_v46 = vld [vmem:[%s2457_s9 + $0x28] ss:$16 sps:$4 sm:$0xff]   ;;  %609 = vmatprep.subr.bf16.mxu1 %v2504_v45  ;;  %v2515_v48 = vld [vmem:[%s2457_s9 + $0x60] ss:$16 sps:$4 sm:$0xff]  }
  0x35   : > { %v2518_v49 = vld [vmem:[%s2457_s9 + $0x84] ss:$16 sps:$4 sm:$0xff]   ;;  %v2521_v50 = vld [vmem:[%s2457_s9 + $0x4c] ss:$16 sps:$4 sm:$0xff]   ;;  %v2526_v51 = vld [vmem:[%s2457_s9 + $0x48] ss:$16 sps:$4 sm:$0xff]   ;;  %1125 = vperm.xlu0 %2056, %v2511_v47   ;;  %985 = vperm.xlu1 %2057, %v982_v5  }
  0x36   : > { %v2531_v52 = vld [vmem:[%s2457_s9 + $0x6c] ss:$16 sps:$4 sm:$0xff]   ;;  %v2537_v53 = vld [vmem:[%s2457_s9 + $0x80] ss:$16 sps:$4 sm:$0xff]   ;;  %v2543_v54 = vld [vmem:[%s2457_s9 + $0xa4] ss:$16 sps:$4 sm:$0xff]  }
  0x37   : > { %569 = vmatpush1.bf16.msra.mxu0 %v2472_v38  ;;  %610 = vmatpush1.bf16.msra.mxu1 %v2507_v46  ;;  %v2547_v55 = vld [vmem:[%s2457_s9 + $0x68] ss:$16 sps:$4 sm:$0xff]   ;;  %v2552_v56 = vld [vmem:[%s2457_s9 + $0x8c] ss:$16 sps:$4 sm:$0xff]   ;;  %v2562_v57 = vld [vmem:[%s2457_s9 + $0xa0] ss:$16 sps:$4 sm:$0xff]  }
  0x38   : > { %570 = vmatprep.subr.bf16.mxu0 %v2479_v39  ;;  %611 = vmatprep.subr.bf16.mxu1 %v2521_v50  ;;  %v2565_v58 = vld [vmem:[%s2457_s9 + $0xc4] ss:$16 sps:$4 sm:$0xff]   ;;  %v2570_v59 = vld [vmem:[%s2457_s9 + $0x88] ss:$16 sps:$4 sm:$0xff]   ;;  %v2578_v60 = vld [vmem:[%s2457_s9 + $0xac] ss:$16 sps:$4 sm:$0xff]  }
  0x39   : > { %1272 = vperm.xlu0 %2056, %v1269_v61   ;;  %v2582_v0 = vld [vmem:[%s2457_s9 + $0xc0] ss:$16 sps:$4 sm:$0xff]   ;;  %v2586_v2 = vld [vmem:[%s2457_s9 + $0xe4] ss:$16 sps:$4 sm:$0xff]   ;;  %v2590_v3 = vld [vmem:[%s2457_s9 + $0xa8] ss:$16 sps:$4 sm:$0xff]   ;;  %1132 = vperm.xlu1 %2057, %v1129_v12  }
  0x3a   : > { %v2598_v4 = vld [vmem:[%s2457_s9 + $0xcc] ss:$16 sps:$4 sm:$0xff]   ;;  %v2603_v6 = vld [vmem:[%s2457_s9 + $0xe0] ss:$16 sps:$4 sm:$0xff]   ;;  %v2608_v8 = vld [vmem:[%s2457_s9 + $0xc8] ss:$16 sps:$4 sm:$0xff]  }
  0x3b   : > { %571 = vmatpush1.bf16.msra.mxu0 %v2492_v43  ;;  %612 = vmatpush1.bf16.msra.mxu1 %v2526_v51  ;;  %v2615_v9 = vld [vmem:[%s2457_s9 + $0xec] ss:$16 sps:$4 sm:$0xff]   ;;  %v2620_v11 = vld [vmem:[%s2457_s9 + $0xe8] ss:$16 sps:$4 sm:$0xff]   ;;  %s1900_s4 = sshll.u32 %s291_s30, 8  ;;  %s2012_s5 = smul.u32 224, %s2296_s14 }
  0x3c   : > { %572 = vmatprep.subr.bf16.mxu0 %v2500_v44  ;;  %613 = vmatprep.subr.bf16.mxu1 %v2531_v52  ;;  %v2007_v10 = vld [vmem:[%s1841_s28 + $0x38] sm:$0xff]  ;;  %s2663_s6 = scalar_lea.vmem [#allocation5], %s1900_s4  ;;  %s1942_s12 = smul.u32 160, %s2296_s14 }
  0x3d   : > { %1420 = vperm.xlu0 %2056, %v1987_v1   ;;  %1279 = vperm.xlu1 %2057, %v1276_v14   ;;  %s399_s7 = scalar_lea.vmem %s2663_s6, %s2012_s5 [#allocation5]  ;;  %s1952_s10 = smul.u32 96, %s2296_s14 }
  0x3e   : > { %v400_v17 = vld [vmem:[%s399_s7] sm:$0xff]  ;;  %v401_v18 = vld [vmem:[%s399_s7 + $0x8] sm:$0xff]  ;;  %v403_v27 = vld [vmem:[%s399_s7 + $0x18] sm:$0xff]  ;;  %s1795_s8 = scalar_lea.vmem %s2663_s6, %s1942_s12 [#allocation5]  ;;  %s1962_s18 = sshll.u32 %s2296_s14, 5 }
  0x3f   : > { %573 = vmatpush1.bf16.msra.mxu0 %v2515_v48  ;;  %614 = vmatpush1.bf16.msra.mxu1 %v2547_v55  ;;  %v402_v34 = vld [vmem:[%s399_s7 + $0x10] sm:$0xff]  ;;  %s1803_s11 = scalar_lea.vmem %s2663_s6, %s1952_s10 [#allocation5]  ;;  %s1810_s19 = scalar_lea.vmem %s2663_s6, %s1962_s18 [#allocation5] }
  0x40   : > { %574 = vmatprep.subr.bf16.mxu0 %v2518_v49  ;;  %615 = vmatprep.subr.bf16.mxu1 %v2552_v56  ;;  %s2013_s21 = sshll.u32 %s1146_s25, 5  ;;  %s1978_s25 = smul.u32 4294967200, %s2296_s14 }
  0x41   : > { %1568 = vperm.xlu0 %2056, %v1997_v7   ;;  %1427 = vperm.xlu1 %2057, %v1424_v15   ;;  %s1149_s22 = scalar_lea.vmem %s2663_s6, %s2013_s21 [#allocation5]  ;;  %s1988_s24 = smul.u32 4294967136, %s2296_s14 }
  0x42   : > { %s1821_s23 = scalar_lea.vmem %s2663_s6, %s1978_s25 [#allocation5] }
  0x43   : > { %575 = vmatpush1.bf16.msra.mxu0 %v2537_v53  ;;  %616 = vmatpush1.bf16.msra.mxu1 %v2570_v59  ;;  %s1829_s26 = scalar_lea.vmem %s2663_s6, %s1988_s24 [#allocation5] }
  0x44   : > { %576 = vmatprep.subr.bf16.mxu0 %v2543_v54  ;;  %617 = vmatprep.subr.bf16.mxu1 %v2578_v60 }
  0x45   : > { %1716 = vperm.xlu0 %2056, %v2007_v10   ;;  %1575 = vperm.xlu1 %2057, %v1572_v16  }
  0x47   : > { %577 = vmatpush1.bf16.msra.mxu0 %v2562_v57  ;;  %618 = vmatpush1.bf16.msra.mxu1 %v2590_v3 }
  0x48   : > { %578 = vmatprep.subr.bf16.mxu0 %v2565_v58  ;;  %619 = vmatprep.subr.bf16.mxu1 %v2598_v4 }
  0x4b   : > { %579 = vmatpush1.bf16.msra.mxu0 %v2582_v0  ;;  %620 = vmatpush1.bf16.msra.mxu1 %v2608_v8 }
  0x4c   : > { %580 = vmatprep.subr.bf16.mxu0 %v2586_v2  ;;  %621 = vmatprep.subr.bf16.mxu1 %v2615_v9 }
  0x4f   : > { %581 = vmatpush1.bf16.msra.mxu0 %v2603_v6  ;;  %622 = vmatpush1.bf16.msra.mxu1 %v2620_v11 }
  0x50   : > { %714 = vmatprep.subr.bf16.mxu0 %v2461_v35  ;;  %755 = vmatprep.subr.bf16.mxu1 %v2483_v40 }
  0x52   : > { %599 = vmatmul.mubr.bf16.vlgmr.msra.gmra.mrb[0].mxu0 %v2307_v13  ;;  %640 = vmatmul.mubr.bf16.vlgmr.msra.gmra.mrb[0].mxu1 %v2307_v13 }
  0x53   : > { %715 = vmatpush1.bf16.msra.mxu0 %v2464_v36  ;;  %746 = vmatprep.mubr.bf16.mxu0 %v2306_v32 }
  0x54   : > { %716 = vmatprep.subr.bf16.mxu0 %v2468_v37  ;;  %756 = vmatpush1.bf16.msra.mxu1 %v2486_v41 }
  0x55   : > { %757 = vmatprep.subr.bf16.mxu1 %v2504_v45  ;;  %787 = vmatprep.mubr.bf16.mxu1 %v2306_v32 }
  0x57   : > { %717 = vmatpush1.bf16.msra.mxu0 %v2472_v38 }
  0x58   : > { %718 = vmatprep.subr.bf16.mxu0 %v2479_v39  ;;  %758 = vmatpush1.bf16.msra.mxu1 %v2507_v46 }
  0x59   : > { %759 = vmatprep.subr.bf16.mxu1 %v2521_v50 }
  0x5b   : > { %719 = vmatpush1.bf16.msra.mxu0 %v2492_v43 }
  0x5c   : > { %720 = vmatprep.subr.bf16.mxu0 %v2500_v44  ;;  %760 = vmatpush1.bf16.msra.mxu1 %v2526_v51 }
  0x5d   : > { %761 = vmatprep.subr.bf16.mxu1 %v2531_v52 }
  0x5f   : > { %721 = vmatpush1.bf16.msra.mxu0 %v2515_v48 }
  0x60   : > { %722 = vmatprep.subr.bf16.mxu0 %v2518_v49  ;;  %762 = vmatpush1.bf16.msra.mxu1 %v2547_v55 }
  0x61   : > { %763 = vmatprep.subr.bf16.mxu1 %v2552_v56 }
  0x63   : > { %723 = vmatpush1.bf16.msra.mxu0 %v2537_v53 }
  0x64   : > { %724 = vmatprep.subr.bf16.mxu0 %v2543_v54  ;;  %764 = vmatpush1.bf16.msra.mxu1 %v2570_v59 }
  0x65   : > { %765 = vmatprep.subr.bf16.mxu1 %v2578_v60 }
  0x67   : > { %725 = vmatpush1.bf16.msra.mxu0 %v2562_v57 }
  0x68   : > { %726 = vmatprep.subr.bf16.mxu0 %v2565_v58  ;;  %766 = vmatpush1.bf16.msra.mxu1 %v2590_v3 }
  0x69   : > { %767 = vmatprep.subr.bf16.mxu1 %v2598_v4 }
  0x6b   : > { %727 = vmatpush1.bf16.msra.mxu0 %v2582_v0 }
  0x6c   : > { %728 = vmatprep.subr.bf16.mxu0 %v2586_v2  ;;  %768 = vmatpush1.bf16.msra.mxu1 %v2608_v8 }
  0x6d   : > { %769 = vmatprep.subr.bf16.mxu1 %v2615_v9 }
  0x6f   : > { %729 = vmatpush1.bf16.msra.mxu0 %v2603_v6 }
  0x70   : > { %862 = vmatprep.subr.bf16.mxu0 %v2461_v35  ;;  %770 = vmatpush1.bf16.msra.mxu1 %v2620_v11 }
  0x71   : > { %903 = vmatprep.subr.bf16.mxu1 %v2483_v40 }
  0xa8   : > { %v683_v7 = vpop.permute.xlu0 %682 }
 0x125   : > { %v600_v19 = vpop.f32.mrb[0].mxu0  ;;  %v641_v28 = vpop.f32.mrb[0].mxu1 }
 0x126   : > { %v648_v20 = vadd.f32 %v600_v19, %v400_v17  ;;  %v602_v21 = vpop.f32.mrb[1].mxu0  ;;  %v643_v29 = vpop.f32.mrb[1].mxu1  ;;  %v650_v47 = vadd.f32 %v641_v28, %v402_v34  ;;  %v1943_v28 = vld [vmem:[%s1795_s8 + $0x20] sm:$0xff] }
 0x127   : > { %v649_v22 = vadd.f32 %v602_v21, %v401_v18  ;;  %v604_v23 = vpop.f32.mrb[2].mxu0  ;;  %v651_v30 = vadd.f32 %v643_v29, %v403_v27  ;;  %v645_v31 = vpop.f32.mrb[2].mxu1  ;;  %v1944_v29 = vld [vmem:[%s1795_s8 + $0x28] sm:$0xff] }
 0x128   : > { %v1938_v24 = vmul.f32 -1.442695, %v648_v20  ;;  %v605_v25 = vpop.f32.mrb[3].mxu0  ;;  %v646_v33 = vpop.f32.mrb[3].mxu1 }
 0x129   : > { %v1939_v26 = vmul.f32 -1.442695, %v649_v22  ;;  %v1940_v42 = vmul.f32 -1.442695, %v651_v30  ;;  %v690_v17 = vpop.permute.xlu0 %689 }
 0x12a   : > { %2106 = vpow2.f32 %v1938_v24  ;;  %v692_v19 = vmul.f32 0.0, %v690_v17 }
 0x12b   : > { %2108 = vpow2.f32 %v1939_v26 }
 0x12c   : > { %2110 = vpow2.f32 %v1940_v42 }
 0x12d   : > { %2112 = vtanh.f32 %v650_v47 }
 0x134   : > { %v2107_v61 = vpop.eup %2106 }
 0x135   : > { %v2109_v62 = vpop.eup %2108  ;;  %v655_v63 = vadd.f32 1.0, %v2107_v61 }
 0x136   : > { %v661_v1 = vadd.f32 1.0, %v2109_v62  ;;  %v2111_v5 = vpop.eup %2110 }
 0x137   : > { %2114 = vrcp.f32 %v655_v63  ;;  %v2113_v10 = vpop.eup %2112  ;;  %v668_v13 = vadd.f32 1.0, %v2111_v5 }
 0x138   : > { %2116 = vrcp.f32 %v661_v1 }
 0x139   : > { %2118 = vrcp.f32 %v668_v13  ;;  %v1945_v13 = vld [vmem:[%s1795_s8 + $0x30] sm:$0xff] }
 0x141   : > { %v2115_v12 = vpop.eup %2114 }
 0x142   : > { %v2117_v14 = vpop.eup %2116  ;;  %v673_v15 = vmul.f32 %v2115_v12, %v2113_v10  ;;  %v1946_v10 = vld [vmem:[%s1795_s8 + $0x38] sm:$0xff] }
 0x143   : > { %v672_v16 = vmul.f32 0.0, %v2117_v14  ;;  %v2119_v22 = vpop.eup %2118 }
 0x145   : > { %v674_v18 = vadd.f32 %v673_v15, %v672_v16 }
 0x147   : > { %2120 = vtanh.f32 %v674_v18  ;;  %v685_v20 = vmul.f32 %v683_v7, %v674_v18 }
 0x149   : > { %v2666_v21 = vadd.f32 %v692_v19, %v685_v20 }
 0x151   : > { %v2121_v23 = vpop.eup %2120 }
 0x152   : > { %v676_v24 = vmul.f32 %v2121_v23, %v2119_v22 }
 0x154   : > { %v2668_v25 = vmul.f32 %v683_v7, %v676_v24 }
 0x156   : > { %v2671_v26 = vadd.f32 %v2668_v25, %v692_v19 }
 0x158   : > { %v713_v27 = vpack.c.bf16 %v2671_v26, %v2671_v26 }
 0x15a   : > { %747 = vmatmul.mubr.bf16.vlgmr.msra.gmra.mrb[4].mxu0 %v713_v27  ;;  %788 = vmatmul.mubr.bf16.vlgmr.msra.gmra.mrb[4].mxu1 %v713_v27 }
 0x15b   : > { %863 = vmatpush1.bf16.msra.mxu0 %v2464_v36  ;;  %904 = vmatpush1.bf16.msra.mxu1 %v2486_v41 }
 0x15c   : > { %864 = vmatprep.subr.bf16.mxu0 %v2468_v37  ;;  %905 = vmatprep.subr.bf16.mxu1 %v2504_v45 }
 0x15d   : > { %894 = vmatprep.mubr.bf16.mxu0 %v2306_v32  ;;  %935 = vmatprep.mubr.bf16.mxu1 %v2306_v32 }
 0x15f   : > { %865 = vmatpush1.bf16.msra.mxu0 %v2472_v38  ;;  %906 = vmatpush1.bf16.msra.mxu1 %v2507_v46 }
 0x160   : > { %866 = vmatprep.subr.bf16.mxu0 %v2479_v39  ;;  %907 = vmatprep.subr.bf16.mxu1 %v2521_v50 }
 0x163   : > { %867 = vmatpush1.bf16.msra.mxu0 %v2492_v43  ;;  %908 = vmatpush1.bf16.msra.mxu1 %v2526_v51 }
 0x164   : > { %868 = vmatprep.subr.bf16.mxu0 %v2500_v44  ;;  %909 = vmatprep.subr.bf16.mxu1 %v2531_v52 }
 0x167   : > { %869 = vmatpush1.bf16.msra.mxu0 %v2515_v48  ;;  %910 = vmatpush1.bf16.msra.mxu1 %v2547_v55 }
 0x168   : > { %870 = vmatprep.subr.bf16.mxu0 %v2518_v49  ;;  %911 = vmatprep.subr.bf16.mxu1 %v2552_v56 }
 0x16b   : > { %871 = vmatpush1.bf16.msra.mxu0 %v2537_v53  ;;  %912 = vmatpush1.bf16.msra.mxu1 %v2570_v59 }
 0x16c   : > { %872 = vmatprep.subr.bf16.mxu0 %v2543_v54  ;;  %913 = vmatprep.subr.bf16.mxu1 %v2578_v60 }
 0x16f   : > { %873 = vmatpush1.bf16.msra.mxu0 %v2562_v57  ;;  %914 = vmatpush1.bf16.msra.mxu1 %v2590_v3 }
 0x170   : > { %874 = vmatprep.subr.bf16.mxu0 %v2565_v58  ;;  %915 = vmatprep.subr.bf16.mxu1 %v2598_v4 }
 0x173   : > { %875 = vmatpush1.bf16.msra.mxu0 %v2582_v0  ;;  %916 = vmatpush1.bf16.msra.mxu1 %v2608_v8 }
 0x174   : > { %876 = vmatprep.subr.bf16.mxu0 %v2586_v2  ;;  %917 = vmatprep.subr.bf16.mxu1 %v2615_v9 }
 0x177   : > { %877 = vmatpush1.bf16.msra.mxu0 %v2603_v6  ;;  %918 = vmatpush1.bf16.msra.mxu1 %v2620_v11 }
 0x178   : > { %1009 = vmatprep.subr.bf16.mxu0 %v2461_v35  ;;  %1050 = vmatprep.subr.bf16.mxu1 %v2483_v40 }
 0x22d   : > { %v748_v30 = vpop.f32.mrb[4].mxu0  ;;  %v789_v31 = vpop.f32.mrb[4].mxu1 }
 0x22e   : > { %v796_v33 = vadd.f32 %v1943_v28, %v748_v30  ;;  %v750_v34 = vpop.f32.mrb[5].mxu0  ;;  %v791_v42 = vpop.f32.mrb[5].mxu1  ;;  %v798_v15 = vadd.f32 %v1945_v13, %v789_v31 }
 0x22f   : > { %v797_v47 = vadd.f32 %v1944_v29, %v750_v34  ;;  %v752_v61 = vpop.f32.mrb[6].mxu0  ;;  %v793_v62 = vpop.f32.mrb[6].mxu1  ;;  %v799_v12 = vadd.f32 %v1946_v10, %v791_v42 }
 0x230   : > { %v1947_v63 = vmul.f32 -1.442695, %v796_v33  ;;  %v753_v1 = vpop.f32.mrb[7].mxu0  ;;  %v794_v5 = vpop.f32.mrb[7].mxu1 }
 0x231   : > { %v1948_v7 = vmul.f32 -1.442695, %v797_v47  ;;  %v1949_v14 = vmul.f32 -1.442695, %v799_v12  ;;  %v2715_v31 = vpop.permute.xlu1 %830  ;;  %v1954_v5 = vld [vmem:[%s1803_s11 + $0x48] sm:$0xff] }
 0x232   : > { %2122 = vpow2.f32 %v1947_v63 }
 0x233   : > { %2124 = vpow2.f32 %v1948_v7 }
 0x234   : > { %2126 = vpow2.f32 %v1949_v14 }
 0x235   : > { %2128 = vtanh.f32 %v798_v15  ;;  %v2717_v47 = vpop.permute.xlu1 %837 }
 0x236   : > { %v845_v61 = vmul.f32 %v2717_v47, %v2671_v26  ;;  %v1953_v26 = vld [vmem:[%s1803_s11 + $0x40] sm:$0xff] }
 0x23c   : > { %v2123_v16 = vpop.eup %2122 }
 0x23d   : > { %v2125_v17 = vpop.eup %2124  ;;  %v803_v18 = vadd.f32 1.0, %v2123_v16 }
 0x23e   : > { %v809_v19 = vadd.f32 1.0, %v2125_v17  ;;  %v2127_v20 = vpop.eup %2126 }
 0x23f   : > { %2130 = vrcp.f32 %v803_v18  ;;  %v2129_v22 = vpop.eup %2128  ;;  %v816_v27 = vadd.f32 1.0, %v2127_v20 }
 0x240   : > { %2132 = vrcp.f32 %v809_v19 }
 0x241   : > { %2134 = vrcp.f32 %v816_v27  ;;  %v1955_v27 = vld [vmem:[%s1803_s11 + $0x50] sm:$0xff] }
 0x249   : > { %v2131_v23 = vpop.eup %2130 }
 0x24a   : > { %v2133_v24 = vpop.eup %2132  ;;  %v821_v28 = vmul.f32 %v2131_v23, %v2129_v22  ;;  %v1956_v23 = vld [vmem:[%s1803_s11 + $0x58] sm:$0xff] }
 0x24b   : > { %v820_v29 = vmul.f32 %v2133_v24, %v2666_v21  ;;  %v2135_v33 = vpop.eup %2134 }
 0x24d   : > { %v2712_v30 = vadd.f32 %v821_v28, %v820_v29 }
 0x24f   : > { %2136 = vtanh.f32 %v2712_v30 }
 0x259   : > { %v2137_v34 = vpop.eup %2136 }
 0x25a   : > { %v824_v42 = vmul.f32 %v2137_v34, %v2135_v33 }
 0x25c   : > { %v2722_v62 = vmul.f32 %v2715_v31, %v824_v42 }
 0x25e   : > { %v2725_v63 = vadd.f32 %v845_v61, %v2722_v62 }
 0x260   : > { %v861_v1 = vpack.c.bf16 %v2725_v63, %v2725_v63 }
 0x262   : > { %895 = vmatmul.mubr.bf16.vlgmr.msra.gmra.mrb[8].mxu0 %v861_v1  ;;  %936 = vmatmul.mubr.bf16.vlgmr.msra.gmra.mrb[8].mxu1 %v861_v1  ;;  %v833_v1 = vmul.f32 %v2715_v31, %v2712_v30 }
 0x263   : > { %1010 = vmatpush1.bf16.msra.mxu0 %v2464_v36  ;;  %1051 = vmatpush1.bf16.msra.mxu1 %v2486_v41 }
 0x264   : > { %1011 = vmatprep.subr.bf16.mxu0 %v2468_v37  ;;  %1052 = vmatprep.subr.bf16.mxu1 %v2504_v45 }
 0x265   : > { %1041 = vmatprep.mubr.bf16.mxu0 %v2306_v32  ;;  %1082 = vmatprep.mubr.bf16.mxu1 %v2306_v32 }
 0x267   : > { %1012 = vmatpush1.bf16.msra.mxu0 %v2472_v38  ;;  %1053 = vmatpush1.bf16.msra.mxu1 %v2507_v46 }
 0x268   : > { %1013 = vmatprep.subr.bf16.mxu0 %v2479_v39  ;;  %1054 = vmatprep.subr.bf16.mxu1 %v2521_v50 }
 0x26b   : > { %1014 = vmatpush1.bf16.msra.mxu0 %v2492_v43  ;;  %1055 = vmatpush1.bf16.msra.mxu1 %v2526_v51 }
 0x26c   : > { %1015 = vmatprep.subr.bf16.mxu0 %v2500_v44  ;;  %1056 = vmatprep.subr.bf16.mxu1 %v2531_v52 }
 0x26f   : > { %1016 = vmatpush1.bf16.msra.mxu0 %v2515_v48  ;;  %1057 = vmatpush1.bf16.msra.mxu1 %v2547_v55 }
 0x270   : > { %1017 = vmatprep.subr.bf16.mxu0 %v2518_v49  ;;  %1058 = vmatprep.subr.bf16.mxu1 %v2552_v56 }
 0x273   : > { %1018 = vmatpush1.bf16.msra.mxu0 %v2537_v53  ;;  %1059 = vmatpush1.bf16.msra.mxu1 %v2570_v59 }
 0x274   : > { %1019 = vmatprep.subr.bf16.mxu0 %v2543_v54  ;;  %1060 = vmatprep.subr.bf16.mxu1 %v2578_v60 }
 0x277   : > { %1020 = vmatpush1.bf16.msra.mxu0 %v2562_v57  ;;  %1061 = vmatpush1.bf16.msra.mxu1 %v2590_v3 }
 0x278   : > { %1021 = vmatprep.subr.bf16.mxu0 %v2565_v58  ;;  %1062 = vmatprep.subr.bf16.mxu1 %v2598_v4 }
 0x27b   : > { %1022 = vmatpush1.bf16.msra.mxu0 %v2582_v0  ;;  %1063 = vmatpush1.bf16.msra.mxu1 %v2608_v8 }
 0x27c   : > { %1023 = vmatprep.subr.bf16.mxu0 %v2586_v2  ;;  %1064 = vmatprep.subr.bf16.mxu1 %v2615_v9 }
 0x27f   : > { %1024 = vmatpush1.bf16.msra.mxu0 %v2603_v6  ;;  %1065 = vmatpush1.bf16.msra.mxu1 %v2620_v11 }
 0x280   : > { %1156 = vmatprep.subr.bf16.mxu0 %v2461_v35  ;;  %1197 = vmatprep.subr.bf16.mxu1 %v2483_v40 }
 0x335   : > { %v896_v7 = vpop.f32.mrb[8].mxu0  ;;  %v937_v10 = vpop.f32.mrb[8].mxu1 }
 0x336   : > { %v944_v12 = vadd.f32 %v1953_v26, %v896_v7  ;;  %v898_v13 = vpop.f32.mrb[9].mxu0  ;;  %v939_v14 = vpop.f32.mrb[9].mxu1  ;;  %v946_v29 = vadd.f32 %v1955_v27, %v937_v10 }
 0x337   : > { %v945_v15 = vadd.f32 %v1954_v5, %v898_v13  ;;  %v900_v16 = vpop.f32.mrb[10].mxu0  ;;  %v941_v17 = vpop.f32.mrb[10].mxu1  ;;  %v947_v24 = vadd.f32 %v1956_v23, %v939_v14  ;;  %v840_v5 = vmul.f32 %v2717_v47, %v2666_v21  ;;  %v849_v47 = vadd.f32 %v2722_v62, %v2668_v25  ;;  %v1963_v25 = vld [vmem:[%s1810_s19 + $0x60] sm:$0xff]  ;;  %v1964_v62 = vld [vmem:[%s1810_s19 + $0x68] sm:$0xff] }
 0x338   : > { %v1957_v18 = vmul.f32 -1.442695, %v944_v12  ;;  %v901_v19 = vpop.f32.mrb[11].mxu0  ;;  %v942_v20 = vpop.f32.mrb[11].mxu1 }
 0x339   : > { %v1958_v22 = vmul.f32 -1.442695, %v945_v15  ;;  %v1959_v28 = vmul.f32 -1.442695, %v947_v24  ;;  %v2769_v13 = vadd.f32 %v840_v5, %v833_v1  ;;  %v2775_v19 = vpop.permute.xlu0 %978  ;;  %v2777_v21 = vpop.permute.xlu1 %985 }
 0x33a   : > { %2138 = vpow2.f32 %v1957_v18  ;;  %v993_v20 = vmul.f32 %v2777_v21, %v2725_v63 }
 0x33b   : > { %2140 = vpow2.f32 %v1958_v22 }
 0x33c   : > { %2142 = vpow2.f32 %v1959_v28 }
 0x33d   : > { %2144 = vtanh.f32 %v946_v29 }
 0x344   : > { %v2139_v33 = vpop.eup %2138 }
 0x345   : > { %v2141_v34 = vpop.eup %2140  ;;  %v951_v42 = vadd.f32 1.0, %v2139_v33 }
 0x346   : > { %v957_v61 = vadd.f32 1.0, %v2141_v34  ;;  %v2143_v26 = vpop.eup %2142 }
 0x347   : > { %2146 = vrcp.f32 %v951_v42  ;;  %v2145_v7 = vpop.eup %2144  ;;  %v964_v15 = vadd.f32 1.0, %v2143_v26 }
 0x348   : > { %2148 = vrcp.f32 %v957_v61 }
 0x349   : > { %2150 = vrcp.f32 %v964_v15 }
 0x351   : > { %v2147_v12 = vpop.eup %2146 }
 0x352   : > { %v2149_v10 = vpop.eup %2148  ;;  %v969_v14 = vmul.f32 %v2147_v12, %v2145_v7 }
 0x353   : > { %v968_v16 = vmul.f32 %v2149_v10, %v2769_v13  ;;  %v2151_v18 = vpop.eup %2150  ;;  %v1965_v10 = vld [vmem:[%s1810_s19 + $0x70] sm:$0xff] }
 0x355   : > { %v2772_v17 = vadd.f32 %v969_v14, %v968_v16 }
 0x357   : > { %2152 = vtanh.f32 %v2772_v17 }
 0x361   : > { %v2153_v30 = vpop.eup %2152 }
 0x362   : > { %v972_v31 = vmul.f32 %v2153_v30, %v2151_v18 }
 0x364   : > { %v991_v22 = vmul.f32 %v2775_v19, %v972_v31 }
 0x366   : > { %v2784_v23 = vadd.f32 %v993_v20, %v991_v22  ;;  %v2786_v24 = vadd.f32 %v991_v22, %v849_v47  ;;  %v981_v47 = vmul.f32 %v2775_v19, %v2772_v17  ;;  %v988_v22 = vmul.f32 %v2777_v21, %v2769_v13  ;;  %v2838_v13 = vpop.permute.xlu1 %1132 }
 0x368   : > { %v1008_v27 = vpack.c.bf16 %v2784_v23, %v2784_v23 }
 0x36a   : > { %1042 = vmatmul.mubr.bf16.vlgmr.msra.gmra.mrb[12].mxu0 %v1008_v27  ;;  %1083 = vmatmul.mubr.bf16.vlgmr.msra.gmra.mrb[12].mxu1 %v1008_v27 }
 0x36b   : > { %1157 = vmatpush1.bf16.msra.mxu0 %v2464_v36  ;;  %1198 = vmatpush1.bf16.msra.mxu1 %v2486_v41 }
 0x36c   : > { %1158 = vmatprep.subr.bf16.mxu0 %v2468_v37  ;;  %1199 = vmatprep.subr.bf16.mxu1 %v2504_v45 }
 0x36d   : > { %1188 = vmatprep.mubr.bf16.mxu0 %v2306_v32  ;;  %1229 = vmatprep.mubr.bf16.mxu1 %v2306_v32 }
 0x36f   : > { %1159 = vmatpush1.bf16.msra.mxu0 %v2472_v38  ;;  %1200 = vmatpush1.bf16.msra.mxu1 %v2507_v46 }
 0x370   : > { %1160 = vmatprep.subr.bf16.mxu0 %v2479_v39  ;;  %1201 = vmatprep.subr.bf16.mxu1 %v2521_v50 }
 0x373   : > { %1161 = vmatpush1.bf16.msra.mxu0 %v2492_v43  ;;  %1202 = vmatpush1.bf16.msra.mxu1 %v2526_v51 }
 0x374   : > { %1162 = vmatprep.subr.bf16.mxu0 %v2500_v44  ;;  %1203 = vmatprep.subr.bf16.mxu1 %v2531_v52 }
 0x377   : > { %1163 = vmatpush1.bf16.msra.mxu0 %v2515_v48  ;;  %1204 = vmatpush1.bf16.msra.mxu1 %v2547_v55 }
 0x378   : > { %1164 = vmatprep.subr.bf16.mxu0 %v2518_v49  ;;  %1205 = vmatprep.subr.bf16.mxu1 %v2552_v56 }
 0x37b   : > { %1165 = vmatpush1.bf16.msra.mxu0 %v2537_v53  ;;  %1206 = vmatpush1.bf16.msra.mxu1 %v2570_v59 }
 0x37c   : > { %1166 = vmatprep.subr.bf16.mxu0 %v2543_v54  ;;  %1207 = vmatprep.subr.bf16.mxu1 %v2578_v60 }
 0x37f   : > { %1167 = vmatpush1.bf16.msra.mxu0 %v2562_v57  ;;  %1208 = vmatpush1.bf16.msra.mxu1 %v2590_v3 }
 0x380   : > { %1168 = vmatprep.subr.bf16.mxu0 %v2565_v58  ;;  %1209 = vmatprep.subr.bf16.mxu1 %v2598_v4 }
 0x383   : > { %1169 = vmatpush1.bf16.msra.mxu0 %v2582_v0  ;;  %1210 = vmatpush1.bf16.msra.mxu1 %v2608_v8 }
 0x384   : > { %1170 = vmatprep.subr.bf16.mxu0 %v2586_v2  ;;  %1211 = vmatprep.subr.bf16.mxu1 %v2615_v9 }
 0x387   : > { %1171 = vmatpush1.bf16.msra.mxu0 %v2603_v6  ;;  %1212 = vmatpush1.bf16.msra.mxu1 %v2620_v11 }
 0x388   : > { %1304 = vmatprep.subr.bf16.mxu0 %v2461_v35  ;;  %1345 = vmatprep.subr.bf16.mxu1 %v2483_v40  ;;  %v1966_v35 = vld [vmem:[%s1810_s19 + $0x78] sm:$0xff] }
 0x43d   : > { %v1043_v63 = vpop.f32.mrb[12].mxu0  ;;  %v1084_v28 = vpop.f32.mrb[12].mxu1 }
 0x43e   : > { %v1091_v29 = vadd.f32 %v1963_v25, %v1043_v63  ;;  %v1045_v33 = vpop.f32.mrb[13].mxu0  ;;  %v1086_v34 = vpop.f32.mrb[13].mxu1  ;;  %v1093_v15 = vadd.f32 %v1965_v10, %v1084_v28 }
 0x43f   : > { %v1092_v42 = vadd.f32 %v1964_v62, %v1045_v33  ;;  %v1047_v61 = vpop.f32.mrb[14].mxu0  ;;  %v1088_v1 = vpop.f32.mrb[14].mxu1  ;;  %v1094_v40 = vadd.f32 %v1966_v35, %v1086_v34  ;;  %v2830_v62 = vadd.f32 %v988_v22, %v981_v47 }
 0x440   : > { %v1967_v26 = vmul.f32 -1.442695, %v1091_v29  ;;  %v1048_v5 = vpop.f32.mrb[15].mxu0  ;;  %v1089_v7 = vpop.f32.mrb[15].mxu1  ;;  %v1140_v1 = vmul.f32 %v2838_v13, %v2784_v23 }
 0x441   : > { %v1968_v12 = vmul.f32 -1.442695, %v1092_v42  ;;  %v1969_v14 = vmul.f32 -1.442695, %v1094_v40  ;;  %v2836_v61 = vpop.permute.xlu0 %1125  ;;  %v1135_v35 = vmul.f32 %v2838_v13, %v2830_v62  ;;  %v2940_v13 = vld [vmem:[%s2457_s9 + $0x28] ss:$16 sps:$4 sm:$0xff]  }
 0x442   : > { %2154 = vpow2.f32 %v1967_v26 }
 0x443   : > { %2156 = vpow2.f32 %v1968_v12 }
 0x444   : > { %2158 = vpow2.f32 %v1969_v14 }
 0x445   : > { %2160 = vtanh.f32 %v1093_v15 }
 0x44c   : > { %v2155_v16 = vpop.eup %2154 }
 0x44d   : > { %v2157_v18 = vpop.eup %2156  ;;  %v1098_v30 = vadd.f32 1.0, %v2155_v16 }
 0x44e   : > { %v1104_v31 = vadd.f32 1.0, %v2157_v18  ;;  %v2159_v20 = vpop.eup %2158 }
 0x44f   : > { %2162 = vrcp.f32 %v1098_v30  ;;  %v2161_v27 = vpop.eup %2160  ;;  %v1111_v29 = vadd.f32 1.0, %v2159_v20 }
 0x450   : > { %2164 = vrcp.f32 %v1104_v31 }
 0x451   : > { %2166 = vrcp.f32 %v1111_v29 }
 0x459   : > { %v2163_v25 = vpop.eup %2162 }
 0x45a   : > { %v2165_v63 = vpop.eup %2164  ;;  %v1116_v28 = vmul.f32 %v2163_v25, %v2161_v27  ;;  %v2903_v27 = vpop.permute.xlu0 %1272 }
 0x45b   : > { %v1115_v33 = vmul.f32 %v2165_v63, %v2830_v62  ;;  %v2167_v42 = vpop.eup %2166  ;;  %v2905_v25 = vpop.permute.xlu1 %1279 }
 0x45d   : > { %v2833_v34 = vadd.f32 %v1116_v28, %v1115_v33 }
 0x45f   : > { %2168 = vtanh.f32 %v2833_v34 }
 0x469   : > { %v2169_v17 = vpop.eup %2168 }
 0x46a   : > { %v1119_v19 = vmul.f32 %v2169_v17, %v2167_v42  ;;  %v2922_v42 = vld [vmem:[%s2457_s9 + $0x8] ss:$16 sps:$4 sm:$0xff]   ;;  %v2926_v17 = vld [vmem:[%s2457_s9 + $0x24] ss:$16 sps:$4 sm:$0xff]  }
 0x46c   : > { %v1138_v21 = vmul.f32 %v2836_v61, %v1119_v19  ;;  %v2930_v19 = vld [vmem:[%s2457_s9 + $0x2c] ss:$16 sps:$4 sm:$0xff]  }
 0x46e   : > { %v2843_v26 = vadd.f32 %v1140_v1, %v1138_v21  ;;  %v2846_v5 = vadd.f32 %v1138_v21, %v2786_v24  ;;  %v1128_v24 = vmul.f32 %v2836_v61, %v2833_v34  ;;  %v2918_v34 = vld [vmem:[%s2457_s9] ss:$16 sps:$4 sm:$0xff]   ;;  %v2944_v21 = vld [vmem:[%s2457_s9 + $0x44] ss:$16 sps:$4 sm:$0xff]   ;;  %v2948_v1 = vld [vmem:[%s2457_s9 + $0x4c] ss:$16 sps:$4 sm:$0xff]  }
 0x46f   : > { %v2936_v61 = vld [vmem:[%s2457_s9 + $0x20] ss:$16 sps:$4 sm:$0xff]  }
 0x470   : > { %v1155_v7 = vpack.c.bf16 %v2843_v26, %v2843_v26  ;;  %v2897_v14 = vadd.f32 %v1135_v35, %v1128_v24  ;;  %v1287_v63 = vmul.f32 %v2905_v25, %v2843_v26  ;;  %v2952_v26 = vld [vmem:[%s2457_s9 + $0x40] ss:$16 sps:$4 sm:$0xff]  }
 0x472   : > { %1189 = vmatmul.mubr.bf16.vlgmr.msra.gmra.mrb[16].mxu0 %v1155_v7  ;;  %1230 = vmatmul.mubr.bf16.vlgmr.msra.gmra.mrb[16].mxu1 %v1155_v7  ;;  %v2960_v7 = vld [vmem:[%s2457_s9 + $0x64] ss:$16 sps:$4 sm:$0xff]  }
 0x473   : > { %1305 = vmatpush1.bf16.msra.mxu0 %v2464_v36  ;;  %1346 = vmatpush1.bf16.msra.mxu1 %v2486_v41  ;;  %v2883_v36 = vld [vmem:[%s2457_s9 + $0x4] ss:$16 sps:$4 sm:$0xff]   ;;  %v1151_v41 = vld [vmem:[%s1149_s22 + $0x8] sm:$0xff] }
 0x474   : > { %1306 = vmatprep.subr.bf16.mxu0 %v2468_v37  ;;  %1347 = vmatprep.subr.bf16.mxu1 %v2504_v45  ;;  %v2887_v37 = vld [vmem:[%s2457_s9 + $0xc] ss:$16 sps:$4 sm:$0xff]  }
 0x475   : > { %1336 = vmatprep.mubr.bf16.mxu0 %v2306_v32  ;;  %1377 = vmatprep.mubr.bf16.mxu1 %v2306_v32 }
 0x477   : > { %1307 = vmatpush1.bf16.msra.mxu0 %v2472_v38  ;;  %1348 = vmatpush1.bf16.msra.mxu1 %v2507_v46  ;;  %v1150_v38 = vld [vmem:[%s1149_s22] sm:$0xff] }
 0x478   : > { %1308 = vmatprep.subr.bf16.mxu0 %v2479_v39  ;;  %1349 = vmatprep.subr.bf16.mxu1 %v2521_v50  ;;  %v1152_v39 = vld [vmem:[%s1149_s22 + $0x10] sm:$0xff] }
 0x47b   : > { %1309 = vmatpush1.bf16.msra.mxu0 %v2492_v43  ;;  %1350 = vmatpush1.bf16.msra.mxu1 %v2526_v51  ;;  %v1153_v43 = vld [vmem:[%s1149_s22 + $0x18] sm:$0xff] }
 0x47c   : > { %1310 = vmatprep.subr.bf16.mxu0 %v2500_v44  ;;  %1351 = vmatprep.subr.bf16.mxu1 %v2531_v52 }
 0x47f   : > { %1311 = vmatpush1.bf16.msra.mxu0 %v2515_v48  ;;  %1352 = vmatpush1.bf16.msra.mxu1 %v2547_v55 }
 0x480   : > { %1312 = vmatprep.subr.bf16.mxu0 %v2518_v49  ;;  %1353 = vmatprep.subr.bf16.mxu1 %v2552_v56 }
 0x483   : > { %1313 = vmatpush1.bf16.msra.mxu0 %v2537_v53  ;;  %1354 = vmatpush1.bf16.msra.mxu1 %v2570_v59 }
 0x484   : > { %1314 = vmatprep.subr.bf16.mxu0 %v2543_v54  ;;  %1355 = vmatprep.subr.bf16.mxu1 %v2578_v60 }
 0x487   : > { %1315 = vmatpush1.bf16.msra.mxu0 %v2562_v57  ;;  %1356 = vmatpush1.bf16.msra.mxu1 %v2590_v3 }
 0x488   : > { %1316 = vmatprep.subr.bf16.mxu0 %v2565_v58  ;;  %1357 = vmatprep.subr.bf16.mxu1 %v2598_v4 }
 0x48b   : > { %1317 = vmatpush1.bf16.msra.mxu0 %v2582_v0  ;;  %1358 = vmatpush1.bf16.msra.mxu1 %v2608_v8 }
 0x48c   : > { %1318 = vmatprep.subr.bf16.mxu0 %v2586_v2  ;;  %1359 = vmatprep.subr.bf16.mxu1 %v2615_v9 }
 0x48f   : > { %1319 = vmatpush1.bf16.msra.mxu0 %v2603_v6  ;;  %1360 = vmatpush1.bf16.msra.mxu1 %v2620_v11 }
 0x490   : > { %1452 = vmatprep.subr.bf16.mxu0 %v2883_v36  ;;  %1493 = vmatprep.subr.bf16.mxu1 %v2887_v37 }
 0x545   : > { %v1190_v44 = vpop.f32.mrb[16].mxu0  ;;  %v1231_v45 = vpop.f32.mrb[16].mxu1 }
 0x546   : > { %v1238_v46 = vadd.f32 %v1190_v44, %v1150_v38  ;;  %v1240_v48 = vadd.f32 %v1231_v45, %v1152_v39  ;;  %v1192_v49 = vpop.f32.mrb[17].mxu0  ;;  %v1233_v50 = vpop.f32.mrb[17].mxu1  ;;  %v2964_v38 = vld [vmem:[%s2457_s9 + $0x6c] ss:$16 sps:$4 sm:$0xff]   ;;  %v2968_v39 = vld [vmem:[%s2457_s9 + $0x60] ss:$16 sps:$4 sm:$0xff]  }
 0x547   : > { %v1239_v51 = vadd.f32 %v1192_v49, %v1151_v41  ;;  %v1241_v52 = vadd.f32 %v1233_v50, %v1153_v43  ;;  %v1194_v53 = vpop.f32.mrb[18].mxu0  ;;  %v1235_v54 = vpop.f32.mrb[18].mxu1  ;;  %v2972_v41 = vld [vmem:[%s2457_s9 + $0x68] ss:$16 sps:$4 sm:$0xff]   ;;  %v2976_v43 = vld [vmem:[%s2457_s9 + $0x84] ss:$16 sps:$4 sm:$0xff]  }
 0x548   : > { %v1974_v55 = vmul.f32 -1.442695, %v1238_v46  ;;  %v1195_v56 = vpop.f32.mrb[19].mxu0  ;;  %v1236_v57 = vpop.f32.mrb[19].mxu1  ;;  %v2980_v44 = vld [vmem:[%s2457_s9 + $0x8c] ss:$16 sps:$4 sm:$0xff]  }
 0x549   : > { %v1975_v58 = vmul.f32 -1.442695, %v1239_v51  ;;  %v1976_v59 = vmul.f32 -1.442695, %v1241_v52  ;;  %v2984_v45 = vld [vmem:[%s2457_s9 + $0x80] ss:$16 sps:$4 sm:$0xff]  }
 0x54a   : > { %2170 = vpow2.f32 %v1974_v55  ;;  %v2988_v46 = vld [vmem:[%s2457_s9 + $0x88] ss:$16 sps:$4 sm:$0xff]   ;;  %v2996_v49 = vld [vmem:[%s2457_s9 + $0xac] ss:$16 sps:$4 sm:$0xff]   ;;  %v3000_v50 = vld [vmem:[%s2457_s9 + $0xa0] ss:$16 sps:$4 sm:$0xff]  }
 0x54b   : > { %2172 = vpow2.f32 %v1975_v58  ;;  %v3005_v51 = vld [vmem:[%s2457_s9 + $0xc4] ss:$16 sps:$4 sm:$0xff]   ;;  %v3010_v52 = vld [vmem:[%s2457_s9 + $0xc0] ss:$16 sps:$4 sm:$0xff]  }
 0x54c   : > { %2174 = vpow2.f32 %v1976_v59  ;;  %v3015_v53 = vld [vmem:[%s2457_s9 + $0xe4] ss:$16 sps:$4 sm:$0xff]  }
 0x54d   : > { %2176 = vtanh.f32 %v1240_v48  ;;  %v2992_v48 = vld [vmem:[%s2457_s9 + $0xa4] ss:$16 sps:$4 sm:$0xff]  }
 0x554   : > { %v2171_v60 = vpop.eup %2170 }
 0x555   : > { %v2173_v0 = vpop.eup %2172  ;;  %v1245_v2 = vadd.f32 1.0, %v2171_v60 }
 0x556   : > { %v1251_v23 = vadd.f32 1.0, %v2173_v0  ;;  %v2175_v12 = vpop.eup %2174 }
 0x557   : > { %2178 = vrcp.f32 %v1245_v2  ;;  %v2177_v40 = vpop.eup %2176  ;;  %v1258_v18 = vadd.f32 1.0, %v2175_v12  ;;  %v1981_v2 = vld [vmem:[%s1821_s23 + $0xb0] sm:$0xff] }
 0x558   : > { %2180 = vrcp.f32 %v1251_v23 }
 0x559   : > { %2182 = vrcp.f32 %v1258_v18  ;;  %v1282_v18 = vmul.f32 %v2905_v25, %v2897_v14 }
 0x561   : > { %v2179_v10 = vpop.eup %2178 }
 0x562   : > { %v2181_v15 = vpop.eup %2180  ;;  %v1263_v16 = vmul.f32 %v2179_v10, %v2177_v40 }
 0x563   : > { %v1262_v30 = vmul.f32 %v2181_v15, %v2897_v14  ;;  %v2183_v47 = vpop.eup %2182  ;;  %v3037_v14 = vpop.permute.xlu1 %1427 }
 0x565   : > { %v2900_v31 = vadd.f32 %v1263_v16, %v1262_v30 }
 0x567   : > { %2184 = vtanh.f32 %v2900_v31  ;;  %v1275_v15 = vmul.f32 %v2903_v27, %v2900_v31 }
 0x571   : > { %v2185_v20 = vpop.eup %2184 }
 0x572   : > { %v1266_v22 = vmul.f32 %v2185_v20, %v2183_v47  ;;  %v3029_v20 = vadd.f32 %v1282_v18, %v1275_v15 }
 0x574   : > { %v1285_v62 = vmul.f32 %v2903_v27, %v1266_v22 }
 0x576   : > { %v2910_v28 = vadd.f32 %v1287_v63, %v1285_v62  ;;  %v2913_v29 = vadd.f32 %v1285_v62, %v2846_v5  ;;  %v2956_v5 = vld [vmem:[%s2457_s9 + $0x48] ss:$16 sps:$4 sm:$0xff]  }
 0x578   : > { %v1303_v33 = vpack.c.bf16 %v2910_v28, %v2910_v28 }
 0x57a   : > { %1337 = vmatmul.mubr.bf16.vlgmr.msra.gmra.mrb[20].mxu0 %v1303_v33  ;;  %1378 = vmatmul.mubr.bf16.vlgmr.msra.gmra.mrb[20].mxu1 %v1303_v33 }
 0x57b   : > { %1453 = vmatpush1.bf16.msra.mxu0 %v2918_v34  ;;  %1494 = vmatpush1.bf16.msra.mxu1 %v2922_v42 }
 0x57c   : > { %1454 = vmatprep.subr.bf16.mxu0 %v2926_v17  ;;  %1495 = vmatprep.subr.bf16.mxu1 %v2930_v19 }
 0x57d   : > { %1484 = vmatprep.mubr.bf16.mxu0 %v2306_v32  ;;  %1525 = vmatprep.mubr.bf16.mxu1 %v2306_v32 }
 0x57f   : > { %1455 = vmatpush1.bf16.msra.mxu0 %v2936_v61  ;;  %1496 = vmatpush1.bf16.msra.mxu1 %v2940_v13 }
 0x580   : > { %1456 = vmatprep.subr.bf16.mxu0 %v2944_v21  ;;  %1497 = vmatprep.subr.bf16.mxu1 %v2948_v1 }
 0x583   : > { %1457 = vmatpush1.bf16.msra.mxu0 %v2952_v26  ;;  %1498 = vmatpush1.bf16.msra.mxu1 %v2956_v5 }
 0x584   : > { %1458 = vmatprep.subr.bf16.mxu0 %v2960_v7  ;;  %1499 = vmatprep.subr.bf16.mxu1 %v2964_v38 }
 0x587   : > { %1459 = vmatpush1.bf16.msra.mxu0 %v2968_v39  ;;  %1500 = vmatpush1.bf16.msra.mxu1 %v2972_v41 }
 0x588   : > { %1460 = vmatprep.subr.bf16.mxu0 %v2976_v43  ;;  %1501 = vmatprep.subr.bf16.mxu1 %v2980_v44 }
 0x58b   : > { %1461 = vmatpush1.bf16.msra.mxu0 %v2984_v45  ;;  %1502 = vmatpush1.bf16.msra.mxu1 %v2988_v46 }
 0x58c   : > { %1462 = vmatprep.subr.bf16.mxu0 %v2992_v48  ;;  %1503 = vmatprep.subr.bf16.mxu1 %v2996_v49 }
 0x58f   : > { %1463 = vmatpush1.bf16.msra.mxu0 %v3000_v50  ;;  %1504 = vmatpush1.bf16.msra.mxu1 %v2590_v3  ;;  %v1979_v3 = vld [vmem:[%s1821_s23 + $0xa0] sm:$0xff] }
 0x590   : > { %1464 = vmatprep.subr.bf16.mxu0 %v3005_v51  ;;  %1505 = vmatprep.subr.bf16.mxu1 %v2598_v4  ;;  %v1980_v4 = vld [vmem:[%s1821_s23 + $0xa8] sm:$0xff] }
 0x593   : > { %1465 = vmatpush1.bf16.msra.mxu0 %v3010_v52  ;;  %1506 = vmatpush1.bf16.msra.mxu1 %v2608_v8 }
 0x594   : > { %1466 = vmatprep.subr.bf16.mxu0 %v3015_v53  ;;  %1507 = vmatprep.subr.bf16.mxu1 %v2615_v9 }
 0x597   : > { %1467 = vmatpush1.bf16.msra.mxu0 %v2603_v6  ;;  %1508 = vmatpush1.bf16.msra.mxu1 %v2620_v11 }
 0x598   : > { %1600 = vmatprep.subr.bf16.mxu0 %v2883_v36  ;;  %1641 = vmatprep.subr.bf16.mxu1 %v2887_v37  ;;  %v1982_v36 = vld [vmem:[%s1821_s23 + $0xb8] sm:$0xff] }
 0x64d   : > { %v1338_v54 = vpop.f32.mrb[20].mxu0  ;;  %v1379_v8 = vpop.f32.mrb[20].mxu1 }
 0x64e   : > { %v1386_v55 = vadd.f32 %v1979_v3, %v1338_v54  ;;  %v1340_v56 = vpop.f32.mrb[21].mxu0  ;;  %v1381_v57 = vpop.f32.mrb[21].mxu1  ;;  %v1388_v24 = vadd.f32 %v1981_v2, %v1379_v8  ;;  %v1435_v8 = vmul.f32 %v3037_v14, %v2910_v28  ;;  %v2261_v28 = vld [vmem:[%s2457_s9 + $0xcc] ss:$16 sps:$4 sm:$0xff]  }
 0x64f   : > { %v1387_v58 = vadd.f32 %v1980_v4, %v1340_v56  ;;  %v1342_v59 = vpop.f32.mrb[22].mxu0  ;;  %v1383_v9 = vpop.f32.mrb[22].mxu1  ;;  %v1389_v37 = vadd.f32 %v1982_v36, %v1381_v57 }
 0x650   : > { %v1983_v60 = vmul.f32 -1.442695, %v1386_v55  ;;  %v1343_v6 = vpop.f32.mrb[23].mxu0  ;;  %v1384_v0 = vpop.f32.mrb[23].mxu1 }
 0x651   : > { %v1984_v11 = vmul.f32 -1.442695, %v1387_v58  ;;  %v1985_v23 = vmul.f32 -1.442695, %v1389_v37  ;;  %v3035_v54 = vpop.permute.xlu0 %1420  ;;  %v1430_v6 = vmul.f32 %v3037_v14, %v3029_v20 }
 0x652   : > { %2186 = vpow2.f32 %v1983_v60 }
 0x653   : > { %2188 = vpow2.f32 %v1984_v11 }
 0x654   : > { %2190 = vpow2.f32 %v1985_v23 }
 0x655   : > { %2192 = vtanh.f32 %v1388_v24 }
 0x65c   : > { %v2187_v12 = vpop.eup %2186 }
 0x65d   : > { %v2189_v35 = vpop.eup %2188  ;;  %v1393_v40 = vadd.f32 1.0, %v2187_v12 }
 0x65e   : > { %v1399_v10 = vadd.f32 1.0, %v2189_v35  ;;  %v2191_v16 = vpop.eup %2190  ;;  %v1569_v35 = vpop.permute.xlu0 %1568 }
 0x65f   : > { %2194 = vrcp.f32 %v1393_v40  ;;  %v2193_v30 = vpop.eup %2192  ;;  %v1406_v63 = vadd.f32 1.0, %v2191_v16  ;;  %v1576_v40 = vpop.permute.xlu1 %1575 }
 0x660   : > { %2196 = vrcp.f32 %v1399_v10 }
 0x661   : > { %2198 = vrcp.f32 %v1406_v63 }
 0x669   : > { %v2195_v47 = vpop.eup %2194 }
 0x66a   : > { %v2197_v22 = vpop.eup %2196  ;;  %v1411_v62 = vmul.f32 %v2195_v47, %v2193_v30 }
 0x66b   : > { %v1410_v33 = vmul.f32 %v2197_v22, %v3029_v20  ;;  %v2199_v4 = vpop.eup %2198 }
 0x66d   : > { %v3032_v3 = vadd.f32 %v1411_v62, %v1410_v33 }
 0x66f   : > { %2200 = vtanh.f32 %v3032_v3  ;;  %v1423_v9 = vmul.f32 %v3035_v54, %v3032_v3 }
 0x671   : > { %v1431_v36 = vadd.f32 %v1430_v6, %v1423_v9 }
 0x673   : > { %v1578_v15 = vmul.f32 %v1576_v40, %v1431_v36 }
 0x679   : > { %v2201_v31 = vpop.eup %2200 }
 0x67a   : > { %v1414_v27 = vmul.f32 %v2201_v31, %v2199_v4 }
 0x67c   : > { %v1433_v25 = vmul.f32 %v3035_v54, %v1414_v27 }
 0x67e   : > { %v3042_v55 = vadd.f32 %v1435_v8, %v1433_v25  ;;  %v3045_v56 = vadd.f32 %v1433_v25, %v2913_v29  ;;  %v2262_v29 = vld [vmem:[%s2457_s9 + $0xc8] ss:$16 sps:$4 sm:$0xff]  }
 0x680   : > { %v1451_v57 = vpack.c.bf16 %v3042_v55, %v3042_v55  ;;  %v1583_v22 = vmul.f32 %v1576_v40, %v3042_v55 }
 0x682   : > { %1485 = vmatmul.mubr.bf16.vlgmr.msra.gmra.mrb[24].mxu0 %v1451_v57  ;;  %1526 = vmatmul.mubr.bf16.vlgmr.msra.gmra.mrb[24].mxu1 %v1451_v57 }
 0x683   : > { %1601 = vmatpush1.bf16.msra.mxu0 %v2918_v34  ;;  %1642 = vmatpush1.bf16.msra.mxu1 %v2922_v42  ;;  %v2263_v34 = vld [vmem:[%s2457_s9 + $0xec] ss:$16 sps:$4 sm:$0xff]   ;;  %v2264_v42 = vld [vmem:[%s2457_s9 + $0xe0] ss:$16 sps:$4 sm:$0xff]  }
 0x684   : > { %1602 = vmatprep.subr.bf16.mxu0 %v2926_v17  ;;  %1643 = vmatprep.subr.bf16.mxu1 %v2930_v19  ;;  %v2265_v17 = vld [vmem:[%s2457_s9 + $0xe8] ss:$16 sps:$4 sm:$0xff]   ;;  %v1989_v19 = vld [vmem:[%s1829_s26 + $0xc0] sm:$0xff] }
 0x685   : > { %1632 = vmatprep.mubr.bf16.mxu0 %v2306_v32  ;;  %1673 = vmatprep.mubr.bf16.mxu1 %v2306_v32  ;;  %v2260_v32 = vld [vmem:[%s2457_s9 + $0xa8] ss:$16 sps:$4 sm:$0xff]   ;;  %s1998_s9 = smul.u32 4294967072, %s2296_s14  ;;  %s1903_s14 = sshll.u32 %s2446_s29, 3 }
 0x686   : > { %s355_s4 = scalar_lea.vmem %s3113_s3, %s1903_s14 }
 0x687   : > { %1603 = vmatpush1.bf16.msra.mxu0 %v2936_v61  ;;  %1644 = vmatpush1.bf16.msra.mxu1 %v2940_v13  ;;  %v1990_v61 = vld [vmem:[%s1829_s26 + $0xc8] sm:$0xff]  ;;  %s1837_s27 = scalar_lea.vmem %s2663_s6, %s1998_s9 [#allocation5] }
 0x688   : > { %1604 = vmatprep.subr.bf16.mxu0 %v2944_v21  ;;  %1645 = vmatprep.subr.bf16.mxu1 %v2948_v1  ;;  %v1999_v3 = vld [vmem:[%s1837_s27 + $0xe0] sm:$0xff]  ;;  %v2000_v4 = vld [vmem:[%s1837_s27 + $0xe8] sm:$0xff] }
 0x68b   : > { %1605 = vmatpush1.bf16.msra.mxu0 %v2952_v26  ;;  %1646 = vmatpush1.bf16.msra.mxu1 %v2956_v5 }
 0x68c   : > { %1606 = vmatprep.subr.bf16.mxu0 %v2960_v7  ;;  %1647 = vmatprep.subr.bf16.mxu1 %v2964_v38 }
 0x68f   : > { %1607 = vmatpush1.bf16.msra.mxu0 %v2968_v39  ;;  %1648 = vmatpush1.bf16.msra.mxu1 %v2972_v41 }
 0x690   : > { %1608 = vmatprep.subr.bf16.mxu0 %v2976_v43  ;;  %1649 = vmatprep.subr.bf16.mxu1 %v2980_v44 }
 0x693   : > { %1609 = vmatpush1.bf16.msra.mxu0 %v2984_v45  ;;  %1650 = vmatpush1.bf16.msra.mxu1 %v2988_v46  ;;  %v1992_v46 = vld [vmem:[%s1829_s26 + $0xd8] sm:$0xff] }
 0x694   : > { %1610 = vmatprep.subr.bf16.mxu0 %v2992_v48  ;;  %1651 = vmatprep.subr.bf16.mxu1 %v2996_v49  ;;  %v1991_v49 = vld [vmem:[%s1829_s26 + $0xd0] sm:$0xff] }
 0x697   : > { %1611 = vmatpush1.bf16.msra.mxu0 %v3000_v50  ;;  %1652 = vmatpush1.bf16.msra.mxu1 %v2260_v32 }
 0x698   : > { %1612 = vmatprep.subr.bf16.mxu0 %v3005_v51  ;;  %1653 = vmatprep.subr.bf16.mxu1 %v2261_v28 }
 0x69b   : > { %1613 = vmatpush1.bf16.msra.mxu0 %v3010_v52  ;;  %1654 = vmatpush1.bf16.msra.mxu1 %v2262_v29 }
 0x69c   : > { %1614 = vmatprep.subr.bf16.mxu0 %v3015_v53  ;;  %1655 = vmatprep.subr.bf16.mxu1 %v2263_v34 }
 0x69f   : > { %1615 = vmatpush1.bf16.msra.mxu0 %v2264_v42  ;;  %1656 = vmatpush1.bf16.msra.mxu1 %v2265_v17  ;;  %v2001_v17 = vld [vmem:[%s1837_s27 + $0xf0] sm:$0xff] }
 0x755   : > { %v1486_v13 = vpop.f32.mrb[24].mxu0  ;;  %v1527_v21 = vpop.f32.mrb[24].mxu1 }
 0x756   : > { %v1534_v1 = vadd.f32 %v1989_v19, %v1486_v13  ;;  %v1488_v26 = vpop.f32.mrb[25].mxu0  ;;  %v1529_v5 = vpop.f32.mrb[25].mxu1  ;;  %v1536_v51 = vadd.f32 %v1991_v49, %v1527_v21 }
 0x757   : > { %v1535_v7 = vadd.f32 %v1990_v61, %v1488_v26  ;;  %v1490_v38 = vpop.f32.mrb[26].mxu0  ;;  %v1531_v39 = vpop.f32.mrb[26].mxu1  ;;  %v1537_v48 = vadd.f32 %v1992_v46, %v1529_v5 }
 0x758   : > { %v1993_v41 = vmul.f32 -1.442695, %v1534_v1  ;;  %v1491_v43 = vpop.f32.mrb[27].mxu0  ;;  %v1532_v44 = vpop.f32.mrb[27].mxu1 }
 0x759   : > { %v1994_v45 = vmul.f32 -1.442695, %v1535_v7  ;;  %v1995_v50 = vmul.f32 -1.442695, %v1537_v48 }
 0x75a   : > { %2202 = vpow2.f32 %v1993_v41 }
 0x75b   : > { %2204 = vpow2.f32 %v1994_v45 }
 0x75c   : > { %2206 = vpow2.f32 %v1995_v50  ;;  %v1717_v50 = vpop.permute.xlu0 %1716 }
 0x75d   : > { %2208 = vtanh.f32 %v1536_v51 }
 0x764   : > { %v2203_v52 = vpop.eup %2202 }
 0x765   : > { %v2205_v53 = vpop.eup %2204  ;;  %v1541_v58 = vadd.f32 1.0, %v2203_v52 }
 0x766   : > { %v1547_v59 = vadd.f32 1.0, %v2205_v53  ;;  %v2207_v60 = vpop.eup %2206 }
 0x767   : > { %2210 = vrcp.f32 %v1541_v58  ;;  %v2209_v0 = vpop.eup %2208  ;;  %v1554_v23 = vadd.f32 1.0, %v2207_v60 }
 0x768   : > { %2212 = vrcp.f32 %v1547_v59 }
 0x769   : > { %2214 = vrcp.f32 %v1554_v23 }
 0x771   : > { %v2211_v11 = vpop.eup %2210 }
 0x772   : > { %v2213_v37 = vpop.eup %2212  ;;  %v1559_v2 = vmul.f32 %v2211_v11, %v2209_v0 }
 0x773   : > { %v1558_v24 = vmul.f32 %v2213_v37, %v1431_v36  ;;  %v2215_v18 = vpop.eup %2214 }
 0x775   : > { %v1560_v12 = vadd.f32 %v1559_v2, %v1558_v24 }
 0x777   : > { %2216 = vtanh.f32 %v1560_v12  ;;  %v1571_v10 = vmul.f32 %v1569_v35, %v1560_v12 }
 0x779   : > { %v1579_v16 = vadd.f32 %v1578_v15, %v1571_v10 }
 0x781   : > { %v2217_v30 = vpop.eup %2216 }
 0x782   : > { %v1562_v47 = vmul.f32 %v2217_v30, %v2215_v18 }
 0x784   : > { %v1581_v20 = vmul.f32 %v1569_v35, %v1562_v47 }
 0x786   : > { %v1584_v62 = vadd.f32 %v1583_v22, %v1581_v20  ;;  %v1587_v63 = vadd.f32 %v1581_v20, %v3045_v56  ;;  %v2002_v56 = vld [vmem:[%s1837_s27 + $0xf8] sm:$0xff] }
 0x788   : > { %v1599_v33 = vpack.c.bf16 %v1584_v62, %v1584_v62 }
 0x78a   : > { %1633 = vmatmul.mubr.bf16.vlgmr.msra.gmra.mrb[28].mxu0 %v1599_v33  ;;  %1674 = vmatmul.mubr.bf16.vlgmr.msra.gmra.mrb[28].mxu1 %v1599_v33 }
 0x85d   : > { %v1634_v31 = vpop.f32.mrb[28].mxu0  ;;  %v1675_v27 = vpop.f32.mrb[28].mxu1 }
 0x85e   : > { %v1682_v54 = vadd.f32 %v1999_v3, %v1634_v31  ;;  %v1636_v14 = vpop.f32.mrb[29].mxu0  ;;  %v1677_v25 = vpop.f32.mrb[29].mxu1  ;;  %v1684_v61 = vadd.f32 %v2001_v17, %v1675_v27 }
 0x85f   : > { %v1683_v8 = vadd.f32 %v2000_v4, %v1636_v14  ;;  %v1638_v57 = vpop.f32.mrb[30].mxu0  ;;  %v1679_v32 = vpop.f32.mrb[30].mxu1  ;;  %v1685_v42 = vadd.f32 %v2002_v56, %v1677_v25 }
 0x860   : > { %v2003_v28 = vmul.f32 -1.442695, %v1682_v54  ;;  %v1639_v55 = vpop.f32.mrb[31].mxu0  ;;  %v1680_v29 = vpop.f32.mrb[31].mxu1 }
 0x861   : > { %v2004_v34 = vmul.f32 -1.442695, %v1683_v8  ;;  %v2005_v19 = vmul.f32 -1.442695, %v1685_v42 }
 0x862   : > { %2218 = vpow2.f32 %v2003_v28 }
 0x863   : > { %2220 = vpow2.f32 %v2004_v34 }
 0x864   : > { %2222 = vpow2.f32 %v2005_v19 }
 0x865   : > { %2224 = vtanh.f32 %v1684_v61 }
 0x86c   : > { %v2219_v13 = vpop.eup %2218 }
 0x86d   : > { %v2221_v21 = vpop.eup %2220  ;;  %v1689_v1 = vadd.f32 1.0, %v2219_v13 }
 0x86e   : > { %v1695_v26 = vadd.f32 1.0, %v2221_v21  ;;  %v2223_v5 = vpop.eup %2222 }
 0x86f   : > { %2226 = vrcp.f32 %v1689_v1  ;;  %v2225_v7 = vpop.eup %2224  ;;  %v1702_v43 = vadd.f32 1.0, %v2223_v5 }
 0x870   : > { %2228 = vrcp.f32 %v1695_v26 }
 0x871   : > { %2230 = vrcp.f32 %v1702_v43 }
 0x879   : > { %v2227_v38 = vpop.eup %2226 }
 0x87a   : > { %v2229_v39 = vpop.eup %2228  ;;  %v1707_v41 = vmul.f32 %v2227_v38, %v2225_v7 }
 0x87b   : > { %v1706_v44 = vmul.f32 %v2229_v39, %v1579_v16  ;;  %v2231_v46 = vpop.eup %2230 }
 0x87d   : > { %v1708_v45 = vadd.f32 %v1707_v41, %v1706_v44 }
 0x87f   : > { %2232 = vtanh.f32 %v1708_v45 }
 0x889   : > { %v2233_v48 = vpop.eup %2232 }
 0x88a   : > { %v1710_v49 = vmul.f32 %v2233_v48, %v2231_v46 }
 0x88c   : > { %v1729_v51 = vmul.f32 %v1717_v50, %v1710_v49 }
 0x88e   : > { %v1735_v52 = vadd.f32 %v1729_v51, %v1587_v63 }
 0x890   : > { %1741 = vst [vmem:[%s355_s4] sm:$0xff] %v1735_v52 }
 0x891 PF: > { %s13_s16 = sadd.s32 1, %s2304_s16   ;;  %s3114_s12 = smov %s2292_s13 }
 0x892   : > { %p10_p10 = scmp.ge.s32.totalorder %s13_s16, 4   ;;  %s3115_s13 = smov %s2363_s20 }
 0x893   : > { %s3116_s14 = smov %s2300_s15  ;;  %s3117_s15 = smov %s3119_s17 }
 0x894   :  { %12 = sbr.rel (!%p10_p10) target bundleno = 3 (0x3), region = 120 }

// kernel: model_bert_forward.4
= control target key start
LH: loop header
LB: loop body
LE: loop exit
PB: predicated region body
PF: predicated region fallthrough
CT: control target
= control target key end

     0   :  { %s3442_s18 = smov 0   ;;  %s5024_s0 = inlined_call_operand.vmem [shape: f32[2,328,4], index: 0, kind: input, shape index: {}]   ;;  %s5025_s1 = inlined_call_operand.vmem [shape: bf16[36,128], index: 1, kind: input, shape index: {}]   ;;  %s5026_s2 = inlined_call_operand.vmem [shape: f32[1,128], index: 2, kind: input, shape index: {}]   ;;  %s5027_s3 = inlined_call_operand.vmem [shape: bf16[128,256], index: 3, kind: input, shape index: {}]   ;;  %s5028_s4 = inlined_call_operand.vmem [shape: f32[1,256], index: 4, kind: input, shape index: {}]   ;;  %s5029_s5 = inlined_call_operand.vmem [shape: f32[2,1,256], index: 5, kind: output, shape index: {}]  }
   0x1 LB: > { %s3127_s19 = sadd.s32 4294967295, %s3398_s18   ;;  %p3131_p0 = scmp.ge.s32.totalorder %s3398_s18, 1  ;;  %s3398_s18 = sphi %s3442_s18, %s15_s18  }
   0x2   : > { %p187_p1 = scmp.lt.s32.totalorder %s3398_s18, 3 }
   0x4   : > { %p188_p2 = pnand %p3131_p0, %p187_p1 }
   0x5   : > { %p214_p3 = scmp.lt.s32.totalorder (!%p188_p2), %s3127_s19, 1  ;;  %s3400_s24 = smov (!%p188_p2), 8   ;;  %v3404_v10 = vmov (!%p188_p2), 0.0   ;;  %vm604_vm0 = vcmask (!%p188_p2), 31744   ;;  %v3361_v17 = vld [vmem:[%s5025_s1] sm:$0xff] (!%p188_p2)   ;;  %v3362_v18 = vld [vmem:[%s5025_s1 + $0x8] sm:$0xff] (!%p188_p2)  }
   0x6   : > { %191 = sbr.rel (%p188_p2) target bundleno = 1186 (0x4a2), region = 40  ;;  %s3401_s25 = smov (!%p188_p2), 4   ;;  %3220 = vmatprep.subr.bf16.mxu0 (!%p188_p2), %v3404_v10  ;;  %585 = vst [vmem:[#allocation3] sm:$0x1] (!%p188_p2), %v3404_v10  ;;  %3262 = vmatprep.subr.bf16.mxu1 (!%p188_p2), %v3404_v10  ;;  %vm1577_vm1 = vcmask (!%p188_p2), 1041408   ;;  %vm5031_vm2 = vmmov (!%p188_p2), 0  }
   0x7   : > { %s3402_s26 = smov (!%p188_p2), 12   ;;  %s3403_s27 = smov (!%p188_p2), 16   ;;  %3221 = vmatpush3.bf16.msra.mxu0 (!%p188_p2), %v3361_v17  ;;  %v3363_v21 = vld [vmem:[%s5025_s1 + $0x10] ss:$0 sps:$4 sm:$0x33] (!%p188_p2)   ;;  %3226 = vmatprep.mubr.msk.bf16.mxu0 (!%p188_p2), %vm5031_vm2, %v3404_v10  ;;  %v3364_v59 = vld [vmem:[%s5025_s1] sm:$0xff] (!%p188_p2)  }
   0x8   : > { %s3405_s28 = smov (!%p188_p2), 20   ;;  %s3406_s29 = smov (!%p188_p2), 24   ;;  %3222 = vmatprep.subr.bf16.mxu0 (!%p188_p2), %v3404_v10  ;;  %3268 = vmatprep.mubr.msk.bf16.mxu1 (!%p188_p2), %vm5031_vm2, %v3404_v10  ;;  %v1579_v26 = vsel (!%p188_p2), %vm1577_vm1, %v3363_v21, 0  ;;  %vm713_vm3 = vcmask (!%p188_p2), 64544   ;;  %v3365_v63 = vld [vmem:[%s5025_s1 + $0x8] sm:$0xff] (!%p188_p2)   ;;  %vm822_vm4 = vcmask (!%p188_p2), 97344  }
   0x9   : > { %s3407_s9 = smov (!%p188_p2), 28   ;;  %s3409_s12 = smov (!%p188_p2), 32   ;;  %3263 = vmatpush3.bf16.msra.mxu1 (!%p188_p2), %v3364_v59  ;;  %vm5033_vm5 = vcmask (!%p188_p2), 130144   ;;  %vm5034_vm6 = vcmask (!%p188_p2), 162944   ;;  %vm1149_vm7 = vcmask (!%p188_p2), 195744   ;;  %vm5030_vm8 = vcmask (!%p188_p2), 228544  }
   0xa   : > { %3264 = vmatprep.subr.bf16.mxu1 (!%p188_p2), %v3404_v10  ;;  %vm1367_vm9 = vcmask (!%p188_p2), 261344   ;;  %vm1476_vm10 = vcmask (!%p188_p2), 294144   ;;  %vm1549_vm11 = vcmask (!%p188_p2), 293888  }
   0xb   : > { %3223 = vmatpush3.bf16.msra.mxu0 (!%p188_p2), %v3362_v18 }
   0xc   : > { %3224 = vmatprep.subr.bf16.mxu0 (!%p188_p2), %v3404_v10 }
   0xd   : > { %s5074_s19 = smov (!%p214_p3, %s3127_s19), 1  ;;  %3265 = vmatpush3.bf16.msra.mxu1 %v3365_v63 }
   0xe   : > { %s3304_s20 = smul.u32 328, %s5074_s19  ;;  %3266 = vmatprep.subr.bf16.mxu1 %v3404_v10  ;;  %s3133_s11 = sshll.u32 %s5074_s19, 1 }
   0xf   : > { %3225 = vmatpush3.bf16.msra.mxu0 %v1579_v26  ;;  %s222_s14 = scalar_lea.vmem %s5029_s5, %s3133_s11 }
  0x10   : > { %s3456_s23 = scalar_lea.vmem %s5024_s0, %s3304_s20 }
  0x11   : > { %v732_v0 = vld [vmem:[%s3456_s23 + $0x2] sm:$0xff]  ;;  %v733_v2 = vld [vmem:[%s3456_s23 + $0xa] sm:$0xff]  ;;  %v842_v4 = vld [vmem:[%s3456_s23 + $0x1a] sm:$0xff] }
  0x12   : > { %v623_v1 = vld [vmem:[%s3456_s23 + $0x1] sm:$0xff]  ;;  %768 = vrot.lane.b32.xlu1 %v732_v0, %s3400_s24  ;;  %v624_v3 = vld [vmem:[%s3456_s23 + $0x9] sm:$0xff]  ;;  %v841_v5 = vld [vmem:[%s3456_s23 + $0x12] sm:$0xff] }
  0x13   : > { %659 = vrot.lane.b32.xlu0 %v623_v1, %s3401_s25  ;;  %v951_v6 = vld [vmem:[%s3456_s23 + $0x1b] sm:$0xff]  ;;  %v950_v7 = vld [vmem:[%s3456_s23 + $0x13] sm:$0xff]  ;;  %v1168_v12 = vld [vmem:[%s3456_s23 + $0x24] sm:$0xff] }
  0x14   : > { %v1060_v8 = vld [vmem:[%s3456_s23 + $0x1c] sm:$0xff]  ;;  %v1059_v9 = vld [vmem:[%s3456_s23 + $0x14] sm:$0xff]  ;;  %v1169_v11 = vld [vmem:[%s3456_s23 + $0x2c] sm:$0xff] }
  0x15   : > { %v586_v13 = vld [vmem:[%s3456_s23] sm:$0xff]  ;;  %v587_v14 = vld [vmem:[%s3456_s23 + $0x8] sm:$0xff]  ;;  %v589_v19 = vld [vmem:[%s3456_s23 + $0x18] sm:$0xff] }
  0x16   : > { %770 = vrot.lane.b32.xlu1 %v733_v2, %s3400_s24  ;;  %605 = vst.msk [vmem:[#allocation2] sm:$0xff] %vm604_vm0, %v586_v13  ;;  %606 = vst.msk [vmem:[#allocation2 + $0x8] sm:$0xff] %vm604_vm0, %v587_v14  ;;  %v1278_v15 = vld [vmem:[%s3456_s23 + $0x2d] sm:$0xff]  ;;  %v1277_v16 = vld [vmem:[%s3456_s23 + $0x25] sm:$0xff] }
  0x17   : > { %661 = vrot.lane.b32.xlu0 %v624_v3, %s3401_s25  ;;  %v588_v20 = vld [vmem:[%s3456_s23 + $0x10] sm:$0xff]  ;;  %608 = vst.msk [vmem:[#allocation2 + $0x18] sm:$0xff] %vm604_vm0, %v589_v19  ;;  %v1386_v23 = vld [vmem:[%s3456_s23 + $0x26] sm:$0xff]  ;;  %v626_v24 = vld [vmem:[%s3456_s23 + $0x19] sm:$0xff] }
  0x18   : > { %607 = vst.msk [vmem:[#allocation2 + $0x10] sm:$0xff] %vm604_vm0, %v588_v20  ;;  %v1387_v22 = vld [vmem:[%s3456_s23 + $0x2e] sm:$0xff]  ;;  %v843_v28 = vld [vmem:[%s3456_s23 + $0x22] sm:$0xff]  ;;  %v1388_v38 = vld [vmem:[%s3456_s23 + $0x36] sm:$0xff] }
  0x19   : > { %v625_v25 = vld [vmem:[%s3456_s23 + $0x11] sm:$0xff]  ;;  %v952_v30 = vld [vmem:[%s3456_s23 + $0x23] sm:$0xff]  ;;  %v1785_v41 = vld [vmem:[%s3456_s23 + $0x99] sm:$0xff] }
  0x1a   : > { %879 = vrot.lane.b32.xlu1 %v842_v4, %s3402_s26  ;;  %v844_v27 = vld [vmem:[%s3456_s23 + $0x2a] sm:$0xff]  ;;  %v1171_v31 = vld [vmem:[%s3456_s23 + $0x3c] sm:$0xff]  ;;  %v1170_v32 = vld [vmem:[%s3456_s23 + $0x34] sm:$0xff] }
  0x1b   : > { %877 = vrot.lane.b32.xlu0 %v841_v5, %s3402_s26  ;;  %v953_v29 = vld [vmem:[%s3456_s23 + $0x2b] sm:$0xff]  ;;  %v590_v34 = vld [vmem:[%s3456_s23 + $0x20] sm:$0xff]  ;;  %v1279_v36 = vld [vmem:[%s3456_s23 + $0x35] sm:$0xff] }
  0x1c   : > { %v591_v33 = vld [vmem:[%s3456_s23 + $0x28] sm:$0xff]  ;;  %609 = vst.msk [vmem:[#allocation2 + $0x20] sm:$0xff] %vm604_vm0, %v590_v34  ;;  %v1280_v35 = vld [vmem:[%s3456_s23 + $0x3d] sm:$0xff]  ;;  %v1784_v42 = vld [vmem:[%s3456_s23 + $0x91] sm:$0xff] }
  0x1d   : > { %610 = vst.msk [vmem:[#allocation2 + $0x28] sm:$0xff] %vm604_vm0, %v591_v33  ;;  %v1389_v37 = vld [vmem:[%s3456_s23 + $0x3e] sm:$0xff]  ;;  %v628_v39 = vld [vmem:[%s3456_s23 + $0x29] sm:$0xff]  ;;  %v1892_v44 = vld [vmem:[%s3456_s23 + $0x92] sm:$0xff] }
  0x1e   : > { %988 = vrot.lane.b32.xlu1 %v951_v6, %s3403_s27  ;;  %v627_v40 = vld [vmem:[%s3456_s23 + $0x21] sm:$0xff]  ;;  %v3567_v46 = vld [vmem:[%s3456_s23 + $0x32] sm:$0xff]  ;;  %v3574_v47 = vld [vmem:[%s3456_s23 + $0xaa] sm:$0xff] }
  0x1f   : > { %986 = vrot.lane.b32.xlu0 %v950_v7, %s3403_s27  ;;  %v1893_v43 = vld [vmem:[%s3456_s23 + $0x9a] sm:$0xff]  ;;  %v3577_v48 = vld [vmem:[%s3456_s23 + $0xa2] sm:$0xff]  ;;  %v2109_v51 = vld [vmem:[%s3456_s23 + $0xab] sm:$0xff] }
  0x20   : > { %v3564_v45 = vld [vmem:[%s3456_s23 + $0x3a] sm:$0xff]  ;;  %v2108_v52 = vld [vmem:[%s3456_s23 + $0xa3] sm:$0xff]  ;;  %v2217_v53 = vld [vmem:[%s3456_s23 + $0xac] sm:$0xff] }
  0x21   : > { %v955_v49 = vld [vmem:[%s3456_s23 + $0x3b] sm:$0xff]  ;;  %v954_v50 = vld [vmem:[%s3456_s23 + $0x33] sm:$0xff]  ;;  %v2216_v54 = vld [vmem:[%s3456_s23 + $0xa4] sm:$0xff] }
  0x22   : > { %1097 = vrot.lane.b32.xlu1 %v1060_v8, %s3405_s28  ;;  %v3598_v55 = vld [vmem:[%s3456_s23 + $0x4c] sm:$0xff]  ;;  %v3601_v56 = vld [vmem:[%s3456_s23 + $0x44] sm:$0xff]  ;;  %v3608_v57 = vld [vmem:[%s3456_s23 + $0xbc] sm:$0xff] }
  0x23   : > { %1095 = vrot.lane.b32.xlu0 %v1059_v9, %s3405_s28  ;;  %v3611_v58 = vld [vmem:[%s3456_s23 + $0xb4] sm:$0xff]  ;;  %v1281_v61 = vld [vmem:[%s3456_s23 + $0x45] sm:$0xff]  ;;  %v2433_v62 = vld [vmem:[%s3456_s23 + $0xbd] sm:$0xff] }
  0x24   : > { %v1282_v60 = vld [vmem:[%s3456_s23 + $0x4d] sm:$0xff]  ;;  %v2432_v0 = vld [vmem:[%s3456_s23 + $0xb5] sm:$0xff]  ;;  %v1786_v21 = vld [vmem:[%s3456_s23 + $0xa1] sm:$0xff] }
  0x25   : > { %v593_v1 = vld [vmem:[%s3456_s23 + $0x38] sm:$0xff]  ;;  %v592_v2 = vld [vmem:[%s3456_s23 + $0x30] sm:$0xff]  ;;  %v1390_v7 = vld [vmem:[%s3456_s23 + $0x46] sm:$0xff] }
  0x26   : > { %1206 = vrot.lane.b32.xlu1 %v1169_v11, %s3406_s29  ;;  %612 = vst.msk [vmem:[#allocation2 + $0x38] sm:$0xff] %vm604_vm0, %v593_v1  ;;  %611 = vst.msk [vmem:[#allocation2 + $0x30] sm:$0xff] %vm604_vm0, %v592_v2  ;;  %v1391_v6 = vld [vmem:[%s3456_s23 + $0x4e] sm:$0xff]  ;;  %v2540_v13 = vld [vmem:[%s3456_s23 + $0xb6] sm:$0xff] }
  0x27   : > { %1204 = vrot.lane.b32.xlu0 %v1168_v12, %s3406_s29  ;;  %v629_v17 = vld [vmem:[%s3456_s23 + $0x31] sm:$0xff]  ;;  %v1787_v20 = vld [vmem:[%s3456_s23 + $0xa9] sm:$0xff] }
  0x28   : > { %v3695_v33 = vld [vmem:[%s3456_s23 + $0xb2] sm:$0xff]  ;;  %v2434_v2 = vld [vmem:[%s3456_s23 + $0xc5] sm:$0xff] }
  0x29   : > { %v2435_v1 = vld [vmem:[%s3456_s23 + $0xcd] sm:$0xff] }
  0x2a   : > { %1315 = vrot.lane.b32.xlu1 %v1278_v15, %s3407_s9 }
  0x2b   : > { %1313 = vrot.lane.b32.xlu0 %v1277_v16, %s3407_s9  ;;  %v630_v16 = vld [vmem:[%s3456_s23 + $0x39] sm:$0xff] }
  0x2e   : > { %1424 = vrot.lane.b32.xlu1 %v1387_v22, %s3409_s12 }
  0x2f   : > { %1422 = vrot.lane.b32.xlu0 %v1386_v23, %s3409_s12 }
  0x32   : > { %665 = vrot.lane.b32.xlu1 %v626_v24, %s3401_s25 }
  0x33   : > { %663 = vrot.lane.b32.xlu0 %v625_v25, %s3401_s25 }
  0x36   : > { %774 = vrot.lane.b32.xlu1 %v842_v4, %s3400_s24 }
  0x37   : > { %772 = vrot.lane.b32.xlu0 %v841_v5, %s3400_s24  ;;  %v3366_v5 = vld [vmem:[%s5025_s1 + $0x10] ss:$0 sps:$4 sm:$0x33]  }
  0x38   : > { %v2730_v8 = vsel %vm1577_vm1, %v3366_v5, 0 }
  0x39   : > { %3267 = vmatpush3.bf16.msra.mxu1 %v2730_v8  ;;  %v1750_v8 = vld [vmem:[%s3456_s23 + $0xa0] sm:$0xff] }
  0x3a   : > { %883 = vrot.lane.b32.xlu1 %v844_v27, %s3402_s26 }
  0x3b   : > { %881 = vrot.lane.b32.xlu0 %v843_v28, %s3402_s26 }
  0x3e   : > { %992 = vrot.lane.b32.xlu1 %v953_v29, %s3403_s27  ;;  %v3683_v29 = vld [vmem:[%s3456_s23 + $0x42] sm:$0xff] }
  0x3f   : > { %990 = vrot.lane.b32.xlu0 %v952_v30, %s3403_s27 }
  0x42   : > { %1101 = vrot.lane.b32.xlu1 %v1169_v11, %s3405_s28 }
  0x43   : > { %1099 = vrot.lane.b32.xlu0 %v1168_v12, %s3405_s28  ;;  %v2541_v12 = vld [vmem:[%s3456_s23 + $0xbe] sm:$0xff] }
  0x46   : > { %1210 = vrot.lane.b32.xlu1 %v1171_v31, %s3406_s29 }
  0x47   : > { %1208 = vrot.lane.b32.xlu0 %v1170_v32, %s3406_s29 }
  0x4a   : > { %1319 = vrot.lane.b32.xlu1 %v1280_v35, %s3407_s9 }
  0x4b   : > { %1317 = vrot.lane.b32.xlu0 %v1279_v36, %s3407_s9  ;;  %v1749_v36 = vld [vmem:[%s3456_s23 + $0x98] sm:$0xff] }
  0x4e   : > { %1428 = vrot.lane.b32.xlu1 %v1389_v37, %s3409_s12  ;;  %v1748_v37 = vld [vmem:[%s3456_s23 + $0x90] sm:$0xff] }
  0x4f   : > { %1426 = vrot.lane.b32.xlu0 %v1388_v38, %s3409_s12  ;;  %v957_v38 = vld [vmem:[%s3456_s23 + $0x4b] sm:$0xff] }
  0x52   : > { %669 = vrot.lane.b32.xlu1 %v628_v39, %s3401_s25  ;;  %v956_v39 = vld [vmem:[%s3456_s23 + $0x43] sm:$0xff] }
  0x53   : > { %667 = vrot.lane.b32.xlu0 %v627_v40, %s3401_s25 }
  0x56   : > { %1822 = vrot.lane.b32.xlu1 %v1785_v41, %s3401_s25 }
  0x57   : > { %1820 = vrot.lane.b32.xlu0 %v1784_v42, %s3401_s25 }
  0x5a   : > { %778 = vrot.lane.b32.xlu1 %v844_v27, %s3400_s24 }
  0x5b   : > { %776 = vrot.lane.b32.xlu0 %v843_v28, %s3400_s24  ;;  %v3680_v28 = vld [vmem:[%s3456_s23 + $0x4a] sm:$0xff] }
  0x5e   : > { %1930 = vrot.lane.b32.xlu1 %v1893_v43, %s3400_s24 }
  0x5f   : > { %1928 = vrot.lane.b32.xlu0 %v1892_v44, %s3400_s24 }
  0x62   : > { %887 = vrot.lane.b32.xlu1 %v3564_v45, %s3402_s26 }
  0x63   : > { %885 = vrot.lane.b32.xlu0 %v3567_v46, %s3402_s26 }
  0x66   : > { %2038 = vrot.lane.b32.xlu1 %v3574_v47, %s3402_s26 }
  0x67   : > { %2036 = vrot.lane.b32.xlu0 %v3577_v48, %s3402_s26 }
  0x6a   : > { %996 = vrot.lane.b32.xlu1 %v955_v49, %s3403_s27 }
  0x6b   : > { %994 = vrot.lane.b32.xlu0 %v954_v50, %s3403_s27 }
  0x6e   : > { %2146 = vrot.lane.b32.xlu1 %v2109_v51, %s3403_s27 }
  0x6f   : > { %2144 = vrot.lane.b32.xlu0 %v2108_v52, %s3403_s27 }
  0x72   : > { %1105 = vrot.lane.b32.xlu1 %v1171_v31, %s3405_s28 }
  0x73   : > { %1103 = vrot.lane.b32.xlu0 %v1170_v32, %s3405_s28  ;;  %v3692_v32 = vld [vmem:[%s3456_s23 + $0xba] sm:$0xff] }
  0x76   : > { %2254 = vrot.lane.b32.xlu1 %v2217_v53, %s3405_s28  ;;  %v3735_v53 = vld [vmem:[%s3456_s23 + $0x5c] sm:$0xff] }
  0x77   : > { %2252 = vrot.lane.b32.xlu0 %v2216_v54, %s3405_s28  ;;  %v3738_v54 = vld [vmem:[%s3456_s23 + $0x54] sm:$0xff] }
  0x7a   : > { %1214 = vrot.lane.b32.xlu1 %v3598_v55, %s3406_s29 }
  0x7b   : > { %1212 = vrot.lane.b32.xlu0 %v3601_v56, %s3406_s29 }
  0x7e   : > { %2362 = vrot.lane.b32.xlu1 %v3608_v57, %s3406_s29 }
  0x7f   : > { %2360 = vrot.lane.b32.xlu0 %v3611_v58, %s3406_s29 }
  0x82   : > { %1323 = vrot.lane.b32.xlu1 %v1282_v60, %s3407_s9 }
  0x83   : > { %1321 = vrot.lane.b32.xlu0 %v1281_v61, %s3407_s9  ;;  %v1284_v61 = vld [vmem:[%s3456_s23 + $0x5d] sm:$0xff] }
  0x84   : > { %v769_v3 = vpop.permute.xlu1 %768 }
  0x85   : > { %v660_v4 = vpop.permute.xlu0 %659 }
  0x86   : > { %714 = vst.msk [vmem:[#allocation2] sm:$0xff] %vm713_vm3, %v660_v4  ;;  %2470 = vrot.lane.b32.xlu1 %v2433_v62, %s3407_s9  ;;  %v1283_v62 = vld [vmem:[%s3456_s23 + $0x55] sm:$0xff]  ;;  %v594_v4 = vld [vmem:[%s3456_s23 + $0x40] sm:$0xff] }
  0x87   : > { %2468 = vrot.lane.b32.xlu0 %v2432_v0, %s3407_s9  ;;  %823 = vst.msk [vmem:[#allocation2] sm:$0xff] %vm822_vm4, %v769_v3  ;;  %v595_v3 = vld [vmem:[%s3456_s23 + $0x48] sm:$0xff] }
  0x88   : > { %v771_v9 = vpop.permute.xlu1 %770  ;;  %614 = vst.msk [vmem:[#allocation2 + $0x48] sm:$0xff] %vm604_vm0, %v595_v3  ;;  %613 = vst.msk [vmem:[#allocation2 + $0x40] sm:$0xff] %vm604_vm0, %v594_v4  ;;  %v2437_v3 = vld [vmem:[%s3456_s23 + $0xdd] sm:$0xff]  ;;  %v2436_v4 = vld [vmem:[%s3456_s23 + $0xd5] sm:$0xff] }
  0x89   : > { %v662_v11 = vpop.permute.xlu0 %661 }
  0x8a   : > { %715 = vst.msk [vmem:[#allocation2 + $0x8] sm:$0xff] %vm713_vm3, %v662_v11  ;;  %1432 = vrot.lane.b32.xlu1 %v1391_v6, %s3409_s12  ;;  %v1392_v11 = vld [vmem:[%s3456_s23 + $0x56] sm:$0xff] }
  0x8b   : > { %1430 = vrot.lane.b32.xlu0 %v1390_v7, %s3409_s12  ;;  %824 = vst.msk [vmem:[#allocation2 + $0x8] sm:$0xff] %vm822_vm4, %v771_v9  ;;  %v1751_v7 = vld [vmem:[%s3456_s23 + $0xa8] sm:$0xff]  ;;  %v1393_v9 = vld [vmem:[%s3456_s23 + $0x5e] sm:$0xff] }
  0x8c   : > { %v880_v14 = vpop.permute.xlu1 %879 }
  0x8d   : > { %v878_v15 = vpop.permute.xlu0 %877  ;;  %933 = vst.msk [vmem:[#allocation2 + $0x8] sm:$0xff] %vm5033_vm5, %v880_v14 }
  0x8e   : > { %932 = vst.msk [vmem:[#allocation2] sm:$0xff] %vm5033_vm5, %v878_v15  ;;  %2578 = vrot.lane.b32.xlu1 %v2541_v12, %s3409_s12 }
  0x8f   : > { %2576 = vrot.lane.b32.xlu0 %v2540_v13, %s3409_s12 }
  0x90   : > { %v989_v18 = vpop.permute.xlu1 %988 }
  0x91   : > { %v987_v19 = vpop.permute.xlu0 %986  ;;  %1042 = vst.msk [vmem:[#allocation2 + $0x8] sm:$0xff] %vm5034_vm6, %v989_v18  ;;  %v2542_v18 = vld [vmem:[%s3456_s23 + $0xc6] sm:$0xff] }
  0x92   : > { %1041 = vst.msk [vmem:[#allocation2] sm:$0xff] %vm5034_vm6, %v987_v19  ;;  %673 = vrot.lane.b32.xlu1 %v630_v16, %s3401_s25 }
  0x93   : > { %671 = vrot.lane.b32.xlu0 %v629_v17, %s3401_s25  ;;  %v2543_v17 = vld [vmem:[%s3456_s23 + $0xce] sm:$0xff] }
  0x94   : > { %v1098_v22 = vpop.permute.xlu1 %1097 }
  0x95   : > { %v1096_v23 = vpop.permute.xlu0 %1095  ;;  %1151 = vst.msk [vmem:[#allocation2 + $0x8] sm:$0xff] %vm1149_vm7, %v1098_v22  ;;  %v631_v22 = vld [vmem:[%s3456_s23 + $0x41] sm:$0xff] }
  0x96   : > { %1150 = vst.msk [vmem:[#allocation2] sm:$0xff] %vm1149_vm7, %v1096_v23  ;;  %1826 = vrot.lane.b32.xlu1 %v1787_v20, %s3401_s25 }
  0x97   : > { %1824 = vrot.lane.b32.xlu0 %v1786_v21, %s3401_s25  ;;  %v632_v21 = vld [vmem:[%s3456_s23 + $0x49] sm:$0xff] }
  0x98   : > { %v1207_v24 = vpop.permute.xlu1 %1206 }
  0x99   : > { %v1205_v25 = vpop.permute.xlu0 %1204  ;;  %1260 = vst.msk [vmem:[#allocation2 + $0x8] sm:$0xff] %vm5030_vm8, %v1207_v24 }
  0x9a   : > { %1259 = vst.msk [vmem:[#allocation2] sm:$0xff] %vm5030_vm8, %v1205_v25  ;;  %782 = vrot.lane.b32.xlu1 %v3564_v45, %s3400_s24  ;;  %v2111_v45 = vld [vmem:[%s3456_s23 + $0xbb] sm:$0xff] }
  0x9b   : > { %780 = vrot.lane.b32.xlu0 %v3567_v46, %s3400_s24  ;;  %v2110_v46 = vld [vmem:[%s3456_s23 + $0xb3] sm:$0xff] }
  0x9c   : > { %v1316_v26 = vpop.permute.xlu1 %1315  ;;  %v1789_v25 = vld [vmem:[%s3456_s23 + $0xb9] sm:$0xff] }
  0x9d   : > { %v1314_v27 = vpop.permute.xlu0 %1313  ;;  %1369 = vst.msk [vmem:[#allocation2 + $0x8] sm:$0xff] %vm1367_vm9, %v1316_v26  ;;  %v1788_v26 = vld [vmem:[%s3456_s23 + $0xb1] sm:$0xff] }
  0x9e   : > { %1368 = vst.msk [vmem:[#allocation2] sm:$0xff] %vm1367_vm9, %v1314_v27  ;;  %1934 = vrot.lane.b32.xlu1 %v3574_v47, %s3400_s24 }
  0x9f   : > { %1932 = vrot.lane.b32.xlu0 %v3577_v48, %s3400_s24 }
  0xa0   : > { %v1425_v30 = vpop.permute.xlu1 %1424 }
  0xa1   : > { %v1423_v31 = vpop.permute.xlu0 %1422  ;;  %1478 = vst.msk [vmem:[#allocation2 + $0x8] sm:$0xff] %vm1476_vm10, %v1425_v30 }
  0xa2   : > { %1477 = vst.msk [vmem:[#allocation2] sm:$0xff] %vm1476_vm10, %v1423_v31  ;;  %891 = vrot.lane.b32.xlu1 %v3680_v28, %s3402_s26 }
  0xa3   : > { %889 = vrot.lane.b32.xlu0 %v3683_v29, %s3402_s26 }
  0xa4   : > { %v666_v34 = vpop.permute.xlu1 %665 }
  0xa5   : > { %v664_v35 = vpop.permute.xlu0 %663  ;;  %717 = vst.msk [vmem:[#allocation2 + $0x18] sm:$0xff] %vm713_vm3, %v666_v34 }
  0xa6   : > { %716 = vst.msk [vmem:[#allocation2 + $0x10] sm:$0xff] %vm713_vm3, %v664_v35  ;;  %2042 = vrot.lane.b32.xlu1 %v3692_v32, %s3402_s26 }
  0xa7   : > { %2040 = vrot.lane.b32.xlu0 %v3695_v33, %s3402_s26 }
  0xa8   : > { %v775_v40 = vpop.permute.xlu1 %774  ;;  %v1496_v43 = vld [vmem:[#allocation2 + $0x8] sm:$0xff] }
  0xa9   : > { %v773_v41 = vpop.permute.xlu0 %772  ;;  %v1495_v42 = vld [vmem:[#allocation2] sm:$0xff]  ;;  %826 = vst.msk [vmem:[#allocation2 + $0x18] sm:$0xff] %vm822_vm4, %v775_v40 }
  0xaa   : > { %825 = vst.msk [vmem:[#allocation2 + $0x10] sm:$0xff] %vm822_vm4, %v773_v41  ;;  %v1513_v44 = vpack.c.bf16 %v1496_v43, %v1495_v42  ;;  %1000 = vrot.lane.b32.xlu1 %v957_v38, %s3403_s27  ;;  %v959_v41 = vld [vmem:[%s3456_s23 + $0x5b] sm:$0xff]  ;;  %v958_v42 = vld [vmem:[%s3456_s23 + $0x53] sm:$0xff] }
  0xab   : > { %1767 = vst.msk [vmem:[#allocation2 + $0x8] sm:$0xff] %vm604_vm0, %v1749_v36  ;;  %1766 = vst.msk [vmem:[#allocation2] sm:$0xff] %vm604_vm0, %v1748_v37  ;;  %998 = vrot.lane.b32.xlu0 %v956_v39, %s3403_s27  ;;  %v3818_v37 = vld [vmem:[%s3456_s23 + $0x5a] sm:$0xff] }
  0xac   : > { %3227 = vmatmul.mubr.msk.bf16.vlgmr.msra.gmra.mrb[0].mxu0 %vm1549_vm11, %v1513_v44  ;;  %v884_v47 = vpop.permute.xlu1 %883 }
  0xad   : > { %v882_v48 = vpop.permute.xlu0 %881  ;;  %3230 = vmatprep.mubr.msk.bf16.mxu0 %vm5031_vm2, %v3404_v10  ;;  %935 = vst.msk [vmem:[#allocation2 + $0x18] sm:$0xff] %vm5033_vm5, %v884_v47 }
  0xae   : > { %934 = vst.msk [vmem:[#allocation2 + $0x10] sm:$0xff] %vm5033_vm5, %v882_v48  ;;  %2150 = vrot.lane.b32.xlu1 %v2111_v45, %s3403_s27  ;;  %v2113_v45 = vld [vmem:[%s3456_s23 + $0xcb] sm:$0xff] }
  0xaf   : > { %2148 = vrot.lane.b32.xlu0 %v2110_v46, %s3403_s27  ;;  %v2112_v46 = vld [vmem:[%s3456_s23 + $0xc3] sm:$0xff] }
  0xb0   : > { %v993_v49 = vpop.permute.xlu1 %992 }
  0xb1   : > { %v991_v50 = vpop.permute.xlu0 %990  ;;  %1044 = vst.msk [vmem:[#allocation2 + $0x18] sm:$0xff] %vm5034_vm6, %v993_v49 }
  0xb2   : > { %1043 = vst.msk [vmem:[#allocation2 + $0x10] sm:$0xff] %vm5034_vm6, %v991_v50  ;;  %1109 = vrot.lane.b32.xlu1 %v3598_v55, %s3405_s28 }
  0xb3   : > { %1107 = vrot.lane.b32.xlu0 %v3601_v56, %s3405_s28 }
  0xb4   : > { %v1102_v51 = vpop.permute.xlu1 %1101 }
  0xb5   : > { %v1100_v52 = vpop.permute.xlu0 %1099  ;;  %1153 = vst.msk [vmem:[#allocation2 + $0x18] sm:$0xff] %vm1149_vm7, %v1102_v51 }
  0xb6   : > { %1152 = vst.msk [vmem:[#allocation2 + $0x10] sm:$0xff] %vm1149_vm7, %v1100_v52  ;;  %2258 = vrot.lane.b32.xlu1 %v3608_v57, %s3405_s28  ;;  %v3747_v57 = vld [vmem:[%s3456_s23 + $0xcc] sm:$0xff] }
  0xb7   : > { %2256 = vrot.lane.b32.xlu0 %v3611_v58, %s3405_s28  ;;  %v3750_v58 = vld [vmem:[%s3456_s23 + $0xc4] sm:$0xff] }
  0xb8   : > { %v1211_v55 = vpop.permute.xlu1 %1210 }
  0xb9   : > { %v1209_v56 = vpop.permute.xlu0 %1208  ;;  %1262 = vst.msk [vmem:[#allocation2 + $0x18] sm:$0xff] %vm5030_vm8, %v1211_v55  ;;  %v3866_v55 = vld [vmem:[%s3456_s23 + $0x6c] sm:$0xff] }
  0xba   : > { %1261 = vst.msk [vmem:[#allocation2 + $0x10] sm:$0xff] %vm5030_vm8, %v1209_v56  ;;  %1218 = vrot.lane.b32.xlu1 %v3735_v53, %s3406_s29 }
  0xbb   : > { %1216 = vrot.lane.b32.xlu0 %v3738_v54, %s3406_s29 }
  0xbc   : > { %v1320_v59 = vpop.permute.xlu1 %1319 }
  0xbd   : > { %v1318_v60 = vpop.permute.xlu0 %1317  ;;  %1371 = vst.msk [vmem:[#allocation2 + $0x18] sm:$0xff] %vm1367_vm9, %v1320_v59 }
  0xbe   : > { %1370 = vst.msk [vmem:[#allocation2 + $0x10] sm:$0xff] %vm1367_vm9, %v1318_v60  ;;  %2366 = vrot.lane.b32.xlu1 %v3747_v57, %s3406_s29 }
  0xbf   : > { %2364 = vrot.lane.b32.xlu0 %v3750_v58, %s3406_s29 }
  0xc0   : > { %v1429_v63 = vpop.permute.xlu1 %1428 }
  0xc1   : > { %v1427_v0 = vpop.permute.xlu0 %1426  ;;  %1480 = vst.msk [vmem:[#allocation2 + $0x18] sm:$0xff] %vm1476_vm10, %v1429_v63 }
  0xc2   : > { %1479 = vst.msk [vmem:[#allocation2 + $0x10] sm:$0xff] %vm1476_vm10, %v1427_v0  ;;  %1327 = vrot.lane.b32.xlu1 %v1284_v61, %s3407_s9  ;;  %v1286_v61 = vld [vmem:[%s3456_s23 + $0x6d] sm:$0xff] }
  0xc3   : > { %1325 = vrot.lane.b32.xlu0 %v1283_v62, %s3407_s9  ;;  %v1285_v62 = vld [vmem:[%s3456_s23 + $0x65] sm:$0xff] }
  0xc4   : > { %v670_v5 = vpop.permute.xlu1 %669 }
  0xc5   : > { %v668_v6 = vpop.permute.xlu0 %667  ;;  %719 = vst.msk [vmem:[#allocation2 + $0x28] sm:$0xff] %vm713_vm3, %v670_v5 }
  0xc6   : > { %718 = vst.msk [vmem:[#allocation2 + $0x20] sm:$0xff] %vm713_vm3, %v668_v6  ;;  %2474 = vrot.lane.b32.xlu1 %v2435_v1, %s3407_s9  ;;  %v1753_v1 = vld [vmem:[%s3456_s23 + $0xb8] sm:$0xff] }
  0xc7   : > { %2472 = vrot.lane.b32.xlu0 %v2434_v2, %s3407_s9  ;;  %v1752_v2 = vld [vmem:[%s3456_s23 + $0xb0] sm:$0xff] }
  0xc8   : > { %v1823_v12 = vpop.permute.xlu1 %1822  ;;  %v1498_v15 = vld [vmem:[#allocation2 + $0x18] sm:$0xff] }
  0xc9   : > { %v1821_v13 = vpop.permute.xlu0 %1820  ;;  %v1497_v14 = vld [vmem:[#allocation2 + $0x10] sm:$0xff]  ;;  %1875 = vst.msk [vmem:[#allocation2 + $0x8] sm:$0xff] %vm713_vm3, %v1823_v12 }
  0xca   : > { %1874 = vst.msk [vmem:[#allocation2] sm:$0xff] %vm713_vm3, %v1821_v13  ;;  %v1514_v16 = vpack.c.bf16 %v1498_v15, %v1497_v14  ;;  %1436 = vrot.lane.b32.xlu1 %v1393_v9, %s3409_s12  ;;  %v597_v9 = vld [vmem:[%s3456_s23 + $0x58] sm:$0xff]  ;;  %v596_v12 = vld [vmem:[%s3456_s23 + $0x50] sm:$0xff]  ;;  %v1394_v14 = vld [vmem:[%s3456_s23 + $0x66] sm:$0xff] }
  0xcb   : > { %1769 = vst.msk [vmem:[#allocation2 + $0x18] sm:$0xff] %vm604_vm0, %v1751_v7  ;;  %1768 = vst.msk [vmem:[#allocation2 + $0x10] sm:$0xff] %vm604_vm0, %v1750_v8  ;;  %1434 = vrot.lane.b32.xlu0 %v1392_v11, %s3409_s12  ;;  %v1395_v13 = vld [vmem:[%s3456_s23 + $0x6e] sm:$0xff] }
  0xcc   : > { %3231 = vmatmul.mubr.msk.bf16.gmra.mrb[4].mxu0 %vm1549_vm11, %v1514_v16  ;;  %v779_v19 = vpop.permute.xlu1 %778  ;;  %616 = vst.msk [vmem:[#allocation2 + $0x58] sm:$0xff] %vm604_vm0, %v597_v9  ;;  %615 = vst.msk [vmem:[#allocation2 + $0x50] sm:$0xff] %vm604_vm0, %v596_v12 }
  0xcd   : > { %v777_v20 = vpop.permute.xlu0 %776  ;;  %3234 = vmatprep.mubr.msk.bf16.mxu0 %vm5031_vm2, %v3404_v10  ;;  %828 = vst.msk [vmem:[#allocation2 + $0x28] sm:$0xff] %vm822_vm4, %v779_v19 }
  0xce   : > { %827 = vst.msk [vmem:[#allocation2 + $0x20] sm:$0xff] %vm822_vm4, %v777_v20  ;;  %2582 = vrot.lane.b32.xlu1 %v2543_v17, %s3409_s12  ;;  %v2545_v20 = vld [vmem:[%s3456_s23 + $0xde] sm:$0xff] }
  0xcf   : > { %2580 = vrot.lane.b32.xlu0 %v2542_v18, %s3409_s12 }
  0xd0   : > { %v1931_v23 = vpop.permute.xlu1 %1930 }
  0xd1   : > { %v1929_v24 = vpop.permute.xlu0 %1928  ;;  %1983 = vst.msk [vmem:[#allocation2 + $0x8] sm:$0xff] %vm822_vm4, %v1931_v23 }
  0xd2   : > { %1982 = vst.msk [vmem:[#allocation2] sm:$0xff] %vm822_vm4, %v1929_v24  ;;  %677 = vrot.lane.b32.xlu1 %v632_v21, %s3401_s25  ;;  %v2544_v21 = vld [vmem:[%s3456_s23 + $0xd6] sm:$0xff] }
  0xd3   : > { %675 = vrot.lane.b32.xlu0 %v631_v22, %s3401_s25  ;;  %v634_v24 = vld [vmem:[%s3456_s23 + $0x59] sm:$0xff] }
  0xd4   : > { %v888_v27 = vpop.permute.xlu1 %887 }
  0xd5   : > { %v886_v30 = vpop.permute.xlu0 %885  ;;  %937 = vst.msk [vmem:[#allocation2 + $0x28] sm:$0xff] %vm5033_vm5, %v888_v27 }
  0xd6   : > { %936 = vst.msk [vmem:[#allocation2 + $0x20] sm:$0xff] %vm5033_vm5, %v886_v30  ;;  %1830 = vrot.lane.b32.xlu1 %v1789_v25, %s3401_s25  ;;  %v633_v25 = vld [vmem:[%s3456_s23 + $0x51] sm:$0xff]  ;;  %v1791_v30 = vld [vmem:[%s3456_s23 + $0xc9] sm:$0xff] }
  0xd7   : > { %1828 = vrot.lane.b32.xlu0 %v1788_v26, %s3401_s25 }
  0xd8   : > { %v2039_v31 = vpop.permute.xlu1 %2038 }
  0xd9   : > { %v2037_v34 = vpop.permute.xlu0 %2036  ;;  %2091 = vst.msk [vmem:[#allocation2 + $0x8] sm:$0xff] %vm5033_vm5, %v2039_v31  ;;  %v1790_v31 = vld [vmem:[%s3456_s23 + $0xc1] sm:$0xff] }
  0xda   : > { %2090 = vst.msk [vmem:[#allocation2] sm:$0xff] %vm5033_vm5, %v2037_v34  ;;  %786 = vrot.lane.b32.xlu1 %v3680_v28, %s3400_s24  ;;  %v3821_v28 = vld [vmem:[%s3456_s23 + $0x52] sm:$0xff] }
  0xdb   : > { %784 = vrot.lane.b32.xlu0 %v3683_v29, %s3400_s24 }
  0xdc   : > { %v997_v35 = vpop.permute.xlu1 %996 }
  0xdd   : > { %v995_v36 = vpop.permute.xlu0 %994  ;;  %1046 = vst.msk [vmem:[#allocation2 + $0x28] sm:$0xff] %vm5034_vm6, %v997_v35 }
  0xde   : > { %1045 = vst.msk [vmem:[#allocation2 + $0x20] sm:$0xff] %vm5034_vm6, %v995_v36  ;;  %1938 = vrot.lane.b32.xlu1 %v3692_v32, %s3400_s24  ;;  %v3830_v32 = vld [vmem:[%s3456_s23 + $0xca] sm:$0xff] }
  0xdf   : > { %1936 = vrot.lane.b32.xlu0 %v3695_v33, %s3400_s24  ;;  %v3833_v33 = vld [vmem:[%s3456_s23 + $0xc2] sm:$0xff] }
  0xe0   : > { %v2147_v29 = vpop.permute.xlu1 %2146 }
  0xe1   : > { %v2145_v38 = vpop.permute.xlu0 %2144  ;;  %2199 = vst.msk [vmem:[#allocation2 + $0x8] sm:$0xff] %vm5034_vm6, %v2147_v29 }
  0xe2   : > { %2198 = vst.msk [vmem:[#allocation2] sm:$0xff] %vm5034_vm6, %v2145_v38  ;;  %895 = vrot.lane.b32.xlu1 %v3818_v37, %s3402_s26 }
  0xe3   : > { %893 = vrot.lane.b32.xlu0 %v3821_v28, %s3402_s26 }
  0xe4   : > { %v1106_v39 = vpop.permute.xlu1 %1105 }
  0xe5   : > { %v1104_v40 = vpop.permute.xlu0 %1103  ;;  %1155 = vst.msk [vmem:[#allocation2 + $0x28] sm:$0xff] %vm1149_vm7, %v1106_v39 }
  0xe6   : > { %1154 = vst.msk [vmem:[#allocation2 + $0x20] sm:$0xff] %vm1149_vm7, %v1104_v40  ;;  %2046 = vrot.lane.b32.xlu1 %v3830_v32, %s3402_s26  ;;  %v3952_v40 = vld [vmem:[%s3456_s23 + $0x6a] sm:$0xff] }
  0xe7   : > { %2044 = vrot.lane.b32.xlu0 %v3833_v33, %s3402_s26 }
  0xe8   : > { %v2255_v43 = vpop.permute.xlu1 %2254 }
  0xe9   : > { %v2253_v44 = vpop.permute.xlu0 %2252  ;;  %2307 = vst.msk [vmem:[#allocation2 + $0x8] sm:$0xff] %vm1149_vm7, %v2255_v43 }
  0xea   : > { %2306 = vst.msk [vmem:[#allocation2] sm:$0xff] %vm1149_vm7, %v2253_v44  ;;  %1004 = vrot.lane.b32.xlu1 %v959_v41, %s3403_s27  ;;  %v961_v44 = vld [vmem:[%s3456_s23 + $0x6b] sm:$0xff] }
  0xeb   : > { %1002 = vrot.lane.b32.xlu0 %v958_v42, %s3403_s27 }
  0xec   : > { %v1215_v47 = vpop.permute.xlu1 %1214 }
  0xed   : > { %v1213_v48 = vpop.permute.xlu0 %1212  ;;  %1264 = vst.msk [vmem:[#allocation2 + $0x28] sm:$0xff] %vm5030_vm8, %v1215_v47 }
  0xee   : > { %1263 = vst.msk [vmem:[#allocation2 + $0x20] sm:$0xff] %vm5030_vm8, %v1213_v48  ;;  %2154 = vrot.lane.b32.xlu1 %v2113_v45, %s3403_s27  ;;  %v960_v45 = vld [vmem:[%s3456_s23 + $0x63] sm:$0xff]  ;;  %v2115_v48 = vld [vmem:[%s3456_s23 + $0xdb] sm:$0xff] }
  0xef   : > { %2152 = vrot.lane.b32.xlu0 %v2112_v46, %s3403_s27 }
  0xf0   : > { %v2363_v49 = vpop.permute.xlu1 %2362 }
  0xf1   : > { %v2361_v50 = vpop.permute.xlu0 %2360  ;;  %2415 = vst.msk [vmem:[#allocation2 + $0x8] sm:$0xff] %vm5030_vm8, %v2363_v49  ;;  %v2114_v49 = vld [vmem:[%s3456_s23 + $0xd3] sm:$0xff] }
  0xf2   : > { %2414 = vst.msk [vmem:[#allocation2] sm:$0xff] %vm5030_vm8, %v2361_v50  ;;  %1113 = vrot.lane.b32.xlu1 %v3735_v53, %s3405_s28  ;;  %v3869_v53 = vld [vmem:[%s3456_s23 + $0x64] sm:$0xff] }
  0xf3   : > { %1111 = vrot.lane.b32.xlu0 %v3738_v54, %s3405_s28 }
  0xf4   : > { %v1324_v51 = vpop.permute.xlu1 %1323 }
  0xf5   : > { %v1322_v52 = vpop.permute.xlu0 %1321  ;;  %1373 = vst.msk [vmem:[#allocation2 + $0x28] sm:$0xff] %vm1367_vm9, %v1324_v51 }
  0xf6   : > { %1372 = vst.msk [vmem:[#allocation2 + $0x20] sm:$0xff] %vm1367_vm9, %v1322_v52  ;;  %2262 = vrot.lane.b32.xlu1 %v3747_v57, %s3405_s28  ;;  %v3878_v57 = vld [vmem:[%s3456_s23 + $0xdc] sm:$0xff] }
  0xf7   : > { %2260 = vrot.lane.b32.xlu0 %v3750_v58, %s3405_s28  ;;  %v3881_v58 = vld [vmem:[%s3456_s23 + $0xd4] sm:$0xff] }
  0xf8   : > { %v2471_v54 = vpop.permute.xlu1 %2470 }
  0xf9   : > { %v2469_v56 = vpop.permute.xlu0 %2468  ;;  %2523 = vst.msk [vmem:[#allocation2 + $0x8] sm:$0xff] %vm1367_vm9, %v2471_v54 }
  0xfa   : > { %2522 = vst.msk [vmem:[#allocation2] sm:$0xff] %vm1367_vm9, %v2469_v56  ;;  %1222 = vrot.lane.b32.xlu1 %v3866_v55, %s3406_s29 }
  0xfb   : > { %1220 = vrot.lane.b32.xlu0 %v3869_v53, %s3406_s29 }
  0xfc   : > { %v1433_v59 = vpop.permute.xlu1 %1432 }
  0xfd   : > { %v1431_v60 = vpop.permute.xlu0 %1430  ;;  %1482 = vst.msk [vmem:[#allocation2 + $0x28] sm:$0xff] %vm1476_vm10, %v1433_v59 }
  0xfe   : > { %1481 = vst.msk [vmem:[#allocation2 + $0x20] sm:$0xff] %vm1476_vm10, %v1431_v60  ;;  %2370 = vrot.lane.b32.xlu1 %v3878_v57, %s3406_s29  ;;  %v4000_v60 = vld [vmem:[%s3456_s23 + $0x7c] sm:$0xff] }
  0xff   : > { %2368 = vrot.lane.b32.xlu0 %v3881_v58, %s3406_s29 }
 0x100   : > { %v2579_v63 = vpop.permute.xlu1 %2578 }
 0x101   : > { %v2577_v0 = vpop.permute.xlu0 %2576  ;;  %2631 = vst.msk [vmem:[#allocation2 + $0x8] sm:$0xff] %vm1476_vm10, %v2579_v63 }
 0x102   : > { %2630 = vst.msk [vmem:[#allocation2] sm:$0xff] %vm1476_vm10, %v2577_v0  ;;  %1331 = vrot.lane.b32.xlu1 %v1286_v61, %s3407_s9  ;;  %v1288_v0 = vld [vmem:[%s3456_s23 + $0x7d] sm:$0xff] }
 0x103   : > { %1329 = vrot.lane.b32.xlu0 %v1285_v62, %s3407_s9 }
 0x104   : > { %v674_v5 = vpop.permute.xlu1 %673  ;;  %v1500_v8 = vld [vmem:[#allocation2 + $0x28] sm:$0xff] }
 0x105   : > { %v672_v6 = vpop.permute.xlu0 %671  ;;  %v1499_v7 = vld [vmem:[#allocation2 + $0x20] sm:$0xff]  ;;  %721 = vst.msk [vmem:[#allocation2 + $0x38] sm:$0xff] %vm713_vm3, %v674_v5 }
 0x106   : > { %720 = vst.msk [vmem:[#allocation2 + $0x30] sm:$0xff] %vm713_vm3, %v672_v6  ;;  %v1515_v11 = vpack.c.bf16 %v1500_v8, %v1499_v7  ;;  %2478 = vrot.lane.b32.xlu1 %v2437_v3, %s3407_s9  ;;  %v1754_v5 = vld [vmem:[%s3456_s23 + $0xc0] sm:$0xff]  ;;  %v2439_v6 = vld [vmem:[%s3456_s23 + $0xed] sm:$0xff] }
 0x107   : > { %1771 = vst.msk [vmem:[#allocation2 + $0x28] sm:$0xff] %vm604_vm0, %v1753_v1  ;;  %1770 = vst.msk [vmem:[#allocation2 + $0x20] sm:$0xff] %vm604_vm0, %v1752_v2  ;;  %2476 = vrot.lane.b32.xlu0 %v2436_v4, %s3407_s9  ;;  %v1287_v1 = vld [vmem:[%s3456_s23 + $0x75] sm:$0xff]  ;;  %v1755_v4 = vld [vmem:[%s3456_s23 + $0xc8] sm:$0xff] }
 0x108   : > { %3235 = vmatmul.mubr.msk.bf16.gmra.mrb[8].mxu0 %vm1549_vm11, %v1515_v11  ;;  %v1827_v15 = vpop.permute.xlu1 %1826  ;;  %v2649_v18 = vld [vmem:[#allocation2 + $0x8] sm:$0xff] }
 0x109   : > { %v1825_v16 = vpop.permute.xlu0 %1824  ;;  %v2648_v17 = vld [vmem:[#allocation2] sm:$0xff]  ;;  %3238 = vmatprep.mubr.msk.bf16.mxu0 %vm5031_vm2, %v3404_v10  ;;  %1877 = vst.msk [vmem:[#allocation2 + $0x18] sm:$0xff] %vm713_vm3, %v1827_v15 }
 0x10a   : > { %1876 = vst.msk [vmem:[#allocation2 + $0x10] sm:$0xff] %vm713_vm3, %v1825_v16  ;;  %v2666_v19 = vpack.c.bf16 %v2649_v18, %v2648_v17  ;;  %1440 = vrot.lane.b32.xlu1 %v1395_v13, %s3409_s12  ;;  %v2438_v7 = vld [vmem:[%s3456_s23 + $0xe5] sm:$0xff]  ;;  %v1396_v17 = vld [vmem:[%s3456_s23 + $0x76] sm:$0xff] }
 0x10b   : > { %1438 = vrot.lane.b32.xlu0 %v1394_v14, %s3409_s12  ;;  %v599_v13 = vld [vmem:[%s3456_s23 + $0x68] sm:$0xff]  ;;  %v598_v15 = vld [vmem:[%s3456_s23 + $0x60] sm:$0xff] }
 0x10c   : > { %3269 = vmatmul.mubr.msk.bf16.vlgmr.msra.gmra.mrb[0].mxu1 %vm1549_vm11, %v2666_v19  ;;  %v783_v22 = vpop.permute.xlu1 %782  ;;  %618 = vst.msk [vmem:[#allocation2 + $0x68] sm:$0xff] %vm604_vm0, %v599_v13  ;;  %617 = vst.msk [vmem:[#allocation2 + $0x60] sm:$0xff] %vm604_vm0, %v598_v15  ;;  %v1397_v16 = vld [vmem:[%s3456_s23 + $0x7e] sm:$0xff] }
 0x10d   : > { %v781_v23 = vpop.permute.xlu0 %780  ;;  %3272 = vmatprep.mubr.msk.bf16.mxu1 %vm5031_vm2, %v3404_v10  ;;  %830 = vst.msk [vmem:[#allocation2 + $0x38] sm:$0xff] %vm822_vm4, %v783_v22 }
 0x10e   : > { %829 = vst.msk [vmem:[#allocation2 + $0x30] sm:$0xff] %vm822_vm4, %v781_v23  ;;  %2586 = vrot.lane.b32.xlu1 %v2545_v20, %s3409_s12  ;;  %v2547_v23 = vld [vmem:[%s3456_s23 + $0xee] sm:$0xff] }
 0x10f   : > { %2584 = vrot.lane.b32.xlu0 %v2544_v21, %s3409_s12 }
 0x110   : > { %v1935_v26 = vpop.permute.xlu1 %1934 }
 0x111   : > { %v1933_v27 = vpop.permute.xlu0 %1932  ;;  %1985 = vst.msk [vmem:[#allocation2 + $0x18] sm:$0xff] %vm822_vm4, %v1935_v26 }
 0x112   : > { %1984 = vst.msk [vmem:[#allocation2 + $0x10] sm:$0xff] %vm822_vm4, %v1933_v27  ;;  %681 = vrot.lane.b32.xlu1 %v634_v24, %s3401_s25  ;;  %v2546_v24 = vld [vmem:[%s3456_s23 + $0xe6] sm:$0xff] }
 0x113   : > { %679 = vrot.lane.b32.xlu0 %v633_v25, %s3401_s25  ;;  %v636_v27 = vld [vmem:[%s3456_s23 + $0x69] sm:$0xff] }
 0x114   : > { %v892_v34 = vpop.permute.xlu1 %891 }
 0x115   : > { %v890_v35 = vpop.permute.xlu0 %889  ;;  %939 = vst.msk [vmem:[#allocation2 + $0x38] sm:$0xff] %vm5033_vm5, %v892_v34 }
 0x116   : > { %938 = vst.msk [vmem:[#allocation2 + $0x30] sm:$0xff] %vm5033_vm5, %v890_v35  ;;  %1834 = vrot.lane.b32.xlu1 %v1791_v30, %s3401_s25  ;;  %v635_v30 = vld [vmem:[%s3456_s23 + $0x61] sm:$0xff]  ;;  %v1793_v35 = vld [vmem:[%s3456_s23 + $0xd9] sm:$0xff] }
 0x117   : > { %1832 = vrot.lane.b32.xlu0 %v1790_v31, %s3401_s25 }
 0x118   : > { %v2043_v36 = vpop.permute.xlu1 %2042 }
 0x119   : > { %v2041_v29 = vpop.permute.xlu0 %2040  ;;  %2093 = vst.msk [vmem:[#allocation2 + $0x18] sm:$0xff] %vm5033_vm5, %v2043_v36  ;;  %v1792_v36 = vld [vmem:[%s3456_s23 + $0xd1] sm:$0xff] }
 0x11a   : > { %2092 = vst.msk [vmem:[#allocation2 + $0x10] sm:$0xff] %vm5033_vm5, %v2041_v29  ;;  %790 = vrot.lane.b32.xlu1 %v3818_v37, %s3400_s24  ;;  %v3955_v37 = vld [vmem:[%s3456_s23 + $0x62] sm:$0xff] }
 0x11b   : > { %788 = vrot.lane.b32.xlu0 %v3821_v28, %s3400_s24 }
 0x11c   : > { %v1001_v38 = vpop.permute.xlu1 %1000 }
 0x11d   : > { %v999_v39 = vpop.permute.xlu0 %998  ;;  %1048 = vst.msk [vmem:[#allocation2 + $0x38] sm:$0xff] %vm5034_vm6, %v1001_v38 }
 0x11e   : > { %1047 = vst.msk [vmem:[#allocation2 + $0x30] sm:$0xff] %vm5034_vm6, %v999_v39  ;;  %1942 = vrot.lane.b32.xlu1 %v3830_v32, %s3400_s24  ;;  %v3964_v32 = vld [vmem:[%s3456_s23 + $0xda] sm:$0xff]  ;;  %v224_v39 = vlaneseq }
 0x11f   : > { %1940 = vrot.lane.b32.xlu0 %v3833_v33, %s3400_s24  ;;  %v3967_v33 = vld [vmem:[%s3456_s23 + $0xd2] sm:$0xff] }
 0x120   : > { %v2151_v28 = vpop.permute.xlu1 %2150 }
 0x121   : > { %v2149_v41 = vpop.permute.xlu0 %2148  ;;  %2201 = vst.msk [vmem:[#allocation2 + $0x18] sm:$0xff] %vm5034_vm6, %v2151_v28 }
 0x122   : > { %2200 = vst.msk [vmem:[#allocation2 + $0x10] sm:$0xff] %vm5034_vm6, %v2149_v41  ;;  %899 = vrot.lane.b32.xlu1 %v3952_v40, %s3402_s26 }
 0x123   : > { %897 = vrot.lane.b32.xlu0 %v3955_v37, %s3402_s26 }
 0x124   : > { %v1110_v42 = vpop.permute.xlu1 %1109 }
 0x125   : > { %v1108_v43 = vpop.permute.xlu0 %1107  ;;  %1157 = vst.msk [vmem:[#allocation2 + $0x38] sm:$0xff] %vm1149_vm7, %v1110_v42  ;;  %v4080_v42 = vshrl.u32 %v224_v39, 7 }
 0x126   : > { %1156 = vst.msk [vmem:[#allocation2 + $0x30] sm:$0xff] %vm1149_vm7, %v1108_v43  ;;  %2050 = vrot.lane.b32.xlu1 %v3964_v32, %s3402_s26 }
 0x127   : > { %2048 = vrot.lane.b32.xlu0 %v3967_v33, %s3402_s26 }
 0x128   : > { %v2259_v46 = vpop.permute.xlu1 %2258 }
 0x129   : > { %v2257_v47 = vpop.permute.xlu0 %2256  ;;  %2309 = vst.msk [vmem:[#allocation2 + $0x18] sm:$0xff] %vm1149_vm7, %v2259_v46 }
 0x12a   : > { %2308 = vst.msk [vmem:[#allocation2 + $0x10] sm:$0xff] %vm1149_vm7, %v2257_v47  ;;  %1008 = vrot.lane.b32.xlu1 %v961_v44, %s3403_s27 }
 0x12b   : > { %1006 = vrot.lane.b32.xlu0 %v960_v45, %s3403_s27  ;;  %v226_v45 = vadd.s32 8, %v4080_v42 }
 0x12c   : > { %v1219_v50 = vpop.permute.xlu1 %1218 }
 0x12d   : > { %v1217_v51 = vpop.permute.xlu0 %1216  ;;  %1266 = vst.msk [vmem:[#allocation2 + $0x38] sm:$0xff] %vm5030_vm8, %v1219_v50 }
 0x12e   : > { %1265 = vst.msk [vmem:[#allocation2 + $0x30] sm:$0xff] %vm5030_vm8, %v1217_v51  ;;  %2158 = vrot.lane.b32.xlu1 %v2115_v48, %s3403_s27  ;;  %v4106_v48 = vld [vmem:[%s3456_s23 + $0xea] sm:$0xff]  ;;  %v4111_v50 = vmul.u32.u64.low 3817748708, %v226_v45  ;;  %v4112_v51 = vmul.u32.u64.high 3817748708, %v226_v45, %v4111_v50 }
 0x12f   : > { %2156 = vrot.lane.b32.xlu0 %v2114_v49, %s3403_s27  ;;  %v4109_v49 = vld [vmem:[%s3456_s23 + $0xe2] sm:$0xff]  ;;  %v2440_v50 = vld [vmem:[%s3456_s23 + $0xf5] sm:$0xff] }
 0x130   : > { %v2367_v52 = vpop.permute.xlu1 %2366 }
 0x131   : > { %v2365_v54 = vpop.permute.xlu0 %2364  ;;  %2417 = vst.msk [vmem:[#allocation2 + $0x18] sm:$0xff] %vm5030_vm8, %v2367_v52 }
 0x132   : > { %2416 = vst.msk [vmem:[#allocation2 + $0x10] sm:$0xff] %vm5030_vm8, %v2365_v54  ;;  %1117 = vrot.lane.b32.xlu1 %v3866_v55, %s3405_s28  ;;  %v4003_v55 = vld [vmem:[%s3456_s23 + $0x74] sm:$0xff] }
 0x133   : > { %1115 = vrot.lane.b32.xlu0 %v3869_v53, %s3405_s28 }
 0x134   : > { %v1328_v56 = vpop.permute.xlu1 %1327 }
 0x135   : > { %v1326_v59 = vpop.permute.xlu0 %1325  ;;  %1375 = vst.msk [vmem:[#allocation2 + $0x38] sm:$0xff] %vm1367_vm9, %v1328_v56  ;;  %v963_v56 = vld [vmem:[%s3456_s23 + $0x7b] sm:$0xff] }
 0x136   : > { %1374 = vst.msk [vmem:[#allocation2 + $0x30] sm:$0xff] %vm1367_vm9, %v1326_v59  ;;  %2266 = vrot.lane.b32.xlu1 %v3878_v57, %s3405_s28  ;;  %v4012_v57 = vld [vmem:[%s3456_s23 + $0xec] sm:$0xff] }
 0x137   : > { %2264 = vrot.lane.b32.xlu0 %v3881_v58, %s3405_s28  ;;  %v4015_v58 = vld [vmem:[%s3456_s23 + $0xe4] sm:$0xff]  ;;  %v962_v59 = vld [vmem:[%s3456_s23 + $0x73] sm:$0xff] }
 0x138   : > { %v2475_v53 = vpop.permute.xlu1 %2474 }
 0x139   : > { %v2473_v61 = vpop.permute.xlu0 %2472  ;;  %2525 = vst.msk [vmem:[#allocation2 + $0x18] sm:$0xff] %vm1367_vm9, %v2475_v53 }
 0x13a   : > { %2524 = vst.msk [vmem:[#allocation2 + $0x10] sm:$0xff] %vm1367_vm9, %v2473_v61  ;;  %1226 = vrot.lane.b32.xlu1 %v4000_v60, %s3406_s29 }
 0x13b   : > { %1224 = vrot.lane.b32.xlu0 %v4003_v55, %s3406_s29 }
 0x13c   : > { %v1437_v62 = vpop.permute.xlu1 %1436 }
 0x13d   : > { %v1435_v63 = vpop.permute.xlu0 %1434  ;;  %1484 = vst.msk [vmem:[#allocation2 + $0x38] sm:$0xff] %vm1476_vm10, %v1437_v62 }
 0x13e   : > { %1483 = vst.msk [vmem:[#allocation2 + $0x30] sm:$0xff] %vm1476_vm10, %v1435_v63  ;;  %2374 = vrot.lane.b32.xlu1 %v4012_v57, %s3406_s29  ;;  %v2117_v63 = vld [vmem:[%s3456_s23 + $0xeb] sm:$0xff] }
 0x13f   : > { %2372 = vrot.lane.b32.xlu0 %v4015_v58, %s3406_s29 }
 0x140   : > { %v2583_v2 = vpop.permute.xlu1 %2582 }
 0x141   : > { %v2581_v3 = vpop.permute.xlu0 %2580  ;;  %2633 = vst.msk [vmem:[#allocation2 + $0x18] sm:$0xff] %vm1476_vm10, %v2583_v2 }
 0x142   : > { %2632 = vst.msk [vmem:[#allocation2 + $0x10] sm:$0xff] %vm1476_vm10, %v2581_v3  ;;  %1335 = vrot.lane.b32.xlu1 %v1288_v0, %s3407_s9  ;;  %v2116_v0 = vld [vmem:[%s3456_s23 + $0xe3] sm:$0xff] }
 0x143   : > { %1333 = vrot.lane.b32.xlu0 %v1287_v1, %s3407_s9  ;;  %v260_v1 = vshrl.u32 %v4112_v51, 4 }
 0x144   : > { %v678_v8 = vpop.permute.xlu1 %677  ;;  %v1502_v12 = vld [vmem:[#allocation2 + $0x38] sm:$0xff] }
 0x145   : > { %v676_v9 = vpop.permute.xlu0 %675  ;;  %v1501_v11 = vld [vmem:[#allocation2 + $0x30] sm:$0xff]  ;;  %723 = vst.msk [vmem:[#allocation2 + $0x48] sm:$0xff] %vm713_vm3, %v678_v8 }
 0x146   : > { %722 = vst.msk [vmem:[#allocation2 + $0x40] sm:$0xff] %vm713_vm3, %v676_v9  ;;  %v1516_v14 = vpack.c.bf16 %v1502_v12, %v1501_v11  ;;  %2482 = vrot.lane.b32.xlu1 %v2439_v6, %s3407_s9 }
 0x147   : > { %1773 = vst.msk [vmem:[#allocation2 + $0x38] sm:$0xff] %vm604_vm0, %v1755_v4  ;;  %1772 = vst.msk [vmem:[#allocation2 + $0x30] sm:$0xff] %vm604_vm0, %v1754_v5  ;;  %2480 = vrot.lane.b32.xlu0 %v2438_v7, %s3407_s9  ;;  %v261_v5 = vmul.u32 18, %v260_v1 }
 0x148   : > { %3239 = vmatmul.mubr.msk.bf16.gmra.mrb[12].mxu0 %vm1549_vm11, %v1516_v14  ;;  %v1831_v18 = vpop.permute.xlu1 %1830  ;;  %v2651_v21 = vld [vmem:[#allocation2 + $0x18] sm:$0xff] }
 0x149   : > { %v1829_v19 = vpop.permute.xlu0 %1828  ;;  %v2650_v20 = vld [vmem:[#allocation2 + $0x10] sm:$0xff]  ;;  %3242 = vmatprep.mubr.msk.bf16.mxu0 %vm5031_vm2, %v3404_v10  ;;  %1879 = vst.msk [vmem:[#allocation2 + $0x28] sm:$0xff] %vm713_vm3, %v1831_v18  ;;  %v262_v9 = vsub.s32 %v226_v45, %v261_v5  ;;  %v1757_v45 = vld [vmem:[%s3456_s23 + $0xd8] sm:$0xff] }
 0x14a   : > { %1878 = vst.msk [vmem:[#allocation2 + $0x20] sm:$0xff] %vm713_vm3, %v1829_v19  ;;  %v2667_v22 = vpack.c.bf16 %v2651_v21, %v2650_v20  ;;  %1444 = vrot.lane.b32.xlu1 %v1397_v16, %s3409_s12  ;;  %v4171_v18 = vld [vmem:[%s3456_s23 + $0xf4] sm:$0xff]  ;;  %v4176_v21 = vld [vmem:[%s5026_s2] ss:$0 sm:$0xff] }
 0x14b   : > { %1442 = vrot.lane.b32.xlu0 %v1396_v17, %s3409_s12  ;;  %vm442_vm14 = vcmp.ne.s32.totalorder %v262_v9, 0  ;;  %vm460_vm15 = vcmp.lt.s32.totalorder %v262_v9, 0  ;;  %v496_v15 = vadd.s32 18, %v262_v9  ;;  %v4168_v17 = vld [vmem:[%s3456_s23 + $0xfc] sm:$0xff] }
 0x14c   : > { %3273 = vmatmul.mubr.msk.bf16.gmra.mrb[4].mxu1 %vm1549_vm11, %v2667_v22  ;;  %v787_v25 = vpop.permute.xlu1 %786  ;;  %v4179_v22 = vadd.s32 16, %v4080_v42 }
 0x14d   : > { %v785_v26 = vpop.permute.xlu0 %784  ;;  %3276 = vmatprep.mubr.msk.bf16.mxu1 %vm5031_vm2, %v3404_v10  ;;  %832 = vst.msk [vmem:[#allocation2 + $0x48] sm:$0xff] %vm822_vm4, %v787_v25 }
 0x14e   : > { %831 = vst.msk [vmem:[#allocation2 + $0x40] sm:$0xff] %vm822_vm4, %v785_v26  ;;  %2590 = vrot.lane.b32.xlu1 %v2547_v23, %s3409_s12 }
 0x14f   : > { %2588 = vrot.lane.b32.xlu0 %v2546_v24, %s3409_s12 }
 0x150   : > { %v1939_v31 = vpop.permute.xlu1 %1938 }
 0x151   : > { %v1937_v34 = vpop.permute.xlu0 %1936  ;;  %1987 = vst.msk [vmem:[#allocation2 + $0x28] sm:$0xff] %vm822_vm4, %v1939_v31  ;;  %v1289_v31 = vld [vmem:[%s3456_s23 + $0x85] sm:$0xff] }
 0x152   : > { %1986 = vst.msk [vmem:[#allocation2 + $0x20] sm:$0xff] %vm822_vm4, %v1937_v34  ;;  %685 = vrot.lane.b32.xlu1 %v636_v27, %s3401_s25  ;;  %v4195_v34 = vadd.s32 24, %v4080_v42 }
 0x153   : > { %683 = vrot.lane.b32.xlu0 %v635_v30, %s3401_s25  ;;  %v1290_v30 = vld [vmem:[%s3456_s23 + $0x8d] sm:$0xff] }
 0x154   : > { %v896_v29 = vpop.permute.xlu1 %895 }
 0x155   : > { %v894_v38 = vpop.permute.xlu0 %893  ;;  %941 = vst.msk [vmem:[#allocation2 + $0x48] sm:$0xff] %vm5033_vm5, %v896_v29 }
 0x156   : > { %940 = vst.msk [vmem:[#allocation2 + $0x40] sm:$0xff] %vm5033_vm5, %v894_v38  ;;  %1838 = vrot.lane.b32.xlu1 %v1793_v35, %s3401_s25  ;;  %v4198_v29 = vmul.u32.u64.low 3817748708, %v4179_v22  ;;  %v4199_v38 = vmul.u32.u64.high 3817748708, %v4179_v22, %v4198_v29 }
 0x157   : > { %1836 = vrot.lane.b32.xlu0 %v1792_v36, %s3401_s25 }
 0x158   : > { %v2047_v28 = vpop.permute.xlu1 %2046 }
 0x159   : > { %v2045_v41 = vpop.permute.xlu0 %2044  ;;  %2095 = vst.msk [vmem:[#allocation2 + $0x28] sm:$0xff] %vm5033_vm5, %v2047_v28 }
 0x15a   : > { %2094 = vst.msk [vmem:[#allocation2 + $0x20] sm:$0xff] %vm5033_vm5, %v2045_v41  ;;  %794 = vrot.lane.b32.xlu1 %v3952_v40, %s3400_s24  ;;  %v4089_v40 = vld [vmem:[%s3456_s23 + $0x7a] sm:$0xff] }
 0x15b   : > { %792 = vrot.lane.b32.xlu0 %v3955_v37, %s3400_s24  ;;  %v4092_v37 = vld [vmem:[%s3456_s23 + $0x72] sm:$0xff] }
 0x15c   : > { %v1005_v43 = vpop.permute.xlu1 %1004 }
 0x15d   : > { %v1003_v44 = vpop.permute.xlu0 %1002  ;;  %1050 = vst.msk [vmem:[#allocation2 + $0x48] sm:$0xff] %vm5034_vm6, %v1005_v43 }
 0x15e   : > { %1049 = vst.msk [vmem:[#allocation2 + $0x40] sm:$0xff] %vm5034_vm6, %v1003_v44  ;;  %1946 = vrot.lane.b32.xlu1 %v3964_v32, %s3400_s24 }
 0x15f   : > { %1944 = vrot.lane.b32.xlu0 %v3967_v33, %s3400_s24  ;;  %v4102_v32 = vmul.u32.u64.low 3817748708, %v4080_v42  ;;  %v4103_v33 = vmul.u32.u64.high 3817748708, %v4080_v42, %v4102_v32 }
 0x160   : > { %v2155_v46 = vpop.permute.xlu1 %2154 }
 0x161   : > { %v2153_v47 = vpop.permute.xlu0 %2152  ;;  %2203 = vst.msk [vmem:[#allocation2 + $0x28] sm:$0xff] %vm5034_vm6, %v2155_v46  ;;  %v249_v62 = vshrl.u32 %v4103_v33, 4  ;;  %v1756_v46 = vld [vmem:[%s3456_s23 + $0xd0] sm:$0xff]  ;;  %v2441_v33 = vld [vmem:[%s3456_s23 + $0xfd] sm:$0xff] }
 0x162   : > { %2202 = vst.msk [vmem:[#allocation2 + $0x20] sm:$0xff] %vm5034_vm6, %v2153_v47  ;;  %903 = vrot.lane.b32.xlu1 %v4089_v40, %s3402_s26 }
 0x163   : > { %901 = vrot.lane.b32.xlu0 %v4092_v37, %s3402_s26  ;;  %v250_v4 = vmul.u32 18, %v249_v62  ;;  %v601_v62 = vld [vmem:[%s3456_s23 + $0x78] sm:$0xff] }
 0x164   : > { %v1114_v52 = vpop.permute.xlu1 %1113  ;;  %620 = vst.msk [vmem:[#allocation2 + $0x78] sm:$0xff] %vm604_vm0, %v601_v62 }
 0x165   : > { %v1112_v54 = vpop.permute.xlu0 %1111  ;;  %1159 = vst.msk [vmem:[#allocation2 + $0x48] sm:$0xff] %vm1149_vm7, %v1114_v52  ;;  %v251_v8 = vsub.s32 %v4080_v42, %v250_v4  ;;  %v4217_v51 = vmul.u32.u64.low 3817748708, %v4195_v34  ;;  %v4218_v52 = vmul.u32.u64.high 3817748708, %v4195_v34, %v4217_v51  ;;  %v1398_v4 = vld [vmem:[%s3456_s23 + $0x86] sm:$0xff] }
 0x166   : > { %1158 = vst.msk [vmem:[#allocation2 + $0x40] sm:$0xff] %vm1149_vm7, %v1112_v54  ;;  %2054 = vrot.lane.b32.xlu1 %v4106_v48, %s3402_s26  ;;  %v4297_v51 = vld [vmem:[%s3456_s23 + $0x82] sm:$0xff] }
 0x167   : > { %2052 = vrot.lane.b32.xlu0 %v4109_v49, %s3402_s26  ;;  %vm441_vm12 = vcmp.ne.s32.totalorder %v251_v8, 0  ;;  %vm459_vm13 = vcmp.lt.s32.totalorder %v251_v8, 0 }
 0x168   : > { %v2263_v53 = vpop.permute.xlu1 %2262  ;;  %vm4155_vm1 = vmand %vm459_vm13, %vm441_vm12 }
 0x169   : > { %v2261_v61 = vpop.permute.xlu0 %2260  ;;  %2311 = vst.msk [vmem:[#allocation2 + $0x28] sm:$0xff] %vm1149_vm7, %v2263_v53 }
 0x16a   : > { %2310 = vst.msk [vmem:[#allocation2 + $0x20] sm:$0xff] %vm1149_vm7, %v2261_v61  ;;  %1012 = vrot.lane.b32.xlu1 %v963_v56, %s3403_s27 }
 0x16b   : > { %1010 = vrot.lane.b32.xlu0 %v962_v59, %s3403_s27 }
 0x16c   : > { %v1223_v2 = vpop.permute.xlu1 %1222 }
 0x16d   : > { %v1221_v3 = vpop.permute.xlu0 %1220  ;;  %1268 = vst.msk [vmem:[#allocation2 + $0x48] sm:$0xff] %vm5030_vm8, %v1223_v2 }
 0x16e   : > { %1267 = vst.msk [vmem:[#allocation2 + $0x40] sm:$0xff] %vm5030_vm8, %v1221_v3  ;;  %2162 = vrot.lane.b32.xlu1 %v2117_v63, %s3403_s27  ;;  %v1399_v3 = vld [vmem:[%s3456_s23 + $0x8e] sm:$0xff] }
 0x16f   : > { %2160 = vrot.lane.b32.xlu0 %v2116_v0, %s3403_s27  ;;  %v600_v0 = vld [vmem:[%s3456_s23 + $0x70] sm:$0xff] }
 0x170   : > { %v2371_v6 = vpop.permute.xlu1 %2370  ;;  %619 = vst.msk [vmem:[#allocation2 + $0x70] sm:$0xff] %vm604_vm0, %v600_v0  ;;  %v4317_v0 = vld [vmem:[%s3456_s23 + $0xf2] sm:$0xff] }
 0x171   : > { %v2369_v7 = vpop.permute.xlu0 %2368  ;;  %2419 = vst.msk [vmem:[#allocation2 + $0x28] sm:$0xff] %vm5030_vm8, %v2371_v6 }
 0x172   : > { %2418 = vst.msk [vmem:[#allocation2 + $0x20] sm:$0xff] %vm5030_vm8, %v2369_v7  ;;  %1121 = vrot.lane.b32.xlu1 %v4000_v60, %s3405_s28  ;;  %v4148_v60 = vld [vmem:[%s3456_s23 + $0x8c] sm:$0xff]  ;;  %vm4163_vm8 = vmand %vm460_vm15, %vm442_vm14 }
 0x173   : > { %1119 = vrot.lane.b32.xlu0 %v4003_v55, %s3405_s28  ;;  %v4151_v55 = vld [vmem:[%s3456_s23 + $0x84] sm:$0xff]  ;;  %v514_v24 = vsel %vm4163_vm8, %v496_v15, %v262_v9 }
 0x174   : > { %v1332_v11 = vpop.permute.xlu1 %1331  ;;  %vm532_vm8 = vcmp.lt.s32.totalorder %v514_v24, 16 }
 0x175   : > { %v1330_v12 = vpop.permute.xlu0 %1329  ;;  %1377 = vst.msk [vmem:[#allocation2 + $0x48] sm:$0xff] %vm1367_vm9, %v1332_v11  ;;  %v4212_v32 = vsel %vm532_vm8, 1.0, %v3404_v10  ;;  %v271_v11 = vshrl.u32 %v4199_v38, 4 }
 0x176   : > { %1376 = vst.msk [vmem:[#allocation2 + $0x40] sm:$0xff] %vm1367_vm9, %v1330_v12  ;;  %2270 = vrot.lane.b32.xlu1 %v4012_v57, %s3405_s28  ;;  %v282_v57 = vshrl.u32 %v4218_v52, 4 }
 0x177   : > { %2268 = vrot.lane.b32.xlu0 %v4015_v58, %s3405_s28  ;;  %v495_v58 = vadd.s32 18, %v251_v8  ;;  %v272_v16 = vmul.u32 18, %v271_v11 }
 0x178   : > { %v2479_v13 = vpop.permute.xlu1 %2478 }
 0x179   : > { %v2477_v14 = vpop.permute.xlu0 %2476  ;;  %2527 = vst.msk [vmem:[#allocation2 + $0x28] sm:$0xff] %vm1367_vm9, %v2479_v13  ;;  %v513_v23 = vsel %vm4155_vm1, %v495_v58, %v251_v8  ;;  %v2549_v13 = vld [vmem:[%s3456_s23 + $0xfe] sm:$0xff] }
 0x17a   : > { %2526 = vst.msk [vmem:[#allocation2 + $0x20] sm:$0xff] %vm1367_vm9, %v2477_v14  ;;  %1230 = vrot.lane.b32.xlu1 %v4148_v60, %s3406_s29  ;;  %vm531_vm12 = vcmp.lt.s32.totalorder %v513_v23, 16  ;;  %v2548_v14 = vld [vmem:[%s3456_s23 + $0xf6] sm:$0xff]  ;;  %v283_v23 = vmul.u32 18, %v282_v57 }
 0x17b   : > { %1228 = vrot.lane.b32.xlu0 %v4151_v55, %s3406_s29  ;;  %v4209_v47 = vsel %vm531_vm12, 1.0, %v3404_v10 }
 0x17c   : > { %v1441_v19 = vpop.permute.xlu1 %1440 }
 0x17d   : > { %v1439_v20 = vpop.permute.xlu0 %1438  ;;  %1486 = vst.msk [vmem:[#allocation2 + $0x48] sm:$0xff] %vm1476_vm10, %v1441_v19  ;;  %v638_v19 = vld [vmem:[%s3456_s23 + $0x79] sm:$0xff] }
 0x17e   : > { %1485 = vst.msk [vmem:[#allocation2 + $0x40] sm:$0xff] %vm1476_vm10, %v1439_v20  ;;  %2378 = vrot.lane.b32.xlu1 %v4168_v17, %s3406_s29  ;;  %v637_v20 = vld [vmem:[%s3456_s23 + $0x71] sm:$0xff] }
 0x17f   : > { %2376 = vrot.lane.b32.xlu0 %v4171_v18, %s3406_s29  ;;  %v1615_v25 = vpop.f32.mrb[0].mxu0 }
 0x180   : > { %v1616_v26 = vadd.f32 %v4176_v21, %v1615_v25  ;;  %v3228_v27 = vpop.f32.mrb[1].mxu0  ;;  %v2587_v35 = vpop.permute.xlu1 %2586 }
 0x181   : > { %v2585_v36 = vpop.permute.xlu0 %2584  ;;  %2635 = vst.msk [vmem:[#allocation2 + $0x28] sm:$0xff] %vm1476_vm10, %v2587_v35  ;;  %v1618_v28 = vpop.f32.mrb[2].mxu0  ;;  %v1795_v27 = vld [vmem:[%s3456_s23 + $0xe9] sm:$0xff] }
 0x182   : > { %2634 = vst.msk [vmem:[#allocation2 + $0x20] sm:$0xff] %vm1476_vm10, %v2585_v36  ;;  %v1686_v41 = vmax.f32 %v1616_v26, 0.0  ;;  %v1619_v43 = vadd.f32 %v4176_v21, %v1618_v28  ;;  %v3229_v44 = vpop.f32.mrb[3].mxu0  ;;  %1339 = vrot.lane.b32.xlu1 %v1290_v30, %s3407_s9  ;;  %v273_v26 = vsub.s32 %v4179_v22, %v272_v16  ;;  %v1794_v30 = vld [vmem:[%s3456_s23 + $0xe1] sm:$0xff] }
 0x183   : > { %1337 = vrot.lane.b32.xlu0 %v1289_v31, %s3407_s9  ;;  %v284_v31 = vsub.s32 %v4195_v34, %v283_v23 }
 0x184   : > { %v1687_v54 = vmax.f32 %v1619_v43, 0.0  ;;  %v682_v56 = vpop.permute.xlu1 %681  ;;  %v1504_v61 = vld [vmem:[#allocation2 + $0x48] sm:$0xff]  ;;  %v1704_v1 = vmul.f32 %v4209_v47, %v1686_v41  ;;  %vm443_vm13 = vcmp.ne.s32.totalorder %v273_v26, 0  ;;  %vm461_vm14 = vcmp.lt.s32.totalorder %v273_v26, 0 }
 0x185   : > { %v680_v59 = vpop.permute.xlu0 %679  ;;  %v1503_v53 = vld [vmem:[#allocation2 + $0x40] sm:$0xff]  ;;  %725 = vst.msk [vmem:[#allocation2 + $0x58] sm:$0xff] %vm713_vm3, %v682_v56  ;;  %v497_v22 = vadd.s32 18, %v273_v26  ;;  %vm4268_vm15 = vmand %vm461_vm14, %vm443_vm13  ;;  %vm444_vm1 = vcmp.ne.s32.totalorder %v284_v31, 0  ;;  %vm462_vm12 = vcmp.lt.s32.totalorder %v284_v31, 0  ;;  %v498_v28 = vadd.s32 18, %v284_v31 }
 0x186   : > { %724 = vst.msk [vmem:[#allocation2 + $0x50] sm:$0xff] %vm713_vm3, %v680_v59  ;;  %v1517_v63 = vpack.c.bf16 %v1504_v61, %v1503_v53  ;;  %v1705_v2 = vmul.f32 %v4212_v32, %v1687_v54  ;;  %2486 = vrot.lane.b32.xlu1 %v2441_v33, %s3407_s9  ;;  %vm4280_vm8 = vmand %vm462_vm12, %vm444_vm1  ;;  %v2443_v43 = vld [vmem:[%s3456_s23 + $0x10d] sm:$0xff] }
 0x187   : > { %1775 = vst.msk [vmem:[#allocation2 + $0x48] sm:$0xff] %vm604_vm0, %v1757_v45  ;;  %1774 = vst.msk [vmem:[#allocation2 + $0x40] sm:$0xff] %vm604_vm0, %v1756_v46  ;;  %2484 = vrot.lane.b32.xlu0 %v2440_v50, %s3407_s9  ;;  %v515_v41 = vsel %vm4268_vm15, %v497_v22, %v273_v26  ;;  %v4294_v50 = vld [vmem:[%s3456_s23 + $0x8a] sm:$0xff]  ;;  %vm5043_vm15 = vcmask 228544  }
 0x188   : > { %3243 = vmatmul.mubr.msk.bf16.gmra.mrb[16].mxu0 %vm1549_vm11, %v1517_v63  ;;  %v4235_v5 = vadd.f32 %v1705_v2, %v1704_v1  ;;  %v1835_v6 = vpop.permute.xlu1 %1834  ;;  %v2653_v9 = vld [vmem:[#allocation2 + $0x28] sm:$0xff]  ;;  %vm533_vm13 = vcmp.lt.s32.totalorder %v515_v41, 16  ;;  %v4314_v63 = vld [vmem:[%s3456_s23 + $0xfa] sm:$0xff]  ;;  %vm5044_vm1 = vmmov %vm5043_vm15 }
 0x189   : > { %v1833_v7 = vpop.permute.xlu0 %1832  ;;  %v2652_v8 = vld [vmem:[#allocation2 + $0x20] sm:$0xff]  ;;  %3246 = vmatprep.mubr.msk.bf16.mxu0 %vm5031_vm2, %v3404_v10  ;;  %1881 = vst.msk [vmem:[#allocation2 + $0x38] sm:$0xff] %vm713_vm3, %v1835_v6  ;;  %v4300_v52 = vsel %vm533_vm13, 1.0, %v3404_v10  ;;  %vm5045_vm12 = vmmov %vm5044_vm1 }
 0x18a   : > { %1880 = vst.msk [vmem:[#allocation2 + $0x30] sm:$0xff] %vm713_vm3, %v1833_v7  ;;  %v2668_v12 = vpack.c.bf16 %v2653_v9, %v2652_v8  ;;  %1448 = vrot.lane.b32.xlu1 %v1399_v3, %s3409_s12  ;;  %v965_v7 = vld [vmem:[%s3456_s23 + $0x8b] sm:$0xff]  ;;  %v964_v8 = vld [vmem:[%s3456_s23 + $0x83] sm:$0xff] }
 0x18b   : > { %1446 = vrot.lane.b32.xlu0 %v1398_v4, %s3409_s12  ;;  %v1758_v41 = vld [vmem:[%s3456_s23 + $0xe0] sm:$0xff] }
 0x18c   : > { %3277 = vmatmul.mubr.msk.bf16.gmra.mrb[8].mxu1 %vm1549_vm11, %v2668_v12  ;;  %v791_v58 = vpop.permute.xlu1 %790 }
 0x18d   : > { %v789_v15 = vpop.permute.xlu0 %788  ;;  %3280 = vmatprep.mubr.msk.bf16.mxu1 %vm5031_vm2, %v3404_v10  ;;  %834 = vst.msk [vmem:[#allocation2 + $0x58] sm:$0xff] %vm822_vm4, %v791_v58 }
 0x18e   : > { %833 = vst.msk [vmem:[#allocation2 + $0x50] sm:$0xff] %vm822_vm4, %v789_v15  ;;  %2594 = vrot.lane.b32.xlu1 %v2549_v13, %s3409_s12  ;;  %v2118_v13 = vld [vmem:[%s3456_s23 + $0xf3] sm:$0xff] }
 0x18f   : > { %2592 = vrot.lane.b32.xlu0 %v2548_v14, %s3409_s12 }
 0x190   : > { %v1943_v24 = vpop.permute.xlu1 %1942 }
 0x191   : > { %v1941_v25 = vpop.permute.xlu0 %1940  ;;  %1989 = vst.msk [vmem:[#allocation2 + $0x38] sm:$0xff] %vm822_vm4, %v1943_v24  ;;  %v4360_v24 = vadd.s32 32, %v4080_v42 }
 0x192   : > { %1988 = vst.msk [vmem:[#allocation2 + $0x30] sm:$0xff] %vm822_vm4, %v1941_v25  ;;  %689 = vrot.lane.b32.xlu1 %v638_v19, %s3401_s25  ;;  %v4375_v25 = vadd.s32 40, %v4080_v42 }
 0x193   : > { %687 = vrot.lane.b32.xlu0 %v637_v20, %s3401_s25  ;;  %v4354_v20 = vld [vmem:[%s3456_s23 + $0x9c] sm:$0xff] }
 0x194   : > { %v900_v35 = vpop.permute.xlu1 %899  ;;  %v4390_v22 = vmul.u32.u64.low 3817748708, %v4375_v25  ;;  %v4391_v29 = vmul.u32.u64.high 3817748708, %v4375_v25, %v4390_v22 }
 0x195   : > { %v898_v36 = vpop.permute.xlu0 %897  ;;  %943 = vst.msk [vmem:[#allocation2 + $0x58] sm:$0xff] %vm5033_vm5, %v900_v35  ;;  %v1292_v35 = vld [vmem:[%s3456_s23 + $0x9d] sm:$0xff] }
 0x196   : > { %942 = vst.msk [vmem:[#allocation2 + $0x50] sm:$0xff] %vm5033_vm5, %v898_v36  ;;  %1842 = vrot.lane.b32.xlu1 %v1795_v27, %s3401_s25  ;;  %v1291_v36 = vld [vmem:[%s3456_s23 + $0x95] sm:$0xff] }
 0x197   : > { %1840 = vrot.lane.b32.xlu0 %v1794_v30, %s3401_s25 }
 0x198   : > { %v2051_v34 = vpop.permute.xlu1 %2050 }
 0x199   : > { %v2049_v38 = vpop.permute.xlu0 %2048  ;;  %2097 = vst.msk [vmem:[#allocation2 + $0x38] sm:$0xff] %vm5033_vm5, %v2051_v34 }
 0x19a   : > { %2096 = vst.msk [vmem:[#allocation2 + $0x30] sm:$0xff] %vm5033_vm5, %v2049_v38  ;;  %798 = vrot.lane.b32.xlu1 %v4089_v40, %s3400_s24  ;;  %v516_v40 = vsel %vm4280_vm8, %v498_v28, %v284_v31  ;;  %vm5046_vm8 = vmmov %vm5044_vm1  ;;  %v4378_v30 = vmul.u32.u64.low 3817748708, %v4360_v24  ;;  %v4379_v31 = vmul.u32.u64.high 3817748708, %v4360_v24, %v4378_v30  ;;  %v1759_v28 = vld [vmem:[%s3456_s23 + $0xe8] sm:$0xff] }
 0x19b   : > { %796 = vrot.lane.b32.xlu0 %v4092_v37, %s3400_s24  ;;  %vm534_vm14 = vcmp.lt.s32.totalorder %v516_v40, 16 }
 0x19c   : > { %v1009_v44 = vpop.permute.xlu1 %1008  ;;  %v4311_v62 = vsel %vm534_vm14, 1.0, %v3404_v10 }
 0x19d   : > { %v1007_v45 = vpop.permute.xlu0 %1006  ;;  %1052 = vst.msk [vmem:[#allocation2 + $0x58] sm:$0xff] %vm5034_vm6, %v1009_v44  ;;  %v2442_v44 = vld [vmem:[%s3456_s23 + $0x105] sm:$0xff] }
 0x19e   : > { %1051 = vst.msk [vmem:[#allocation2 + $0x50] sm:$0xff] %vm5034_vm6, %v1007_v45  ;;  %1950 = vrot.lane.b32.xlu1 %v4106_v48, %s3400_s24 }
 0x19f   : > { %1948 = vrot.lane.b32.xlu0 %v4109_v49, %s3400_s24  ;;  %v1623_v37 = vpop.f32.mrb[4].mxu0 }
 0x1a0   : > { %v1624_v46 = vadd.f32 %v4176_v21, %v1623_v37  ;;  %v3232_v33 = vpop.f32.mrb[5].mxu0  ;;  %v2159_v54 = vpop.permute.xlu1 %2158 }
 0x1a1   : > { %v2157_v56 = vpop.permute.xlu0 %2156  ;;  %2205 = vst.msk [vmem:[#allocation2 + $0x38] sm:$0xff] %vm5034_vm6, %v2159_v54  ;;  %v1626_v49 = vpop.f32.mrb[6].mxu0  ;;  %v293_v33 = vshrl.u32 %v4379_v31, 4  ;;  %v603_v54 = vld [vmem:[%s3456_s23 + $0x88] sm:$0xff] }
 0x1a2   : > { %v1688_v48 = vmax.f32 %v1624_v46, 0.0  ;;  %2204 = vst.msk [vmem:[#allocation2 + $0x30] sm:$0xff] %vm5034_vm6, %v2157_v56  ;;  %v1627_v59 = vadd.f32 %v4176_v21, %v1626_v49  ;;  %v3233_v53 = vpop.f32.mrb[7].mxu0  ;;  %907 = vrot.lane.b32.xlu1 %v4294_v50, %s3402_s26  ;;  %v1401_v49 = vld [vmem:[%s3456_s23 + $0x9e] sm:$0xff] }
 0x1a3   : > { %905 = vrot.lane.b32.xlu0 %v4297_v51, %s3402_s26  ;;  %622 = vst.msk [vmem:[#allocation2 + $0x88] sm:$0xff] %vm604_vm0, %v603_v54  ;;  %v304_v53 = vshrl.u32 %v4391_v29, 4  ;;  %v858_v54 = vld [vmem:[%s3456_s23 + $0x9a] sm:$0xff] }
 0x1a4   : > { %v1706_v61 = vmul.f32 %v4300_v52, %v1688_v48  ;;  %v1689_v1 = vmax.f32 %v1627_v59, 0.0  ;;  %v1118_v2 = vpop.permute.xlu1 %1117  ;;  %v602_v48 = vld [vmem:[%s3456_s23 + $0x80] sm:$0xff]  ;;  %v1400_v59 = vld [vmem:[%s3456_s23 + $0x96] sm:$0xff] }
 0x1a5   : > { %v1116_v3 = vpop.permute.xlu0 %1115  ;;  %1161 = vst.msk [vmem:[#allocation2 + $0x58] sm:$0xff] %vm1149_vm7, %v1118_v2 }
 0x1a6   : > { %v1724_v4 = vadd.f32 %v4235_v5, %v1706_v61  ;;  %1160 = vst.msk [vmem:[#allocation2 + $0x50] sm:$0xff] %vm1149_vm7, %v1116_v3  ;;  %v1707_v6 = vmul.f32 %v4311_v62, %v1689_v1  ;;  %2058 = vrot.lane.b32.xlu1 %v4314_v63, %s3402_s26  ;;  %v2119_v5 = vld [vmem:[%s3456_s23 + $0xfb] sm:$0xff] }
 0x1a7   : > { %2056 = vrot.lane.b32.xlu0 %v4317_v0, %s3402_s26  ;;  %621 = vst.msk [vmem:[#allocation2 + $0x80] sm:$0xff] %vm604_vm0, %v602_v48 }
 0x1a8   : > { %v4329_v9 = vadd.f32 %v1724_v4, %v1707_v6  ;;  %v2267_v11 = vpop.permute.xlu1 %2266  ;;  %v294_v4 = vmul.u32 18, %v293_v33 }
 0x1a9   : > { %v2265_v12 = vpop.permute.xlu0 %2264  ;;  %2313 = vst.msk [vmem:[#allocation2 + $0x38] sm:$0xff] %vm1149_vm7, %v2267_v11  ;;  %v305_v11 = vmul.u32 18, %v304_v53 }
 0x1aa   : > { %2312 = vst.msk [vmem:[#allocation2 + $0x30] sm:$0xff] %vm1149_vm7, %v2265_v12  ;;  %1016 = vrot.lane.b32.xlu1 %v965_v7, %s3403_s27  ;;  %v2551_v7 = vld [vmem:[%s3456_s23 + $0x10e] sm:$0xff] }
 0x1ab   : > { %1014 = vrot.lane.b32.xlu0 %v964_v8, %s3403_s27  ;;  %v2550_v8 = vld [vmem:[%s3456_s23 + $0x106] sm:$0xff] }
 0x1ac   : > { %v1227_v14 = vpop.permute.xlu1 %1226 }
 0x1ad   : > { %v1225_v57 = vpop.permute.xlu0 %1224  ;;  %1270 = vst.msk [vmem:[#allocation2 + $0x58] sm:$0xff] %vm5043_vm15, %v1227_v14  ;;  %v640_v14 = vld [vmem:[%s3456_s23 + $0x89] sm:$0xff] }
 0x1ae   : > { %1269 = vst.msk [vmem:[#allocation2 + $0x50] sm:$0xff] %vm5044_vm1, %v1225_v57  ;;  %2166 = vrot.lane.b32.xlu1 %v2119_v5, %s3403_s27  ;;  %v639_v57 = vld [vmem:[%s3456_s23 + $0x81] sm:$0xff] }
 0x1af   : > { %2164 = vrot.lane.b32.xlu0 %v2118_v13, %s3403_s27  ;;  %v295_v13 = vsub.s32 %v4360_v24, %v294_v4 }
 0x1b0   : > { %v2375_v58 = vpop.permute.xlu1 %2374 }
 0x1b1   : > { %v2373_v15 = vpop.permute.xlu0 %2372  ;;  %2421 = vst.msk [vmem:[#allocation2 + $0x38] sm:$0xff] %vm5045_vm12, %v2375_v58  ;;  %v306_v58 = vsub.s32 %v4375_v25, %v305_v11  ;;  %vm445_vm13 = vcmp.ne.s32.totalorder %v295_v13, 0  ;;  %vm463_vm14 = vcmp.lt.s32.totalorder %v295_v13, 0 }
 0x1b2   : > { %2420 = vst.msk [vmem:[#allocation2 + $0x30] sm:$0xff] %vm5046_vm8, %v2373_v15  ;;  %1125 = vrot.lane.b32.xlu1 %v4148_v60, %s3405_s28  ;;  %v4357_v60 = vld [vmem:[%s3456_s23 + $0x94] sm:$0xff]  ;;  %vm4441_vm15 = vmand %vm463_vm14, %vm445_vm13 }
 0x1b3   : > { %1123 = vrot.lane.b32.xlu0 %v4151_v55, %s3405_s28  ;;  %vm446_vm1 = vcmp.ne.s32.totalorder %v306_v58, 0  ;;  %vm464_vm12 = vcmp.lt.s32.totalorder %v306_v58, 0 }
 0x1b4   : > { %v1336_v16 = vpop.permute.xlu1 %1335  ;;  %vm482_vm8 = vmand %vm464_vm12, %vm446_vm1 }
 0x1b5   : > { %v1334_v19 = vpop.permute.xlu0 %1333  ;;  %1379 = vst.msk [vmem:[#allocation2 + $0x58] sm:$0xff] %vm1367_vm9, %v1336_v16 }
 0x1b6   : > { %1378 = vst.msk [vmem:[#allocation2 + $0x50] sm:$0xff] %vm1367_vm9, %v1334_v19  ;;  %2274 = vrot.lane.b32.xlu1 %v4168_v17, %s3405_s28  ;;  %v4369_v17 = vld [vmem:[%s3456_s23 + $0x10c] sm:$0xff]  ;;  %v499_v19 = vadd.s32 18, %v295_v13 }
 0x1b7   : > { %2272 = vrot.lane.b32.xlu0 %v4171_v18, %s3405_s28  ;;  %v4372_v18 = vld [vmem:[%s3456_s23 + $0x104] sm:$0xff] }
 0x1b8   : > { %v2483_v23 = vpop.permute.xlu1 %2482  ;;  %v517_v30 = vsel %vm4441_vm15, %v499_v19, %v295_v13  ;;  %v966_v13 = vld [vmem:[%s3456_s23 + $0x93] sm:$0xff]  ;;  %vm5049_vm15 = vcmask 228544  }
 0x1b9   : > { %v2481_v55 = vpop.permute.xlu0 %2480  ;;  %2529 = vst.msk [vmem:[#allocation2 + $0x38] sm:$0xff] %vm1367_vm9, %v2483_v23  ;;  %v1797_v23 = vld [vmem:[%s3456_s23 + $0xf9] sm:$0xff]  ;;  %vm535_vm13 = vcmp.lt.s32.totalorder %v517_v30, 16  ;;  %vm5050_vm1 = vmmov %vm5049_vm15  ;;  %v4540_v30 = vadd.s32 56, %v4080_v42 }
 0x1ba   : > { %2528 = vst.msk [vmem:[#allocation2 + $0x30] sm:$0xff] %vm1367_vm9, %v2481_v55  ;;  %1234 = vrot.lane.b32.xlu1 %v4354_v20, %s3406_s29  ;;  %v1796_v55 = vld [vmem:[%s3456_s23 + $0xf1] sm:$0xff]  ;;  %vm5051_vm12 = vmmov %vm5050_vm1 }
 0x1bb   : > { %1232 = vrot.lane.b32.xlu0 %v4357_v60, %s3406_s29 }
 0x1bc   : > { %v1445_v26 = vpop.permute.xlu1 %1444 }
 0x1bd   : > { %v1443_v27 = vpop.permute.xlu0 %1442  ;;  %1488 = vst.msk [vmem:[#allocation2 + $0x58] sm:$0xff] %vm1476_vm10, %v1445_v26 }
 0x1be   : > { %1487 = vst.msk [vmem:[#allocation2 + $0x50] sm:$0xff] %vm1476_vm10, %v1443_v27  ;;  %2382 = vrot.lane.b32.xlu1 %v4369_v17, %s3406_s29  ;;  %v500_v27 = vadd.s32 18, %v306_v58 }
 0x1bf   : > { %2380 = vrot.lane.b32.xlu0 %v4372_v18, %s3406_s29 }
 0x1c0   : > { %v2591_v34 = vpop.permute.xlu1 %2590 }
 0x1c1   : > { %v2589_v38 = vpop.permute.xlu0 %2588  ;;  %2637 = vst.msk [vmem:[#allocation2 + $0x38] sm:$0xff] %vm1476_vm10, %v2591_v34 }
 0x1c2   : > { %2636 = vst.msk [vmem:[#allocation2 + $0x30] sm:$0xff] %vm1476_vm10, %v2589_v38  ;;  %1343 = vrot.lane.b32.xlu1 %v1292_v35, %s3407_s9  ;;  %v4459_v38 = vsel %vm535_vm13, 1.0, %v3404_v10 }
 0x1c3   : > { %1341 = vrot.lane.b32.xlu0 %v1291_v36, %s3407_s9  ;;  %v518_v36 = vsel %vm482_vm8, %v500_v27, %v306_v58  ;;  %vm5052_vm8 = vmmov %vm5050_vm1 }
 0x1c4   : > { %v686_v45 = vpop.permute.xlu1 %685  ;;  %v1506_v46 = vld [vmem:[#allocation2 + $0x58] sm:$0xff]  ;;  %vm536_vm14 = vcmp.lt.s32.totalorder %v518_v36, 16 }
 0x1c5   : > { %v684_v40 = vpop.permute.xlu0 %683  ;;  %v1505_v37 = vld [vmem:[#allocation2 + $0x50] sm:$0xff]  ;;  %727 = vst.msk [vmem:[#allocation2 + $0x68] sm:$0xff] %vm713_vm3, %v686_v45 }
 0x1c6   : > { %726 = vst.msk [vmem:[#allocation2 + $0x60] sm:$0xff] %vm713_vm3, %v684_v40  ;;  %v1518_v56 = vpack.c.bf16 %v1506_v46, %v1505_v37  ;;  %2490 = vrot.lane.b32.xlu1 %v2443_v43, %s3407_s9  ;;  %v4470_v37 = vsel %vm536_vm14, 1.0, %v3404_v10 }
 0x1c7   : > { %1777 = vst.msk [vmem:[#allocation2 + $0x58] sm:$0xff] %vm604_vm0, %v1759_v28  ;;  %1776 = vst.msk [vmem:[#allocation2 + $0x50] sm:$0xff] %vm604_vm0, %v1758_v41  ;;  %2488 = vrot.lane.b32.xlu0 %v2442_v44, %s3407_s9 }
 0x1c8   : > { %3247 = vmatmul.mubr.msk.bf16.gmra.mrb[20].mxu0 %vm1549_vm11, %v1518_v56  ;;  %v1839_v61 = vpop.permute.xlu1 %1838  ;;  %v2655_v3 = vld [vmem:[#allocation2 + $0x38] sm:$0xff] }
 0x1c9   : > { %v1837_v1 = vpop.permute.xlu0 %1836  ;;  %v2654_v2 = vld [vmem:[#allocation2 + $0x30] sm:$0xff]  ;;  %3250 = vmatprep.mubr.msk.bf16.mxu0 %vm5031_vm2, %v3404_v10  ;;  %1883 = vst.msk [vmem:[#allocation2 + $0x48] sm:$0xff] %vm713_vm3, %v1839_v61 }
 0x1ca   : > { %1882 = vst.msk [vmem:[#allocation2 + $0x40] sm:$0xff] %vm713_vm3, %v1837_v1  ;;  %v2669_v6 = vpack.c.bf16 %v2655_v3, %v2654_v2  ;;  %1452 = vrot.lane.b32.xlu1 %v1401_v49, %s3409_s12  ;;  %v857_v56 = vld [vmem:[%s3456_s23 + $0x92] sm:$0xff]  ;;  %v4483_v3 = vld [vmem:[%s3456_s23 + $0x10a] sm:$0xff] }
 0x1cb   : > { %1450 = vrot.lane.b32.xlu0 %v1400_v59, %s3409_s12 }
 0x1cc   : > { %3281 = vmatmul.mubr.msk.bf16.gmra.mrb[12].mxu1 %vm1549_vm11, %v2669_v6  ;;  %v795_v12 = vpop.permute.xlu1 %794 }
 0x1cd   : > { %v793_v5 = vpop.permute.xlu0 %792  ;;  %3284 = vmatprep.mubr.msk.bf16.mxu1 %vm5031_vm2, %v3404_v10  ;;  %836 = vst.msk [vmem:[#allocation2 + $0x68] sm:$0xff] %vm822_vm4, %v795_v12 }
 0x1ce   : > { %835 = vst.msk [vmem:[#allocation2 + $0x60] sm:$0xff] %vm822_vm4, %v793_v5  ;;  %2598 = vrot.lane.b32.xlu1 %v2551_v7, %s3409_s12  ;;  %v967_v5 = vld [vmem:[%s3456_s23 + $0x9b] sm:$0xff] }
 0x1cf   : > { %2596 = vrot.lane.b32.xlu0 %v2550_v8, %s3409_s12 }
 0x1d0   : > { %v1947_v15 = vpop.permute.xlu1 %1946 }
 0x1d1   : > { %v1945_v16 = vpop.permute.xlu0 %1944  ;;  %1991 = vst.msk [vmem:[#allocation2 + $0x48] sm:$0xff] %vm822_vm4, %v1947_v15 }
 0x1d2   : > { %1990 = vst.msk [vmem:[#allocation2 + $0x40] sm:$0xff] %vm822_vm4, %v1945_v16  ;;  %693 = vrot.lane.b32.xlu1 %v640_v14, %s3401_s25 }
 0x1d3   : > { %691 = vrot.lane.b32.xlu0 %v639_v57, %s3401_s25 }
 0x1d4   : > { %v904_v25 = vpop.permute.xlu1 %903 }
 0x1d5   : > { %v902_v26 = vpop.permute.xlu0 %901  ;;  %945 = vst.msk [vmem:[#allocation2 + $0x68] sm:$0xff] %vm5033_vm5, %v904_v25  ;;  %v1185_v25 = vld [vmem:[%s3456_s23 + $0xac] sm:$0xff] }
 0x1d6   : > { %944 = vst.msk [vmem:[#allocation2 + $0x60] sm:$0xff] %vm5033_vm5, %v902_v26  ;;  %1846 = vrot.lane.b32.xlu1 %v1797_v23, %s3401_s25  ;;  %v1184_v26 = vld [vmem:[%s3456_s23 + $0xa4] sm:$0xff] }
 0x1d7   : > { %1844 = vrot.lane.b32.xlu0 %v1796_v55, %s3401_s25 }
 0x1d8   : > { %v2055_v31 = vpop.permute.xlu1 %2054 }
 0x1d9   : > { %v2053_v35 = vpop.permute.xlu0 %2052  ;;  %2099 = vst.msk [vmem:[#allocation2 + $0x48] sm:$0xff] %vm5033_vm5, %v2055_v31 }
 0x1da   : > { %2098 = vst.msk [vmem:[#allocation2 + $0x40] sm:$0xff] %vm5033_vm5, %v2053_v35  ;;  %802 = vrot.lane.b32.xlu1 %v4294_v50, %s3400_s24 }
 0x1db   : > { %800 = vrot.lane.b32.xlu0 %v4297_v51, %s3400_s24  ;;  %v1631_v22 = vpop.f32.mrb[8].mxu0 }
 0x1dc   : > { %v1632_v29 = vadd.f32 %v4176_v21, %v1631_v22  ;;  %v3236_v34 = vpop.f32.mrb[9].mxu0  ;;  %v1013_v28 = vpop.permute.xlu1 %1012 }
 0x1dd   : > { %v1011_v41 = vpop.permute.xlu0 %1010  ;;  %1054 = vst.msk [vmem:[#allocation2 + $0x68] sm:$0xff] %vm5034_vm6, %v1013_v28  ;;  %v1634_v50 = vpop.f32.mrb[10].mxu0  ;;  %v1293_v34 = vld [vmem:[%s3456_s23 + $0xa5] sm:$0xff] }
 0x1de   : > { %v1690_v43 = vmax.f32 %v1632_v29, 0.0  ;;  %1053 = vst.msk [vmem:[#allocation2 + $0x60] sm:$0xff] %vm5034_vm6, %v1011_v41  ;;  %v1635_v51 = vadd.f32 %v4176_v21, %v1634_v50  ;;  %v3237_v44 = vpop.f32.mrb[11].mxu0  ;;  %1954 = vrot.lane.b32.xlu1 %v4314_v63, %s3400_s24  ;;  %v1294_v29 = vld [vmem:[%s3456_s23 + $0xad] sm:$0xff]  ;;  %v4555_v28 = vmul.u32.u64.low 3817748708, %v4540_v30  ;;  %v4556_v41 = vmul.u32.u64.high 3817748708, %v4540_v30, %v4555_v28 }
 0x1df   : > { %1952 = vrot.lane.b32.xlu0 %v4317_v0, %s3400_s24  ;;  %v2766_v45 = vpop.f32.mrb[0].mxu1  ;;  %v1760_v44 = vld [vmem:[%s3456_s23 + $0xf0] sm:$0xff] }
 0x1e0   : > { %v1708_v40 = vmul.f32 %v4459_v38, %v1690_v43  ;;  %v2767_v46 = vadd.f32 %v4176_v21, %v2766_v45  ;;  %v3270_v33 = vpop.f32.mrb[1].mxu1  ;;  %v1691_v48 = vmax.f32 %v1635_v51, 0.0  ;;  %v2163_v49 = vpop.permute.xlu1 %2162  ;;  %v1761_v51 = vld [vmem:[%s3456_s23 + $0xf8] sm:$0xff] }
 0x1e1   : > { %v2161_v59 = vpop.permute.xlu0 %2160  ;;  %2207 = vst.msk [vmem:[#allocation2 + $0x48] sm:$0xff] %vm5034_vm6, %v2163_v49  ;;  %v2769_v0 = vpop.f32.mrb[2].mxu1  ;;  %v2445_v45 = vld [vmem:[%s3456_s23 + $0x11d] sm:$0xff] }
 0x1e2   : > { %v1726_v63 = vadd.f32 %v4329_v9, %v1708_v40  ;;  %2206 = vst.msk [vmem:[#allocation2 + $0x40] sm:$0xff] %vm5034_vm6, %v2161_v59  ;;  %v1709_v53 = vmul.f32 %v4470_v37, %v1691_v48  ;;  %v2837_v61 = vmax.f32 %v2767_v46, 0.0  ;;  %v2770_v1 = vadd.f32 %v4176_v21, %v2769_v0  ;;  %v3271_v2 = vpop.f32.mrb[3].mxu1  ;;  %911 = vrot.lane.b32.xlu1 %v858_v54, %s3402_s26  ;;  %v4486_v9 = vld [vmem:[%s3456_s23 + $0x102] sm:$0xff]  ;;  %v2444_v40 = vld [vmem:[%s3456_s23 + $0x115] sm:$0xff] }
 0x1e3   : > { %909 = vrot.lane.b32.xlu0 %v857_v56, %s3402_s26  ;;  %v1403_v59 = vld [vmem:[%s3456_s23 + $0xae] sm:$0xff]  ;;  %v326_v0 = vshrl.u32 %v4556_v41, 4 }
 0x1e4   : > { %v4488_v4 = vadd.f32 %v1726_v63, %v1709_v53  ;;  %v2838_v6 = vmax.f32 %v2770_v1, 0.0  ;;  %v1122_v7 = vpop.permute.xlu1 %1121  ;;  %v2855_v11 = vmul.f32 %v4209_v47, %v2837_v61  ;;  %v2121_v47 = vld [vmem:[%s3456_s23 + $0x10b] sm:$0xff] }
 0x1e5   : > { %v1120_v8 = vpop.permute.xlu0 %1119  ;;  %1163 = vst.msk [vmem:[#allocation2 + $0x68] sm:$0xff] %vm1149_vm7, %v1122_v7  ;;  %v1402_v63 = vld [vmem:[%s3456_s23 + $0xa6] sm:$0xff] }
 0x1e6   : > { %1162 = vst.msk [vmem:[#allocation2 + $0x60] sm:$0xff] %vm1149_vm7, %v1120_v8  ;;  %v2856_v12 = vmul.f32 %v4212_v32, %v2838_v6  ;;  %2062 = vrot.lane.b32.xlu1 %v4483_v3, %s3402_s26  ;;  %v2120_v32 = vld [vmem:[%s3456_s23 + $0x103] sm:$0xff] }
 0x1e7   : > { %2060 = vrot.lane.b32.xlu0 %v4486_v9, %s3402_s26  ;;  %v2553_v8 = vld [vmem:[%s3456_s23 + $0x11e] sm:$0xff] }
 0x1e8   : > { %v4500_v14 = vadd.f32 %v2856_v12, %v2855_v11  ;;  %v2271_v57 = vpop.permute.xlu1 %2270  ;;  %v2552_v11 = vld [vmem:[%s3456_s23 + $0x116] sm:$0xff]  ;;  %v327_v12 = vmul.u32 18, %v326_v0 }
 0x1e9   : > { %v2269_v58 = vpop.permute.xlu0 %2268  ;;  %2315 = vst.msk [vmem:[#allocation2 + $0x48] sm:$0xff] %vm1149_vm7, %v2271_v57 }
 0x1ea   : > { %2314 = vst.msk [vmem:[#allocation2 + $0x40] sm:$0xff] %vm1149_vm7, %v2269_v58  ;;  %1020 = vrot.lane.b32.xlu1 %v967_v5, %s3403_s27  ;;  %v1799_v58 = vld [vmem:[%s3456_s23 + $0x109] sm:$0xff] }
 0x1eb   : > { %1018 = vrot.lane.b32.xlu0 %v966_v13, %s3403_s27 }
 0x1ec   : > { %v1231_v15 = vpop.permute.xlu1 %1230 }
 0x1ed   : > { %v1229_v16 = vpop.permute.xlu0 %1228  ;;  %1272 = vst.msk [vmem:[#allocation2 + $0x68] sm:$0xff] %vm5049_vm15, %v1231_v15 }
 0x1ee   : > { %1271 = vst.msk [vmem:[#allocation2 + $0x60] sm:$0xff] %vm5050_vm1, %v1229_v16  ;;  %2170 = vrot.lane.b32.xlu1 %v2121_v47, %s3403_s27  ;;  %v1798_v47 = vld [vmem:[%s3456_s23 + $0x101] sm:$0xff] }
 0x1ef   : > { %2168 = vrot.lane.b32.xlu0 %v2120_v32, %s3403_s27  ;;  %v328_v32 = vsub.s32 %v4540_v30, %v327_v12 }
 0x1f0   : > { %v2379_v19 = vpop.permute.xlu1 %2378 }
 0x1f1   : > { %v2377_v23 = vpop.permute.xlu0 %2376  ;;  %2423 = vst.msk [vmem:[#allocation2 + $0x48] sm:$0xff] %vm5051_vm12, %v2379_v19  ;;  %vm448_vm1 = vcmp.ne.s32.totalorder %v328_v32, 0  ;;  %vm466_vm12 = vcmp.lt.s32.totalorder %v328_v32, 0 }
 0x1f2   : > { %2422 = vst.msk [vmem:[#allocation2 + $0x40] sm:$0xff] %vm5052_vm8, %v2377_v23  ;;  %1129 = vrot.lane.b32.xlu1 %v4354_v20, %s3405_s28  ;;  %vm4612_vm8 = vmand %vm466_vm12, %vm448_vm1 }
 0x1f3   : > { %1127 = vrot.lane.b32.xlu0 %v4357_v60, %s3405_s28  ;;  %v4527_v60 = vadd.s32 48, %v4080_v42 }
 0x1f4   : > { %v1340_v55 = vpop.permute.xlu1 %1339 }
 0x1f5   : > { %v1338_v24 = vpop.permute.xlu0 %1337  ;;  %1381 = vst.msk [vmem:[#allocation2 + $0x68] sm:$0xff] %vm1367_vm9, %v1340_v55  ;;  %v4543_v36 = vmul.u32.u64.low 3817748708, %v4527_v60  ;;  %v4544_v22 = vmul.u32.u64.high 3817748708, %v4527_v60, %v4543_v36 }
 0x1f6   : > { %1380 = vst.msk [vmem:[#allocation2 + $0x60] sm:$0xff] %vm1367_vm9, %v1338_v24  ;;  %2278 = vrot.lane.b32.xlu1 %v4369_v17, %s3405_s28  ;;  %v4534_v17 = vld [vmem:[%s3456_s23 + $0x11c] sm:$0xff] }
 0x1f7   : > { %2276 = vrot.lane.b32.xlu0 %v4372_v18, %s3405_s28  ;;  %v4537_v18 = vld [vmem:[%s3456_s23 + $0x114] sm:$0xff]  ;;  %v315_v48 = vshrl.u32 %v4544_v22, 4 }
 0x1f8   : > { %v2487_v20 = vpop.permute.xlu1 %2486  ;;  %v2123_v22 = vld [vmem:[%s3456_s23 + $0x11b] sm:$0xff] }
 0x1f9   : > { %v2485_v27 = vpop.permute.xlu0 %2484  ;;  %2531 = vst.msk [vmem:[#allocation2 + $0x48] sm:$0xff] %vm1367_vm9, %v2487_v20  ;;  %v316_v6 = vmul.u32 18, %v315_v48 }
 0x1fa   : > { %2530 = vst.msk [vmem:[#allocation2 + $0x40] sm:$0xff] %vm1367_vm9, %v2485_v27  ;;  %1238 = vrot.lane.b32.xlu1 %v1185_v25, %s3406_s29  ;;  %v502_v25 = vadd.s32 18, %v328_v32  ;;  %v4617_v27 = vld [vmem:[%s3456_s23 + $0x11a] sm:$0xff] }
 0x1fb   : > { %1236 = vrot.lane.b32.xlu0 %v1184_v26, %s3406_s29  ;;  %v317_v57 = vsub.s32 %v4527_v60, %v316_v6  ;;  %v4620_v60 = vld [vmem:[%s3456_s23 + $0x112] sm:$0xff]  ;;  %v4660_v6 = vld [vmem:[%s3456_s23 + $0x124] sm:$0xff] }
 0x1fc   : > { %v1449_v31 = vpop.permute.xlu1 %1448 }
 0x1fd   : > { %v1447_v35 = vpop.permute.xlu0 %1446  ;;  %1490 = vst.msk [vmem:[#allocation2 + $0x68] sm:$0xff] %vm1476_vm10, %v1449_v31  ;;  %vm447_vm13 = vcmp.ne.s32.totalorder %v317_v57, 0  ;;  %vm465_vm14 = vcmp.lt.s32.totalorder %v317_v57, 0  ;;  %v501_v19 = vadd.s32 18, %v317_v57 }
 0x1fe   : > { %1489 = vst.msk [vmem:[#allocation2 + $0x60] sm:$0xff] %vm1476_vm10, %v1447_v35  ;;  %2386 = vrot.lane.b32.xlu1 %v4534_v17, %s3406_s29  ;;  %vm4600_vm15 = vmand %vm465_vm14, %vm447_vm13 }
 0x1ff   : > { %2384 = vrot.lane.b32.xlu0 %v4537_v18, %s3406_s29  ;;  %v519_v26 = vsel %vm4600_vm15, %v501_v19, %v317_v57  ;;  %v2554_v57 = vld [vmem:[%s3456_s23 + $0x126] sm:$0xff]  ;;  %vm5057_vm15 = vcmask 228544  }
 0x200   : > { %v2595_v43 = vpop.permute.xlu1 %2594  ;;  %vm537_vm13 = vcmp.lt.s32.totalorder %v519_v26, 16  ;;  %vm5058_vm1 = vmmov %vm5057_vm15 }
 0x201   : > { %v2593_v50 = vpop.permute.xlu0 %2592  ;;  %2639 = vst.msk [vmem:[#allocation2 + $0x48] sm:$0xff] %vm1476_vm10, %v2595_v43  ;;  %vm5059_vm12 = vmmov %vm5058_vm1 }
 0x202   : > { %2638 = vst.msk [vmem:[#allocation2 + $0x40] sm:$0xff] %vm1476_vm10, %v2593_v50  ;;  %1347 = vrot.lane.b32.xlu1 %v1294_v29, %s3407_s9  ;;  %v2122_v29 = vld [vmem:[%s3456_s23 + $0x113] sm:$0xff] }
 0x203   : > { %1345 = vrot.lane.b32.xlu0 %v1293_v34, %s3407_s9  ;;  %v4634_v34 = vsel %vm537_vm13, 1.0, %v3404_v10 }
 0x204   : > { %v690_v46 = vpop.permute.xlu1 %689  ;;  %v1508_v56 = vld [vmem:[#allocation2 + $0x68] sm:$0xff] }
 0x205   : > { %v688_v33 = vpop.permute.xlu0 %687  ;;  %v1507_v54 = vld [vmem:[#allocation2 + $0x60] sm:$0xff]  ;;  %729 = vst.msk [vmem:[#allocation2 + $0x78] sm:$0xff] %vm713_vm3, %v690_v46 }
 0x206   : > { %728 = vst.msk [vmem:[#allocation2 + $0x70] sm:$0xff] %vm713_vm3, %v688_v33  ;;  %v1519_v49 = vpack.c.bf16 %v1508_v56, %v1507_v54  ;;  %2494 = vrot.lane.b32.xlu1 %v2445_v45, %s3407_s9 }
 0x207   : > { %1779 = vst.msk [vmem:[#allocation2 + $0x68] sm:$0xff] %vm604_vm0, %v1761_v51  ;;  %1778 = vst.msk [vmem:[#allocation2 + $0x60] sm:$0xff] %vm604_vm0, %v1760_v44  ;;  %2492 = vrot.lane.b32.xlu0 %v2444_v40, %s3407_s9 }
 0x208   : > { %3251 = vmatmul.mubr.msk.bf16.gmra.mrb[24].mxu0 %vm1549_vm11, %v1519_v49  ;;  %v1843_v53 = vpop.permute.xlu1 %1842  ;;  %v2657_v2 = vld [vmem:[#allocation2 + $0x48] sm:$0xff] }
 0x209   : > { %v1841_v61 = vpop.permute.xlu0 %1840  ;;  %v2656_v1 = vld [vmem:[#allocation2 + $0x40] sm:$0xff]  ;;  %3254 = vmatprep.mubr.msk.bf16.mxu0 %vm5031_vm2, %v3404_v10  ;;  %1885 = vst.msk [vmem:[#allocation2 + $0x58] sm:$0xff] %vm713_vm3, %v1843_v53 }
 0x20a   : > { %1884 = vst.msk [vmem:[#allocation2 + $0x50] sm:$0xff] %vm713_vm3, %v1841_v61  ;;  %v2670_v7 = vpack.c.bf16 %v2657_v2, %v2656_v1  ;;  %1456 = vrot.lane.b32.xlu1 %v1403_v59, %s3409_s12  ;;  %v4657_v2 = vld [vmem:[%s3456_s23 + $0x12c] sm:$0xff] }
 0x20b   : > { %1454 = vrot.lane.b32.xlu0 %v1402_v63, %s3409_s12 }
 0x20c   : > { %3285 = vmatmul.mubr.msk.bf16.gmra.mrb[16].mxu1 %vm1549_vm11, %v2670_v7  ;;  %v799_v5 = vpop.permute.xlu1 %798 }
 0x20d   : > { %v797_v13 = vpop.permute.xlu0 %796  ;;  %3288 = vmatprep.mubr.msk.bf16.mxu1 %vm5031_vm2, %v3404_v10  ;;  %838 = vst.msk [vmem:[#allocation2 + $0x78] sm:$0xff] %vm822_vm4, %v799_v5 }
 0x20e   : > { %837 = vst.msk [vmem:[#allocation2 + $0x70] sm:$0xff] %vm822_vm4, %v797_v13  ;;  %2602 = vrot.lane.b32.xlu1 %v2553_v8, %s3409_s12 }
 0x20f   : > { %2600 = vrot.lane.b32.xlu0 %v2552_v11, %s3409_s12 }
 0x210   : > { %v1951_v15 = vpop.permute.xlu1 %1950 }
 0x211   : > { %v1949_v16 = vpop.permute.xlu0 %1948  ;;  %1993 = vst.msk [vmem:[#allocation2 + $0x58] sm:$0xff] %vm822_vm4, %v1951_v15  ;;  %v1800_v15 = vld [vmem:[%s3456_s23 + $0x111] sm:$0xff] }
 0x212   : > { %1992 = vst.msk [vmem:[#allocation2 + $0x50] sm:$0xff] %vm822_vm4, %v1949_v16  ;;  %1850 = vrot.lane.b32.xlu1 %v1799_v58, %s3401_s25 }
 0x213   : > { %1848 = vrot.lane.b32.xlu0 %v1798_v47, %s3401_s25 }
 0x214   : > { %v908_v55 = vpop.permute.xlu1 %907 }
 0x215   : > { %v906_v24 = vpop.permute.xlu0 %905  ;;  %947 = vst.msk [vmem:[#allocation2 + $0x78] sm:$0xff] %vm5033_vm5, %v908_v55 }
 0x216   : > { %946 = vst.msk [vmem:[#allocation2 + $0x70] sm:$0xff] %vm5033_vm5, %v906_v24  ;;  %1958 = vrot.lane.b32.xlu1 %v4483_v3, %s3400_s24  ;;  %v520_v3 = vsel %vm4612_vm8, %v502_v25, %v328_v32  ;;  %v1801_v32 = vld [vmem:[%s3456_s23 + $0x119] sm:$0xff]  ;;  %vm5060_vm8 = vmmov %vm5058_vm1  ;;  %v2017_v24 = vld [vmem:[%s3456_s23 + $0x12a] sm:$0xff] }
 0x217   : > { %1956 = vrot.lane.b32.xlu0 %v4486_v9, %s3400_s24  ;;  %vm538_vm14 = vcmp.lt.s32.totalorder %v520_v3, 16  ;;  %v2016_v25 = vld [vmem:[%s3456_s23 + $0x122] sm:$0xff] }
 0x218   : > { %v2059_v30 = vpop.permute.xlu1 %2058  ;;  %v4643_v46 = vsel %vm538_vm14, 1.0, %v3404_v10  ;;  %v2124_v3 = vld [vmem:[%s3456_s23 + $0x123] sm:$0xff] }
 0x219   : > { %v2057_v31 = vpop.permute.xlu0 %2056  ;;  %2101 = vst.msk [vmem:[#allocation2 + $0x58] sm:$0xff] %vm5033_vm5, %v2059_v30  ;;  %v233_v30 = vadd.s32 64, %v4080_v42 }
 0x21a   : > { %2100 = vst.msk [vmem:[#allocation2 + $0x50] sm:$0xff] %vm5033_vm5, %v2057_v31  ;;  %2066 = vrot.lane.b32.xlu1 %v4617_v27, %s3402_s26  ;;  %v2125_v31 = vld [vmem:[%s3456_s23 + $0x12b] sm:$0xff] }
 0x21b   : > { %2064 = vrot.lane.b32.xlu0 %v4620_v60, %s3402_s26  ;;  %v1639_v9 = vpop.f32.mrb[12].mxu0 }
 0x21c   : > { %v1640_v35 = vadd.f32 %v4176_v21, %v1639_v9  ;;  %v3240_v36 = vpop.f32.mrb[13].mxu0  ;;  %v1017_v28 = vpop.permute.xlu1 %1016 }
 0x21d   : > { %v1015_v41 = vpop.permute.xlu0 %1014  ;;  %1056 = vst.msk [vmem:[#allocation2 + $0x78] sm:$0xff] %vm5034_vm6, %v1017_v28  ;;  %v1642_v50 = vpop.f32.mrb[14].mxu0 }
 0x21e   : > { %v1692_v43 = vmax.f32 %v1640_v35, 0.0  ;;  %1055 = vst.msk [vmem:[#allocation2 + $0x70] sm:$0xff] %vm5034_vm6, %v1015_v41  ;;  %v1643_v51 = vadd.f32 %v4176_v21, %v1642_v50  ;;  %v3241_v44 = vpop.f32.mrb[15].mxu0  ;;  %2174 = vrot.lane.b32.xlu1 %v2123_v22, %s3403_s27  ;;  %v4708_v35 = vmul.u32.u64.low 3817748708, %v233_v30  ;;  %v4709_v36 = vmul.u32.u64.high 3817748708, %v233_v30, %v4708_v35  ;;  %v1762_v50 = vld [vmem:[%s3456_s23 + $0x100] sm:$0xff] }
 0x21f   : > { %2172 = vrot.lane.b32.xlu0 %v2122_v29, %s3403_s27  ;;  %v2774_v45 = vpop.f32.mrb[4].mxu1  ;;  %v2340_v44 = vld [vmem:[%s3456_s23 + $0x134] sm:$0xff] }
 0x220   : > { %v1710_v40 = vmul.f32 %v4634_v34, %v1692_v43  ;;  %v2775_v33 = vadd.f32 %v4176_v21, %v2774_v45  ;;  %v3274_v54 = vpop.f32.mrb[5].mxu1  ;;  %v1693_v56 = vmax.f32 %v1643_v51, 0.0  ;;  %v2167_v48 = vpop.permute.xlu1 %2166  ;;  %v1763_v43 = vld [vmem:[%s3456_s23 + $0x108] sm:$0xff]  ;;  %v2341_v51 = vld [vmem:[%s3456_s23 + $0x13c] sm:$0xff] }
 0x221   : > { %v2165_v49 = vpop.permute.xlu0 %2164  ;;  %2209 = vst.msk [vmem:[#allocation2 + $0x58] sm:$0xff] %vm5034_vm6, %v2167_v48  ;;  %v2777_v0 = vpop.f32.mrb[6].mxu1 }
 0x222   : > { %v1728_v59 = vadd.f32 %v4488_v4, %v1710_v40  ;;  %v2839_v63 = vmax.f32 %v2775_v33, 0.0  ;;  %2208 = vst.msk [vmem:[#allocation2 + $0x50] sm:$0xff] %vm5034_vm6, %v2165_v49  ;;  %v1711_v53 = vmul.f32 %v4643_v46, %v1693_v56  ;;  %v2778_v61 = vadd.f32 %v4176_v21, %v2777_v0  ;;  %v3275_v1 = vpop.f32.mrb[7].mxu1  ;;  %2282 = vrot.lane.b32.xlu1 %v4534_v17, %s3405_s28  ;;  %v2449_v49 = vld [vmem:[%s3456_s23 + $0x13d] sm:$0xff] }
 0x223   : > { %2280 = vrot.lane.b32.xlu0 %v4537_v18, %s3405_s28  ;;  %v2446_v18 = vld [vmem:[%s3456_s23 + $0x125] sm:$0xff]  ;;  %v337_v56 = vshrl.u32 %v4709_v36, 4 }
 0x224   : > { %v2857_v4 = vmul.f32 %v4300_v52, %v2839_v63  ;;  %v4662_v7 = vadd.f32 %v1728_v59, %v1711_v53  ;;  %v2840_v8 = vmax.f32 %v2778_v61, 0.0  ;;  %v1126_v11 = vpop.permute.xlu1 %1125  ;;  %v2447_v52 = vld [vmem:[%s3456_s23 + $0x12d] sm:$0xff]  ;;  %v2448_v59 = vld [vmem:[%s3456_s23 + $0x135] sm:$0xff] }
 0x225   : > { %v1124_v21 = vpop.permute.xlu0 %1123  ;;  %1165 = vst.msk [vmem:[#allocation2 + $0x78] sm:$0xff] %vm1149_vm7, %v1126_v11 }
 0x226   : > { %v2875_v12 = vadd.f32 %v4500_v14, %v2857_v4  ;;  %1164 = vst.msk [vmem:[#allocation2 + $0x70] sm:$0xff] %vm1149_vm7, %v1124_v21  ;;  %v2858_v17 = vmul.f32 %v4311_v62, %v2840_v8  ;;  %2390 = vrot.lane.b32.xlu1 %v4657_v2, %s3406_s29  ;;  %v2555_v62 = vld [vmem:[%s3456_s23 + $0x12e] sm:$0xff]  ;;  %v338_v4 = vmul.u32 18, %v337_v56  ;;  %v2556_v8 = vld [vmem:[%s3456_s23 + $0x136] sm:$0xff] }
 0x227   : > { %2388 = vrot.lane.b32.xlu0 %v4660_v6, %s3406_s29 }
 0x228   : > { %v4674_v5 = vadd.f32 %v2875_v12, %v2858_v17  ;;  %v2275_v14 = vpop.permute.xlu1 %2274  ;;  %v339_v17 = vsub.s32 %v233_v30, %v338_v4 }
 0x229   : > { %v2273_v13 = vpop.permute.xlu0 %2272  ;;  %2317 = vst.msk [vmem:[#allocation2 + $0x58] sm:$0xff] %vm1149_vm7, %v2275_v14 }
 0x22a   : > { %2316 = vst.msk [vmem:[#allocation2 + $0x50] sm:$0xff] %vm1149_vm7, %v2273_v13  ;;  %2498 = vrot.lane.b32.xlu1 %v2447_v52, %s3407_s9  ;;  %vm449_vm13 = vcmp.ne.s32.totalorder %v339_v17, 0  ;;  %vm467_vm14 = vcmp.lt.s32.totalorder %v339_v17, 0  ;;  %v503_v13 = vadd.s32 18, %v339_v17 }
 0x22b   : > { %2496 = vrot.lane.b32.xlu0 %v2446_v18, %s3407_s9 }
 0x22c   : > { %v1235_v58 = vpop.permute.xlu1 %1234 }
 0x22d   : > { %v1233_v47 = vpop.permute.xlu0 %1232  ;;  %1274 = vst.msk [vmem:[#allocation2 + $0x78] sm:$0xff] %vm5057_vm15, %v1235_v58  ;;  %vm485_vm15 = vmand %vm467_vm14, %vm449_vm13 }
 0x22e   : > { %1273 = vst.msk [vmem:[#allocation2 + $0x70] sm:$0xff] %vm5058_vm1, %v1233_v47  ;;  %2606 = vrot.lane.b32.xlu1 %v2555_v62, %s3409_s12  ;;  %v521_v47 = vsel %vm485_vm15, %v503_v13, %v339_v17 }
 0x22f   : > { %2604 = vrot.lane.b32.xlu0 %v2554_v57, %s3409_s12 }
 0x230   : > { %v2383_v16 = vpop.permute.xlu1 %2382 }
 0x231   : > { %v2381_v19 = vpop.permute.xlu0 %2380  ;;  %2425 = vst.msk [vmem:[#allocation2 + $0x58] sm:$0xff] %vm5059_vm12, %v2383_v16 }
 0x232   : > { %2424 = vst.msk [vmem:[#allocation2 + $0x50] sm:$0xff] %vm5060_vm8, %v2381_v19  ;;  %1854 = vrot.lane.b32.xlu1 %v1801_v32, %s3401_s25 }
 0x233   : > { %1852 = vrot.lane.b32.xlu0 %v1800_v15, %s3401_s25 }
 0x234   : > { %v1344_v23 = vpop.permute.xlu1 %1343 }
 0x235   : > { %v1342_v55 = vpop.permute.xlu0 %1341  ;;  %1383 = vst.msk [vmem:[#allocation2 + $0x78] sm:$0xff] %vm1367_vm9, %v1344_v23  ;;  %v4763_v23 = vld [vmem:[%s5026_s2] ss:$0 sm:$0xff] }
 0x236   : > { %1382 = vst.msk [vmem:[#allocation2 + $0x70] sm:$0xff] %vm1367_vm9, %v1342_v55  ;;  %1962 = vrot.lane.b32.xlu1 %v4617_v27, %s3400_s24  ;;  %v234_v27 = vadd.s32 72, %v4080_v42 }
 0x237   : > { %1960 = vrot.lane.b32.xlu0 %v4620_v60, %s3400_s24 }
 0x238   : > { %v2491_v26 = vpop.permute.xlu1 %2490  ;;  %v4715_v22 = vmul.u32.u64.low 3817748708, %v234_v27  ;;  %v4716_v29 = vmul.u32.u64.high 3817748708, %v234_v27, %v4715_v22 }
 0x239   : > { %v2489_v20 = vpop.permute.xlu0 %2488  ;;  %2533 = vst.msk [vmem:[#allocation2 + $0x58] sm:$0xff] %vm1367_vm9, %v2491_v26 }
 0x23a   : > { %2532 = vst.msk [vmem:[#allocation2 + $0x50] sm:$0xff] %vm1367_vm9, %v2489_v20  ;;  %2070 = vrot.lane.b32.xlu1 %v2017_v24, %s3402_s26  ;;  %v348_v63 = vshrl.u32 %v4716_v29, 4 }
 0x23b   : > { %2068 = vrot.lane.b32.xlu0 %v2016_v25, %s3402_s26 }
 0x23c   : > { %v1453_v60 = vpop.permute.xlu1 %1452  ;;  %v349_v11 = vmul.u32 18, %v348_v63 }
 0x23d   : > { %v1451_v9 = vpop.permute.xlu0 %1450  ;;  %1492 = vst.msk [vmem:[#allocation2 + $0x78] sm:$0xff] %vm1476_vm10, %v1453_v60 }
 0x23e   : > { %1491 = vst.msk [vmem:[#allocation2 + $0x70] sm:$0xff] %vm1476_vm10, %v1451_v9  ;;  %2178 = vrot.lane.b32.xlu1 %v2125_v31, %s3403_s27  ;;  %v350_v52 = vsub.s32 %v234_v27, %v349_v11  ;;  %v236_v11 = vadd.s32 88, %v4080_v42 }
 0x23f   : > { %2176 = vrot.lane.b32.xlu0 %v2124_v3, %s3403_s27 }
 0x240   : > { %v2599_v28 = vpop.permute.xlu1 %2598  ;;  %vm450_vm1 = vcmp.ne.s32.totalorder %v350_v52, 0  ;;  %vm468_vm12 = vcmp.lt.s32.totalorder %v350_v52, 0  ;;  %v504_v58 = vadd.s32 18, %v350_v52 }
 0x241   : > { %v2597_v41 = vpop.permute.xlu0 %2596  ;;  %2641 = vst.msk [vmem:[#allocation2 + $0x58] sm:$0xff] %vm1476_vm10, %v2599_v28  ;;  %vm486_vm8 = vmand %vm468_vm12, %vm450_vm1 }
 0x242   : > { %2640 = vst.msk [vmem:[#allocation2 + $0x50] sm:$0xff] %vm1476_vm10, %v2597_v41  ;;  %2286 = vrot.lane.b32.xlu1 %v4657_v2, %s3405_s28  ;;  %v522_v16 = vsel %vm486_vm8, %v504_v58, %v350_v52  ;;  %v1764_v58 = vld [vmem:[%s3456_s23 + $0x110] sm:$0xff] }
 0x243   : > { %2284 = vrot.lane.b32.xlu0 %v4660_v6, %s3405_s28  ;;  %v2557_v6 = vld [vmem:[%s3456_s23 + $0x13e] sm:$0xff]  ;;  %vm540_vm13 = vcmp.lt.s32.totalorder %v522_v16, 16 }
 0x244   : > { %v694_v45 = vpop.permute.xlu1 %693  ;;  %v1510_v54 = vld [vmem:[#allocation2 + $0x78] sm:$0xff]  ;;  %v4774_v35 = vsel %vm540_vm13, 1.0, %v3404_v10 }
 0x245   : > { %v692_v40 = vpop.permute.xlu0 %691  ;;  %v1509_v33 = vld [vmem:[#allocation2 + $0x70] sm:$0xff]  ;;  %731 = vst.msk [vmem:[#allocation2 + $0x88] sm:$0xff] %vm713_vm3, %v694_v45 }
 0x246   : > { %730 = vst.msk [vmem:[#allocation2 + $0x80] sm:$0xff] %vm713_vm3, %v692_v40  ;;  %v1520_v48 = vpack.c.bf16 %v1510_v54, %v1509_v33  ;;  %2394 = vrot.lane.b32.xlu1 %v2341_v51, %s3406_s29 }
 0x247   : > { %1781 = vst.msk [vmem:[#allocation2 + $0x78] sm:$0xff] %vm604_vm0, %v1763_v43  ;;  %1780 = vst.msk [vmem:[#allocation2 + $0x70] sm:$0xff] %vm604_vm0, %v1762_v50  ;;  %2392 = vrot.lane.b32.xlu0 %v2340_v44, %s3406_s29 }
 0x248   : > { %3255 = vmatmul.mubr.msk.bf16.gmra.mrb[28].mxu0 %vm1549_vm11, %v1520_v48  ;;  %v1847_v0 = vpop.permute.xlu1 %1846  ;;  %v2659_v1 = vld [vmem:[#allocation2 + $0x58] sm:$0xff] }
 0x249   : > { %v1845_v53 = vpop.permute.xlu0 %1844  ;;  %v2658_v61 = vld [vmem:[#allocation2 + $0x50] sm:$0xff]  ;;  %3258 = vmatprep.mubr.msk.bf16.mxu0 %vm5031_vm2, %v3404_v10  ;;  %1887 = vst.msk [vmem:[#allocation2 + $0x68] sm:$0xff] %vm713_vm3, %v1847_v0 }
 0x24a   : > { %1886 = vst.msk [vmem:[#allocation2 + $0x60] sm:$0xff] %vm713_vm3, %v1845_v53  ;;  %v2671_v2 = vpack.c.bf16 %v2659_v1, %v2658_v61  ;;  %2502 = vrot.lane.b32.xlu1 %v2449_v49, %s3407_s9 }
 0x24b   : > { %2500 = vrot.lane.b32.xlu0 %v2448_v59, %s3407_s9 }
 0x24c   : > { %3289 = vmatmul.mubr.msk.bf16.gmra.mrb[20].mxu1 %vm1549_vm11, %v2671_v2  ;;  %v803_v21 = vpop.permute.xlu1 %802 }
 0x24d   : > { %v801_v12 = vpop.permute.xlu0 %800  ;;  %3292 = vmatprep.mubr.msk.bf16.mxu1 %vm5031_vm2, %v3404_v10  ;;  %840 = vst.msk [vmem:[#allocation2 + $0x88] sm:$0xff] %vm822_vm4, %v803_v21  ;;  %vm539_vm2 = vcmp.lt.s32.totalorder %v521_v47, 16 }
 0x24e   : > { %839 = vst.msk [vmem:[#allocation2 + $0x80] sm:$0xff] %vm822_vm4, %v801_v12  ;;  %2610 = vrot.lane.b32.xlu1 %v2557_v6, %s3409_s12  ;;  %v4767_v25 = vsel %vm539_vm2, 1.0, %v3404_v10  ;;  %vm5061_vm2 = vcmask 228544  }
 0x24f   : > { %2608 = vrot.lane.b32.xlu0 %v2556_v8, %s3409_s12  ;;  %vm5062_vm14 = vmmov %vm5061_vm2  ;;  %v235_v8 = vadd.s32 80, %v4080_v42 }
 0x250   : > { %v1955_v18 = vpop.permute.xlu1 %1954  ;;  %vm5063_vm15 = vmmov %vm5061_vm2 }
 0x251   : > { %v1953_v14 = vpop.permute.xlu0 %1952  ;;  %1995 = vst.msk [vmem:[#allocation2 + $0x68] sm:$0xff] %vm822_vm4, %v1955_v18  ;;  %vm5064_vm1 = vmmov %vm5061_vm2  ;;  %v4803_v17 = vmul.u32.u64.low 3817748708, %v235_v8  ;;  %v4804_v52 = vmul.u32.u64.high 3817748708, %v235_v8, %v4803_v17 }
 0x252   : > { %1994 = vst.msk [vmem:[#allocation2 + $0x60] sm:$0xff] %vm822_vm4, %v1953_v14  ;;  %v4808_v18 = vmul.u32.u64.low 3817748708, %v236_v11  ;;  %v4809_v14 = vmul.u32.u64.high 3817748708, %v236_v11, %v4808_v18 }
 0x254   : > { %v912_v62 = vpop.permute.xlu1 %911 }
 0x255   : > { %v910_v57 = vpop.permute.xlu0 %909  ;;  %949 = vst.msk [vmem:[#allocation2 + $0x88] sm:$0xff] %vm5033_vm5, %v912_v62 }
 0x256   : > { %948 = vst.msk [vmem:[#allocation2 + $0x80] sm:$0xff] %vm5033_vm5, %v910_v57  ;;  %v1765_v57 = vld [vmem:[%s3456_s23 + $0x118] sm:$0xff] }
 0x258   : > { %v2063_v32 = vpop.permute.xlu1 %2062 }
 0x259   : > { %v2061_v15 = vpop.permute.xlu0 %2060  ;;  %2103 = vst.msk [vmem:[#allocation2 + $0x68] sm:$0xff] %vm5033_vm5, %v2063_v32 }
 0x25a   : > { %2102 = vst.msk [vmem:[#allocation2 + $0x60] sm:$0xff] %vm5033_vm5, %v2061_v15 }
 0x25b   : > { %v1647_v19 = vpop.f32.mrb[16].mxu0 }
 0x25c   : > { %v1648_v55 = vadd.f32 %v4763_v23, %v1647_v19  ;;  %v3244_v24 = vpop.f32.mrb[17].mxu0  ;;  %v1021_v26 = vpop.permute.xlu1 %1020  ;;  %v359_v19 = vshrl.u32 %v4804_v52, 4 }
 0x25d   : > { %v1019_v20 = vpop.permute.xlu0 %1018  ;;  %1058 = vst.msk [vmem:[#allocation2 + $0x88] sm:$0xff] %vm5034_vm6, %v1021_v26  ;;  %v1650_v31 = vpop.f32.mrb[18].mxu0  ;;  %v370_v24 = vshrl.u32 %v4809_v14, 4 }
 0x25e   : > { %v1694_v30 = vmax.f32 %v1648_v55, 0.0  ;;  %1057 = vst.msk [vmem:[#allocation2 + $0x80] sm:$0xff] %vm5034_vm6, %v1019_v20  ;;  %v1651_v3 = vadd.f32 %v4763_v23, %v1650_v31  ;;  %v3245_v27 = vpop.f32.mrb[19].mxu0 }
 0x25f   : > { %v2782_v60 = vpop.f32.mrb[8].mxu1 }
 0x260   : > { %v1712_v9 = vmul.f32 %v4767_v25, %v1694_v30  ;;  %v2783_v36 = vadd.f32 %v4763_v23, %v2782_v60  ;;  %v3278_v22 = vpop.f32.mrb[9].mxu1  ;;  %v1695_v29 = vmax.f32 %v1651_v3, 0.0  ;;  %v2171_v28 = vpop.permute.xlu1 %2170  ;;  %v360_v3 = vmul.u32 18, %v359_v19 }
 0x261   : > { %v2169_v41 = vpop.permute.xlu0 %2168  ;;  %2211 = vst.msk [vmem:[#allocation2 + $0x68] sm:$0xff] %vm5034_vm6, %v2171_v28  ;;  %v2785_v51 = vpop.f32.mrb[10].mxu1  ;;  %v371_v60 = vmul.u32 18, %v370_v24 }
 0x262   : > { %v1730_v43 = vadd.f32 %v4662_v7, %v1712_v9  ;;  %v2841_v50 = vmax.f32 %v2783_v36, 0.0  ;;  %2210 = vst.msk [vmem:[#allocation2 + $0x60] sm:$0xff] %vm5034_vm6, %v2169_v41  ;;  %v1713_v44 = vmul.f32 %v4774_v35, %v1695_v29  ;;  %v2786_v45 = vadd.f32 %v4763_v23, %v2785_v51  ;;  %v3279_v40 = vpop.f32.mrb[11].mxu1 }
 0x263   : > { %v361_v22 = vsub.s32 %v235_v8, %v360_v3  ;;  %v372_v29 = vsub.s32 %v236_v11, %v371_v60 }
 0x264   : > { %v2859_v33 = vmul.f32 %v4459_v38, %v2841_v50  ;;  %v4783_v54 = vadd.f32 %v1730_v43, %v1713_v44  ;;  %v2842_v56 = vmax.f32 %v2786_v45, 0.0  ;;  %v1130_v48 = vpop.permute.xlu1 %1129 }
 0x265   : > { %v1128_v49 = vpop.permute.xlu0 %1127  ;;  %1167 = vst.msk [vmem:[#allocation2 + $0x88] sm:$0xff] %vm1149_vm7, %v1130_v48  ;;  %vm451_vm12 = vcmp.ne.s32.totalorder %v361_v22, 0  ;;  %vm469_vm8 = vcmp.lt.s32.totalorder %v361_v22, 0  ;;  %v505_v43 = vadd.s32 18, %v361_v22  ;;  %v506_v44 = vadd.s32 18, %v372_v29 }
 0x266   : > { %v2877_v7 = vadd.f32 %v4674_v5, %v2859_v33  ;;  %1166 = vst.msk [vmem:[#allocation2 + $0x80] sm:$0xff] %vm1149_vm7, %v1128_v49  ;;  %v2860_v59 = vmul.f32 %v4470_v37, %v2842_v56  ;;  %vm487_vm13 = vmand %vm469_vm8, %vm451_vm12 }
 0x267   : > { %v523_v45 = vsel %vm487_vm13, %v505_v43, %v361_v22  ;;  %v238_v22 = vadd.s32 104, %v4080_v42 }
 0x268   : > { %v4789_v63 = vadd.f32 %v2877_v7, %v2860_v59  ;;  %v2279_v0 = vpop.permute.xlu1 %2278 }
 0x269   : > { %v2277_v53 = vpop.permute.xlu0 %2276  ;;  %2319 = vst.msk [vmem:[#allocation2 + $0x68] sm:$0xff] %vm1149_vm7, %v2279_v0 }
 0x26a   : > { %2318 = vst.msk [vmem:[#allocation2 + $0x60] sm:$0xff] %vm1149_vm7, %v2277_v53 }
 0x26c   : > { %v1239_v38 = vpop.permute.xlu1 %1238 }
 0x26d   : > { %v1237_v61 = vpop.permute.xlu0 %1236  ;;  %1276 = vst.msk [vmem:[#allocation2 + $0x88] sm:$0xff] %vm5061_vm2, %v1239_v38  ;;  %vm452_vm2 = vcmp.ne.s32.totalorder %v372_v29, 0 }
 0x26e   : > { %1275 = vst.msk [vmem:[#allocation2 + $0x80] sm:$0xff] %vm5062_vm14, %v1237_v61  ;;  %vm470_vm14 = vcmp.lt.s32.totalorder %v372_v29, 0 }
 0x270   : > { %v2387_v5 = vpop.permute.xlu1 %2386 }
 0x271   : > { %v2385_v1 = vpop.permute.xlu0 %2384  ;;  %2427 = vst.msk [vmem:[#allocation2 + $0x68] sm:$0xff] %vm5063_vm15, %v2387_v5  ;;  %vm488_vm15 = vmand %vm470_vm14, %vm452_vm2 }
 0x272   : > { %2426 = vst.msk [vmem:[#allocation2 + $0x60] sm:$0xff] %vm5064_vm1, %v2385_v1  ;;  %v524_v56 = vsel %vm488_vm15, %v506_v44, %v372_v29 }
 0x273   : > { %vm542_vm12 = vcmp.lt.s32.totalorder %v524_v56, 16 }
 0x274   : > { %v1348_v37 = vpop.permute.xlu1 %1347 }
 0x275   : > { %v1346_v4 = vpop.permute.xlu0 %1345  ;;  %1385 = vst.msk [vmem:[#allocation2 + $0x88] sm:$0xff] %vm1367_vm9, %v1348_v37 }
 0x276   : > { %1384 = vst.msk [vmem:[#allocation2 + $0x80] sm:$0xff] %vm1367_vm9, %v1346_v4 }
 0x278   : > { %v2495_v2 = vpop.permute.xlu1 %2494 }
 0x279   : > { %v2493_v6 = vpop.permute.xlu0 %2492  ;;  %2535 = vst.msk [vmem:[#allocation2 + $0x68] sm:$0xff] %vm1367_vm9, %v2495_v2  ;;  %v4844_v2 = vsel %vm542_vm12, 1.0, %v3404_v10 }
 0x27a   : > { %2534 = vst.msk [vmem:[#allocation2 + $0x60] sm:$0xff] %vm1367_vm9, %v2493_v6 }
 0x27c   : > { %v1457_v21 = vpop.permute.xlu1 %1456 }
 0x27d   : > { %v1455_v12 = vpop.permute.xlu0 %1454  ;;  %1494 = vst.msk [vmem:[#allocation2 + $0x88] sm:$0xff] %vm1476_vm10, %v1457_v21 }
 0x27e   : > { %1493 = vst.msk [vmem:[#allocation2 + $0x80] sm:$0xff] %vm1476_vm10, %v1455_v12 }
 0x280   : > { %v2603_v13 = vpop.permute.xlu1 %2602 }
 0x281   : > { %v2601_v62 = vpop.permute.xlu0 %2600  ;;  %2643 = vst.msk [vmem:[#allocation2 + $0x68] sm:$0xff] %vm1476_vm10, %v2603_v13 }
 0x282   : > { %2642 = vst.msk [vmem:[#allocation2 + $0x60] sm:$0xff] %vm1476_vm10, %v2601_v62 }
 0x284   : > { %v1851_v47 = vpop.permute.xlu1 %1850  ;;  %v1512_v16 = vld [vmem:[#allocation2 + $0x88] sm:$0xff] }
 0x285   : > { %v1849_v32 = vpop.permute.xlu0 %1848  ;;  %v1511_v15 = vld [vmem:[#allocation2 + $0x80] sm:$0xff]  ;;  %1889 = vst.msk [vmem:[#allocation2 + $0x78] sm:$0xff] %vm713_vm3, %v1851_v47 }
 0x286   : > { %1888 = vst.msk [vmem:[#allocation2 + $0x70] sm:$0xff] %vm713_vm3, %v1849_v32  ;;  %v1521_v55 = vpack.c.bf16 %v1512_v16, %v1511_v15 }
 0x287   : > { %1783 = vst.msk [vmem:[#allocation2 + $0x88] sm:$0xff] %vm604_vm0, %v1765_v57  ;;  %1782 = vst.msk [vmem:[#allocation2 + $0x80] sm:$0xff] %vm604_vm0, %v1764_v58  ;;  %vm5065_vm0 = vmmov 0  }
 0x288   : > { %3259 = vmatmul.mubr.msk.bf16.gmra.mrb[32].mxu0 %vm1549_vm11, %v1521_v55  ;;  %v1959_v26 = vpop.permute.xlu1 %1958  ;;  %v2661_v31 = vld [vmem:[#allocation2 + $0x68] sm:$0xff] }
 0x289   : > { %v1957_v20 = vpop.permute.xlu0 %1956  ;;  %v2660_v30 = vld [vmem:[#allocation2 + $0x60] sm:$0xff]  ;;  %1997 = vst.msk [vmem:[#allocation2 + $0x78] sm:$0xff] %vm822_vm4, %v1959_v26 }
 0x28a   : > { %1996 = vst.msk [vmem:[#allocation2 + $0x70] sm:$0xff] %vm822_vm4, %v1957_v20  ;;  %v2672_v27 = vpack.c.bf16 %v2661_v31, %v2660_v30 }
 0x28c   : > { %3293 = vmatmul.mubr.msk.bf16.gmra.mrb[24].mxu1 %vm1549_vm11, %v2672_v27  ;;  %v2067_v9 = vpop.permute.xlu1 %2066 }
 0x28d   : > { %v2065_v36 = vpop.permute.xlu0 %2064  ;;  %3296 = vmatprep.mubr.msk.bf16.mxu1 %vm5065_vm0, %v3404_v10  ;;  %2105 = vst.msk [vmem:[#allocation2 + $0x78] sm:$0xff] %vm5033_vm5, %v2067_v9 }
 0x28e   : > { %2104 = vst.msk [vmem:[#allocation2 + $0x70] sm:$0xff] %vm5033_vm5, %v2065_v36  ;;  %vm5066_vm5 = vmmov %vm5064_vm1  ;;  %v237_v36 = vadd.s32 96, %v4080_v42 }
 0x290   : > { %v2175_v28 = vpop.permute.xlu1 %2174 }
 0x291   : > { %v2173_v41 = vpop.permute.xlu0 %2172  ;;  %2213 = vst.msk [vmem:[#allocation2 + $0x78] sm:$0xff] %vm5034_vm6, %v2175_v28 }
 0x292   : > { %2212 = vst.msk [vmem:[#allocation2 + $0x70] sm:$0xff] %vm5034_vm6, %v2173_v41  ;;  %vm541_vm6 = vcmp.lt.s32.totalorder %v523_v45, 16  ;;  %v4876_v41 = vmul.u32.u64.low 3817748708, %v237_v36  ;;  %v4877_v43 = vmul.u32.u64.high 3817748708, %v237_v36, %v4876_v41 }
 0x293   : > { %v4837_v59 = vsel %vm541_vm6, 1.0, %v3404_v10  ;;  %vm5069_vm6 = vcmask 162944   ;;  %v3375_v41 = vld [vmem:[%s5027_s3 + $0x24] ss:$8 sps:$4 sm:$0xff]  }
 0x294   : > { %v2283_v50 = vpop.permute.xlu1 %2282  ;;  %vm5070_vm8 = vmmov %vm5069_vm6 }
 0x295   : > { %v2281_v51 = vpop.permute.xlu0 %2280  ;;  %2321 = vst.msk [vmem:[#allocation2 + $0x78] sm:$0xff] %vm1149_vm7, %v2283_v50 }
 0x296   : > { %2320 = vst.msk [vmem:[#allocation2 + $0x70] sm:$0xff] %vm1149_vm7, %v2281_v51  ;;  %v4881_v50 = vmul.u32.u64.low 3817748708, %v238_v22  ;;  %v4882_v51 = vmul.u32.u64.high 3817748708, %v238_v22, %v4881_v50 }
 0x297   : > { %v3373_v50 = vld [vmem:[%s5027_s3 + $0x20] ss:$8 sps:$4 sm:$0xff]  }
 0x298   : > { %v2391_v40 = vpop.permute.xlu1 %2390 }
 0x299   : > { %v2389_v33 = vpop.permute.xlu0 %2388  ;;  %2429 = vst.msk [vmem:[#allocation2 + $0x78] sm:$0xff] %vm5064_vm1, %v2391_v40  ;;  %v381_v40 = vshrl.u32 %v4877_v43, 4 }
 0x29a   : > { %2428 = vst.msk [vmem:[#allocation2 + $0x70] sm:$0xff] %vm5066_vm5, %v2389_v33  ;;  %v392_v33 = vshrl.u32 %v4882_v51, 4  ;;  %v3378_v51 = vld [vmem:[%s5027_s3 + $0x34] ss:$8 sps:$4 sm:$0xff]  }
 0x29b   : > { %v1655_v48 = vpop.f32.mrb[20].mxu0 }
 0x29c   : > { %v1656_v49 = vadd.f32 %v4763_v23, %v1655_v48  ;;  %v3248_v7 = vpop.f32.mrb[21].mxu0  ;;  %v2499_v0 = vpop.permute.xlu1 %2498 }
 0x29d   : > { %v2497_v53 = vpop.permute.xlu0 %2496  ;;  %2537 = vst.msk [vmem:[#allocation2 + $0x78] sm:$0xff] %vm1367_vm9, %v2499_v0  ;;  %v1658_v61 = vpop.f32.mrb[22].mxu0  ;;  %v393_v0 = vmul.u32 18, %v392_v33 }
 0x29e   : > { %v1696_v38 = vmax.f32 %v1656_v49, 0.0  ;;  %2536 = vst.msk [vmem:[#allocation2 + $0x70] sm:$0xff] %vm1367_vm9, %v2497_v53  ;;  %v1659_v5 = vadd.f32 %v4763_v23, %v1658_v61  ;;  %v3249_v1 = vpop.f32.mrb[23].mxu0  ;;  %v382_v49 = vmul.u32 18, %v381_v40  ;;  %v3376_v40 = vld [vmem:[%s5027_s3 + $0x30] ss:$8 sps:$4 sm:$0xff]  }
 0x29f   : > { %v2790_v37 = vpop.f32.mrb[12].mxu1 }
 0x2a0   : > { %v1714_v4 = vmul.f32 %v4837_v59, %v1696_v38  ;;  %v2791_v6 = vadd.f32 %v4763_v23, %v2790_v37  ;;  %v3282_v8 = vpop.f32.mrb[13].mxu1  ;;  %v1697_v11 = vmax.f32 %v1659_v5, 0.0  ;;  %v2607_v21 = vpop.permute.xlu1 %2606  ;;  %v383_v53 = vsub.s32 %v237_v36, %v382_v49 }
 0x2a1   : > { %v2605_v12 = vpop.permute.xlu0 %2604  ;;  %2645 = vst.msk [vmem:[#allocation2 + $0x78] sm:$0xff] %vm1476_vm10, %v2607_v21  ;;  %v2793_v18 = vpop.f32.mrb[14].mxu1  ;;  %v394_v38 = vsub.s32 %v238_v22, %v393_v0  ;;  %v3370_v22 = vld [vmem:[%s5027_s3 + $0x10] ss:$8 sps:$4 sm:$0xff]  }
 0x2a2   : > { %v1732_v17 = vadd.f32 %v4783_v54, %v1714_v4  ;;  %v2843_v52 = vmax.f32 %v2791_v6, 0.0  ;;  %2644 = vst.msk [vmem:[#allocation2 + $0x70] sm:$0xff] %vm1476_vm10, %v2605_v12  ;;  %v1715_v14 = vmul.f32 %v4844_v2, %v1697_v11  ;;  %v2794_v13 = vadd.f32 %v4763_v23, %v2793_v18  ;;  %v3283_v62 = vpop.f32.mrb[15].mxu1 }
 0x2a3   : > { %v507_v61 = vadd.s32 18, %v383_v53  ;;  %vm454_vm13 = vcmp.ne.s32.totalorder %v394_v38, 0  ;;  %vm472_vm2 = vcmp.lt.s32.totalorder %v394_v38, 0  ;;  %v508_v5 = vadd.s32 18, %v394_v38 }
 0x2a4   : > { %v2861_v57 = vmul.f32 %v4634_v34, %v2843_v52  ;;  %v4853_v58 = vadd.f32 %v1732_v17, %v1715_v14  ;;  %v2844_v47 = vmax.f32 %v2794_v13, 0.0  ;;  %v1855_v32 = vpop.permute.xlu1 %1854 }
 0x2a5   : > { %v1853_v15 = vpop.permute.xlu0 %1852  ;;  %1891 = vst.msk [vmem:[#allocation2 + $0x88] sm:$0xff] %vm713_vm3, %v1855_v32 }
 0x2a6   : > { %v2879_v54 = vadd.f32 %v4789_v63, %v2861_v57  ;;  %1890 = vst.msk [vmem:[#allocation2 + $0x80] sm:$0xff] %vm713_vm3, %v1853_v15  ;;  %v2862_v16 = vmul.f32 %v4643_v46, %v2844_v47  ;;  %vm5067_vm3 = vcmask 130144  }
 0x2a7   : > { %vm5068_vm5 = vmmov %vm5067_vm3 }
 0x2a8   : > { %v4859_v19 = vadd.f32 %v2879_v54, %v2862_v16  ;;  %v1963_v55 = vpop.permute.xlu1 %1962  ;;  %v2663_v20 = vld [vmem:[#allocation2 + $0x78] sm:$0xff] }
 0x2a9   : > { %v1961_v24 = vpop.permute.xlu0 %1960  ;;  %v2662_v26 = vld [vmem:[#allocation2 + $0x70] sm:$0xff]  ;;  %1999 = vst.msk [vmem:[#allocation2 + $0x88] sm:$0xff] %vm822_vm4, %v1963_v55 }
 0x2aa   : > { %1998 = vst.msk [vmem:[#allocation2 + $0x80] sm:$0xff] %vm822_vm4, %v1961_v24  ;;  %v2673_v34 = vpack.c.bf16 %v2663_v20, %v2662_v26  ;;  %vm5071_vm4 = vmmov %vm5064_vm1 }
 0x2ac   : > { %3297 = vmatmul.mubr.msk.bf16.gmra.mrb[28].mxu1 %vm1549_vm11, %v2673_v34  ;;  %v2071_v63 = vpop.permute.xlu1 %2070 }
 0x2ad   : > { %v2069_v30 = vpop.permute.xlu0 %2068  ;;  %3300 = vmatprep.mubr.msk.bf16.mxu1 %vm5065_vm0, %v3404_v10  ;;  %2107 = vst.msk [vmem:[#allocation2 + $0x88] sm:$0xff] %vm5067_vm3, %v2071_v63  ;;  %vm5072_vm0 = vmmov %vm5064_vm1 }
 0x2ae   : > { %2106 = vst.msk [vmem:[#allocation2 + $0x80] sm:$0xff] %vm5068_vm5, %v2069_v30 }
 0x2b0   : > { %v2179_v46 = vpop.permute.xlu1 %2178 }
 0x2b1   : > { %v2177_v31 = vpop.permute.xlu0 %2176  ;;  %2215 = vst.msk [vmem:[#allocation2 + $0x88] sm:$0xff] %vm5069_vm6, %v2179_v46 }
 0x2b2   : > { %2214 = vst.msk [vmem:[#allocation2 + $0x80] sm:$0xff] %vm5070_vm8, %v2177_v31  ;;  %v3369_v31 = vld [vmem:[%s5027_s3 + $0x4] ss:$8 sps:$4 sm:$0xff]  }
 0x2b3   : > { %3010 = vmatprep.subr.bf16.mxu0 %v3369_v31  ;;  %v3390_v31 = vld [vmem:[%s5027_s3 + $0x74] ss:$8 sps:$4 sm:$0xff]  }
 0x2b4   : > { %v2287_v3 = vpop.permute.xlu1 %2286 }
 0x2b5   : > { %v2285_v27 = vpop.permute.xlu0 %2284  ;;  %2323 = vst.msk [vmem:[#allocation2 + $0x88] sm:$0xff] %vm1149_vm7, %v2287_v3  ;;  %v239_v3 = vadd.s32 112, %v4080_v42 }
 0x2b6   : > { %2322 = vst.msk [vmem:[#allocation2 + $0x80] sm:$0xff] %vm1149_vm7, %v2285_v27  ;;  %vm453_vm7 = vcmp.ne.s32.totalorder %v383_v53, 0 }
 0x2b8   : > { %v2395_v60 = vpop.permute.xlu1 %2394 }
 0x2b9   : > { %v2393_v9 = vpop.permute.xlu0 %2392  ;;  %2431 = vst.msk [vmem:[#allocation2 + $0x88] sm:$0xff] %vm5071_vm4, %v2395_v60 }
 0x2ba   : > { %2430 = vst.msk [vmem:[#allocation2 + $0x80] sm:$0xff] %vm5072_vm0, %v2393_v9 }
 0x2bc   : > { %v2503_v29 = vpop.permute.xlu1 %2502 }
 0x2bd   : > { %v2501_v28 = vpop.permute.xlu0 %2500  ;;  %2539 = vst.msk [vmem:[#allocation2 + $0x88] sm:$0xff] %vm1367_vm9, %v2503_v29  ;;  %v3372_v29 = vld [vmem:[%s5027_s3 + $0x14] ss:$8 sps:$4 sm:$0xff]  }
 0x2be   : > { %2538 = vst.msk [vmem:[#allocation2 + $0x80] sm:$0xff] %vm1367_vm9, %v2501_v28  ;;  %vm471_vm9 = vcmp.lt.s32.totalorder %v383_v53, 0 }
 0x2bf   : > { %vm489_vm14 = vmand %vm471_vm9, %vm453_vm7 }
 0x2c0   : > { %v2611_v44 = vpop.permute.xlu1 %2610  ;;  %v525_v1 = vsel %vm489_vm14, %v507_v61, %v383_v53 }
 0x2c1   : > { %v2609_v45 = vpop.permute.xlu0 %2608  ;;  %2647 = vst.msk [vmem:[#allocation2 + $0x88] sm:$0xff] %vm1476_vm10, %v2611_v44  ;;  %vm543_vm15 = vcmp.lt.s32.totalorder %v525_v1, 16 }
 0x2c2   : > { %2646 = vst.msk [vmem:[#allocation2 + $0x80] sm:$0xff] %vm1476_vm10, %v2609_v45  ;;  %vm490_vm10 = vmand %vm472_vm2, %vm454_vm13  ;;  %v4891_v11 = vsel %vm543_vm15, 1.0, %v3404_v10 }
 0x2c3   : > { %v526_v37 = vsel %vm490_vm10, %v508_v5, %v394_v38 }
 0x2c4   : > { %vm544_vm1 = vcmp.lt.s32.totalorder %v526_v37, 16 }
 0x2c5   : > { %v4895_v18 = vsel %vm544_vm1, 1.0, %v3404_v10 }
 0x2c8   : > { %v2665_v48 = vld [vmem:[#allocation2 + $0x88] sm:$0xff] }
 0x2c9   : > { %v2664_v56 = vld [vmem:[#allocation2 + $0x80] sm:$0xff] }
 0x2ca   : > { %v2674_v7 = vpack.c.bf16 %v2665_v48, %v2664_v56 }
 0x2cc   : > { %3301 = vmatmul.mubr.msk.bf16.gmra.mrb[32].mxu1 %vm1549_vm11, %v2674_v7 }
 0x2db   : > { %v1663_v4 = vpop.f32.mrb[24].mxu0 }
 0x2dc   : > { %v1664_v6 = vadd.f32 %v4763_v23, %v1663_v4  ;;  %v3252_v8 = vpop.f32.mrb[25].mxu0 }
 0x2dd   : > { %v1666_v21 = vpop.f32.mrb[26].mxu0 }
 0x2de   : > { %v1698_v12 = vmax.f32 %v1664_v6, 0.0  ;;  %v1667_v17 = vadd.f32 %v4763_v23, %v1666_v21  ;;  %v3253_v52 = vpop.f32.mrb[27].mxu0 }
 0x2df   : > { %v2798_v14 = vpop.f32.mrb[16].mxu1 }
 0x2e0   : > { %v1716_v13 = vmul.f32 %v4891_v11, %v1698_v12  ;;  %v1699_v62 = vmax.f32 %v1667_v17, 0.0  ;;  %v2799_v57 = vadd.f32 %v4763_v23, %v2798_v14  ;;  %v3286_v47 = vpop.f32.mrb[17].mxu1 }
 0x2e1   : > { %v2801_v32 = vpop.f32.mrb[18].mxu1 }
 0x2e2   : > { %v1734_v15 = vadd.f32 %v4853_v58, %v1716_v13  ;;  %v1717_v54 = vmul.f32 %v4895_v18, %v1699_v62  ;;  %v2845_v16 = vmax.f32 %v2799_v57, 0.0  ;;  %v2802_v55 = vadd.f32 %v4763_v23, %v2801_v32  ;;  %v3287_v24 = vpop.f32.mrb[19].mxu1  ;;  %v3367_v58 = vld [vmem:[%s5027_s3] ss:$8 sps:$4 sm:$0xff]  }
 0x2e3   : > { %3011 = vmatpush1.bf16.msra.mxu0 %v3367_v58  ;;  %v3379_v24 = vld [vmem:[%s5027_s3 + $0x40] ss:$8 sps:$4 sm:$0xff]   ;;  %v242_v58 = vadd.s32 136, %v4080_v42 }
 0x2e4   : > { %v1735_v26 = vadd.f32 %v1734_v15, %v1717_v54  ;;  %v2863_v20 = vmul.f32 %v4767_v25, %v2845_v16  ;;  %v2846_v34 = vmax.f32 %v2802_v55, 0.0  ;;  %v240_v25 = vadd.s32 120, %v4080_v42  ;;  %3012 = vmatprep.subr.bf16.mxu0 %v3372_v29 }
 0x2e6   : > { %v2881_v63 = vadd.f32 %v4859_v19, %v2863_v20  ;;  %v2864_v30 = vmul.f32 %v4774_v35, %v2846_v34  ;;  %v4915_v27 = vmul.u32.u64.low 3817748708, %v239_v3  ;;  %v4916_v19 = vmul.u32.u64.high 3817748708, %v239_v3, %v4915_v27  ;;  %v3387_v34 = vld [vmem:[%s5027_s3 + $0x64] ss:$8 sps:$4 sm:$0xff]  }
 0x2e7   : > { %v4918_v35 = vmul.u32.u64.low 3817748708, %v240_v25  ;;  %v4919_v60 = vmul.u32.u64.high 3817748708, %v240_v25, %v4918_v35  ;;  %3013 = vmatpush1.bf16.msra.mxu0 %v3370_v22  ;;  %v3388_v27 = vld [vmem:[%s5027_s3 + $0x70] ss:$8 sps:$4 sm:$0xff]  }
 0x2e8   : > { %v4905_v46 = vadd.f32 %v2881_v63, %v2864_v30  ;;  %v403_v9 = vshrl.u32 %v4916_v19, 4  ;;  %3014 = vmatprep.subr.bf16.mxu0 %v3375_v41  ;;  %v241_v63 = vadd.s32 128, %v4080_v42  ;;  %v3385_v30 = vld [vmem:[%s5027_s3 + $0x60] ss:$8 sps:$4 sm:$0xff]  }
 0x2e9   : > { %v414_v36 = vshrl.u32 %v4919_v60, 4  ;;  %v4989_v19 = vmul.u32.u64.low 3817748708, %v242_v58  ;;  %v4990_v35 = vmul.u32.u64.high 3817748708, %v242_v58, %v4989_v19 }
 0x2ea   : > { %v404_v28 = vmul.u32 18, %v403_v9 }
 0x2eb   : > { %v415_v43 = vmul.u32 18, %v414_v36  ;;  %3015 = vmatpush1.bf16.msra.mxu0 %v3373_v50  ;;  %v436_v9 = vshrl.u32 %v4990_v35, 4 }
 0x2ec   : > { %v405_v44 = vsub.s32 %v239_v3, %v404_v28  ;;  %3016 = vmatprep.subr.bf16.mxu0 %v3378_v51 }
 0x2ed   : > { %v416_v45 = vsub.s32 %v240_v25, %v415_v43  ;;  %v4983_v3 = vmul.u32.u64.low 3817748708, %v241_v63  ;;  %v4984_v25 = vmul.u32.u64.high 3817748708, %v241_v63, %v4983_v3  ;;  %v437_v22 = vmul.u32 18, %v436_v9 }
 0x2ee   : > { %vm455_vm11 = vcmp.ne.s32.totalorder %v405_v44, 0  ;;  %vm473_vm12 = vcmp.lt.s32.totalorder %v405_v44, 0  ;;  %v509_v33 = vadd.s32 18, %v405_v44 }
 0x2ef   : > { %vm456_vm3 = vcmp.ne.s32.totalorder %v416_v45, 0  ;;  %vm474_vm5 = vcmp.lt.s32.totalorder %v416_v45, 0  ;;  %3017 = vmatpush1.bf16.msra.mxu0 %v3376_v40  ;;  %vm491_vm6 = vmand %vm473_vm12, %vm455_vm11  ;;  %v510_v56 = vadd.s32 18, %v416_v45  ;;  %v425_v60 = vshrl.u32 %v4984_v25, 4 }
 0x2f0   : > { %vm492_vm8 = vmand %vm474_vm5, %vm456_vm3  ;;  %v527_v48 = vsel %vm491_vm6, %v509_v33, %v405_v44  ;;  %v438_v28 = vsub.s32 %v242_v58, %v437_v22  ;;  %vm3071_vm11 = vcmp.lt.s32.totalorder %v224_v39, 256 }
 0x2f1   : > { %v528_v49 = vsel %vm492_vm8, %v510_v56, %v416_v45  ;;  %vm545_vm4 = vcmp.lt.s32.totalorder %v527_v48, 16  ;;  %v426_v36 = vmul.u32 18, %v425_v60 }
 0x2f2   : > { %vm546_vm0 = vcmp.lt.s32.totalorder %v528_v49, 16  ;;  %v4943_v38 = vsel %vm545_vm4, 1.0, %v3404_v10  ;;  %vm458_vm13 = vcmp.ne.s32.totalorder %v438_v28, 0  ;;  %vm476_vm2 = vcmp.lt.s32.totalorder %v438_v28, 0 }
 0x2f3   : > { %v4947_v4 = vsel %vm546_vm0, 1.0, %v3404_v10  ;;  %v427_v29 = vsub.s32 %v241_v63, %v426_v36  ;;  %v512_v43 = vadd.s32 18, %v438_v28  ;;  %vm494_vm10 = vmand %vm476_vm2, %vm458_vm13 }
 0x2f5   : > { %vm457_vm7 = vcmp.ne.s32.totalorder %v427_v29, 0  ;;  %vm475_vm9 = vcmp.lt.s32.totalorder %v427_v29, 0  ;;  %v511_v41 = vadd.s32 18, %v427_v29  ;;  %v530_v51 = vsel %vm494_vm10, %v512_v43, %v438_v28 }
 0x2f6   : > { %vm493_vm14 = vmand %vm475_vm9, %vm457_vm7  ;;  %vm548_vm1 = vcmp.lt.s32.totalorder %v530_v51, 16 }
 0x2f7   : > { %v529_v50 = vsel %vm493_vm14, %v511_v41, %v427_v29 }
 0x2f8   : > { %vm547_vm15 = vcmp.lt.s32.totalorder %v529_v50, 16 }
 0x2f9   : > { %v3150_v33 = vsel %vm547_vm15, 1.0, %v3404_v10 }
 0x31b   : > { %v1671_v7 = vpop.f32.mrb[28].mxu0 }
 0x31c   : > { %v1672_v0 = vadd.f32 %v4763_v23, %v1671_v7  ;;  %v3256_v53 = vpop.f32.mrb[29].mxu0 }
 0x31d   : > { %v1674_v61 = vpop.f32.mrb[30].mxu0 }
 0x31e   : > { %v1700_v5 = vmax.f32 %v1672_v0, 0.0  ;;  %v1675_v1 = vadd.f32 %v4763_v23, %v1674_v61  ;;  %v3257_v37 = vpop.f32.mrb[31].mxu0  ;;  %v3151_v0 = vsel %vm548_vm1, 1.0, %v3404_v10 }
 0x31f   : > { %v2806_v6 = vpop.f32.mrb[20].mxu1 }
 0x320   : > { %v1718_v8 = vmul.f32 %v4943_v38, %v1700_v5  ;;  %v1701_v21 = vmax.f32 %v1675_v1, 0.0  ;;  %v2807_v12 = vadd.f32 %v4763_v23, %v2806_v6  ;;  %v3290_v17 = vpop.f32.mrb[21].mxu1 }
 0x321   : > { %v2809_v52 = vpop.f32.mrb[22].mxu1 }
 0x322   : > { %v1736_v14 = vadd.f32 %v1735_v26, %v1718_v8  ;;  %v1719_v13 = vmul.f32 %v4947_v4, %v1701_v21  ;;  %v2847_v62 = vmax.f32 %v2807_v12, 0.0  ;;  %v2810_v57 = vadd.f32 %v4763_v23, %v2809_v52  ;;  %v3291_v47 = vpop.f32.mrb[23].mxu1  ;;  %v3381_v26 = vld [vmem:[%s5027_s3 + $0x44] ss:$8 sps:$4 sm:$0xff]  }
 0x323   : > { %3018 = vmatprep.subr.bf16.mxu0 %v3381_v26 }
 0x324   : > { %v4953_v32 = vadd.f32 %v1736_v14, %v1719_v13  ;;  %v2865_v15 = vmul.f32 %v4837_v59, %v2847_v62  ;;  %v2848_v54 = vmax.f32 %v2810_v57, 0.0  ;;  %3019 = vmatpush1.bf16.msra.mxu0 %v3379_v24  ;;  %v3384_v59 = vld [vmem:[%s5027_s3 + $0x54] ss:$8 sps:$4 sm:$0xff]  }
 0x325   : > { %3020 = vmatprep.subr.bf16.mxu0 %v3384_v59 }
 0x326   : > { %v2883_v16 = vadd.f32 %v4905_v46, %v2865_v15  ;;  %v2866_v55 = vmul.f32 %v4844_v2, %v2848_v54  ;;  %v3382_v2 = vld [vmem:[%s5027_s3 + $0x50] ss:$8 sps:$4 sm:$0xff]   ;;  %v3410_v46 = vmov 0  }
 0x327   : > { %3042 = vmatprep.mubr.bf16.mxu0 %v3410_v46 }
 0x328   : > { %v4964_v20 = vadd.f32 %v2883_v16, %v2866_v55  ;;  %3021 = vmatpush1.bf16.msra.mxu0 %v3382_v2 }
 0x329   : > { %3022 = vmatprep.subr.bf16.mxu0 %v3387_v34 }
 0x32c   : > { %3023 = vmatpush1.bf16.msra.mxu0 %v3385_v30 }
 0x32d   : > { %3024 = vmatprep.subr.bf16.mxu0 %v3390_v31 }
 0x330   : > { %3025 = vmatpush1.bf16.msra.mxu0 %v3388_v27 }
 0x35b   : > { %v1679_v44 = vpop.f32.mrb[32].mxu0 }
 0x35c   : > { %v1680_v45 = vadd.f32 %v4763_v23, %v1679_v44  ;;  %v3260_v40 = vpop.f32.mrb[33].mxu0 }
 0x35d   : > { %v1682_v56 = vpop.f32.mrb[34].mxu0 }
 0x35e   : > { %v1702_v48 = vmax.f32 %v1680_v45, 0.0  ;;  %v1683_v49 = vadd.f32 %v4763_v23, %v1682_v56  ;;  %v3261_v7 = vpop.f32.mrb[35].mxu0 }
 0x35f   : > { %v2814_v53 = vpop.f32.mrb[24].mxu1 }
 0x360   : > { %v1720_v61 = vmul.f32 %v3150_v33, %v1702_v48  ;;  %v1703_v5 = vmax.f32 %v1683_v49, 0.0  ;;  %v2815_v1 = vadd.f32 %v4763_v23, %v2814_v53  ;;  %v3294_v37 = vpop.f32.mrb[25].mxu1 }
 0x361   : > { %v2817_v6 = vpop.f32.mrb[26].mxu1 }
 0x362   : > { %v1738_v8 = vadd.f32 %v4953_v32, %v1720_v61  ;;  %v1721_v21 = vmul.f32 %v3151_v0, %v1703_v5  ;;  %v2849_v12 = vmax.f32 %v2815_v1, 0.0  ;;  %v2818_v17 = vadd.f32 %v4763_v23, %v2817_v6  ;;  %v3295_v52 = vpop.f32.mrb[27].mxu1  ;;  %v1722_v32 = vld [vmem:[#allocation3] sm:$0x1] }
 0x363   : > { %v3411_v61 = vmov 1966171168  }
 0x364   : > { %v1739_v14 = vadd.f32 %v1738_v8, %v1721_v21  ;;  %v2867_v13 = vmul.f32 %v4891_v11, %v2849_v12  ;;  %v2850_v62 = vmax.f32 %v2818_v17, 0.0  ;;  %v3055_v5 = vunpack.c.l.s4 %v3411_v61 }
 0x366   : > { %v1740_v57 = vrot.slane %v1739_v14, 4  ;;  %v2885_v10 = vadd.f32 %v4964_v20, %v2867_v13  ;;  %v2868_v47 = vmul.f32 %v4895_v18, %v2850_v62  ;;  %v3056_v6 = vunpack.c.0.s8 %v3055_v5 }
 0x368   : > { %v1741_v15 = vadd.f32 %v1740_v57, %v1739_v14  ;;  %v2886_v54 = vadd.f32 %v2885_v10, %v2868_v47  ;;  %v3059_v52 = vsub.s32 %v3056_v6, %v4080_v42 }
 0x36a   : > { %v1742_v16 = vrot.slane %v1741_v15, 2 }
 0x36c   : > { %v1743_v55 = vadd.f32 %v1742_v16, %v1741_v15 }
 0x36e   : > { %v1744_v24 = vrot.slane %v1743_v55, 1 }
 0x370   : > { %v1745_v26 = vadd.f32 %v1744_v24, %v1743_v55 }
 0x372   : > { %v1746_v59 = vadd.f32 %v1745_v26, %v1722_v32 }
 0x374   : > { %1747 = vst [vmem:[#allocation3] sm:$0x1] %v1746_v59 }
 0x37b   : > { %v2873_v56 = vld [vmem:[#allocation3] sm:$0x1] }
 0x37f   : > { %v2822_v2 = vpop.f32.mrb[28].mxu1 }
 0x380   : > { %v2823_v34 = vadd.f32 %v4763_v23, %v2822_v2  ;;  %v3298_v63 = vpop.f32.mrb[29].mxu1 }
 0x381   : > { %v2825_v11 = vpop.f32.mrb[30].mxu1 }
 0x382   : > { %v2851_v30 = vmax.f32 %v2823_v34, 0.0  ;;  %v2826_v46 = vadd.f32 %v4763_v23, %v2825_v11  ;;  %v3299_v20 = vpop.f32.mrb[31].mxu1 }
 0x384   : > { %v2869_v18 = vmul.f32 %v4943_v38, %v2851_v30  ;;  %v2852_v58 = vmax.f32 %v2826_v46, 0.0 }
 0x386   : > { %v2887_v31 = vadd.f32 %v2886_v54, %v2869_v18  ;;  %v2870_v3 = vmul.f32 %v4947_v4, %v2852_v58 }
 0x388   : > { %v2888_v25 = vadd.f32 %v2887_v31, %v2870_v3 }
 0x39f   : > { %v2830_v27 = vpop.f32.mrb[32].mxu1 }
 0x3a0   : > { %v2831_v19 = vadd.f32 %v4763_v23, %v2830_v27  ;;  %v3302_v35 = vpop.f32.mrb[33].mxu1 }
 0x3a1   : > { %v2833_v60 = vpop.f32.mrb[34].mxu1 }
 0x3a2   : > { %v2853_v9 = vmax.f32 %v2831_v19, 0.0  ;;  %v2834_v36 = vadd.f32 %v4763_v23, %v2833_v60  ;;  %v3303_v22 = vpop.f32.mrb[35].mxu1  ;;  %v3002_v23 = vsub.s32 0, %v4080_v42 }
 0x3a4   : > { %v2871_v29 = vmul.f32 %v3150_v33, %v2853_v9  ;;  %v2854_v28 = vmax.f32 %v2834_v36, 0.0  ;;  %v2918_v33 = vld [vmem:[%s5028_s4] sm:$0x3] }
 0x3a5   : > { %v3003_v1 = vrot.slane %v2918_v33, %v3002_v23 }
 0x3a6   : > { %v2889_v41 = vadd.f32 %v2888_v25, %v2871_v29  ;;  %v2872_v43 = vmul.f32 %v3151_v0, %v2854_v28  ;;  %v3006_v0 = vsub.s32 1, %v4080_v42 }
 0x3a8   : > { %v2890_v50 = vadd.f32 %v2889_v41, %v2872_v43  ;;  %v3007_v37 = vrot.slane %v2918_v33, %v3006_v0 }
 0x3aa   : > { %v2891_v38 = vrot.slane %v2890_v50, 4 }
 0x3ac   : > { %v2892_v51 = vadd.f32 %v2891_v38, %v2890_v50 }
 0x3ae   : > { %v2893_v44 = vrot.slane %v2892_v51, 2 }
 0x3b0   : > { %v2894_v45 = vadd.f32 %v2893_v44, %v2892_v51 }
 0x3b2   : > { %v2895_v4 = vrot.slane %v2894_v45, 1 }
 0x3b4   : > { %v2896_v40 = vadd.f32 %v2895_v4, %v2894_v45 }
 0x3b6   : > { %v2897_v48 = vadd.f32 %v2896_v40, %v2873_v56 }
 0x3b8   : > { %2898 = vst [vmem:[#allocation3] sm:$0x1] %v2897_v48 }
 0x3bf   : > { %v2899_v49 = vld [vmem:[#allocation3] sm:$0x1] }
 0x3c0   : > { %v2900_v7 = vmul.f32 0.00390625, %v2899_v49 }
 0x3c2   : > { %v2901_v53 = vpack.c.bf16 %v2900_v7, %v2900_v7 }
 0x3c4   : > { %3043 = vmatmul.mubr.bf16.vlgmr.msra.gmra.mrb[36].mxu0 %v2901_v53 }
 0x497   : > { %v3044_v8 = vpop.f32.mrb[36].mxu0 }
 0x498   : > { %v3045_v21 = vadd.f32 %v3044_v8, %v3003_v1  ;;  %v3046_v12 = vpop.f32.mrb[37].mxu0 }
 0x499   : > { %v3047_v17 = vadd.f32 %v3046_v12, %v3007_v37  ;;  %v3048_v14 = vpop.f32.mrb[38].mxu0 }
 0x49a   : > { %v3049_v13 = vpop.f32.mrb[39].mxu0 }
 0x49b   : > { %v3053_v62 = vcombine.low %v3045_v21, %v3047_v17 }
 0x49d   : > { %v3060_v57 = vrot.slane %v3053_v62, %v3059_v52 }
 0x49f   : > { %v3067_v10 = vrot.slane %v3060_v57, %v3059_v52 }
 0x4a1   : > { %3073 = vst.msk [vmem:[%s222_s14] sm:$0x3] %vm3071_vm11, %v3067_v10 }
 0x4a2 PF: > { %s15_s18 = sadd.s32 1, %s3398_s18  }
 0x4a3   : > { %p12_p4 = scmp.ge.s32.totalorder %s15_s18, 4  }
 0x4a5   :  { %14 = sbr.rel (!%p12_p4) target bundleno = 1 (0x1), region = 70 }

</bundles_post_ra>
